<compile_context>
chip_gen: v6e
topology: v6e:2x2x1
jax: 0.10.0
libtpu: 0.0.40
codegen_flags: <defaults>
</compile_context>

<pallas_src>
import functools

import jax
import jax.numpy as jnp
from jax.experimental import pallas as pl
from jax.experimental.pallas import tpu as pltpu

LANES = 128  # channel lane width for conv2/conv3/fc (lane-dense everywhere)


def _round_up(n, m):
    return (n + m - 1) // m * m


# ----------------------------------------------------------------------------
# In-kernel helpers
# ----------------------------------------------------------------------------
def _pool2x2_bias_relu(z, H, W, b):
    """z: (H*W, C) f32 conv output, rows ordered (h, w).  Fused 2x2 max-pool +
    bias + ReLU (pool commutes with the monotonic per-channel epilogue).
    Returns (H//2, W//2, C) f32."""
    C = z.shape[-1]
    # pool along w: adjacent sublane pairs
    zw = jnp.max(z.reshape(H * (W // 2), 2, C), axis=1)
    # pool along h: max of the two row-blocks
    zh4 = zw.reshape(H // 2, 2, W // 2, C)
    zp = jnp.maximum(zh4[:, 0], zh4[:, 1])
    return jnp.maximum(zp + b, 0.0)


def _conv3x3_stage(src_ref, H, W, w_ref, b):
    """3x3 same-conv + bias + ReLU + 2x2 max-pool from a halo-padded bf16 ref.

    src_ref : (>=H+2, >=W+2, 128) bf16; activation at [1:H+1, 1:W+1], borders 0.
    w_ref   : (1152, 128) bf16 im2col weight, row = (dy*3+dx)*128 + cin.
    Returns (H//2, W//2, 128) f32.
    """
    C = LANES
    cols = []
    for dy in range(3):           # im2col in VMEM: lane-concat of 9 windows
        for dx in range(3):
            win = src_ref[dy:dy + H, dx:dx + W, :]          # (H, W, 128) bf16
            cols.append(win.reshape(H * W, C))
    a = jnp.concatenate(cols, axis=-1)                      # (H*W, 1152) bf16
    z = jnp.dot(a, w_ref[...], preferred_element_type=jnp.float32)
    return _pool2x2_bias_relu(z, H, W, b)


# ----------------------------------------------------------------------------
# Fused whole-network kernel (one batch item per grid step)
# ----------------------------------------------------------------------------
def _lenet5_guest_kernel(x1_ref, w1_ref, b1_ref, w2_ref, b2_ref, w3_ref, b3_ref,
                         wf1_ref, bf1_ref, wf2_ref, bf2_ref,
                         o_ref, s2_ref, s3_ref):
    C = LANES
    _, H1, W1, K1 = x1_ref.shape
    H2, W2 = H1 // 2, W1 // 2
    H3, W3 = H2 // 2, W2 // 2
    H4, W4 = H3 // 2, W3 // 2

    # Zero halo scratch (borders must read as conv zero-padding).  Done every
    # step so each megacore core's private scratch is initialized.
    s2_ref[...] = jnp.zeros_like(s2_ref)
    s3_ref[...] = jnp.zeros_like(s3_ref)

    # ---- Stage 1: conv1 on the wrapper-packed im2col slab (one K=32 dot).
    a1 = x1_ref[0].reshape(H1 * W1, K1)                     # (H1*W1, 32) bf16
    z1 = jnp.dot(a1, w1_ref[...], preferred_element_type=jnp.float32)
    y1 = _pool2x2_bias_relu(z1, H1, W1, b1_ref[...])        # (H2, W2, 128) f32
    s2_ref[1:1 + H2, 1:1 + W2, :] = y1.astype(jnp.bfloat16)

    # ---- Stage 2: conv2 (one K=1152 dot) on VMEM-resident activations.
    y2 = _conv3x3_stage(s2_ref, H2, W2, w2_ref, b2_ref[...])
    s3_ref[1:1 + H3, 1:1 + W3, :] = y2.astype(jnp.bfloat16)

    # ---- Stage 3: conv3 (one K=1152 dot).
    y3 = _conv3x3_stage(s3_ref, H3, W3, w3_ref, b3_ref[...])  # (H4, W4, 128) f32

    # ---- FC head: lane-concat spatial positions so fc1 is one K=1024 dot.
    y3r = y3.reshape(H4 * W4, C)
    feats = jnp.concatenate([y3r[p:p + 1, :] for p in range(H4 * W4)], axis=-1)
    h = jnp.dot(feats.astype(jnp.bfloat16), wf1_ref[...],
                preferred_element_type=jnp.float32)
    h = jnp.maximum(h + bf1_ref[...], 0.0)                  # (1, 128)
    z = jnp.dot(h.astype(jnp.bfloat16), wf2_ref[...],
                preferred_element_type=jnp.float32)
    o_ref[...] = jnp.maximum(z + bf2_ref[...], 0.0).reshape(1, 1, C)


# ----------------------------------------------------------------------------
# Wrapper
# ----------------------------------------------------------------------------
def _prep_conv1_input(x_nchw):
    """NCHW f32 -> (B, H, W, 32) bf16 im2col of the 3x3/pad=1 conv1 taps.
    Lane index = (dy*3+dx)*Cin + ci  (27 used lanes, zero-padded to 32)."""
    B, Cin, H, W = x_nchw.shape
    x = jnp.transpose(x_nchw, (0, 2, 3, 1))                 # NHWC
    xp = jnp.pad(x, ((0, 0), (1, 1), (1, 1), (0, 0)))
    cols = [xp[:, dy:dy + H, dx:dx + W, :] for dy in range(3) for dx in range(3)]
    xcol = jnp.concatenate(cols, axis=-1)                   # (B, H, W, 9*Cin)
    K1 = _round_up(9 * Cin, 8)
    xcol = jnp.pad(xcol, ((0, 0), (0, 0), (0, 0), (0, K1 - 9 * Cin)))
    return xcol.astype(jnp.bfloat16)


def guest_forward(kp, x_nchw, *, n_classes):
    B, Cin, H, W = x_nchw.shape
    assert H % 8 == 0 and W % 8 == 0
    # Linear(480, 84) with 60 conv3 channels requires (H/8)*(W/8) == 8.
    assert kp["fc1_w"].shape[0] == (H // 8) * (W // 8) * LANES
    H2, W2 = H // 2, W // 2
    H3, W3 = H2 // 2, W2 // 2

    xcol = _prep_conv1_input(x_nchw)                        # (B, H, W, 32) bf16
    K1 = xcol.shape[-1]

    out = pl.pallas_call(
        _lenet5_guest_kernel,
        out_shape=jax.ShapeDtypeStruct((B, 1, LANES), jnp.float32),
        grid=(B,),
        in_specs=[
            pl.BlockSpec((1, H, W, K1), lambda b: (b, 0, 0, 0)),
            pl.BlockSpec(kp["c1_w"].shape, lambda b: (0, 0)),
            pl.BlockSpec((1, LANES), lambda b: (0, 0)),
            pl.BlockSpec(kp["c2_w"].shape, lambda b: (0, 0)),
            pl.BlockSpec((1, LANES), lambda b: (0, 0)),
            pl.BlockSpec(kp["c3_w"].shape, lambda b: (0, 0)),
            pl.BlockSpec((1, LANES), lambda b: (0, 0)),
            pl.BlockSpec(kp["fc1_w"].shape, lambda b: (0, 0)),
            pl.BlockSpec((1, LANES), lambda b: (0, 0)),
            pl.BlockSpec(kp["fc2_w"].shape, lambda b: (0, 0)),
            pl.BlockSpec((1, LANES), lambda b: (0, 0)),
        ],
        out_specs=pl.BlockSpec((1, 1, LANES), lambda b: (b, 0, 0)),
        scratch_shapes=[
            # bf16 halo scratch for the stage-2 / stage-3 inputs (widths padded
            # to a multiple of 8 sublanes so window loads stay regular).
            pltpu.VMEM((H2 + 2, _round_up(W2 + 2, 8), LANES), jnp.bfloat16),
            pltpu.VMEM((H3 + 2, _round_up(W3 + 2, 8), LANES), jnp.bfloat16),
        ],
        compiler_params=pltpu.CompilerParams(
            dimension_semantics=("parallel",),
        ),
    )(xcol, kp["c1_w"], kp["c1_b"], kp["c2_w"], kp["c2_b"],
      kp["c3_w"], kp["c3_b"], kp["fc1_w"], kp["fc1_b"], kp["fc2_w"], kp["fc2_b"])

    # local_model output is already 2-D, so the guest flatten(start_dim=1) is
    # the identity; drop the lane padding on the class dim.
    return out.reshape(B, LANES)[:, :n_classes]


# ----------------------------------------------------------------------------
# Parameters (PyTorch-layout init) + one-time conversion to kernel layout
# ----------------------------------------------------------------------------
def init_params(key, n_classes):
    ks = jax.random.split(key, 10)

    def u(k, shape, fan_in):
        bound = 1.0 / (fan_in ** 0.5)
        return jax.random.uniform(k, shape, jnp.float32, -bound, bound)

    return {
        "conv1_w": u(ks[0], (6, 3, 3, 3), 3 * 9),
        "conv1_b": u(ks[1], (6,), 3 * 9),
        "conv2_w": u(ks[2], (16, 6, 3, 3), 6 * 9),
        "conv2_b": u(ks[3], (16,), 6 * 9),
        "conv3_w": u(ks[4], (60, 16, 3, 3), 16 * 9),
        "conv3_b": u(ks[5], (60,), 16 * 9),
        "fc1_w": u(ks[6], (84, 480), 480),   # PyTorch Linear weight (out, in)
        "fc1_b": u(ks[7], (84,), 480),
        "fc2_w": u(ks[8], (n_classes, 84), 84),
        "fc2_b": u(ks[9], (84,), 84) [:n_classes] if False else u(ks[9], (n_classes,), 84),
    }


def prepare_params(p, n_classes):
    """Fold all transposes / permutations / lane-padding / bf16 casts into
    init-time weight prep so the hot path has none of it."""
    C = LANES

    def conv1_w(w):          # (Cout, Cin, 3, 3) -> (32, 128) bf16, row=(tap*Cin+ci)
        Cout, Cin = w.shape[0], w.shape[1]
        k = 9 * Cin
        kp_ = _round_up(k, 8)
        wt = jnp.transpose(w, (2, 3, 1, 0)).reshape(k, Cout)
        wt = jnp.pad(wt, ((0, kp_ - k), (0, C - Cout)))
        return wt.astype(jnp.bfloat16)

    def conv_w(w):           # (Cout, Cin, 3, 3) -> (1152, 128) bf16, row=(tap*128+ci)
        Cout, Cin = w.shape[0], w.shape[1]
        w9 = jnp.transpose(w, (2, 3, 1, 0)).reshape(9, Cin, Cout)
        w9 = jnp.pad(w9, ((0, 0), (0, C - Cin), (0, C - Cout)))
        return w9.reshape(9 * C, C).astype(jnp.bfloat16)

    def vec(b):              # (n,) -> (1, 128) f32, zero-padded
        return jnp.pad(b, (0, C - b.shape[0])).reshape(1, C).astype(jnp.float32)

    # fc1: torch input index = c*n_pos + p (NCHW flatten, c < 60, p = h*W4+w);
    # kernel feats index     = p*128 + c   (lane-concat of spatial positions).
    n_pos, C3, F1 = 8, 60, 84
    w1t = p["fc1_w"].reshape(F1, C3, n_pos)                # [f, c, p]
    w1t = jnp.transpose(w1t, (2, 1, 0))                    # [p, c, f]
    wf1 = jnp.zeros((n_pos, C, C), jnp.float32).at[:, :C3, :F1].set(w1t)
    wf1 = wf1.reshape(n_pos * C, C).astype(jnp.bfloat16)   # (1024, 128)

    wf2 = jnp.zeros((C, C), jnp.float32).at[:F1, :n_classes].set(p["fc2_w"].T)
    wf2 = wf2.astype(jnp.bfloat16)                         # (128, 128)

    return {
        "c1_w": conv1_w(p["conv1_w"]), "c1_b": vec(p["conv1_b"]),
        "c2_w": conv_w(p["conv2_w"]), "c2_b": vec(p["conv2_b"]),
        "c3_w": conv_w(p["conv3_w"]), "c3_b": vec(p["conv3_b"]),
        "fc1_w": wf1, "fc1_b": vec(p["fc1_b"]),
        "fc2_w": wf2, "fc2_b": vec(p["fc2_b"]),
    }


# ----------------------------------------------------------------------------
# Pure-JAX reference (independent math path) for a numerical sanity check
# ----------------------------------------------------------------------------
def _reference_forward(p, x):
    def conv_relu_pool(x, w, b):
        y = jax.lax.conv_general_dilated(
            x, w, window_strides=(1, 1), padding=((1, 1), (1, 1)),
            dimension_numbers=("NCHW", "OIHW", "NCHW"))
        y = jax.nn.relu(y + b[None, :, None, None])
        B, Cc, Hh, Ww = y.shape
        return y.reshape(B, Cc, Hh // 2, 2, Ww // 2, 2).max(axis=(3, 5))

    y = conv_relu_pool(x, p["conv1_w"], p["conv1_b"])
    y = conv_relu_pool(y, p["conv2_w"], p["conv2_b"])
    y = conv_relu_pool(y, p["conv3_w"], p["conv3_b"])
    f = y.reshape(y.shape[0], -1)
    h = jax.nn.relu(f @ p["fc1_w"].T + p["fc1_b"])
    z = jax.nn.relu(h @ p["fc2_w"].T + p["fc2_b"])
    return z  # guest flatten(start_dim=1) is the identity on (B, n_classes)


if __name__ == "__main__":
    n_classes = 10
    key = jax.random.PRNGKey(0)
    pkey, xkey = jax.random.split(key)
    params = init_params(pkey, n_classes)
    kparams = prepare_params(params, n_classes)

    # Linear(480, 84) requires 60*(H/8)*(W/8) == 480 -> input spatial (8, 64).
    x = jax.random.normal(xkey, (2, 3, 8, 64), jnp.float32)

    fwd = jax.jit(functools.partial(guest_forward, n_classes=n_classes))
    logits = fwd(kparams, x)
    jax.block_until_ready(logits)
    assert logits.shape == (2, n_classes)

    # bf16 MXU inputs (f32 accumulation) -> loose tolerance vs the f32 XLA path.
    ref = _reference_forward(params, x)
    assert jnp.allclose(logits, ref, rtol=0.1, atol=0.1), (
        "max abs diff = %f" % float(jnp.max(jnp.abs(logits - ref))))
    print("KERNEL_OK")
</pallas_src>

<mosaic_0001>
module attributes {stable_mosaic.version = 11 : i64} {
  func.func @_lenet5_guest_kernel(%arg0: i32, %arg1: memref<1x8x64x32xbf16, #tpu.memory_space<vmem>>, %arg2: memref<32x128xbf16, #tpu.memory_space<vmem>>, %arg3: memref<1x128xf32, #tpu.memory_space<vmem>>, %arg4: memref<1152x128xbf16, #tpu.memory_space<vmem>>, %arg5: memref<1x128xf32, #tpu.memory_space<vmem>>, %arg6: memref<1152x128xbf16, #tpu.memory_space<vmem>>, %arg7: memref<1x128xf32, #tpu.memory_space<vmem>>, %arg8: memref<1024x128xbf16, #tpu.memory_space<vmem>>, %arg9: memref<1x128xf32, #tpu.memory_space<vmem>>, %arg10: memref<128x128xbf16, #tpu.memory_space<vmem>>, %arg11: memref<1x128xf32, #tpu.memory_space<vmem>>, %arg12: memref<1x1x128xf32, #tpu.memory_space<vmem>>, %arg13: memref<6x40x128xbf16, #tpu.memory_space<vmem>>, %arg14: memref<4x24x128xbf16, #tpu.memory_space<vmem>>) attributes {dimension_semantics = [#tpu.dimension_semantics<parallel>], iteration_bounds = array<i64: 2>, scalar_prefetch = 0 : i64, scratch_operands = 2 : i64, tpu.core_type = #tpu.core_type<tc>, window_params = [{transform_indices = @transform_0, window_bounds = array<i64: 1, 8, 64, 32>}, {pipeline_mode = #tpu.pipeline_mode<synchronous>, transform_indices = @transform_1, window_bounds = array<i64: 32, 128>}, {pipeline_mode = #tpu.pipeline_mode<synchronous>, transform_indices = @transform_2, window_bounds = array<i64: 1, 128>}, {pipeline_mode = #tpu.pipeline_mode<synchronous>, transform_indices = @transform_3, window_bounds = array<i64: 1152, 128>}, {pipeline_mode = #tpu.pipeline_mode<synchronous>, transform_indices = @transform_4, window_bounds = array<i64: 1, 128>}, {pipeline_mode = #tpu.pipeline_mode<synchronous>, transform_indices = @transform_5, window_bounds = array<i64: 1152, 128>}, {pipeline_mode = #tpu.pipeline_mode<synchronous>, transform_indices = @transform_6, window_bounds = array<i64: 1, 128>}, {pipeline_mode = #tpu.pipeline_mode<synchronous>, transform_indices = @transform_7, window_bounds = array<i64: 1024, 128>}, {pipeline_mode = #tpu.pipeline_mode<synchronous>, transform_indices = @transform_8, window_bounds = array<i64: 1, 128>}, {pipeline_mode = #tpu.pipeline_mode<synchronous>, transform_indices = @transform_9, window_bounds = array<i64: 128, 128>}, {pipeline_mode = #tpu.pipeline_mode<synchronous>, transform_indices = @transform_10, window_bounds = array<i64: 1, 128>}, {transform_indices = @transform_11, window_bounds = array<i64: 1, 1, 128>}]} {
    %cst = arith.constant 0.000000e+00 : bf16
    %0 = vector.broadcast %cst : bf16 to vector<6x40x128xbf16>
    %c0 = arith.constant 0 : index
    %c0_0 = arith.constant 0 : index
    %c0_1 = arith.constant 0 : index
    %1 = vector.load %arg13[%c0, %c0_0, %c0_1] : memref<6x40x128xbf16, #tpu.memory_space<vmem>>, vector<6x40x128xbf16>
    tpu.vector_store %arg13[%c0, %c0_0, %c0_1], %0 {strides = array<i32>} : memref<6x40x128xbf16, #tpu.memory_space<vmem>>, vector<6x40x128xbf16>,
    %cst_2 = arith.constant 0.000000e+00 : bf16
    %2 = vector.broadcast %cst_2 : bf16 to vector<4x24x128xbf16>
    %c0_3 = arith.constant 0 : index
    %c0_4 = arith.constant 0 : index
    %c0_5 = arith.constant 0 : index
    %3 = vector.load %arg14[%c0_3, %c0_4, %c0_5] : memref<4x24x128xbf16, #tpu.memory_space<vmem>>, vector<4x24x128xbf16>
    tpu.vector_store %arg14[%c0_3, %c0_4, %c0_5], %2 {strides = array<i32>} : memref<4x24x128xbf16, #tpu.memory_space<vmem>>, vector<4x24x128xbf16>,
    %c0_6 = arith.constant 0 : index
    %c0_7 = arith.constant 0 : index
    %c0_8 = arith.constant 0 : index
    %c0_9 = arith.constant 0 : index
    %4 = vector.load %arg1[%c0_6, %c0_7, %c0_8, %c0_9] : memref<1x8x64x32xbf16, #tpu.memory_space<vmem>>, vector<1x8x64x32xbf16>
    %5 = vector.shape_cast %4 : vector<1x8x64x32xbf16> to vector<8x64x32xbf16>
    %6 = vector.shape_cast %5 : vector<8x64x32xbf16> to vector<512x32xbf16>
    %c0_10 = arith.constant 0 : index
    %c0_11 = arith.constant 0 : index
    %7 = vector.load %arg2[%c0_10, %c0_11] : memref<32x128xbf16, #tpu.memory_space<vmem>>, vector<32x128xbf16>
    %cst_12 = arith.constant dense<0.000000e+00> : vector<512x128xf32>
    %8 = tpu.matmul %6, %7, %cst_12 {dimension_numbers = #tpu.dot_dimension_numbers<[1], [0], [0], [1], [0, 0, 1, 1], [], []>} : vector<512x32xbf16>, vector<32x128xbf16>, vector<512x128xf32> -> vector<512x128xf32>
    %c0_13 = arith.constant 0 : index
    %c0_14 = arith.constant 0 : index
    %9 = vector.load %arg3[%c0_13, %c0_14] : memref<1x128xf32, #tpu.memory_space<vmem>>, vector<1x128xf32>
    %10 = vector.shape_cast %8 : vector<512x128xf32> to vector<256x2x128xf32>
    %cst_15 = arith.constant dense<0xFF800000> : vector<256x128xf32>
    %11 = vector.multi_reduction <maximumf>, %10, %cst_15 [1] : vector<256x2x128xf32> to vector<256x128xf32>
    %12 = vector.shape_cast %11 : vector<256x128xf32> to vector<4x2x32x128xf32>
    %13 = vector.extract_strided_slice %12 {offsets = [0, 0, 0, 0], sizes = [4, 1, 32, 128], strides = [1, 1, 1, 1]} : vector<4x2x32x128xf32> to vector<4x1x32x128xf32>
    %14 = vector.shape_cast %13 : vector<4x1x32x128xf32> to vector<4x32x128xf32>
    %15 = vector.extract_strided_slice %12 {offsets = [0, 1, 0, 0], sizes = [4, 1, 32, 128], strides = [1, 1, 1, 1]} : vector<4x2x32x128xf32> to vector<4x1x32x128xf32>
    %16 = vector.shape_cast %15 : vector<4x1x32x128xf32> to vector<4x32x128xf32>
    %17 = arith.maximumf %14, %16 : vector<4x32x128xf32>
    %18 = vector.shape_cast %9 : vector<1x128xf32> to vector<1x1x128xf32>
    %19 = vector.broadcast %18 : vector<1x1x128xf32> to vector<4x32x128xf32>
    %20 = arith.addf %17, %19 : vector<4x32x128xf32>
    %cst_16 = arith.constant 0.000000e+00 : f32
    %21 = vector.broadcast %cst_16 : f32 to vector<4x32x128xf32>
    %22 = arith.maximumf %20, %21 : vector<4x32x128xf32>
    %23 = arith.truncf %22 : vector<4x32x128xf32> to vector<4x32x128xbf16>
    %c1 = arith.constant 1 : index
    %c1_17 = arith.constant 1 : index
    %c0_18 = arith.constant 0 : index
    %24 = vector.load %arg13[%c1, %c1_17, %c0_18] : memref<6x40x128xbf16, #tpu.memory_space<vmem>>, vector<4x32x128xbf16>
    tpu.vector_store %arg13[%c1, %c1_17, %c0_18], %23 {strides = array<i32>} : memref<6x40x128xbf16, #tpu.memory_space<vmem>>, vector<4x32x128xbf16>,
    %c0_19 = arith.constant 0 : index
    %c0_20 = arith.constant 0 : index
    %25 = vector.load %arg5[%c0_19, %c0_20] : memref<1x128xf32, #tpu.memory_space<vmem>>, vector<1x128xf32>
    %c0_21 = arith.constant 0 : index
    %c0_22 = arith.constant 0 : index
    %c0_23 = arith.constant 0 : index
    %26 = vector.load %arg13[%c0_21, %c0_22, %c0_23] : memref<6x40x128xbf16, #tpu.memory_space<vmem>>, vector<4x32x128xbf16>
    %27 = vector.shape_cast %26 : vector<4x32x128xbf16> to vector<128x128xbf16>
    %c0_24 = arith.constant 0 : index
    %c1_25 = arith.constant 1 : index
    %c0_26 = arith.constant 0 : index
    %28 = vector.load %arg13[%c0_24, %c1_25, %c0_26] : memref<6x40x128xbf16, #tpu.memory_space<vmem>>, vector<4x32x128xbf16>
    %29 = vector.shape_cast %28 : vector<4x32x128xbf16> to vector<128x128xbf16>
    %c0_27 = arith.constant 0 : index
    %c2 = arith.constant 2 : index
    %c0_28 = arith.constant 0 : index
    %30 = vector.load %arg13[%c0_27, %c2, %c0_28] : memref<6x40x128xbf16, #tpu.memory_space<vmem>>, vector<4x32x128xbf16>
    %31 = vector.shape_cast %30 : vector<4x32x128xbf16> to vector<128x128xbf16>
    %c1_29 = arith.constant 1 : index
    %c0_30 = arith.constant 0 : index
    %c0_31 = arith.constant 0 : index
    %32 = vector.load %arg13[%c1_29, %c0_30, %c0_31] : memref<6x40x128xbf16, #tpu.memory_space<vmem>>, vector<4x32x128xbf16>
    %33 = vector.shape_cast %32 : vector<4x32x128xbf16> to vector<128x128xbf16>
    %c1_32 = arith.constant 1 : index
    %c1_33 = arith.constant 1 : index
    %c0_34 = arith.constant 0 : index
    %34 = vector.load %arg13[%c1_32, %c1_33, %c0_34] : memref<6x40x128xbf16, #tpu.memory_space<vmem>>, vector<4x32x128xbf16>
    %35 = vector.shape_cast %34 : vector<4x32x128xbf16> to vector<128x128xbf16>
    %c1_35 = arith.constant 1 : index
    %c2_36 = arith.constant 2 : index
    %c0_37 = arith.constant 0 : index
    %36 = vector.load %arg13[%c1_35, %c2_36, %c0_37] : memref<6x40x128xbf16, #tpu.memory_space<vmem>>, vector<4x32x128xbf16>
    %37 = vector.shape_cast %36 : vector<4x32x128xbf16> to vector<128x128xbf16>
    %c2_38 = arith.constant 2 : index
    %c0_39 = arith.constant 0 : index
    %c0_40 = arith.constant 0 : index
    %38 = vector.load %arg13[%c2_38, %c0_39, %c0_40] : memref<6x40x128xbf16, #tpu.memory_space<vmem>>, vector<4x32x128xbf16>
    %39 = vector.shape_cast %38 : vector<4x32x128xbf16> to vector<128x128xbf16>
    %c2_41 = arith.constant 2 : index
    %c1_42 = arith.constant 1 : index
    %c0_43 = arith.constant 0 : index
    %40 = vector.load %arg13[%c2_41, %c1_42, %c0_43] : memref<6x40x128xbf16, #tpu.memory_space<vmem>>, vector<4x32x128xbf16>
    %41 = vector.shape_cast %40 : vector<4x32x128xbf16> to vector<128x128xbf16>
    %c2_44 = arith.constant 2 : index
    %c2_45 = arith.constant 2 : index
    %c0_46 = arith.constant 0 : index
    %42 = vector.load %arg13[%c2_44, %c2_45, %c0_46] : memref<6x40x128xbf16, #tpu.memory_space<vmem>>, vector<4x32x128xbf16>
    %43 = vector.shape_cast %42 : vector<4x32x128xbf16> to vector<128x128xbf16>
    %44 = tpu.concatenate %27, %29, %31, %33, %35, %37, %39, %41, %43 in 1 : vector<128x128xbf16>, vector<128x128xbf16>, vector<128x128xbf16>, vector<128x128xbf16>, vector<128x128xbf16>, vector<128x128xbf16>, vector<128x128xbf16>, vector<128x128xbf16>, vector<128x128xbf16> -> vector<128x1152xbf16>
    %c0_47 = arith.constant 0 : index
    %c0_48 = arith.constant 0 : index
    %45 = vector.load %arg4[%c0_47, %c0_48] : memref<1152x128xbf16, #tpu.memory_space<vmem>>, vector<1152x128xbf16>
    %cst_49 = arith.constant dense<0.000000e+00> : vector<128x128xf32>
    %46 = tpu.matmul %44, %45, %cst_49 {dimension_numbers = #tpu.dot_dimension_numbers<[1], [0], [0], [1], [0, 0, 1, 1], [], []>} : vector<128x1152xbf16>, vector<1152x128xbf16>, vector<128x128xf32> -> vector<128x128xf32>
    %47 = vector.shape_cast %46 : vector<128x128xf32> to vector<64x2x128xf32>
    %cst_50 = arith.constant dense<0xFF800000> : vector<64x128xf32>
    %48 = vector.multi_reduction <maximumf>, %47, %cst_50 [1] : vector<64x2x128xf32> to vector<64x128xf32>
    %49 = vector.shape_cast %48 : vector<64x128xf32> to vector<2x2x16x128xf32>
    %50 = vector.extract_strided_slice %49 {offsets = [0, 0, 0, 0], sizes = [2, 1, 16, 128], strides = [1, 1, 1, 1]} : vector<2x2x16x128xf32> to vector<2x1x16x128xf32>
    %51 = vector.shape_cast %50 : vector<2x1x16x128xf32> to vector<2x16x128xf32>
    %52 = vector.extract_strided_slice %49 {offsets = [0, 1, 0, 0], sizes = [2, 1, 16, 128], strides = [1, 1, 1, 1]} : vector<2x2x16x128xf32> to vector<2x1x16x128xf32>
    %53 = vector.shape_cast %52 : vector<2x1x16x128xf32> to vector<2x16x128xf32>
    %54 = arith.maximumf %51, %53 : vector<2x16x128xf32>
    %55 = vector.shape_cast %25 : vector<1x128xf32> to vector<1x1x128xf32>
    %56 = vector.broadcast %55 : vector<1x1x128xf32> to vector<2x16x128xf32>
    %57 = arith.addf %54, %56 : vector<2x16x128xf32>
    %cst_51 = arith.constant 0.000000e+00 : f32
    %58 = vector.broadcast %cst_51 : f32 to vector<2x16x128xf32>
    %59 = arith.maximumf %57, %58 : vector<2x16x128xf32>
    %60 = arith.truncf %59 : vector<2x16x128xf32> to vector<2x16x128xbf16>
    %c1_52 = arith.constant 1 : index
    %c1_53 = arith.constant 1 : index
    %c0_54 = arith.constant 0 : index
    %61 = vector.load %arg14[%c1_52, %c1_53, %c0_54] : memref<4x24x128xbf16, #tpu.memory_space<vmem>>, vector<2x16x128xbf16>
    tpu.vector_store %arg14[%c1_52, %c1_53, %c0_54], %60 {strides = array<i32>} : memref<4x24x128xbf16, #tpu.memory_space<vmem>>, vector<2x16x128xbf16>,
    %c0_55 = arith.constant 0 : index
    %c0_56 = arith.constant 0 : index
    %62 = vector.load %arg7[%c0_55, %c0_56] : memref<1x128xf32, #tpu.memory_space<vmem>>, vector<1x128xf32>
    %c0_57 = arith.constant 0 : index
    %c0_58 = arith.constant 0 : index
    %c0_59 = arith.constant 0 : index
    %63 = vector.load %arg14[%c0_57, %c0_58, %c0_59] : memref<4x24x128xbf16, #tpu.memory_space<vmem>>, vector<2x16x128xbf16>
    %64 = vector.shape_cast %63 : vector<2x16x128xbf16> to vector<32x128xbf16>
    %c0_60 = arith.constant 0 : index
    %c1_61 = arith.constant 1 : index
    %c0_62 = arith.constant 0 : index
    %65 = vector.load %arg14[%c0_60, %c1_61, %c0_62] : memref<4x24x128xbf16, #tpu.memory_space<vmem>>, vector<2x16x128xbf16>
    %66 = vector.shape_cast %65 : vector<2x16x128xbf16> to vector<32x128xbf16>
    %c0_63 = arith.constant 0 : index
    %c2_64 = arith.constant 2 : index
    %c0_65 = arith.constant 0 : index
    %67 = vector.load %arg14[%c0_63, %c2_64, %c0_65] : memref<4x24x128xbf16, #tpu.memory_space<vmem>>, vector<2x16x128xbf16>
    %68 = vector.shape_cast %67 : vector<2x16x128xbf16> to vector<32x128xbf16>
    %c1_66 = arith.constant 1 : index
    %c0_67 = arith.constant 0 : index
    %c0_68 = arith.constant 0 : index
    %69 = vector.load %arg14[%c1_66, %c0_67, %c0_68] : memref<4x24x128xbf16, #tpu.memory_space<vmem>>, vector<2x16x128xbf16>
    %70 = vector.shape_cast %69 : vector<2x16x128xbf16> to vector<32x128xbf16>
    %c1_69 = arith.constant 1 : index
    %c1_70 = arith.constant 1 : index
    %c0_71 = arith.constant 0 : index
    %71 = vector.load %arg14[%c1_69, %c1_70, %c0_71] : memref<4x24x128xbf16, #tpu.memory_space<vmem>>, vector<2x16x128xbf16>
    %72 = vector.shape_cast %71 : vector<2x16x128xbf16> to vector<32x128xbf16>
    %c1_72 = arith.constant 1 : index
    %c2_73 = arith.constant 2 : index
    %c0_74 = arith.constant 0 : index
    %73 = vector.load %arg14[%c1_72, %c2_73, %c0_74] : memref<4x24x128xbf16, #tpu.memory_space<vmem>>, vector<2x16x128xbf16>
    %74 = vector.shape_cast %73 : vector<2x16x128xbf16> to vector<32x128xbf16>
    %c2_75 = arith.constant 2 : index
    %c0_76 = arith.constant 0 : index
    %c0_77 = arith.constant 0 : index
    %75 = vector.load %arg14[%c2_75, %c0_76, %c0_77] : memref<4x24x128xbf16, #tpu.memory_space<vmem>>, vector<2x16x128xbf16>
    %76 = vector.shape_cast %75 : vector<2x16x128xbf16> to vector<32x128xbf16>
    %c2_78 = arith.constant 2 : index
    %c1_79 = arith.constant 1 : index
    %c0_80 = arith.constant 0 : index
    %77 = vector.load %arg14[%c2_78, %c1_79, %c0_80] : memref<4x24x128xbf16, #tpu.memory_space<vmem>>, vector<2x16x128xbf16>
    %78 = vector.shape_cast %77 : vector<2x16x128xbf16> to vector<32x128xbf16>
    %c2_81 = arith.constant 2 : index
    %c2_82 = arith.constant 2 : index
    %c0_83 = arith.constant 0 : index
    %79 = vector.load %arg14[%c2_81, %c2_82, %c0_83] : memref<4x24x128xbf16, #tpu.memory_space<vmem>>, vector<2x16x128xbf16>
    %80 = vector.shape_cast %79 : vector<2x16x128xbf16> to vector<32x128xbf16>
    %81 = tpu.concatenate %64, %66, %68, %70, %72, %74, %76, %78, %80 in 1 : vector<32x128xbf16>, vector<32x128xbf16>, vector<32x128xbf16>, vector<32x128xbf16>, vector<32x128xbf16>, vector<32x128xbf16>, vector<32x128xbf16>, vector<32x128xbf16>, vector<32x128xbf16> -> vector<32x1152xbf16>
    %c0_84 = arith.constant 0 : index
    %c0_85 = arith.constant 0 : index
    %82 = vector.load %arg6[%c0_84, %c0_85] : memref<1152x128xbf16, #tpu.memory_space<vmem>>, vector<1152x128xbf16>
    %cst_86 = arith.constant dense<0.000000e+00> : vector<32x128xf32>
    %83 = tpu.matmul %81, %82, %cst_86 {dimension_numbers = #tpu.dot_dimension_numbers<[1], [0], [0], [1], [0, 0, 1, 1], [], []>} : vector<32x1152xbf16>, vector<1152x128xbf16>, vector<32x128xf32> -> vector<32x128xf32>
    %84 = vector.shape_cast %83 : vector<32x128xf32> to vector<16x2x128xf32>
    %cst_87 = arith.constant dense<0xFF800000> : vector<16x128xf32>
    %85 = vector.multi_reduction <maximumf>, %84, %cst_87 [1] : vector<16x2x128xf32> to vector<16x128xf32>
    %86 = vector.shape_cast %85 : vector<16x128xf32> to vector<1x2x8x128xf32>
    %87 = vector.extract_strided_slice %86 {offsets = [0, 0, 0, 0], sizes = [1, 1, 8, 128], strides = [1, 1, 1, 1]} : vector<1x2x8x128xf32> to vector<1x1x8x128xf32>
    %88 = vector.shape_cast %87 : vector<1x1x8x128xf32> to vector<1x8x128xf32>
    %89 = vector.extract_strided_slice %86 {offsets = [0, 1, 0, 0], sizes = [1, 1, 8, 128], strides = [1, 1, 1, 1]} : vector<1x2x8x128xf32> to vector<1x1x8x128xf32>
    %90 = vector.shape_cast %89 : vector<1x1x8x128xf32> to vector<1x8x128xf32>
    %91 = arith.maximumf %88, %90 : vector<1x8x128xf32>
    %92 = vector.shape_cast %62 : vector<1x128xf32> to vector<1x1x128xf32>
    %93 = vector.broadcast %92 : vector<1x1x128xf32> to vector<1x8x128xf32>
    %94 = arith.addf %91, %93 : vector<1x8x128xf32>
    %cst_88 = arith.constant 0.000000e+00 : f32
    %95 = vector.broadcast %cst_88 : f32 to vector<1x8x128xf32>
    %96 = arith.maximumf %94, %95 : vector<1x8x128xf32>
    %97 = vector.shape_cast %96 : vector<1x8x128xf32> to vector<8x128xf32>
    %98 = vector.extract_strided_slice %97 {offsets = [0, 0], sizes = [1, 128], strides = [1, 1]} : vector<8x128xf32> to vector<1x128xf32>
    %99 = vector.extract_strided_slice %97 {offsets = [1, 0], sizes = [1, 128], strides = [1, 1]} : vector<8x128xf32> to vector<1x128xf32>
    %100 = vector.extract_strided_slice %97 {offsets = [2, 0], sizes = [1, 128], strides = [1, 1]} : vector<8x128xf32> to vector<1x128xf32>
    %101 = vector.extract_strided_slice %97 {offsets = [3, 0], sizes = [1, 128], strides = [1, 1]} : vector<8x128xf32> to vector<1x128xf32>
    %102 = vector.extract_strided_slice %97 {offsets = [4, 0], sizes = [1, 128], strides = [1, 1]} : vector<8x128xf32> to vector<1x128xf32>
    %103 = vector.extract_strided_slice %97 {offsets = [5, 0], sizes = [1, 128], strides = [1, 1]} : vector<8x128xf32> to vector<1x128xf32>
    %104 = vector.extract_strided_slice %97 {offsets = [6, 0], sizes = [1, 128], strides = [1, 1]} : vector<8x128xf32> to vector<1x128xf32>
    %105 = vector.extract_strided_slice %97 {offsets = [7, 0], sizes = [1, 128], strides = [1, 1]} : vector<8x128xf32> to vector<1x128xf32>
    %106 = tpu.concatenate %98, %99, %100, %101, %102, %103, %104, %105 in 1 : vector<1x128xf32>, vector<1x128xf32>, vector<1x128xf32>, vector<1x128xf32>, vector<1x128xf32>, vector<1x128xf32>, vector<1x128xf32>, vector<1x128xf32> -> vector<1x1024xf32>
    %107 = arith.truncf %106 : vector<1x1024xf32> to vector<1x1024xbf16>
    %c0_89 = arith.constant 0 : index
    %c0_90 = arith.constant 0 : index
    %108 = vector.load %arg8[%c0_89, %c0_90] : memref<1024x128xbf16, #tpu.memory_space<vmem>>, vector<1024x128xbf16>
    %cst_91 = arith.constant dense<0.000000e+00> : vector<1x128xf32>
    %109 = tpu.matmul %107, %108, %cst_91 {dimension_numbers = #tpu.dot_dimension_numbers<[1], [0], [0], [1], [0, 0, 1, 1], [], []>} : vector<1x1024xbf16>, vector<1024x128xbf16>, vector<1x128xf32> -> vector<1x128xf32>
    %c0_92 = arith.constant 0 : index
    %c0_93 = arith.constant 0 : index
    %110 = vector.load %arg9[%c0_92, %c0_93] : memref<1x128xf32, #tpu.memory_space<vmem>>, vector<1x128xf32>
    %111 = arith.addf %109, %110 : vector<1x128xf32>
    %cst_94 = arith.constant 0.000000e+00 : f32
    %112 = vector.broadcast %cst_94 : f32 to vector<1x128xf32>
    %113 = arith.maximumf %111, %112 : vector<1x128xf32>
    %114 = arith.truncf %113 : vector<1x128xf32> to vector<1x128xbf16>
    %c0_95 = arith.constant 0 : index
    %c0_96 = arith.constant 0 : index
    %115 = vector.load %arg10[%c0_95, %c0_96] : memref<128x128xbf16, #tpu.memory_space<vmem>>, vector<128x128xbf16>
    %cst_97 = arith.constant dense<0.000000e+00> : vector<1x128xf32>
    %116 = tpu.matmul %114, %115, %cst_97 {dimension_numbers = #tpu.dot_dimension_numbers<[1], [0], [0], [1], [0, 0, 1, 1], [], []>} : vector<1x128xbf16>, vector<128x128xbf16>, vector<1x128xf32> -> vector<1x128xf32>
    %c0_98 = arith.constant 0 : index
    %c0_99 = arith.constant 0 : index
    %117 = vector.load %arg11[%c0_98, %c0_99] : memref<1x128xf32, #tpu.memory_space<vmem>>, vector<1x128xf32>
    %118 = arith.addf %116, %117 : vector<1x128xf32>
    %cst_100 = arith.constant 0.000000e+00 : f32
    %119 = vector.broadcast %cst_100 : f32 to vector<1x128xf32>
    %120 = arith.maximumf %118, %119 : vector<1x128xf32>
    %121 = vector.shape_cast %120 : vector<1x128xf32> to vector<1x1x128xf32>
    %c0_101 = arith.constant 0 : index
    %c0_102 = arith.constant 0 : index
    %c0_103 = arith.constant 0 : index
    %122 = vector.load %arg12[%c0_101, %c0_102, %c0_103] : memref<1x1x128xf32, #tpu.memory_space<vmem>>, vector<1x1x128xf32>
    tpu.vector_store %arg12[%c0_101, %c0_102, %c0_103], %121 {strides = array<i32>} : memref<1x1x128xf32, #tpu.memory_space<vmem>>, vector<1x1x128xf32>,
    return
  }
  func.func @transform_0(%arg0: i32) -> (i32, i32, i32, i32) {
    %c0_i32 = arith.constant 0 : i32
    %c0_i32_0 = arith.constant 0 : i32
    %c0_i32_1 = arith.constant 0 : i32
    %c0_i32_2 = arith.constant 0 : i32
    return %arg0, %c0_i32, %c0_i32_0, %c0_i32_1 : i32, i32, i32, i32
  }
  func.func @transform_1(%arg0: i32) -> (i32, i32) {
    %c0_i32 = arith.constant 0 : i32
    %c0_i32_0 = arith.constant 0 : i32
    %c0_i32_1 = arith.constant 0 : i32
    return %c0_i32, %c0_i32_0 : i32, i32
  }
  func.func @transform_2(%arg0: i32) -> (i32, i32) {
    %c0_i32 = arith.constant 0 : i32
    %c0_i32_0 = arith.constant 0 : i32
    %c0_i32_1 = arith.constant 0 : i32
    return %c0_i32, %c0_i32_0 : i32, i32
  }
  func.func @transform_3(%arg0: i32) -> (i32, i32) {
    %c0_i32 = arith.constant 0 : i32
    %c0_i32_0 = arith.constant 0 : i32
    %c0_i32_1 = arith.constant 0 : i32
    return %c0_i32, %c0_i32_0 : i32, i32
  }
  func.func @transform_4(%arg0: i32) -> (i32, i32) {
    %c0_i32 = arith.constant 0 : i32
    %c0_i32_0 = arith.constant 0 : i32
    %c0_i32_1 = arith.constant 0 : i32
    return %c0_i32, %c0_i32_0 : i32, i32
  }
  func.func @transform_5(%arg0: i32) -> (i32, i32) {
    %c0_i32 = arith.constant 0 : i32
    %c0_i32_0 = arith.constant 0 : i32
    %c0_i32_1 = arith.constant 0 : i32
    return %c0_i32, %c0_i32_0 : i32, i32
  }
  func.func @transform_6(%arg0: i32) -> (i32, i32) {
    %c0_i32 = arith.constant 0 : i32
    %c0_i32_0 = arith.constant 0 : i32
    %c0_i32_1 = arith.constant 0 : i32
    return %c0_i32, %c0_i32_0 : i32, i32
  }
  func.func @transform_7(%arg0: i32) -> (i32, i32) {
    %c0_i32 = arith.constant 0 : i32
    %c0_i32_0 = arith.constant 0 : i32
    %c0_i32_1 = arith.constant 0 : i32
    return %c0_i32, %c0_i32_0 : i32, i32
  }
  func.func @transform_8(%arg0: i32) -> (i32, i32) {
    %c0_i32 = arith.constant 0 : i32
    %c0_i32_0 = arith.constant 0 : i32
    %c0_i32_1 = arith.constant 0 : i32
    return %c0_i32, %c0_i32_0 : i32, i32
  }
  func.func @transform_9(%arg0: i32) -> (i32, i32) {
    %c0_i32 = arith.constant 0 : i32
    %c0_i32_0 = arith.constant 0 : i32
    %c0_i32_1 = arith.constant 0 : i32
    return %c0_i32, %c0_i32_0 : i32, i32
  }
  func.func @transform_10(%arg0: i32) -> (i32, i32) {
    %c0_i32 = arith.constant 0 : i32
    %c0_i32_0 = arith.constant 0 : i32
    %c0_i32_1 = arith.constant 0 : i32
    return %c0_i32, %c0_i32_0 : i32, i32
  }
  func.func @transform_11(%arg0: i32) -> (i32, i32, i32) {
    %c0_i32 = arith.constant 0 : i32
    %c0_i32_0 = arith.constant 0 : i32
    %c0_i32_1 = arith.constant 0 : i32
    return %arg0, %c0_i32, %c0_i32_0 : i32, i32, i32
  }
}

</mosaic_0001>

<bundles_post_ra>
// kernel: guest_forward.1
= control target key start
LH: loop header
LB: loop body
LE: loop exit
PB: predicated region body
PF: predicated region fallthrough
CT: control target
= control target key end

     0   :  { %s16631_s0 = inlined_call_operand.vmem [shape: bf16[2,8,64,32], index: 0, kind: input, shape index: {}]   ;;  %s16632_s1 = inlined_call_operand.vmem [shape: bf16[32,128], index: 1, kind: input, shape index: {}]   ;;  %s16633_s2 = inlined_call_operand.vmem [shape: f32[1,128], index: 2, kind: input, shape index: {}]   ;;  %s16634_s3 = inlined_call_operand.vmem [shape: bf16[1152,128], index: 3, kind: input, shape index: {}]   ;;  %s16635_s4 = inlined_call_operand.vmem [shape: f32[1,128], index: 4, kind: input, shape index: {}]   ;;  %s16636_s5 = inlined_call_operand.vmem [shape: bf16[1152,128], index: 5, kind: input, shape index: {}]   ;;  %s16637_s6 = inlined_call_operand.vmem [shape: f32[1,128], index: 6, kind: input, shape index: {}]   ;;  %s16638_s7 = inlined_call_operand.vmem [shape: bf16[1024,128], index: 7, kind: input, shape index: {}]   ;;  %s16639_s8 = inlined_call_operand.vmem [shape: f32[1,128], index: 8, kind: input, shape index: {}]   ;;  %s16640_s9 = inlined_call_operand.vmem [shape: bf16[128,128], index: 9, kind: input, shape index: {}]   ;;  %s16641_s10 = inlined_call_operand.vmem [shape: f32[1,128], index: 10, kind: input, shape index: {}]   ;;  %s16642_s11 = inlined_call_operand.hbm [shape: f32[2,1,128], index: 11, kind: output, shape index: {}]  }
   0x1   :  { %16661 = sst [smem:[#allocation24_spill]] %s16631_s0 }
   0x2   :  { %16 = vsyncpa [#allocation5], 0 }
   0x3   :  { %18 = vsyncpa [#allocation5 + $0x1], 0  ;;  %s13013_s17 = smov 0   ;;  %s13015_s18 = smov 0  }
   0x4   :  { %s13017_s19 = smov 0   ;;  %s13019_s20 = smov 0  }
   0x5 LB: > { %s13034_s21 = sadd.s32 4294967295, %s12946_s20   ;;  %s11140_s22 = sadd.s32 4294967294, %s12946_s20   ;;  %s12946_s20 = sphi %s13019_s20, %s16753_s20   ;;  %s12942_s19 = sphi %s13017_s19, %s16752_s19   ;;  %s12938_s18 = sphi %s13015_s18, %s16751_s18   ;;  %s12934_s17 = sphi %s13013_s17, %s16750_s17  }
   0x6   : > { %s13038_s23 = sadd.s32 1, %s12946_s20   ;;  %s267_s24 = sadd.s32 1, %s12942_s19 }
   0x7   : > { %s264_s25 = ssub.s32 %s12946_s20, %s13038_s23  ;;  %p277_p0 = scmp.ne.s32.totalorder %s12942_s19, %s12938_s18 }
   0x8   : > { %p265_p1 = scmp.eq.s32.totalorder %s264_s25, 0  ;;  %p278_p2 = scmp.eq.s32.totalorder %s13034_s21, 1 }
   0x9   : > { %p283_p3 = scmp.ne.s32.totalorder %s12938_s18, %s12934_s17  ;;  %p284_p4 = scmp.eq.s32.totalorder %s11140_s22, 1 }
   0xa   : > { %s13049_s26 = scalar_select %p265_p1, %s12942_s19, %s267_s24  }
   0xb   : > { %p13051_p5 = por %p278_p2, %p277_p0  ;;  %p13055_p6 = por %p284_p4, %p283_p3 }
   0xc   : > { %p11143_p7 = scmp.ge.s32.totalorder %s12946_s20, 1  ;;  %p340_p8 = scmp.lt.s32.totalorder %s12946_s20, 3 }
   0xe   : > { %p341_p9 = pnand %p11143_p7, %p340_p8 }
  0x10   : > { %344 = sbr.rel (%p341_p9) target bundleno = 2270 (0x8de), region = 64 }
  0x15   : > { %v12583_v0 = vld [vmem:[%s16632_s1 + $0x8] sm:$0xff]   ;;  %p379_p10 = scmp.lt.s32.totalorder %s13034_s21, 1  ;;  %v12584_v1 = vld [vmem:[%s16632_s1] sm:$0xff]   ;;  %vm667_vm0 = vcmask 261120   ;;  %s16664_s0 = sld [smem:[#allocation24_spill]]  ;;  %v1122_v36 = vlaneseq  ;;  %v12949_v37 = vmov 0  }
  0x16   : > { %12400 = vmatprep.subr.bf16.mxu0 %v12583_v0  ;;  %v12948_v34 = vmov 1983009808   ;;  %390 = vst [vmem:[#allocation2 + $0x14] sm:$0xf] %v12949_v37  ;;  %391 = vst [vmem:[#allocation2 + $0x18] sm:$0xf] %v12949_v37 }
  0x17   : > { %s380_s14 = scalar_select %p379_p10, %s13034_s21, 1  ;;  %12401 = vmatpush3.bf16.msra.mxu0 %v12583_v0  ;;  %v1120_v35 = vunpack.c.l.s4 %v12948_v34  ;;  %385 = vst [vmem:[#allocation2] sm:$0xf] %v12949_v37  ;;  %386 = vst [vmem:[#allocation2 + $0x4] sm:$0xf] %v12949_v37  ;;  %v1123_v39 = vshrl.u32 %v1122_v36, 7 }
  0x18   : > { %12402 = vmatprep.subr.bf16.mxu0 %v12584_v1  ;;  %387 = vst [vmem:[#allocation2 + $0x8] sm:$0xf] %v12949_v37  ;;  %388 = vst [vmem:[#allocation2 + $0xc] sm:$0xf] %v12949_v37  ;;  %vm2462_vm1 = vcmask 1041408   ;;  %vm5287_vm2 = vcmask 1042434  }
  0x19   : > { %s11708_s15 = sshll.u32 %s380_s14, 8  ;;  %389 = vst [vmem:[#allocation2 + $0x10] sm:$0xf] %v12949_v37  ;;  %392 = vst [vmem:[#allocation2 + $0x1c] sm:$0xf] %v12949_v37  ;;  %v1121_v38 = vunpack.c.0.s8 %v1120_v35  ;;  %vm5290_vm3 = vcmask 1043459  }
  0x1a   : > { %393 = vst [vmem:[#allocation2 + $0x20] sm:$0xf] %v12949_v37  ;;  %394 = vst [vmem:[#allocation2 + $0x24] sm:$0xf] %v12949_v37  ;;  %vm5293_vm4 = vcmask 1044484   ;;  %vm5296_vm5 = vcmask 1045509  }
  0x1b   : > { %s13072_s24 = scalar_lea.vmem %s16664_s0, %s11708_s15  ;;  %12403 = vmatpush3.bf16.msra.mxu0 %v12584_v1  ;;  %395 = vst [vmem:[#allocation2 + $0x28] sm:$0xf] %v12949_v37  ;;  %396 = vst [vmem:[#allocation2 + $0x2c] sm:$0xf] %v12949_v37  ;;  %v13138_v40 = vsub.s32 %v1121_v38, %v1123_v39  ;;  %vm5299_vm6 = vcmask 1046534   ;;  %vm5302_vm7 = vcmask 1047559  }
  0x1c   : > { %v12585_v2 = vld [vmem:[%s13072_s24] sm:$0xff]   ;;  %v12586_v3 = vld [vmem:[%s13072_s24 + $0x8] sm:$0xff]   ;;  %v12587_v4 = vld [vmem:[%s13072_s24 + $0x10] sm:$0xff]   ;;  %397 = vst [vmem:[#allocation2 + $0x30] sm:$0xf] %v12949_v37  ;;  %vm5305_vm8 = vcmask 1041409  }
  0x1d   : > { %12404 = vmatprep.mubr.msk.bf16.mxu0 %vm667_vm0, %v12585_v2  ;;  %v12588_v5 = vld [vmem:[%s13072_s24 + $0x18] sm:$0xff]   ;;  %v12589_v6 = vld [vmem:[%s13072_s24 + $0x20] sm:$0xff]   ;;  %v12590_v7 = vld [vmem:[%s13072_s24 + $0x28] sm:$0xff]   ;;  %398 = vst [vmem:[#allocation2 + $0x34] sm:$0xf] %v12949_v37  ;;  %vm5553_vm9 = vcmask 1043456  }
  0x1e   : > { %12405 = vmatmul.mubr.msk.bf16.vlgmr.msra.gmra.mxu0 %vm667_vm0, %v12586_v3  ;;  %v12591_v8 = vld [vmem:[%s13072_s24 + $0x30] sm:$0xff]   ;;  %v12592_v9 = vld [vmem:[%s13072_s24 + $0x38] sm:$0xff]   ;;  %v12593_v10 = vld [vmem:[%s13072_s24 + $0x40] sm:$0xff]   ;;  %399 = vst [vmem:[#allocation2 + $0x38] sm:$0xf] %v12949_v37  ;;  %vm5562_vm12 = vcmask 1040384  }
  0x1f   : > { %12408 = vmatprep.mubr.msk.bf16.mxu0 %vm667_vm0, %v12587_v4  ;;  %v12594_v11 = vld [vmem:[%s13072_s24 + $0x48] sm:$0xff]   ;;  %v12595_v12 = vld [vmem:[%s13072_s24 + $0x50] sm:$0xff]   ;;  %v12596_v13 = vld [vmem:[%s13072_s24 + $0x58] sm:$0xff]   ;;  %400 = vst [vmem:[#allocation2 + $0x3c] sm:$0xf] %v12949_v37  ;;  %s377_s25 = sand.u32 1, %s12938_s18  }
  0x20   : > { %v12597_v14 = vld [vmem:[%s13072_s24 + $0x60] sm:$0xff]   ;;  %v12598_v15 = vld [vmem:[%s13072_s24 + $0x68] sm:$0xff]   ;;  %v12599_v16 = vld [vmem:[%s13072_s24 + $0x70] sm:$0xff]   ;;  %401 = vst [vmem:[#allocation2 + $0x40] sm:$0xf] %v12949_v37  ;;  %s11705_s12 = sshll.u32 %s13034_s21, 4 }
  0x21   : > { %v12600_v17 = vld [vmem:[%s13072_s24 + $0x78] sm:$0xff]   ;;  %v12601_v18 = vld [vmem:[%s13072_s24 + $0x80] sm:$0xff]   ;;  %v12602_v19 = vld [vmem:[%s13072_s24 + $0x88] sm:$0xff]   ;;  %402 = vst [vmem:[#allocation2 + $0x44] sm:$0xf] %v12949_v37  ;;  %s378_s13 = scalar_lea.vmem [#allocation4], %s377_s25  ;;  %s16590_s22 = scalar_lea.hbm %s16642_s11, %s11705_s12 }
  0x22   : > { %v12603_v20 = vld [vmem:[%s13072_s24 + $0x90] sm:$0xff]   ;;  %v12604_v21 = vld [vmem:[%s13072_s24 + $0x98] sm:$0xff]   ;;  %v12605_v22 = vld [vmem:[%s13072_s24 + $0xa0] sm:$0xff]   ;;  %403 = vst [vmem:[#allocation2 + $0x48] sm:$0xf] %v12949_v37  ;;  %s11085_s14 = sshll.u32 %s378_s13, 4  ;;  %s16592_s14 = int_to_ptr.vmem [resolvable:$true] %s11085_s14 }
  0x23   : > { %v12606_v23 = vld [vmem:[%s13072_s24 + $0xa8] sm:$0xff]   ;;  %v12607_v24 = vld [vmem:[%s13072_s24 + $0xb0] sm:$0xff]   ;;  %v12608_v25 = vld [vmem:[%s13072_s24 + $0xb8] sm:$0xff]   ;;  %404 = vst [vmem:[#allocation2 + $0x4c] sm:$0xf] %v12949_v37  ;;  %s12886_s21 = scalar_lea.vmem %s16592_s14, 16 }
  0x24   : > { %v12609_v26 = vld [vmem:[%s13072_s24 + $0xc0] sm:$0xff]   ;;  %v12610_v27 = vld [vmem:[%s13072_s24 + $0xc8] sm:$0xff]   ;;  %v12611_v28 = vld [vmem:[%s13072_s24 + $0xd0] sm:$0xff]   ;;  %405 = vst [vmem:[#allocation2 + $0x50] sm:$0xf] %v12949_v37  ;;  %p12887_p11 = scmp.ne.s32.totalorder %s16592_s14, %s12886_s21  ;;  %s12952_s29 = smov [#allocation4]  }
  0x25   : > { %v12612_v29 = vld [vmem:[%s13072_s24 + $0xd8] sm:$0xff]   ;;  %v12613_v30 = vld [vmem:[%s13072_s24 + $0xe0] sm:$0xff]   ;;  %v12614_v31 = vld [vmem:[%s13072_s24 + $0xe8] sm:$0xff]   ;;  %406 = vst [vmem:[#allocation2 + $0x54] sm:$0xf] %v12949_v37  ;;  %s12890_s30 = sshll.u32 %s12952_s29, 4  ;;  %s12891_s30 = int_to_ptr.vmem [resolvable:$false] %s12890_s30 }
  0x26   : > { %12409 = vmatmul.mubr.msk.bf16.gmra.mxu0 %vm667_vm0, %v12588_v5  ;;  %v12615_v32 = vld [vmem:[%s13072_s24 + $0xf0] sm:$0xff]   ;;  %v12616_v33 = vld [vmem:[%s13072_s24 + $0xf8] sm:$0xff]   ;;  %407 = vst [vmem:[#allocation2 + $0x58] sm:$0xf] %v12949_v37  ;;  %408 = vst [vmem:[#allocation2 + $0x5c] sm:$0xf] %v12949_v37  ;;  %p12888_p12 = pnand %p12887_p11, %p13051_p5  ;;  %p12893_p0 = scmp.lt.s32.totalorder %s16592_s14, %s12891_s30 }
  0x27   : > { %12412 = vmatprep.mubr.msk.bf16.mxu0 %vm667_vm0, %v12589_v6  ;;  %409 = vst [vmem:[#allocation2 + $0x60] sm:$0xf] %v12949_v37  ;;  %410 = vst [vmem:[#allocation2 + $0x64] sm:$0xf] %v12949_v37  ;;  %vm5554_vm10 = vsmask.f32 7938 }
  0x28   : > { %411 = vst [vmem:[#allocation2 + $0x68] sm:$0xf] %v12949_v37  ;;  %412 = vst [vmem:[#allocation2 + $0x6c] sm:$0xf] %v12949_v37  ;;  %vm5563_vm13 = vsmask.f32 256  ;;  %p12889_p13 = pneg %p12888_p12 }
  0x29   : > { %413 = vst [vmem:[#allocation2 + $0x70] sm:$0xf] %v12949_v37  ;;  %414 = vst [vmem:[#allocation2 + $0x74] sm:$0xf] %v12949_v37  ;;  %vm5616_vm15 = vsmask.f32 3328 }
  0x2a   : > { %415 = vst [vmem:[#allocation3] sm:$0xf] %v12949_v37  ;;  %416 = vst [vmem:[#allocation3 + $0x4] sm:$0xf] %v12949_v37  ;;  %s11073_s24 = scalar_lea.sflag [#allocation5], %s377_s25  ;;  %s12892_s15 = scalar_lea.vmem %s12891_s30, 32 }
  0x2b   : > { %417 = vst [vmem:[#allocation3 + $0x8] sm:$0xf] %v12949_v37  ;;  %418 = vst [vmem:[#allocation3 + $0xc] sm:$0xf] %v12949_v37  ;;  %p12894_p1 = scmp.lt.s32.totalorder %s12892_s15, %s12886_s21 }
  0x2c   : > { %419 = vst [vmem:[#allocation3 + $0x10] sm:$0xf] %v12949_v37  ;;  %420 = vst [vmem:[#allocation3 + $0x14] sm:$0xf] %v12949_v37 }
  0x2d   : > { %421 = vst [vmem:[#allocation3 + $0x18] sm:$0xf] %v12949_v37  ;;  %422 = vst [vmem:[#allocation3 + $0x1c] sm:$0xf] %v12949_v37  ;;  %p12895_p2 = por %p12894_p1, %p12893_p0 }
  0x2e   : > { %12413 = vmatmul.mubr.msk.bf16.gmra.mxu0 %vm667_vm0, %v12590_v7  ;;  %423 = vst [vmem:[#allocation3 + $0x20] sm:$0xf] %v12949_v37  ;;  %424 = vst [vmem:[#allocation3 + $0x24] sm:$0xf] %v12949_v37 }
  0x2f   : > { %12416 = vmatprep.mubr.msk.bf16.mxu0 %vm667_vm0, %v12591_v8  ;;  %425 = vst [vmem:[#allocation3 + $0x28] sm:$0xf] %v12949_v37  ;;  %426 = vst [vmem:[#allocation3 + $0x2c] sm:$0xf] %v12949_v37  ;;  %p12896_p3 = pnand %p12895_p2, %p12889_p13 }
  0x30   : > { %16665 = vst [vmem:[#allocation7_spill] sm:$0xff] %v13138_v40  ;;  %vm13427_vm11 = vmand %vm5553_vm9, %vm5554_vm10  ;;  %vm5819_vm10 = vcmask 1042432  }
  0x31   : > { %vm13535_vm14 = vmand %vm5562_vm12, %vm5563_vm13  ;;  %vm5820_vm12 = vcmask 1046532  }
  0x32   : > { %vm14137_vm13 = vmor %vm5819_vm10, %vm5820_vm12 }
  0x36   : > { %12417 = vmatmul.mubr.msk.bf16.gmra.mxu0 %vm667_vm0, %v12592_v9 }
  0x37   : > { %12420 = vmatprep.mubr.msk.bf16.mxu0 %vm667_vm0, %v12593_v10 }
  0x3e   : > { %12421 = vmatmul.mubr.msk.bf16.gmra.mxu0 %vm667_vm0, %v12594_v11 }
  0x3f   : > { %12424 = vmatprep.mubr.msk.bf16.mxu0 %vm667_vm0, %v12595_v12 }
  0x46   : > { %12425 = vmatmul.mubr.msk.bf16.gmra.mxu0 %vm667_vm0, %v12596_v13 }
  0x47   : > { %12428 = vmatprep.mubr.msk.bf16.mxu0 %vm667_vm0, %v12597_v14 }
  0x4e   : > { %12429 = vmatmul.mubr.msk.bf16.gmra.mxu0 %vm667_vm0, %v12598_v15 }
  0x4f   : > { %12432 = vmatprep.mubr.msk.bf16.mxu0 %vm667_vm0, %v12599_v16 }
  0x56   : > { %12433 = vmatmul.mubr.msk.bf16.gmra.mxu0 %vm667_vm0, %v12600_v17 }
  0x57   : > { %12436 = vmatprep.mubr.msk.bf16.mxu0 %vm667_vm0, %v12601_v18 }
  0x5e   : > { %12437 = vmatmul.mubr.msk.bf16.gmra.mxu0 %vm667_vm0, %v12602_v19 }
  0x5f   : > { %12440 = vmatprep.mubr.msk.bf16.mxu0 %vm667_vm0, %v12603_v20 }
  0x66   : > { %12441 = vmatmul.mubr.msk.bf16.gmra.mxu0 %vm667_vm0, %v12604_v21 }
  0x67   : > { %12444 = vmatprep.mubr.msk.bf16.mxu0 %vm667_vm0, %v12605_v22 }
  0x6e   : > { %12445 = vmatmul.mubr.msk.bf16.gmra.mxu0 %vm667_vm0, %v12606_v23 }
  0x6f   : > { %12448 = vmatprep.mubr.msk.bf16.mxu0 %vm667_vm0, %v12607_v24 }
  0x76   : > { %12449 = vmatmul.mubr.msk.bf16.gmra.mxu0 %vm667_vm0, %v12608_v25 }
  0x77   : > { %12452 = vmatprep.mubr.msk.bf16.mxu0 %vm667_vm0, %v12609_v26 }
  0x7e   : > { %12453 = vmatmul.mubr.msk.bf16.gmra.mxu0 %vm667_vm0, %v12610_v27 }
  0x7f   : > { %12456 = vmatprep.mubr.msk.bf16.mxu0 %vm667_vm0, %v12611_v28 }
  0x86   : > { %12457 = vmatmul.mubr.msk.bf16.gmra.mxu0 %vm667_vm0, %v12612_v29 }
  0x87   : > { %12460 = vmatprep.mubr.msk.bf16.mxu0 %vm667_vm0, %v12613_v30 }
  0x8e   : > { %12461 = vmatmul.mubr.msk.bf16.gmra.mxu0 %vm667_vm0, %v12614_v31 }
  0x8f   : > { %12464 = vmatprep.mubr.msk.bf16.mxu0 %vm667_vm0, %v12615_v32 }
  0x96   : > { %12465 = vmatmul.mubr.msk.bf16.gmra.mxu0 %vm667_vm0, %v12616_v33  ;;  %vm5617_vm0 = vsmask.f32 7440 }
  0x97   : > { %vm14014_vm9 = vmor %vm5616_vm15, %vm5617_vm0 }
  0xde   : > { %v12406_v41 = vpop.f32.mrf.mxu0 }
  0xdf   : > { %v1152_v42 = vcombine.high %v12406_v41, %v12406_v41  ;;  %v1159_v43 = vrot.slane %v12406_v41, %v13138_v40 }
  0xe0   : > { %v798_v44 = vpop.f32.mrf.mxu0 }
  0xe1   : > { %v1166_v45 = vrot.slane %v1152_v42, %v13138_v40  ;;  %v1167_v46 = vcombine.high %v1159_v43, %v1159_v43  ;;  %v2519_v47 = vsel %vm2462_vm1, %v1159_v43, -inf  ;;  %v1118_v48 = vcombine.high %v798_v44, %v798_v44 }
  0xe2   : > { %v2520_v49 = vrot.slane %v2519_v47, 4  ;;  %v1125_v50 = vrot.slane %v798_v44, %v13138_v40  ;;  %v12407_v15 = vpop.f32.mrf.mxu0 }
  0xe3   : > { %v1168_v51 = vcombine.high %v1166_v45, %v1166_v45  ;;  %v2526_v52 = vsel %vm2462_vm1, %v1167_v46, -inf  ;;  %v2533_v53 = vsel %vm2462_vm1, %v1166_v45, -inf  ;;  %v1132_v54 = vrot.slane %v1118_v48, %v13138_v40 }
  0xe4   : > { %v2521_v55 = vmax.f32 %v2519_v47, %v2520_v49  ;;  %v2527_v56 = vrot.slane %v2526_v52, 4  ;;  %v2534_v57 = vrot.slane %v2533_v53, 4  ;;  %v1133_v58 = vcombine.high %v1125_v50, %v1125_v50  ;;  %v801_v31 = vpop.f32.mrf.mxu0 }
  0xe5   : > { %v2540_v59 = vsel %vm2462_vm1, %v1168_v51, -inf  ;;  %v1134_v60 = vcombine.high %v1132_v54, %v1132_v54  ;;  %v2463_v61 = vsel %vm2462_vm1, %v1125_v50, -inf  ;;  %v2477_v62 = vsel %vm2462_vm1, %v1132_v54, -inf }
  0xe6   : > { %v2522_v63 = vrot.slane %v2521_v55, 2  ;;  %v2528_v0 = vmax.f32 %v2526_v52, %v2527_v56  ;;  %v2535_v1 = vmax.f32 %v2533_v53, %v2534_v57  ;;  %v2541_v2 = vrot.slane %v2540_v59, 4 }
  0xe7   : > { %v2464_v3 = vrot.slane %v2463_v61, 4  ;;  %v2470_v4 = vsel %vm2462_vm1, %v1133_v58, -inf  ;;  %v2478_v5 = vrot.slane %v2477_v62, 4  ;;  %v2484_v6 = vsel %vm2462_vm1, %v1134_v60, -inf }
  0xe8   : > { %v2523_v7 = vmax.f32 %v2521_v55, %v2522_v63  ;;  %v2529_v8 = vrot.slane %v2528_v0, 2  ;;  %v2536_v9 = vrot.slane %v2535_v1, 2  ;;  %v2542_v10 = vmax.f32 %v2540_v59, %v2541_v2 }
  0xe9   : > { %v2465_v11 = vmax.f32 %v2463_v61, %v2464_v3  ;;  %v2471_v12 = vrot.slane %v2470_v4, 4  ;;  %v2479_v13 = vmax.f32 %v2477_v62, %v2478_v5  ;;  %v2485_v14 = vrot.slane %v2484_v6, 4 }
  0xea   : > { %v2524_v16 = vrot.slane %v2523_v7, 1  ;;  %v2530_v17 = vmax.f32 %v2528_v0, %v2529_v8  ;;  %v2537_v18 = vmax.f32 %v2535_v1, %v2536_v9  ;;  %v2543_v19 = vrot.slane %v2542_v10, 2 }
  0xeb   : > { %v2466_v20 = vrot.slane %v2465_v11, 2  ;;  %v2472_v21 = vmax.f32 %v2470_v4, %v2471_v12  ;;  %v2480_v22 = vrot.slane %v2479_v13, 2  ;;  %v2486_v23 = vmax.f32 %v2484_v6, %v2485_v14 }
  0xec   : > { %v2531_v24 = vrot.slane %v2530_v17, 1  ;;  %v2538_v25 = vrot.slane %v2537_v18, 1  ;;  %v2544_v26 = vmax.f32 %v2542_v10, %v2543_v19  ;;  %v1169_v33 = vcombine.high %v12407_v15, %v12407_v15 }
  0xed   : > { %v13152_v27 = vmax.f32 %v2465_v11, %v2466_v20  ;;  %v2473_v28 = vrot.slane %v2472_v21, 2  ;;  %v2481_v29 = vmax.f32 %v2479_v13, %v2480_v22  ;;  %v2487_v30 = vrot.slane %v2486_v23, 2 }
  0xee   : > { %v2545_v32 = vrot.slane %v2544_v26, 1  ;;  %v13154_v34 = vmax.f32 %v2523_v7, %v2524_v16  ;;  %v13160_v37 = vmax.f32 %v2530_v17, %v2531_v24  ;;  %v1176_v38 = vrot.slane %v12407_v15, %v13138_v40 }
  0xef   : > { %v13156_v35 = vmax.f32 %v2472_v21, %v2473_v28  ;;  %v13158_v36 = vmax.f32 %v2486_v23, %v2487_v30  ;;  %v1183_v39 = vrot.slane %v1169_v33, %v13138_v40  ;;  %v1135_v41 = vcombine.high %v801_v31, %v801_v31 }
  0xf0   : > { %v13164_v42 = vmax.f32 %v2537_v18, %v2538_v25  ;;  %v13166_v43 = vmax.f32 %v2544_v26, %v2545_v32  ;;  %v2468_v44 = vrot.slane %v13152_v27, 1  ;;  %v2482_v45 = vrot.slane %v2481_v29, 1  ;;  %v12410_v18 = vpop.f32.mrf.mxu0 }
  0xf1   : > { %v1184_v46 = vcombine.high %v1176_v38, %v1176_v38  ;;  %v1185_v47 = vcombine.high %v1183_v39, %v1183_v39  ;;  %v2547_v48 = vsel %vm2462_vm1, %v1176_v38, -inf  ;;  %v2561_v49 = vsel %vm2462_vm1, %v1183_v39, -inf }
  0xf2   : > { %v2475_v50 = vrot.slane %v13156_v35, 1  ;;  %v2489_v51 = vrot.slane %v13158_v36, 1  ;;  %v2548_v52 = vrot.slane %v2547_v48, 4  ;;  %v2562_v53 = vrot.slane %v2561_v49, 4 }
  0xf3   : > { %v2554_v54 = vsel %vm2462_vm1, %v1184_v46, -inf  ;;  %v2568_v55 = vsel %vm2462_vm1, %v1185_v47, -inf  ;;  %v1142_v56 = vrot.slane %v801_v31, %v13138_v40  ;;  %v1149_v57 = vrot.slane %v1135_v41, %v13138_v40  ;;  %v814_v46 = vpop.f32.mrf.mxu0 }
  0xf4   : > { %v2549_v58 = vmax.f32 %v2547_v48, %v2548_v52  ;;  %v2555_v59 = vrot.slane %v2554_v54, 4  ;;  %v2563_v60 = vmax.f32 %v2561_v49, %v2562_v53  ;;  %v2569_v61 = vrot.slane %v2568_v55, 4 }
  0xf5   : > { %v1150_v62 = vcombine.high %v1142_v56, %v1142_v56  ;;  %v1151_v63 = vcombine.high %v1149_v57, %v1149_v57  ;;  %v2491_v0 = vsel %vm2462_vm1, %v1142_v56, -inf  ;;  %v2505_v1 = vsel %vm2462_vm1, %v1149_v57, -inf }
  0xf6   : > { %v2550_v2 = vrot.slane %v2549_v58, 2  ;;  %v2556_v3 = vmax.f32 %v2554_v54, %v2555_v59  ;;  %v2564_v4 = vrot.slane %v2563_v60, 2  ;;  %v2570_v5 = vmax.f32 %v2568_v55, %v2569_v61 }
  0xf7   : > { %v2492_v6 = vrot.slane %v2491_v0, 4  ;;  %v2498_v7 = vsel %vm2462_vm1, %v1150_v62, -inf  ;;  %v2506_v8 = vrot.slane %v2505_v1, 4  ;;  %v2512_v9 = vsel %vm2462_vm1, %v1151_v63, -inf }
  0xf8   : > { %v2551_v10 = vmax.f32 %v2549_v58, %v2550_v2  ;;  %v2557_v11 = vrot.slane %v2556_v3, 2  ;;  %v2565_v12 = vmax.f32 %v2563_v60, %v2564_v4  ;;  %v2571_v13 = vrot.slane %v2570_v5, 2 }
  0xf9   : > { %v2493_v14 = vmax.f32 %v2491_v0, %v2492_v6  ;;  %v2499_v15 = vrot.slane %v2498_v7, 4  ;;  %v2507_v16 = vmax.f32 %v2505_v1, %v2506_v8  ;;  %v2513_v17 = vrot.slane %v2512_v9, 4 }
  0xfa   : > { %v2552_v19 = vrot.slane %v2551_v10, 1  ;;  %v2558_v20 = vmax.f32 %v2556_v3, %v2557_v11  ;;  %v2566_v21 = vrot.slane %v2565_v12, 1  ;;  %v2572_v22 = vmax.f32 %v2570_v5, %v2571_v13 }
  0xfb   : > { %v2494_v23 = vrot.slane %v2493_v14, 2  ;;  %v2500_v24 = vmax.f32 %v2498_v7, %v2499_v15  ;;  %v2508_v25 = vrot.slane %v2507_v16, 2  ;;  %v2514_v26 = vmax.f32 %v2512_v9, %v2513_v17  ;;  %v12411_v17 = vpop.f32.mrf.mxu0 }
  0xfc   : > { %v13182_v28 = vmax.f32 %v13152_v27, %v2468_v44  ;;  %v13184_v30 = vmax.f32 %v2481_v29, %v2482_v45  ;;  %v2559_v31 = vrot.slane %v2558_v20, 1  ;;  %v2573_v32 = vrot.slane %v2572_v22, 1 }
  0xfd   : > { %v2495_v33 = vmax.f32 %v2493_v14, %v2494_v23  ;;  %v2501_v38 = vrot.slane %v2500_v24, 2  ;;  %v2509_v39 = vmax.f32 %v2507_v16, %v2508_v25  ;;  %v2515_v41 = vrot.slane %v2514_v26, 2 }
  0xfe   : > { %v13187_v47 = vmax.f32 %v13156_v35, %v2475_v50  ;;  %v13190_v48 = vmax.f32 %v13158_v36, %v2489_v51  ;;  %v1220_v49 = vcombine.high %v12410_v18, %v12410_v18  ;;  %v1227_v52 = vrot.slane %v12410_v18, %v13138_v40 }
  0xff   : > { %v13193_v27 = vmax.f32 %v2551_v10, %v2552_v19  ;;  %v13195_v29 = vmax.f32 %v2565_v12, %v2566_v21  ;;  %v2496_v44 = vrot.slane %v2495_v33, 1  ;;  %v2502_v45 = vmax.f32 %v2500_v24, %v2501_v38 }
 0x100   : > { %v1234_v53 = vrot.slane %v1220_v49, %v13138_v40  ;;  %v1235_v54 = vcombine.high %v1227_v52, %v1227_v52  ;;  %v2631_v55 = vsel %vm2462_vm1, %v1227_v52, -inf  ;;  %v1186_v56 = vcombine.high %v814_v46, %v814_v46 }
 0x101   : > { %v13199_v35 = vmax.f32 %v2558_v20, %v2559_v31  ;;  %v13201_v50 = vmax.f32 %v2572_v22, %v2573_v32  ;;  %v2510_v36 = vrot.slane %v2509_v39, 1  ;;  %v2516_v51 = vmax.f32 %v2514_v26, %v2515_v41 }
 0x102   : > { %v1236_v57 = vcombine.high %v1234_v53, %v1234_v53  ;;  %v2632_v58 = vrot.slane %v2631_v55, 4  ;;  %v2638_v59 = vsel %vm2462_vm1, %v1235_v54, -inf  ;;  %v2645_v60 = vsel %vm2462_vm1, %v1234_v53, -inf }
 0x103   : > { %v13205_v61 = vmax.f32 %v2495_v33, %v2496_v44  ;;  %v2503_v62 = vrot.slane %v2502_v45, 1  ;;  %v2639_v63 = vrot.slane %v2638_v59, 4  ;;  %v2646_v0 = vrot.slane %v2645_v60, 4 }
 0x104   : > { %v2633_v1 = vmax.f32 %v2631_v55, %v2632_v58  ;;  %v2652_v2 = vsel %vm2462_vm1, %v1236_v57, -inf  ;;  %v1193_v3 = vrot.slane %v814_v46, %v13138_v40  ;;  %v1200_v4 = vrot.slane %v1186_v56, %v13138_v40 }
 0x105   : > { %v2517_v5 = vrot.slane %v2516_v51, 1  ;;  %v2640_v6 = vmax.f32 %v2638_v59, %v2639_v63  ;;  %v2647_v7 = vmax.f32 %v2645_v60, %v2646_v0  ;;  %v2653_v8 = vrot.slane %v2652_v2, 4 }
 0x106   : > { %v2634_v9 = vrot.slane %v2633_v1, 2  ;;  %v1201_v10 = vcombine.high %v1193_v3, %v1193_v3  ;;  %v1202_v11 = vcombine.high %v1200_v4, %v1200_v4  ;;  %v2575_v12 = vsel %vm2462_vm1, %v1193_v3, -inf }
 0x107   : > { %v2641_v13 = vrot.slane %v2640_v6, 2  ;;  %v2648_v14 = vrot.slane %v2647_v7, 2  ;;  %v2654_v15 = vmax.f32 %v2652_v2, %v2653_v8  ;;  %v2576_v16 = vrot.slane %v2575_v12, 4 }
 0x108   : > { %v2635_v18 = vmax.f32 %v2633_v1, %v2634_v9  ;;  %v2582_v19 = vsel %vm2462_vm1, %v1201_v10, -inf  ;;  %v2589_v20 = vsel %vm2462_vm1, %v1200_v4, -inf  ;;  %v2596_v21 = vsel %vm2462_vm1, %v1202_v11, -inf  ;;  %v817_v1 = vpop.f32.mrf.mxu0 }
 0x109   : > { %v2642_v22 = vmax.f32 %v2640_v6, %v2641_v13  ;;  %v2649_v23 = vmax.f32 %v2647_v7, %v2648_v14  ;;  %v2655_v24 = vrot.slane %v2654_v15, 2  ;;  %v2577_v25 = vmax.f32 %v2575_v12, %v2576_v16 }
 0x10a   : > { %v2583_v26 = vrot.slane %v2582_v19, 4  ;;  %v2590_v31 = vrot.slane %v2589_v20, 4  ;;  %v2597_v32 = vrot.slane %v2596_v21, 4  ;;  %v1237_v33 = vcombine.high %v12411_v17, %v12411_v17 }
 0x10b   : > { %v2636_v38 = vrot.slane %v2635_v18, 1  ;;  %v2643_v41 = vrot.slane %v2642_v22, 1  ;;  %v2656_v46 = vmax.f32 %v2654_v15, %v2655_v24  ;;  %v2578_v49 = vrot.slane %v2577_v25, 2 }
 0x10c   : > { %v13214_v52 = vmax.f32 %v2509_v39, %v2510_v36  ;;  %v2584_v44 = vmax.f32 %v2582_v19, %v2583_v26  ;;  %v2591_v53 = vmax.f32 %v2589_v20, %v2590_v31  ;;  %v2598_v54 = vmax.f32 %v2596_v21, %v2597_v32 }
 0x10d   : > { %v13216_v55 = vmax.f32 %v2502_v45, %v2503_v62  ;;  %v2650_v56 = vrot.slane %v2649_v23, 1  ;;  %v2657_v57 = vrot.slane %v2656_v46, 1  ;;  %v2579_v58 = vmax.f32 %v2577_v25, %v2578_v49 }
 0x10e   : > { %v2585_v59 = vrot.slane %v2584_v44, 2  ;;  %v2592_v60 = vrot.slane %v2591_v53, 2  ;;  %v2599_v63 = vrot.slane %v2598_v54, 2  ;;  %v1244_v0 = vrot.slane %v12411_v17, %v13138_v40 }
 0x10f   : > { %v13219_v2 = vmax.f32 %v2516_v51, %v2517_v5  ;;  %v13221_v3 = vmax.f32 %v2635_v18, %v2636_v38  ;;  %v13223_v39 = vmax.f32 %v2642_v22, %v2643_v41  ;;  %v1251_v36 = vrot.slane %v1237_v33, %v13138_v40  ;;  %v12617_v51 = vld [vmem:[%s16634_s3 + $0x78] sm:$0xff]  }
 0x110   : > { %v2580_v4 = vrot.slane %v2579_v58, 1  ;;  %v2586_v45 = vmax.f32 %v2584_v44, %v2585_v59  ;;  %v2593_v62 = vmax.f32 %v2591_v53, %v2592_v60  ;;  %v1252_v6 = vcombine.high %v1244_v0, %v1244_v0  ;;  %11909 = vmatprep.subr.bf16.mxu1 %v12617_v51 }
 0x111   : > { %v1253_v7 = vcombine.high %v1251_v36, %v1251_v36  ;;  %v2659_v8 = vsel %vm2462_vm1, %v1244_v0, -inf  ;;  %v2673_v9 = vsel %vm2462_vm1, %v1251_v36, -inf  ;;  %v1203_v10 = vcombine.high %v817_v1, %v817_v1 }
 0x112   : > { %v13231_v5 = vmax.f32 %v2649_v23, %v2650_v56  ;;  %v13233_v11 = vmax.f32 %v2656_v46, %v2657_v57  ;;  %v2600_v12 = vmax.f32 %v2598_v54, %v2599_v63  ;;  %v2660_v13 = vrot.slane %v2659_v8, 4  ;;  %v12414_v57 = vpop.f32.mrf.mxu0 }
 0x113   : > { %v2666_v14 = vsel %vm2462_vm1, %v1252_v6, -inf  ;;  %v2674_v15 = vrot.slane %v2673_v9, 4  ;;  %v2680_v16 = vsel %vm2462_vm1, %v1253_v7, -inf  ;;  %v1210_v17 = vrot.slane %v817_v1, %v13138_v40 }
 0x114   : > { %v13238_v18 = vmax.f32 %v2579_v58, %v2580_v4  ;;  %v2587_v19 = vrot.slane %v2586_v45, 1  ;;  %v2594_v20 = vrot.slane %v2593_v62, 1  ;;  %v2661_v21 = vmax.f32 %v2659_v8, %v2660_v13 }
 0x115   : > { %v2667_v22 = vrot.slane %v2666_v14, 4  ;;  %v2675_v23 = vmax.f32 %v2673_v9, %v2674_v15  ;;  %v2681_v24 = vrot.slane %v2680_v16, 4  ;;  %v1217_v25 = vrot.slane %v1203_v10, %v13138_v40 }
 0x116   : > { %v2601_v26 = vrot.slane %v2600_v12, 1  ;;  %v2662_v31 = vrot.slane %v2661_v21, 2  ;;  %v1218_v32 = vcombine.high %v1210_v17, %v1210_v17  ;;  %v2603_v33 = vsel %vm2462_vm1, %v1210_v17, -inf }
 0x117   : > { %v2668_v38 = vmax.f32 %v2666_v14, %v2667_v22  ;;  %v2676_v41 = vrot.slane %v2675_v23, 2  ;;  %v2682_v46 = vmax.f32 %v2680_v16, %v2681_v24  ;;  %v1219_v49 = vcombine.high %v1217_v25, %v1217_v25 }
 0x118   : > { %v2663_v44 = vmax.f32 %v2661_v21, %v2662_v31  ;;  %v2604_v53 = vrot.slane %v2603_v33, 4  ;;  %v2610_v54 = vsel %vm2462_vm1, %v1218_v32, -inf  ;;  %v2617_v56 = vsel %vm2462_vm1, %v1217_v25, -inf }
 0x119   : > { %v2669_v58 = vrot.slane %v2668_v38, 2  ;;  %v2677_v59 = vmax.f32 %v2675_v23, %v2676_v41  ;;  %v2683_v60 = vrot.slane %v2682_v46, 2  ;;  %v2611_v63 = vrot.slane %v2610_v54, 4 }
 0x11a   : > { %v13244_v0 = vmax.f32 %v2586_v45, %v2587_v19  ;;  %v2605_v1 = vmax.f32 %v2603_v33, %v2604_v53  ;;  %v2618_v36 = vrot.slane %v2617_v56, 4  ;;  %v2624_v4 = vsel %vm2462_vm1, %v1219_v49, -inf  ;;  %v12618_v33 = vld [vmem:[%s16634_s3 + $0x38] sm:$0xff]   ;;  %v830_v53 = vpop.f32.mrf.mxu0 }
 0x11b   : > { %v2670_v6 = vmax.f32 %v2668_v38, %v2669_v58  ;;  %v2684_v7 = vmax.f32 %v2682_v46, %v2683_v60  ;;  %v2612_v8 = vmax.f32 %v2610_v54, %v2611_v63  ;;  %v1288_v9 = vcombine.high %v12414_v57, %v12414_v57  ;;  %11910 = vmatpush3.bf16.msra.mxu1 %v12618_v33 }
 0x11c   : > { %v2664_v10 = vrot.slane %v2663_v44, 1  ;;  %v2606_v51 = vrot.slane %v2605_v1, 2  ;;  %v2619_v13 = vmax.f32 %v2617_v56, %v2618_v36  ;;  %v2625_v14 = vrot.slane %v2624_v4, 4 }
 0x11d   : > { %v13247_v15 = vmax.f32 %v2593_v62, %v2594_v20  ;;  %v2671_v16 = vrot.slane %v2670_v6, 1  ;;  %v2678_v17 = vrot.slane %v2677_v59, 1  ;;  %v2613_v21 = vrot.slane %v2612_v8, 2 }
 0x11e   : > { %v2607_v22 = vmax.f32 %v2605_v1, %v2606_v51  ;;  %v2620_v45 = vrot.slane %v2619_v13, 2  ;;  %v2626_v19 = vmax.f32 %v2624_v4, %v2625_v14  ;;  %v1295_v23 = vrot.slane %v12414_v57, %v13138_v40 }
 0x11f   : > { %v13250_v24 = vmax.f32 %v2600_v12, %v2601_v26  ;;  %v2685_v25 = vrot.slane %v2684_v7, 1  ;;  %v2614_v31 = vmax.f32 %v2612_v8, %v2613_v21  ;;  %v1302_v32 = vrot.slane %v1288_v9, %v13138_v40 }
 0x120   : > { %v13256_v62 = vmax.f32 %v2663_v44, %v2664_v10  ;;  %v2608_v20 = vrot.slane %v2607_v22, 1  ;;  %v13258_v38 = vmax.f32 %v2619_v13, %v2620_v45  ;;  %v1303_v41 = vcombine.high %v1295_v23, %v1295_v23  ;;  %v13274_v13 = vpop.f32.mrf.mxu0 }
 0x121   : > { %v13260_v46 = vmax.f32 %v2677_v59, %v2678_v17  ;;  %v1304_v49 = vcombine.high %v1302_v32, %v1302_v32  ;;  %v2743_v12 = vsel %vm2462_vm1, %v1295_v23, -inf  ;;  %v2757_v26 = vsel %vm2462_vm1, %v1302_v32, -inf }
 0x122   : > { %v13264_v54 = vmax.f32 %v2670_v6, %v2671_v16  ;;  %v2615_v56 = vrot.slane %v2614_v31, 1  ;;  %v2627_v57 = vrot.slane %v2626_v19, 2  ;;  %v2744_v58 = vrot.slane %v2743_v12, 4 }
 0x123   : > { %v13266_v44 = vmax.f32 %v2684_v7, %v2685_v25  ;;  %v2750_v60 = vsel %vm2462_vm1, %v1303_v41, -inf  ;;  %v2758_v63 = vrot.slane %v2757_v26, 4  ;;  %v2764_v59 = vsel %vm2462_vm1, %v1304_v49, -inf }
 0x124   : > { %v13270_v1 = vmax.f32 %v2607_v22, %v2608_v20  ;;  %v2622_v36 = vrot.slane %v13258_v38, 1  ;;  %v2745_v4 = vmax.f32 %v2743_v12, %v2744_v58  ;;  %v2751_v8 = vrot.slane %v2750_v60, 4 }
 0x125   : > { %v2759_v9 = vmax.f32 %v2757_v26, %v2758_v63  ;;  %v2765_v10 = vrot.slane %v2764_v59, 4  ;;  %v1254_v6 = vcombine.high %v830_v53, %v830_v53  ;;  %v1261_v51 = vrot.slane %v830_v53, %v13138_v40 }
 0x126   : > { %v13276_v7 = vmax.f32 %v2614_v31, %v2615_v56  ;;  %v13278_v14 = vmax.f32 %v2626_v19, %v2627_v57  ;;  %v2746_v16 = vrot.slane %v2745_v4, 2  ;;  %v2752_v17 = vmax.f32 %v2750_v60, %v2751_v8  ;;  %v12619_v31 = vld [vmem:[%s16634_s3 + $0x70] sm:$0xff]  }
 0x127   : > { %v2760_v21 = vrot.slane %v2759_v9, 2  ;;  %v2766_v22 = vmax.f32 %v2764_v59, %v2765_v10  ;;  %v1268_v45 = vrot.slane %v1254_v6, %v13138_v40  ;;  %v1269_v23 = vcombine.high %v1261_v51, %v1261_v51  ;;  %11911 = vmatprep.subr.bf16.mxu1 %v12619_v31 }
 0x128   : > { %v2747_v25 = vmax.f32 %v2745_v4, %v2746_v16  ;;  %v2753_v32 = vrot.slane %v2752_v17, 2  ;;  %v2687_v33 = vsel %vm2462_vm1, %v1261_v51, -inf }
 0x129   : > { %v2761_v19 = vmax.f32 %v2759_v9, %v2760_v21  ;;  %v2767_v41 = vrot.slane %v2766_v22, 2  ;;  %v1270_v49 = vcombine.high %v1268_v45, %v1268_v45  ;;  %v2688_v12 = vrot.slane %v2687_v33, 4  ;;  %v13293_v9 = vld [vmem:[%s16633_s2] ss:$0 sm:$0xff] }
 0x12a   : > { %v2748_v26 = vrot.slane %v2747_v25, 1  ;;  %v2754_v53 = vmax.f32 %v2752_v17, %v2753_v32  ;;  %v2694_v56 = vsel %vm2462_vm1, %v1269_v23, -inf  ;;  %v2701_v57 = vsel %vm2462_vm1, %v1268_v45, -inf }
 0x12b   : > { %v2762_v58 = vrot.slane %v2761_v19, 1  ;;  %v2768_v60 = vmax.f32 %v2766_v22, %v2767_v41  ;;  %v2689_v63 = vmax.f32 %v2687_v33, %v2688_v12  ;;  %v2695_v59 = vrot.slane %v2694_v56, 4 }
 0x12c   : > { %v2749_v4 = vmax.f32 %v2747_v25, %v2748_v26  ;;  %v2755_v8 = vrot.slane %v2754_v53, 1  ;;  %v2702_v10 = vrot.slane %v2701_v57, 4  ;;  %v2708_v6 = vsel %vm2462_vm1, %v1270_v49, -inf }
 0x12d   : > { %v2763_v51 = vmax.f32 %v2761_v19, %v2762_v58  ;;  %v2769_v16 = vrot.slane %v2768_v60, 1  ;;  %v2690_v17 = vrot.slane %v2689_v63, 2  ;;  %v2696_v21 = vmax.f32 %v2694_v56, %v2695_v59  ;;  %v12620_v19 = vld [vmem:[%s16634_s3 + $0x30] sm:$0xff]  }
 0x12e   : > { %v2756_v45 = vmax.f32 %v2754_v53, %v2755_v8  ;;  %v4263_v23 = vmax.f32 %v13154_v34, %v2749_v4  ;;  %v2703_v22 = vmax.f32 %v2701_v57, %v2702_v10  ;;  %v2709_v32 = vrot.slane %v2708_v6, 4  ;;  %11912 = vmatpush3.bf16.msra.mxu1 %v12620_v19 }
 0x12f   : > { %v2770_v33 = vmax.f32 %v2768_v60, %v2769_v16  ;;  %v4265_v25 = vmax.f32 %v13164_v42, %v2763_v51  ;;  %v2691_v31 = vmax.f32 %v2689_v63, %v2690_v17  ;;  %v2697_v41 = vrot.slane %v2696_v21, 2 }
 0x130   : > { %v4264_v49 = vmax.f32 %v13160_v37, %v2756_v45  ;;  %v4397_v12 = vadd.f32 %v13293_v9, %v4263_v23  ;;  %v2704_v26 = vrot.slane %v2703_v22, 2  ;;  %v2710_v20 = vmax.f32 %v2708_v6, %v2709_v32 }
 0x131   : > { %v4266_v53 = vmax.f32 %v13166_v43, %v2770_v33  ;;  %v4399_v34 = vadd.f32 %v13293_v9, %v4265_v25  ;;  %v2692_v56 = vrot.slane %v2691_v31, 1  ;;  %v2698_v57 = vmax.f32 %v2696_v21, %v2697_v41 }
 0x132   : > { %v4398_v42 = vadd.f32 %v13293_v9, %v4264_v49  ;;  %v4525_v58 = vmax.f32 %v4397_v12, 0.0  ;;  %v2705_v60 = vmax.f32 %v2703_v22, %v2704_v26  ;;  %v2711_v63 = vrot.slane %v2710_v20, 2  ;;  %v12621_v49 = vld [vmem:[%s16634_s3 + $0x68] sm:$0xff]  }
 0x133   : > { %v4400_v37 = vadd.f32 %v13293_v9, %v4266_v53  ;;  %v4527_v59 = vmax.f32 %v4399_v34, 0.0  ;;  %v2693_v4 = vmax.f32 %v2691_v31, %v2692_v56  ;;  %v2699_v8 = vrot.slane %v2698_v57, 1  ;;  %11913 = vmatprep.subr.bf16.mxu1 %v12621_v49 }
 0x134   : > { %v4526_v10 = vmax.f32 %v4398_v42, 0.0  ;;  %v11717_v6 = vpack.c.bf16 %v4525_v58, %v4525_v58  ;;  %v2706_v51 = vrot.slane %v2705_v60, 1  ;;  %v2712_v16 = vmax.f32 %v2710_v20, %v2711_v63 }
 0x135   : > { %v4528_v43 = vmax.f32 %v4400_v37, 0.0  ;;  %v13306_v17 = vpack.c.bf16 %v4527_v59, %v4527_v59  ;;  %v2700_v45 = vmax.f32 %v2698_v57, %v2699_v8  ;;  %v4255_v21 = vmax.f32 %v13182_v28, %v2693_v4 }
 0x136   : > { %v13309_v23 = vpack.c.bf16 %v4526_v10, %v4526_v10  ;;  %v5165_v22 = vunpack.c.l.b16 %v11717_v6  ;;  %v2707_v32 = vmax.f32 %v2705_v60, %v2706_v51  ;;  %v2713_v33 = vrot.slane %v2712_v16, 1 }
 0x137   : > { %v13311_v25 = vpack.c.bf16 %v4528_v43, %v4528_v43  ;;  %v4256_v31 = vmax.f32 %v13187_v47, %v2700_v45  ;;  %v4389_v41 = vadd.f32 %v13293_v9, %v4255_v21  ;;  %v1312_v20 = vrot.slane %v13274_v13, %v13138_v40 }
 0x138   : > { %v13323_v28 = vmax.f32 %v13258_v38, %v2622_v36  ;;  %v2629_v12 = vrot.slane %v13278_v14, 1  ;;  %v2714_v26 = vmax.f32 %v2712_v16, %v2713_v33  ;;  %v4257_v19 = vmax.f32 %v13184_v30, %v2707_v32 }
 0x139   : > { %v5166_v47 = vunpack.c.l.b16 %v13309_v23  ;;  %v5167_v53 = vunpack.c.l.b16 %v13306_v17  ;;  %v4390_v34 = vadd.f32 %v13293_v9, %v4256_v31  ;;  %v4517_v56 = vmax.f32 %v4389_v41, 0.0  ;;  %v833_v31 = vpop.f32.mrf.mxu0 }
 0x13a   : > { %v13330_v57 = vrot.slane %v5165_v22, 7  ;;  %v4258_v38 = vmax.f32 %v13190_v48, %v2714_v26  ;;  %v4391_v36 = vadd.f32 %v13293_v9, %v4257_v19  ;;  %v16666_v30 = vcombine.high %v13274_v13, %v13274_v13 }
 0x13b   : > { %v5168_v58 = vunpack.c.l.b16 %v13311_v25  ;;  %v4518_v60 = vmax.f32 %v4390_v34, 0.0  ;;  %v11709_v63 = vpack.c.bf16 %v4517_v56, %v4517_v56  ;;  %v1320_v37 = vcombine.high %v1312_v20, %v1312_v20 }
 0x13c   : > { %v1319_v42 = vrot.slane %v16666_v30, %v13138_v40  ;;  %v4392_v59 = vadd.f32 %v13293_v9, %v4258_v38  ;;  %v4519_v4 = vmax.f32 %v4391_v36, 0.0  ;;  %v2771_v10 = vsel %vm2462_vm1, %v1312_v20, -inf  ;;  %v12622_v36 = vld [vmem:[%s16634_s3 + $0x28] sm:$0xff]  }
 0x13d   : > { %v11710_v6 = vpack.c.bf16 %v4518_v60, %v4518_v60  ;;  %v5157_v48 = vunpack.c.l.b16 %v11709_v63  ;;  %v2772_v51 = vrot.slane %v2771_v10, 4  ;;  %v2778_v16 = vsel %vm2462_vm1, %v1320_v37, -inf  ;;  %11914 = vmatpush3.bf16.msra.mxu1 %v12622_v36 }
 0x13e   : > { %v1321_v8 = vcombine.high %v1319_v42, %v1319_v42  ;;  %v4520_v43 = vmax.f32 %v4392_v59, 0.0  ;;  %v11711_v17 = vpack.c.bf16 %v4519_v4, %v4519_v4  ;;  %v2779_v13 = vrot.slane %v2778_v16, 4 }
 0x13f   : > { %v2785_v45 = vsel %vm2462_vm1, %v1319_v42, -inf  ;;  %v5158_v21 = vunpack.c.l.b16 %v11710_v6  ;;  %v5285_v22 = vrot.slane %v5157_v48, 7  ;;  %v2773_v32 = vmax.f32 %v2771_v10, %v2772_v51 }
 0x140   : > { %v2786_v33 = vrot.slane %v2785_v45, 4  ;;  %v11712_v41 = vpack.c.bf16 %v4520_v43, %v4520_v43  ;;  %v5159_v49 = vunpack.c.l.b16 %v11711_v17  ;;  %v2780_v26 = vmax.f32 %v2778_v16, %v2779_v13 }
 0x141   : > { %v2792_v20 = vsel %vm2462_vm1, %v1321_v8, -inf  ;;  %v5286_v19 = vrot.slane %v5158_v21, 6  ;;  %v2774_v34 = vrot.slane %v2773_v32, 2  ;;  %v1271_v63 = vcombine.high %v833_v31, %v833_v31 }
 0x142   : > { %v2787_v56 = vmax.f32 %v2785_v45, %v2786_v33  ;;  %v2793_v38 = vrot.slane %v2792_v20, 4  ;;  %v5160_v30 = vunpack.c.l.b16 %v11712_v41  ;;  %v5289_v42 = vrot.slane %v5159_v49, 5 }
 0x143   : > { %v2781_v60 = vrot.slane %v2780_v26, 2  ;;  %v5288_v37 = vsel %vm5287_vm2, %v5286_v19, %v5285_v22  ;;  %v2775_v59 = vmax.f32 %v2773_v32, %v2774_v34  ;;  %v13348_v6 = vrot.slane %v5167_v53, 5 }
 0x144   : > { %v2788_v4 = vrot.slane %v2787_v56, 2  ;;  %v2794_v10 = vmax.f32 %v2792_v20, %v2793_v38  ;;  %v13351_v8 = vsel %vm5290_vm3, %v5289_v42, %v5288_v37  ;;  %v1278_v51 = vrot.slane %v833_v31, %v13138_v40 }
 0x145   : > { %v2782_v48 = vmax.f32 %v2780_v26, %v2781_v60  ;;  %v2776_v16 = vrot.slane %v2775_v59, 1  ;;  %v1285_v13 = vrot.slane %v1271_v63, %v13138_v40  ;;  %v13355_v45 = vrot.slane %v5160_v30, 4  ;;  %v12623_v26 = vld [vmem:[%s16634_s3 + $0x60] sm:$0xff]  }
 0x146   : > { %v2789_v43 = vmax.f32 %v2787_v56, %v2788_v4  ;;  %v2795_v17 = vrot.slane %v2794_v10, 2  ;;  %v1286_v22 = vcombine.high %v1278_v51, %v1278_v51  ;;  %v2715_v32 = vsel %vm2462_vm1, %v1278_v51, -inf  ;;  %11915 = vmatprep.subr.bf16.mxu1 %v12623_v26 }
 0x147   : > { %v2783_v21 = vrot.slane %v2782_v48, 1  ;;  %v2777_v33 = vmax.f32 %v2775_v59, %v2776_v16  ;;  %v1287_v49 = vcombine.high %v1285_v13, %v1285_v13  ;;  %v2716_v20 = vrot.slane %v2715_v32, 4 }
 0x148   : > { %v2790_v53 = vrot.slane %v2789_v43, 1  ;;  %v2796_v41 = vmax.f32 %v2794_v10, %v2795_v17  ;;  %v2722_v19 = vsel %vm2462_vm1, %v1286_v22, -inf  ;;  %v2729_v34 = vsel %vm2462_vm1, %v1285_v13, -inf }
 0x149   : > { %v2784_v31 = vmax.f32 %v2782_v48, %v2783_v21  ;;  %v4267_v36 = vmax.f32 %v13193_v27, %v2777_v33  ;;  %v2723_v30 = vrot.slane %v2722_v19, 4  ;;  %v2717_v60 = vmax.f32 %v2715_v32, %v2716_v20 }
 0x14a   : > { %v2791_v56 = vmax.f32 %v2789_v43, %v2790_v53  ;;  %v2797_v38 = vrot.slane %v2796_v41, 1  ;;  %v2730_v63 = vrot.slane %v2729_v34, 4  ;;  %v2736_v37 = vsel %vm2462_vm1, %v1287_v49, -inf }
 0x14b   : > { %v4268_v42 = vmax.f32 %v13199_v35, %v2784_v31  ;;  %v4401_v10 = vadd.f32 %v13293_v9, %v4267_v36  ;;  %v2724_v48 = vmax.f32 %v2722_v19, %v2723_v30  ;;  %v2718_v16 = vrot.slane %v2717_v60, 2  ;;  %v12624_v30 = vld [vmem:[%s16634_s3 + $0x20] sm:$0xff]  }
 0x14c   : > { %v2798_v59 = vmax.f32 %v2796_v41, %v2797_v38  ;;  %v4269_v4 = vmax.f32 %v13195_v29, %v2791_v56  ;;  %v2731_v43 = vmax.f32 %v2729_v34, %v2730_v63  ;;  %v2737_v27 = vrot.slane %v2736_v37, 4  ;;  %11916 = vmatpush3.bf16.msra.mxu1 %v12624_v30 }
 0x14d   : > { %v4402_v51 = vadd.f32 %v13293_v9, %v4268_v42  ;;  %v4529_v35 = vmax.f32 %v4401_v10, 0.0  ;;  %v2725_v21 = vrot.slane %v2724_v48, 2  ;;  %v2719_v32 = vmax.f32 %v2717_v60, %v2718_v16 }
 0x14e   : > { %v4270_v17 = vmax.f32 %v13201_v50, %v2798_v59  ;;  %v4403_v13 = vadd.f32 %v13293_v9, %v4269_v4  ;;  %v2732_v33 = vrot.slane %v2731_v43, 2  ;;  %v2738_v53 = vmax.f32 %v2736_v37, %v2737_v27  ;;  %v12418_v59 = vpop.f32.mrf.mxu0 }
 0x14f   : > { %v4530_v22 = vmax.f32 %v4402_v51, 0.0  ;;  %v11721_v49 = vpack.c.bf16 %v4529_v35, %v4529_v35  ;;  %v2726_v26 = vmax.f32 %v2724_v48, %v2725_v21  ;;  %v2720_v20 = vrot.slane %v2719_v32, 1 }
 0x150   : > { %v4404_v29 = vadd.f32 %v13293_v9, %v4270_v17  ;;  %v4531_v41 = vmax.f32 %v4403_v13, 0.0  ;;  %v2733_v19 = vmax.f32 %v2731_v43, %v2732_v33  ;;  %v2739_v34 = vrot.slane %v2738_v53, 2 }
 0x151   : > { %v11722_v31 = vpack.c.bf16 %v4530_v22, %v4530_v22  ;;  %v5169_v50 = vunpack.c.l.b16 %v11721_v49  ;;  %v2727_v36 = vrot.slane %v2726_v26, 1  ;;  %v2721_v60 = vmax.f32 %v2719_v32, %v2720_v20  ;;  %v846_v22 = vpop.f32.mrf.mxu0 }
 0x152   : > { %v4532_v56 = vmax.f32 %v4404_v29, 0.0  ;;  %v11723_v38 = vpack.c.bf16 %v4531_v41, %v4531_v41  ;;  %v2734_v63 = vrot.slane %v2733_v19, 1  ;;  %v2740_v37 = vmax.f32 %v2738_v53, %v2739_v34  ;;  %v12626_v29 = vld [vmem:[%s16634_s3 + $0x58] sm:$0xff]  }
 0x153   : > { %v5170_v42 = vunpack.c.l.b16 %v11722_v31  ;;  %v13377_v4 = vrot.slane %v5166_v47, 6  ;;  %v13381_v10 = vrot.slane %v5168_v58, 4  ;;  %v2728_v51 = vmax.f32 %v2726_v26, %v2727_v36  ;;  %v12627_v41 = vld [vmem:[%s16634_s3 + $0x138] sm:$0xff]   ;;  %11917 = vmatprep.subr.bf16.mxu1 %v12626_v29 }
 0x154   : > { %v5171_v48 = vunpack.c.l.b16 %v11723_v38  ;;  %v2735_v16 = vmax.f32 %v2733_v19, %v2734_v63  ;;  %v2741_v43 = vrot.slane %v2740_v37, 1  ;;  %v4259_v27 = vmax.f32 %v13205_v61, %v2721_v60 }
 0x155   : > { %v5294_v17 = vsel %vm5293_vm4, %v13355_v45, %v13351_v8  ;;  %v13387_v13 = vpack.c.bf16 %v4532_v56, %v4532_v56  ;;  %v13389_v23 = vrot.slane %v5169_v50, 3  ;;  %v13391_v47 = vrot.slane %v5170_v42, 2 }
 0x156   : > { %v4260_v25 = vmax.f32 %v13216_v55, %v2728_v51  ;;  %v13394_v58 = vrot.slane %v5171_v48, 1  ;;  %v2742_v35 = vmax.f32 %v2740_v37, %v2741_v43  ;;  %v4261_v21 = vmax.f32 %v13214_v52, %v2735_v16  ;;  %v12625_v55 = vld [vmem:[%s16634_s3 + $0x178] sm:$0xff]  }
 0x157   : > { %v4393_v61 = vadd.f32 %v13293_v9, %v4259_v27  ;;  %v1356_v45 = vcombine.high %v12418_v59, %v12418_v59  ;;  %v1363_v53 = vrot.slane %v12418_v59, %v13138_v40  ;;  %v1322_v31 = vcombine.high %v846_v22, %v846_v22  ;;  %12037 = vmatprep.subr.bf16.mxu0 %v12625_v55 }
 0x158   : > { %v4394_v8 = vadd.f32 %v13293_v9, %v4260_v25  ;;  %v4262_v32 = vmax.f32 %v13219_v2, %v2742_v35  ;;  %v4395_v33 = vadd.f32 %v13293_v9, %v4261_v21  ;;  %v13413_v20 = vrot.slane %v846_v22, %v13138_v40  ;;  %12038 = vmatpush3.bf16.msra.mxu0 %v12627_v41 }
 0x159   : > { %v4521_v52 = vmax.f32 %v4393_v61, 0.0  ;;  %v1370_v26 = vrot.slane %v1356_v45, %v13138_v40  ;;  %v1371_v56 = vcombine.high %v1363_v53, %v1363_v53  ;;  %v2855_v36 = vsel %vm2462_vm1, %v1363_v53, -inf }
 0x15a   : > { %v4522_v49 = vmax.f32 %v4394_v8, 0.0  ;;  %v4396_v2 = vadd.f32 %v13293_v9, %v4262_v32  ;;  %v4523_v19 = vmax.f32 %v4395_v33, 0.0  ;;  %v2856_v37 = vrot.slane %v2855_v36, 4 }
 0x15b   : > { %v11713_v34 = vpack.c.bf16 %v4521_v52, %v4521_v52  ;;  %v1372_v50 = vcombine.high %v1370_v26, %v1370_v26  ;;  %v2869_v30 = vsel %vm2462_vm1, %v1370_v26, -inf  ;;  %v2862_v48 = vsel %vm2462_vm1, %v1371_v56, -inf  ;;  %v12628_v56 = vld [vmem:[%s16634_s3 + $0x18] sm:$0xff]  }
 0x15c   : > { %v11714_v38 = vpack.c.bf16 %v4522_v49, %v4522_v49  ;;  %v4524_v42 = vmax.f32 %v4396_v2, 0.0  ;;  %v11715_v60 = vpack.c.bf16 %v4523_v19, %v4523_v19  ;;  %v2870_v51 = vrot.slane %v2869_v30, 4  ;;  %v5556_v19 = vld [vmem:[#allocation2 + $0x14] sm:$0xf]  ;;  %11918 = vmatpush3.bf16.msra.mxu1 %v12628_v56 }
 0x15d   : > { %v5161_v63 = vunpack.c.l.b16 %v11713_v34  ;;  %v2876_v16 = vsel %vm2462_vm1, %v1372_v50, -inf  ;;  %v2857_v35 = vmax.f32 %v2855_v36, %v2856_v37  ;;  %v2863_v61 = vrot.slane %v2862_v48, 4 }
 0x15e   : > { %v5162_v59 = vunpack.c.l.b16 %v11714_v38  ;;  %v11716_v43 = vpack.c.bf16 %v4524_v42, %v4524_v42  ;;  %v5163_v27 = vunpack.c.l.b16 %v11715_v60  ;;  %v2871_v22 = vmax.f32 %v2869_v30, %v2870_v51 }
 0x15f   : > { %v5295_v25 = vrot.slane %v5161_v63, 3  ;;  %v2877_v8 = vrot.slane %v2876_v16, 4  ;;  %v2858_v33 = vrot.slane %v2857_v35, 2  ;;  %v2864_v53 = vmax.f32 %v2862_v48, %v2863_v61 }
 0x160   : > { %v5298_v21 = vrot.slane %v5162_v59, 2  ;;  %v5164_v45 = vunpack.c.l.b16 %v11716_v43  ;;  %v5301_v32 = vrot.slane %v5163_v27, 1  ;;  %v2872_v29 = vrot.slane %v2871_v22, 2 }
 0x161   : > { %v5297_v55 = vsel %vm5296_vm5, %v5295_v25, %v5294_v17  ;;  %v2878_v41 = vmax.f32 %v2876_v16, %v2877_v8  ;;  %v16667_v2 = vmov 0  ;;  %v2859_v17 = vmax.f32 %v2857_v35, %v2858_v33 }
 0x162   : > { %v5300_v52 = vsel %vm5299_vm6, %v5298_v21, %v5297_v55  ;;  %v5306_v26 = vsel %vm5305_vm8, %v13330_v57, %v5164_v45  ;;  %v16668_v2 = vsel %vm13427_vm11, 4294967295, %v16667_v2  ;;  %v1336_v34 = vrot.slane %v1322_v31, %v13138_v40 }
 0x163   : > { %v5303_v49 = vsel %vm5302_vm7, %v5301_v32, %v5300_v52  ;;  %16669 = vst [vmem:[#allocation8_spill] sm:$0xff] %v16668_v2  ;;  %v5308_v38 = vsel %vm5287_vm2, %v13377_v4, %v5306_v26  ;;  %v2865_v36 = vrot.slane %v2864_v53, 2  ;;  %v2873_v57 = vmax.f32 %v2871_v22, %v2872_v29 }
 0x164   : > { %v5512_v50 = vpack.c.b16 %v5303_v49, %v5303_v49  ;;  %v5310_v30 = vsel %vm5290_vm3, %v13348_v6, %v5308_v38  ;;  %v2860_v42 = vrot.slane %v2859_v17, 1  ;;  %v2879_v60 = vrot.slane %v2878_v41, 2 }
 0x165   : > { %v1337_v63 = vcombine.high %v13413_v20, %v13413_v20  ;;  %v5312_v31 = vsel %vm5293_vm4, %v13381_v10, %v5310_v30  ;;  %v2866_v59 = vmax.f32 %v2864_v53, %v2865_v36  ;;  %v2874_v4 = vrot.slane %v2873_v57, 1 }
 0x166   : > { %v5557_v37 = vsel %vm13427_vm11, %v5512_v50, %v5556_v19  ;;  %v5314_v48 = vsel %vm5296_vm5, %v13389_v23, %v5312_v31  ;;  %v2861_v51 = vmax.f32 %v2859_v17, %v2860_v42  ;;  %v2880_v6 = vmax.f32 %v2878_v41, %v2879_v60 }
 0x167   : > { %5558 = vst [vmem:[#allocation2 + $0x14] sm:$0xf] %v5557_v37  ;;  %v1338_v16 = vcombine.high %v1336_v34, %v1336_v34  ;;  %v5316_v43 = vsel %vm5299_vm6, %v13391_v47, %v5314_v48  ;;  %v2867_v27 = vrot.slane %v2866_v59, 1  ;;  %v2875_v25 = vmax.f32 %v2873_v57, %v2874_v4 }
 0x168   : > { %v2799_v10 = vsel %vm2462_vm1, %v13413_v20, -inf  ;;  %v5318_v35 = vsel %vm5302_vm7, %v13394_v58, %v5316_v43  ;;  %v2881_v21 = vrot.slane %v2880_v6, 1  ;;  %v4279_v61 = vmax.f32 %v13221_v3, %v2861_v51  ;;  %v12419_v51 = vpop.f32.mrf.mxu0 }
 0x169   : > { %v2800_v22 = vrot.slane %v2799_v10, 4  ;;  %v5513_v23 = vpack.c.b16 %v5318_v35, %v5318_v35  ;;  %v2868_v8 = vmax.f32 %v2866_v59, %v2867_v27  ;;  %v4281_v45 = vmax.f32 %v13231_v5, %v2875_v25 }
 0x16a   : > { %v2806_v55 = vsel %vm2462_vm1, %v1337_v63, -inf  ;;  %v2882_v32 = vmax.f32 %v2880_v6, %v2881_v21  ;;  %v4413_v47 = vadd.f32 %v13293_v9, %v4279_v61  ;;  %v2813_v53 = vsel %vm2462_vm1, %v1336_v34, -inf  ;;  %v12629_v61 = vld [vmem:[%s16634_s3 + $0x170] sm:$0xff]  }
 0x16b   : > { %v2801_v33 = vmax.f32 %v2799_v10, %v2800_v22  ;;  %v2807_v52 = vrot.slane %v2806_v55, 4  ;;  %5559 = vst [vmem:[#allocation2 + $0x18] sm:$0xf] %v5513_v23  ;;  %v4280_v20 = vmax.f32 %v13223_v39, %v2868_v8  ;;  %v4415_v58 = vadd.f32 %v13293_v9, %v4281_v45  ;;  %v12630_v8 = vld [vmem:[%s16634_s3 + $0x50] sm:$0xff]   ;;  %12039 = vmatprep.subr.bf16.mxu0 %v12629_v61 }
 0x16c   : > { %v2820_v3 = vsel %vm2462_vm1, %v1338_v16, -inf  ;;  %v4282_v29 = vmax.f32 %v13233_v11, %v2882_v32  ;;  %v4541_v41 = vmax.f32 %v4413_v47, 0.0  ;;  %v2814_v17 = vrot.slane %v2813_v53, 4  ;;  %11919 = vmatprep.subr.bf16.mxu1 %v12630_v8 }
 0x16d   : > { %v2802_v5 = vrot.slane %v2801_v33, 2  ;;  %v2808_v49 = vmax.f32 %v2806_v55, %v2807_v52  ;;  %v4414_v26 = vadd.f32 %v13293_v9, %v4280_v20  ;;  %v4543_v19 = vmax.f32 %v4415_v58, 0.0 }
 0x16e   : > { %v2821_v56 = vrot.slane %v2820_v3, 4  ;;  %v4416_v38 = vadd.f32 %v13293_v9, %v4282_v29  ;;  %v11733_v50 = vpack.c.bf16 %v4541_v41, %v4541_v41  ;;  %v2815_v34 = vmax.f32 %v2813_v53, %v2814_v17 }
 0x16f   : > { %v2803_v39 = vmax.f32 %v2801_v33, %v2802_v5  ;;  %v2809_v36 = vrot.slane %v2808_v49, 2  ;;  %v4542_v57 = vmax.f32 %v4414_v26, 0.0  ;;  %v11735_v30 = vpack.c.bf16 %v4543_v19, %v4543_v19 }
 0x170   : > { %v2822_v42 = vmax.f32 %v2820_v3, %v2821_v56  ;;  %v4544_v60 = vmax.f32 %v4416_v38, 0.0  ;;  %v5181_v63 = vunpack.c.l.b16 %v11733_v50  ;;  %v2816_v4 = vrot.slane %v2815_v34, 2 }
 0x171   : > { %v2804_v11 = vrot.slane %v2803_v39, 1  ;;  %v2810_v31 = vmax.f32 %v2808_v49, %v2809_v36  ;;  %v13464_v37 = vpack.c.bf16 %v4542_v57, %v4542_v57  ;;  %v5183_v59 = vunpack.c.l.b16 %v11735_v30 }
 0x172   : > { %v2823_v48 = vrot.slane %v2822_v42, 2  ;;  %v13469_v6 = vmax.f32 %v13278_v14, %v2629_v12  ;;  %v13471_v16 = vpack.c.bf16 %v4544_v60, %v4544_v60  ;;  %v5172_v25 = vunpack.c.l.b16 %v13387_v13  ;;  %v12631_v13 = vld [vmem:[%s16634_s3 + $0x130] sm:$0xff]  }
 0x173   : > { %v2805_v43 = vmax.f32 %v2803_v39, %v2804_v11  ;;  %v2811_v27 = vrot.slane %v2810_v31, 1  ;;  %v13474_v10 = vrot.slane %v5181_v63, 7  ;;  %v2817_v35 = vmax.f32 %v2815_v34, %v2816_v4  ;;  %12040 = vmatpush3.bf16.msra.mxu0 %v12631_v13  ;;  %v12632_v13 = vld [vmem:[%s16634_s3 + $0x10] sm:$0xff]  }
 0x174   : > { %v2824_v21 = vmax.f32 %v2822_v42, %v2823_v48  ;;  %v5182_v22 = vunpack.c.l.b16 %v13464_v37  ;;  %v1373_v12 = vcombine.high %v12419_v51, %v12419_v51  ;;  %v13487_v45 = vrot.slane %v5183_v59, 5  ;;  %11920 = vmatpush3.bf16.msra.mxu1 %v12632_v13 }
 0x175   : > { %v2812_v23 = vmax.f32 %v2810_v31, %v2811_v27  ;;  %v4271_v14 = vmax.f32 %v13238_v18, %v2805_v43  ;;  %v2818_v55 = vrot.slane %v2817_v35, 1  ;;  %v1380_v47 = vrot.slane %v12419_v51, %v13138_v40 }
 0x176   : > { %v2825_v32 = vrot.slane %v2824_v21, 1  ;;  %v5184_v33 = vunpack.c.l.b16 %v13471_v16  ;;  %v1387_v20 = vrot.slane %v1373_v12, %v13138_v40 }
 0x177   : > { %v4272_v18 = vmax.f32 %v13244_v0, %v2812_v23  ;;  %v4405_v52 = vadd.f32 %v13293_v9, %v4271_v14  ;;  %v2819_v58 = vmax.f32 %v2817_v35, %v2818_v55  ;;  %v1388_v3 = vcombine.high %v1380_v47, %v1380_v47 }
 0x178   : > { %v2826_v53 = vmax.f32 %v2824_v21, %v2825_v32  ;;  %v2883_v29 = vsel %vm2462_vm1, %v1380_v47, -inf  ;;  %v1389_v49 = vcombine.high %v1387_v20, %v1387_v20  ;;  %v2897_v56 = vsel %vm2462_vm1, %v1387_v20, -inf }
 0x179   : > { %v4406_v41 = vadd.f32 %v13293_v9, %v4272_v18  ;;  %v4533_v5 = vmax.f32 %v4405_v52, 0.0  ;;  %v2884_v26 = vrot.slane %v2883_v29, 4  ;;  %v4273_v19 = vmax.f32 %v13247_v15, %v2819_v58  ;;  %v849_v52 = vpop.f32.mrf.mxu0 }
 0x17a   : > { %v4274_v0 = vmax.f32 %v13250_v24, %v2826_v53  ;;  %v2890_v17 = vsel %vm2462_vm1, %v1388_v3, -inf  ;;  %v2898_v34 = vrot.slane %v2897_v56, 4  ;;  %v2904_v42 = vsel %vm2462_vm1, %v1389_v49, -inf }
 0x17b   : > { %v4534_v38 = vmax.f32 %v4406_v41, 0.0  ;;  %v11725_v50 = vpack.c.bf16 %v4533_v5, %v4533_v5  ;;  %v2885_v39 = vmax.f32 %v2883_v29, %v2884_v26  ;;  %v2891_v36 = vrot.slane %v2890_v17, 4 }
 0x17c   : > { %v4407_v57 = vadd.f32 %v13293_v9, %v4273_v19  ;;  %v4408_v30 = vadd.f32 %v13293_v9, %v4274_v0  ;;  %v2899_v37 = vmax.f32 %v2897_v56, %v2898_v34  ;;  %v2905_v59 = vrot.slane %v2904_v42, 4 }
 0x17d   : > { %v11726_v60 = vpack.c.bf16 %v4534_v38, %v4534_v38  ;;  %v5173_v63 = vunpack.c.l.b16 %v11725_v50  ;;  %v2886_v15 = vrot.slane %v2885_v39, 2  ;;  %v2892_v11 = vmax.f32 %v2890_v17, %v2891_v36 }
 0x17e   : > { %v4535_v24 = vmax.f32 %v4407_v57, 0.0  ;;  %v4536_v31 = vmax.f32 %v4408_v30, 0.0  ;;  %v2900_v21 = vrot.slane %v2899_v37, 2  ;;  %v2906_v61 = vmax.f32 %v2904_v42, %v2905_v59 }
 0x17f   : > { %v5174_v4 = vunpack.c.l.b16 %v11726_v60  ;;  %v5319_v48 = vrot.slane %v5173_v63, 7  ;;  %v2887_v51 = vmax.f32 %v2885_v39, %v2886_v15  ;;  %v2893_v43 = vrot.slane %v2892_v11, 2 }
 0x180   : > { %v11727_v27 = vpack.c.bf16 %v4535_v24, %v4535_v24  ;;  %v11728_v35 = vpack.c.bf16 %v4536_v31, %v4536_v31  ;;  %v2901_v47 = vmax.f32 %v2899_v37, %v2900_v21  ;;  %v2907_v18 = vrot.slane %v2906_v61, 2 }
 0x181   : > { %v5320_v23 = vsel %vm5305_vm8, %v5319_v48, %v5172_v25  ;;  %v5321_v14 = vrot.slane %v5174_v4, 6  ;;  %v2888_v12 = vrot.slane %v2887_v51, 1  ;;  %v2894_v8 = vmax.f32 %v2892_v11, %v2893_v43 }
 0x182   : > { %v5175_v55 = vunpack.c.l.b16 %v11727_v27  ;;  %v5176_v32 = vunpack.c.l.b16 %v11728_v35  ;;  %v13507_v20 = vrot.slane %v5182_v22, 6  ;;  %v2902_v29 = vrot.slane %v2901_v47, 1 }
 0x183   : > { %v5322_v58 = vsel %vm5287_vm2, %v5321_v14, %v5320_v23  ;;  %v2889_v53 = vmax.f32 %v2887_v51, %v2888_v12  ;;  %v2895_v3 = vrot.slane %v2894_v8, 1  ;;  %v2908_v41 = vmax.f32 %v2906_v61, %v2907_v18  ;;  %v12422_v61 = vpop.f32.mrf.mxu0 }
 0x184   : > { %v5323_v25 = vrot.slane %v5175_v55, 5  ;;  %v5325_v5 = vrot.slane %v5176_v32, 4  ;;  %v1339_v19 = vcombine.high %v849_v52, %v849_v52  ;;  %v2903_v0 = vmax.f32 %v2901_v47, %v2902_v29  ;;  %v5565_v32 = vld [vmem:[#allocation2 + $0x24] sm:$0x1] }
 0x185   : > { %v2896_v49 = vmax.f32 %v2894_v8, %v2895_v3  ;;  %v4283_v26 = vmax.f32 %v13256_v62, %v2889_v53  ;;  %v2909_v17 = vrot.slane %v2908_v41, 1  ;;  %v1346_v22 = vrot.slane %v849_v52, %v13138_v40 }
 0x186   : > { %v5324_v56 = vsel %vm5290_vm3, %v5323_v25, %v5322_v58  ;;  %v1353_v39 = vrot.slane %v1339_v19, %v13138_v40  ;;  %v4285_v57 = vmax.f32 %v13260_v46, %v2903_v0  ;;  %v13531_v13 = vrot.slane %v5184_v33, 4 }
 0x187   : > { %v4284_v38 = vmax.f32 %v13264_v54, %v2896_v49  ;;  %v4417_v50 = vadd.f32 %v13293_v9, %v4283_v26  ;;  %v2910_v36 = vmax.f32 %v2908_v41, %v2909_v17  ;;  %v1354_v30 = vcombine.high %v1346_v22, %v1346_v22  ;;  %v13545_v49 = vpop.f32.mrf.mxu0 }
 0x188   : > { %v2827_v62 = vsel %vm2462_vm1, %v1346_v22, -inf  ;;  %v1355_v60 = vcombine.high %v1353_v39, %v1353_v39  ;;  %v4419_v11 = vadd.f32 %v13293_v9, %v4285_v57  ;;  %v2841_v24 = vsel %vm2462_vm1, %v1353_v39, -inf }
 0x189   : > { %v4418_v34 = vadd.f32 %v13293_v9, %v4284_v38  ;;  %v4545_v42 = vmax.f32 %v4417_v50, 0.0  ;;  %v2828_v63 = vrot.slane %v2827_v62, 4  ;;  %v4286_v15 = vmax.f32 %v13266_v44, %v2910_v36  ;;  %v12633_v50 = vld [vmem:[%s16634_s3 + $0x168] sm:$0xff]  }
 0x18a   : > { %v2834_v54 = vsel %vm2462_vm1, %v1354_v30, -inf  ;;  %v4547_v48 = vmax.f32 %v4419_v11, 0.0  ;;  %v2842_v51 = vrot.slane %v2841_v24, 4  ;;  %v2848_v43 = vsel %vm2462_vm1, %v1355_v60, -inf  ;;  %12041 = vmatprep.subr.bf16.mxu0 %v12633_v50 }
 0x18b   : > { %v4546_v31 = vmax.f32 %v4418_v34, 0.0  ;;  %v11737_v37 = vpack.c.bf16 %v4545_v42, %v4545_v42  ;;  %v2829_v59 = vmax.f32 %v2827_v62, %v2828_v63  ;;  %v2835_v46 = vrot.slane %v2834_v54, 4  ;;  %v12634_v62 = vld [vmem:[%s16634_s3 + $0x48] sm:$0xff]  }
 0x18c   : > { %v4420_v4 = vadd.f32 %v13293_v9, %v4286_v15  ;;  %v13527_v14 = vpack.c.bf16 %v4547_v48, %v4547_v48  ;;  %v2843_v12 = vmax.f32 %v2841_v24, %v2842_v51  ;;  %v2849_v8 = vrot.slane %v2848_v43, 4  ;;  %v12635_v34 = vld [vmem:[%s16634_s3 + $0x128] sm:$0xff]   ;;  %11921 = vmatprep.subr.bf16.mxu1 %v12634_v62 }
 0x18d   : > { %v13525_v27 = vpack.c.bf16 %v4546_v31, %v4546_v31  ;;  %v5185_v35 = vunpack.c.l.b16 %v11737_v37  ;;  %v2830_v44 = vrot.slane %v2829_v59, 2  ;;  %v2836_v21 = vmax.f32 %v2834_v54, %v2835_v46  ;;  %12042 = vmatpush3.bf16.msra.mxu0 %v12635_v34 }
 0x18e   : > { %v4548_v23 = vmax.f32 %v4420_v4, 0.0  ;;  %v16670_v55 = vmov 0  ;;  %v13540_v52 = vsel %vm5293_vm4, %v5325_v5, %v5324_v56  ;;  %v2844_v3 = vrot.slane %v2843_v12, 2 }
 0x18f   : > { %v16671_v55 = vsel %vm13535_vm14, 4294967295, %v16670_v55  ;;  %v2831_v47 = vmax.f32 %v2829_v59, %v2830_v44  ;;  %v2837_v18 = vrot.slane %v2836_v21, 2  ;;  %v5186_v58 = vunpack.c.l.b16 %v13525_v27  ;;  %v12423_v27 = vpop.f32.mrf.mxu0 }
 0x190   : > { %16672 = vst [vmem:[#allocation9_spill] sm:$0xff] %v16671_v55  ;;  %v11837_v53 = vpack.c.bf16 %v4548_v23, %v4548_v23  ;;  %v2850_v25 = vmax.f32 %v2848_v43, %v2849_v8  ;;  %v13543_v16 = vrot.slane %v5185_v35, 3  ;;  %v1424_v41 = vcombine.high %v12422_v61, %v12422_v61 }
 0x191   : > { %v2832_v33 = vrot.slane %v2831_v47, 1  ;;  %v2838_v29 = vmax.f32 %v2836_v21, %v2837_v18  ;;  %v5187_v26 = vunpack.c.l.b16 %v13527_v14  ;;  %v2845_v0 = vmax.f32 %v2843_v12, %v2844_v3 }
 0x192   : > { %v5566_v19 = vsel %vm13535_vm14, %v11837_v53, %v5565_v32  ;;  %v2851_v5 = vrot.slane %v2850_v25, 2  ;;  %v1431_v56 = vrot.slane %v12422_v61, %v13138_v40  ;;  %v1438_v38 = vrot.slane %v1424_v41, %v13138_v40 }
 0x193   : > { %5567 = vst [vmem:[#allocation2 + $0x24] sm:$0x1] %v5566_v19  ;;  %v2833_v17 = vmax.f32 %v2831_v47, %v2832_v33  ;;  %v2839_v22 = vrot.slane %v2838_v29, 1  ;;  %v2846_v39 = vrot.slane %v2845_v0, 1  ;;  %v1390_v57 = vcombine.high %v13545_v49, %v13545_v49 }
 0x194   : > { %v2852_v36 = vmax.f32 %v2850_v25, %v2851_v5  ;;  %v13559_v30 = vrot.slane %v13545_v49, %v13138_v40  ;;  %v1439_v63 = vcombine.high %v1431_v56, %v1431_v56  ;;  %v1440_v15 = vcombine.high %v1438_v38, %v1438_v38 }
 0x195   : > { %v2840_v42 = vmax.f32 %v2838_v29, %v2839_v22  ;;  %v4275_v60 = vmax.f32 %v13270_v1, %v2833_v17  ;;  %v2847_v11 = vmax.f32 %v2845_v0, %v2846_v39  ;;  %v2967_v24 = vsel %vm2462_vm1, %v1431_v56, -inf }
 0x196   : > { %v2853_v54 = vrot.slane %v2852_v36, 1  ;;  %v2981_v31 = vsel %vm2462_vm1, %v1438_v38, -inf  ;;  %v2968_v46 = vrot.slane %v2967_v24, 4  ;;  %v2974_v4 = vsel %vm2462_vm1, %v1439_v63, -inf }
 0x197   : > { %v4276_v37 = vmax.f32 %v13276_v7, %v2840_v42  ;;  %v4409_v59 = vadd.f32 %v13293_v9, %v4275_v60  ;;  %v4277_v1 = vmax.f32 %v13323_v28, %v2847_v11  ;;  %v2975_v51 = vrot.slane %v2974_v4, 4 }
 0x198   : > { %v2854_v48 = vmax.f32 %v2852_v36, %v2853_v54  ;;  %v2982_v43 = vrot.slane %v2981_v31, 4  ;;  %v2969_v21 = vmax.f32 %v2967_v24, %v2968_v46  ;;  %v2988_v61 = vsel %vm2462_vm1, %v1440_v15, -inf }
 0x199   : > { %v4410_v35 = vadd.f32 %v13293_v9, %v4276_v37  ;;  %v4537_v44 = vmax.f32 %v4409_v59, 0.0  ;;  %v4411_v7 = vadd.f32 %v13293_v9, %v4277_v1  ;;  %v2976_v12 = vmax.f32 %v2974_v4, %v2975_v51 }
 0x19a   : > { %v4278_v23 = vmax.f32 %v13469_v6, %v2854_v48  ;;  %v2983_v8 = vmax.f32 %v2981_v31, %v2982_v43  ;;  %v2970_v18 = vrot.slane %v2969_v21, 2  ;;  %v2989_v53 = vrot.slane %v2988_v61, 4 }
 0x19b   : > { %v4538_v32 = vmax.f32 %v4410_v35, 0.0  ;;  %v11729_v47 = vpack.c.bf16 %v4537_v44, %v4537_v44  ;;  %v4539_v3 = vmax.f32 %v4411_v7, 0.0  ;;  %v2977_v25 = vrot.slane %v2976_v12, 2 }
 0x19c   : > { %v4412_v28 = vadd.f32 %v13293_v9, %v4278_v23  ;;  %v2984_v33 = vrot.slane %v2983_v8, 2  ;;  %v2971_v19 = vmax.f32 %v2969_v21, %v2970_v18  ;;  %v2990_v0 = vmax.f32 %v2988_v61, %v2989_v53 }
 0x19d   : > { %v11730_v29 = vpack.c.bf16 %v4538_v32, %v4538_v32  ;;  %v5177_v41 = vunpack.c.l.b16 %v11729_v47  ;;  %v11731_v17 = vpack.c.bf16 %v4539_v3, %v4539_v3  ;;  %v2978_v6 = vmax.f32 %v2976_v12, %v2977_v25 }
 0x19e   : > { %v4540_v5 = vmax.f32 %v4412_v28, 0.0  ;;  %v13579_v22 = vmax.f32 %v2983_v8, %v2984_v33  ;;  %v2972_v50 = vrot.slane %v2971_v19, 1  ;;  %v2991_v39 = vrot.slane %v2990_v0, 2 }
 0x19f   : > { %v5178_v56 = vunpack.c.l.b16 %v11730_v29  ;;  %v5327_v38 = vrot.slane %v5177_v41, 3  ;;  %v5343_v36 = vrot.slane %v5186_v58, 2  ;;  %v5179_v62 = vunpack.c.l.b16 %v11731_v17  ;;  %v12636_v58 = vld [vmem:[%s16634_s3 + $0x8] sm:$0xff]   ;;  %v865_v17 = vpop.f32.mrf.mxu0 }
 0x1a0   : > { %v11732_v9 = vpack.c.bf16 %v4540_v5, %v4540_v5  ;;  %v2979_v34 = vrot.slane %v2978_v6, 1  ;;  %v5345_v42 = vrot.slane %v5187_v26, 1  ;;  %v13587_v15 = vmax.f32 %v2990_v0, %v2991_v39  ;;  %11922 = vmatpush3.bf16.msra.mxu1 %v12636_v58 }
 0x1a1   : > { %v5328_v60 = vsel %vm5296_vm5, %v5327_v38, %v13540_v52  ;;  %v5329_v63 = vrot.slane %v5178_v56, 2  ;;  %v5331_v54 = vrot.slane %v5179_v62, 1  ;;  %v13589_v24 = vmax.f32 %v2971_v19, %v2972_v50 }
 0x1a2   : > { %v5180_v11 = vunpack.c.l.b16 %v11732_v9  ;;  %v2986_v31 = vrot.slane %v13579_v22, 1  ;;  %v13596_v26 = vmax.f32 %v2978_v6, %v2979_v34  ;;  %v1404_v52 = vrot.slane %v1390_v57, %v13138_v40 }
 0x1a3   : > { %v5330_v14 = vsel %vm5299_vm6, %v5329_v63, %v5328_v60  ;;  %v1405_v37 = vcombine.high %v13559_v30, %v13559_v30  ;;  %v2993_v4 = vrot.slane %v13587_v15, 1  ;;  %v2911_v48 = vsel %vm2462_vm1, %v13559_v30, -inf }
 0x1a4   : > { %v5332_v59 = vsel %vm5302_vm7, %v5331_v54, %v5330_v14  ;;  %v5334_v46 = vsel %vm5305_vm8, %v13474_v10, %v5180_v11  ;;  %v1406_v49 = vcombine.high %v1404_v52, %v1404_v52  ;;  %v1441_v57 = vcombine.high %v12423_v27, %v12423_v27  ;;  %v12426_v14 = vpop.f32.mrf.mxu0 }
 0x1a5   : > { %v5336_v1 = vsel %vm5287_vm2, %v13507_v20, %v5334_v46  ;;  %v5514_v51 = vpack.c.b16 %v5332_v59, %v5332_v59  ;;  %v2912_v35 = vrot.slane %v2911_v48, 4  ;;  %v2918_v44 = vsel %vm2462_vm1, %v1405_v37, -inf }
 0x1a6   : > { %v5338_v43 = vsel %vm5290_vm3, %v13487_v45, %v5336_v1  ;;  %v2925_v10 = vsel %vm2462_vm1, %v1404_v52, -inf  ;;  %v2919_v30 = vrot.slane %v2918_v44, 4  ;;  %v2932_v23 = vsel %vm2462_vm1, %v1406_v49, -inf  ;;  %v12637_v52 = vld [vmem:[%s16634_s3 + $0x160] sm:$0xff]  }
 0x1a7   : > { %v5340_v21 = vsel %vm5293_vm4, %v13531_v13, %v5338_v43  ;;  %5560 = vst [vmem:[#allocation2 + $0x1c] sm:$0xf] %v5514_v51  ;;  %v2926_v61 = vrot.slane %v2925_v10, 4  ;;  %v2913_v7 = vmax.f32 %v2911_v48, %v2912_v35  ;;  %v2933_v12 = vrot.slane %v2932_v23, 4  ;;  %12043 = vmatprep.subr.bf16.mxu0 %v12637_v52 }
 0x1a8   : > { %v5342_v20 = vsel %vm5296_vm5, %v13543_v16, %v5340_v21  ;;  %v1448_v45 = vrot.slane %v12423_v27, %v13138_v40  ;;  %v2920_v32 = vmax.f32 %v2918_v44, %v2919_v30  ;;  %v1455_v18 = vrot.slane %v1441_v57, %v13138_v40 }
 0x1a9   : > { %v5344_v8 = vsel %vm5299_vm6, %v5343_v36, %v5342_v20  ;;  %v2927_v47 = vmax.f32 %v2925_v10, %v2926_v61  ;;  %v2914_v53 = vrot.slane %v2913_v7, 2  ;;  %v2934_v28 = vmax.f32 %v2932_v23, %v2933_v12 }
 0x1aa   : > { %v5346_v13 = vsel %vm5302_vm7, %v5345_v42, %v5344_v8  ;;  %v1456_v3 = vcombine.high %v1448_v45, %v1448_v45  ;;  %v2921_v33 = vrot.slane %v2920_v32, 2  ;;  %v1457_v41 = vcombine.high %v1455_v18, %v1455_v18 }
 0x1ab   : > { %v5515_v25 = vpack.c.b16 %v5346_v13, %v5346_v13  ;;  %v2928_v29 = vrot.slane %v2927_v47, 2  ;;  %v2915_v16 = vmax.f32 %v2913_v7, %v2914_v53  ;;  %v2935_v19 = vrot.slane %v2934_v28, 2 }
 0x1ac   : > { %v2995_v0 = vsel %vm2462_vm1, %v1448_v45, -inf  ;;  %v3002_v5 = vsel %vm2462_vm1, %v1456_v3, -inf  ;;  %v2922_v6 = vmax.f32 %v2920_v32, %v2921_v33  ;;  %v3009_v9 = vsel %vm2462_vm1, %v1455_v18, -inf }
 0x1ad   : > { %5561 = vst [vmem:[#allocation2 + $0x20] sm:$0xf] %v5515_v25  ;;  %v2929_v56 = vmax.f32 %v2927_v47, %v2928_v29  ;;  %v2996_v38 = vrot.slane %v2995_v0, 4  ;;  %v3003_v50 = vrot.slane %v3002_v5, 4  ;;  %v2916_v39 = vrot.slane %v2915_v16, 1 }
 0x1ae   : > { %v2936_v36 = vmax.f32 %v2934_v28, %v2935_v19  ;;  %v3016_v62 = vsel %vm2462_vm1, %v1457_v41, -inf  ;;  %v13630_v34 = vmax.f32 %v13579_v22, %v2986_v31  ;;  %v2923_v42 = vrot.slane %v2922_v6, 1  ;;  %v12638_v31 = vld [vmem:[%s16634_s3 + $0x40] sm:$0xff]  }
 0x1af   : > { %v2997_v60 = vmax.f32 %v2995_v0, %v2996_v38  ;;  %v3004_v63 = vmax.f32 %v3002_v5, %v3003_v50  ;;  %v13633_v11 = vmax.f32 %v13587_v15, %v2993_v4  ;;  %v2930_v54 = vrot.slane %v2929_v56, 1  ;;  %v12639_v15 = vld [vmem:[%s16634_s3 + $0x120] sm:$0xff]   ;;  %11923 = vmatprep.subr.bf16.mxu1 %v12638_v31 }
 0x1b0   : > { %v3010_v27 = vrot.slane %v3009_v9, 4  ;;  %v3017_v58 = vrot.slane %v3016_v62, 4  ;;  %v13638_v37 = vmax.f32 %v2915_v16, %v2916_v39  ;;  %v2937_v59 = vrot.slane %v2936_v36, 1  ;;  %12044 = vmatpush3.bf16.msra.mxu0 %v12639_v15 }
 0x1b1   : > { %v2998_v46 = vrot.slane %v2997_v60, 2  ;;  %v3005_v22 = vrot.slane %v3004_v63, 2  ;;  %v13646_v4 = vmax.f32 %v2922_v6, %v2923_v42  ;;  %v1407_v51 = vcombine.high %v865_v17, %v865_v17 }
 0x1b2   : > { %v3011_v48 = vmax.f32 %v3009_v9, %v3010_v27  ;;  %v3018_v1 = vmax.f32 %v3016_v62, %v3017_v58  ;;  %v1414_v43 = vrot.slane %v865_v17, %v13138_v40  ;;  %v1492_v35 = vcombine.high %v12426_v14, %v12426_v14 }
 0x1b3   : > { %v2999_v49 = vmax.f32 %v2997_v60, %v2998_v46  ;;  %v3006_v57 = vmax.f32 %v3004_v63, %v3005_v22  ;;  %v1421_v21 = vrot.slane %v1407_v51, %v13138_v40  ;;  %v1499_v30 = vrot.slane %v12426_v14, %v13138_v40  ;;  %v12640_v46 = vld [vmem:[%s16634_s3] sm:$0xff]  }
 0x1b4   : > { %v3012_v44 = vrot.slane %v3011_v48, 2  ;;  %v3019_v10 = vrot.slane %v3018_v1, 2  ;;  %v1422_v20 = vcombine.high %v1414_v43, %v1414_v43  ;;  %v2939_v7 = vsel %vm2462_vm1, %v1414_v43, -inf  ;;  %11924 = vmatpush3.bf16.msra.mxu1 %v12640_v46 }
 0x1b5   : > { %v3000_v61 = vrot.slane %v2999_v49, 1  ;;  %v3007_v23 = vrot.slane %v3006_v57, 1  ;;  %v1423_v8 = vcombine.high %v1421_v21, %v1421_v21  ;;  %v2940_v32 = vrot.slane %v2939_v7, 4 }
 0x1b6   : > { %v3013_v12 = vmax.f32 %v3011_v48, %v3012_v44  ;;  %v3020_v45 = vmax.f32 %v3018_v1, %v3019_v10  ;;  %v13652_v47 = vmax.f32 %v2929_v56, %v2930_v54  ;;  %v13654_v18 = vmax.f32 %v2936_v36, %v2937_v59  ;;  %v878_v1 = vpop.f32.mrf.mxu0 }
 0x1b7   : > { %v2946_v13 = vsel %vm2462_vm1, %v1422_v20, -inf  ;;  %v2953_v53 = vsel %vm2462_vm1, %v1421_v21, -inf  ;;  %v13658_v28 = vmax.f32 %v2999_v49, %v3000_v61  ;;  %v13660_v3 = vmax.f32 %v3006_v57, %v3007_v23 }
 0x1b8   : > { %v2941_v25 = vmax.f32 %v2939_v7, %v2940_v32  ;;  %v2947_v33 = vrot.slane %v2946_v13, 4  ;;  %v2954_v29 = vrot.slane %v2953_v53, 4  ;;  %v2960_v41 = vsel %vm2462_vm1, %v1423_v8, -inf }
 0x1b9   : > { %v1506_v16 = vrot.slane %v1492_v35, %v13138_v40  ;;  %v1507_v19 = vcombine.high %v1499_v30, %v1499_v30  ;;  %v3014_v0 = vrot.slane %v3013_v12, 1  ;;  %v3021_v5 = vrot.slane %v3020_v45, 1 }
 0x1ba   : > { %v2942_v17 = vrot.slane %v2941_v25, 2  ;;  %v2948_v6 = vmax.f32 %v2946_v13, %v2947_v33  ;;  %v2955_v56 = vmax.f32 %v2953_v53, %v2954_v29  ;;  %v2961_v38 = vrot.slane %v2960_v41, 4 }
 0x1bb   : > { %v1508_v50 = vcombine.high %v1506_v16, %v1506_v16  ;;  %v3079_v39 = vsel %vm2462_vm1, %v1499_v30, -inf  ;;  %v3086_v42 = vsel %vm2462_vm1, %v1507_v19, -inf  ;;  %v3093_v27 = vsel %vm2462_vm1, %v1506_v16, -inf }
 0x1bc   : > { %v2943_v36 = vmax.f32 %v2941_v25, %v2942_v17  ;;  %v2949_v9 = vrot.slane %v2948_v6, 2  ;;  %v3080_v62 = vrot.slane %v3079_v39, 4  ;;  %v2956_v60 = vrot.slane %v2955_v56, 2 }
 0x1bd   : > { %v2962_v63 = vmax.f32 %v2960_v41, %v2961_v38  ;;  %v3087_v54 = vrot.slane %v3086_v42, 4  ;;  %v3094_v59 = vrot.slane %v3093_v27, 4  ;;  %v3100_v48 = vsel %vm2462_vm1, %v1508_v50, -inf }
 0x1be   : > { %v2944_v58 = vrot.slane %v2943_v36, 1  ;;  %v2950_v14 = vmax.f32 %v2948_v6, %v2949_v9  ;;  %v3081_v52 = vmax.f32 %v3079_v39, %v3080_v62  ;;  %v2957_v22 = vmax.f32 %v2955_v56, %v2956_v60 }
 0x1bf   : > { %v2963_v31 = vrot.slane %v2962_v63, 2  ;;  %v3088_v15 = vmax.f32 %v3086_v42, %v3087_v54  ;;  %v13671_v51 = vmax.f32 %v3013_v12, %v3014_v0  ;;  %v3095_v43 = vmax.f32 %v3093_v27, %v3094_v59  ;;  %v12427_v12 = vpop.f32.mrf.mxu0 }
 0x1c0   : > { %v2951_v49 = vrot.slane %v2950_v14, 1  ;;  %v3082_v57 = vrot.slane %v3081_v52, 2  ;;  %v2958_v35 = vrot.slane %v2957_v22, 1  ;;  %v3101_v21 = vrot.slane %v3100_v48, 4 }
 0x1c1   : > { %v2964_v44 = vmax.f32 %v2962_v63, %v2963_v31  ;;  %v3089_v10 = vrot.slane %v3088_v15, 2  ;;  %v13673_v30 = vmax.f32 %v3020_v45, %v3021_v5  ;;  %v3096_v23 = vrot.slane %v3095_v43, 2 }
 0x1c2   : > { %v3083_v61 = vmax.f32 %v3081_v52, %v3082_v57  ;;  %v1458_v20 = vcombine.high %v878_v1, %v878_v1  ;;  %v13675_v7 = vmax.f32 %v2943_v36, %v2944_v58  ;;  %v3102_v13 = vmax.f32 %v3100_v48, %v3101_v21 }
 0x1c3   : > { %v2965_v8 = vrot.slane %v2964_v44, 1  ;;  %v3090_v32 = vmax.f32 %v3088_v15, %v3089_v10  ;;  %v3097_v25 = vmax.f32 %v3095_v43, %v3096_v23  ;;  %v1465_v33 = vrot.slane %v878_v1, %v13138_v40 }
 0x1c4   : > { %v3084_v53 = vrot.slane %v3083_v61, 1  ;;  %v1472_v29 = vrot.slane %v1458_v20, %v13138_v40  ;;  %v13679_v41 = vmax.f32 %v2950_v14, %v2951_v49  ;;  %v13681_v16 = vmax.f32 %v2957_v22, %v2958_v35 }
 0x1c5   : > { %v3091_v45 = vrot.slane %v3090_v32, 1  ;;  %v3103_v19 = vrot.slane %v3102_v13, 2  ;;  %v13683_v0 = vmax.f32 %v2964_v44, %v2965_v8  ;;  %v1473_v5 = vcombine.high %v1465_v33, %v1465_v33  ;;  %v881_v8 = vpop.f32.mrf.mxu0 }
 0x1c6   : > { %v1474_v17 = vcombine.high %v1472_v29, %v1472_v29  ;;  %v1509_v6 = vcombine.high %v12427_v12, %v12427_v12  ;;  %v13685_v56 = vmax.f32 %v3083_v61, %v3084_v53  ;;  %v3023_v50 = vsel %vm2462_vm1, %v1465_v33, -inf }
 0x1c7   : > { %v3104_v38 = vmax.f32 %v3102_v13, %v3103_v19  ;;  %v3037_v39 = vsel %vm2462_vm1, %v1472_v29, -inf  ;;  %v3098_v36 = vrot.slane %v3097_v25, 1  ;;  %v3024_v9 = vrot.slane %v3023_v50, 4 }
 0x1c8   : > { %v3030_v62 = vsel %vm2462_vm1, %v1473_v5, -inf  ;;  %v3038_v42 = vrot.slane %v3037_v39, 4  ;;  %v13690_v60 = vmax.f32 %v3090_v32, %v3091_v45  ;;  %v3044_v54 = vsel %vm2462_vm1, %v1474_v17, -inf }
 0x1c9   : > { %v3031_v63 = vrot.slane %v3030_v62, 4  ;;  %v1516_v27 = vrot.slane %v12427_v12, %v13138_v40  ;;  %v3025_v58 = vmax.f32 %v3023_v50, %v3024_v9  ;;  %v3045_v52 = vrot.slane %v3044_v54, 4 }
 0x1ca   : > { %v3039_v14 = vmax.f32 %v3037_v39, %v3038_v42  ;;  %v1523_v59 = vrot.slane %v1509_v6, %v13138_v40  ;;  %v3105_v46 = vrot.slane %v3104_v38, 1  ;;  %v13699_v5 = vmax.f32 %v3097_v25, %v3098_v36 }
 0x1cb   : > { %v3032_v22 = vmax.f32 %v3030_v62, %v3031_v63  ;;  %v1524_v31 = vcombine.high %v1516_v27, %v1516_v27  ;;  %v3107_v15 = vsel %vm2462_vm1, %v1516_v27, -inf  ;;  %v3026_v48 = vrot.slane %v3025_v58, 2  ;;  %v12430_v63 = vpop.f32.mrf.mxu0 }
 0x1cc   : > { %v3040_v1 = vrot.slane %v3039_v14, 2  ;;  %v3046_v49 = vmax.f32 %v3044_v54, %v3045_v52  ;;  %v1525_v57 = vcombine.high %v1523_v59, %v1523_v59  ;;  %v3108_v35 = vrot.slane %v3107_v15, 4 }
 0x1cd   : > { %v3033_v43 = vrot.slane %v3032_v22, 2  ;;  %v3114_v44 = vsel %vm2462_vm1, %v1524_v31, -inf  ;;  %v3121_v10 = vsel %vm2462_vm1, %v1523_v59, -inf  ;;  %v3027_v21 = vmax.f32 %v3025_v58, %v3026_v48 }
 0x1ce   : > { %v3041_v61 = vmax.f32 %v3039_v14, %v3040_v1  ;;  %v3047_v23 = vrot.slane %v3046_v49, 2  ;;  %v3115_v20 = vrot.slane %v3114_v44, 4  ;;  %v3109_v13 = vmax.f32 %v3107_v15, %v3108_v35 }
 0x1cf   : > { %v3034_v32 = vmax.f32 %v3032_v22, %v3033_v43  ;;  %v3122_v12 = vrot.slane %v3121_v10, 4  ;;  %v3128_v53 = vsel %vm2462_vm1, %v1525_v57, -inf  ;;  %v3028_v33 = vrot.slane %v3027_v21, 1 }
 0x1d0   : > { %v3042_v29 = vrot.slane %v3041_v61, 1  ;;  %v3048_v45 = vmax.f32 %v3046_v49, %v3047_v23  ;;  %v3116_v19 = vmax.f32 %v3114_v44, %v3115_v20  ;;  %v3110_v17 = vrot.slane %v3109_v13, 2 }
 0x1d1   : > { %v3123_v6 = vmax.f32 %v3121_v10, %v3122_v12  ;;  %v3129_v50 = vrot.slane %v3128_v53, 4  ;;  %v13701_v39 = vmax.f32 %v3104_v38, %v3105_v46  ;;  %v13703_v9 = vmax.f32 %v3027_v21, %v3028_v33 }
 0x1d2   : > { %v3035_v62 = vrot.slane %v3034_v32, 1  ;;  %v3117_v42 = vrot.slane %v3116_v19, 2  ;;  %v3049_v54 = vrot.slane %v3048_v45, 1  ;;  %v3111_v27 = vmax.f32 %v3109_v13, %v3110_v17 }
 0x1d3   : > { %v3124_v58 = vrot.slane %v3123_v6, 2  ;;  %v3130_v14 = vmax.f32 %v3128_v53, %v3129_v50  ;;  %v13705_v52 = vmax.f32 %v3041_v61, %v3042_v29  ;;  %v1475_v22 = vcombine.high %v881_v8, %v881_v8 }
 0x1d4   : > { %v3118_v59 = vmax.f32 %v3116_v19, %v3117_v42  ;;  %v1482_v25 = vrot.slane %v881_v8, %v13138_v40  ;;  %v3112_v36 = vrot.slane %v3111_v27, 1  ;;  %v1560_v38 = vcombine.high %v12430_v63, %v12430_v63 }
 0x1d5   : > { %v3125_v31 = vmax.f32 %v3123_v6, %v3124_v58  ;;  %v3131_v15 = vrot.slane %v3130_v14, 2  ;;  %v1489_v48 = vrot.slane %v1475_v22, %v13138_v40  ;;  %v13710_v57 = vmax.f32 %v3034_v32, %v3035_v62 }
 0x1d6   : > { %v3119_v46 = vrot.slane %v3118_v59, 1  ;;  %v1490_v1 = vcombine.high %v1482_v25, %v1482_v25  ;;  %v3051_v49 = vsel %vm2462_vm1, %v1482_v25, -inf  ;;  %v13712_v43 = vmax.f32 %v3048_v45, %v3049_v54 }
 0x1d7   : > { %v3132_v35 = vmax.f32 %v3130_v14, %v3131_v15  ;;  %v3052_v44 = vrot.slane %v3051_v49, 4  ;;  %v13714_v10 = vmax.f32 %v3111_v27, %v3112_v36  ;;  %v1491_v21 = vcombine.high %v1489_v48, %v1489_v48 }
 0x1d8   : > { %v3058_v61 = vsel %vm2462_vm1, %v1490_v1, -inf  ;;  %v3065_v23 = vsel %vm2462_vm1, %v1489_v48, -inf  ;;  %v13718_v20 = vmax.f32 %v3118_v59, %v3119_v46  ;;  %v3126_v8 = vrot.slane %v3125_v31, 1 }
 0x1d9   : > { %v3053_v13 = vmax.f32 %v3051_v49, %v3052_v44  ;;  %v3059_v12 = vrot.slane %v3058_v61, 4  ;;  %v3066_v53 = vrot.slane %v3065_v23, 4  ;;  %v3072_v32 = vsel %vm2462_vm1, %v1491_v21, -inf }
 0x1da   : > { %v1567_v33 = vrot.slane %v12430_v63, %v13138_v40  ;;  %v1574_v29 = vrot.slane %v1560_v38, %v13138_v40  ;;  %v3133_v45 = vrot.slane %v3132_v35, 1  ;;  %v3073_v6 = vrot.slane %v3072_v32, 4 }
 0x1db   : > { %v3054_v19 = vrot.slane %v3053_v13, 2  ;;  %v3060_v17 = vmax.f32 %v3058_v61, %v3059_v12  ;;  %v3067_v50 = vmax.f32 %v3065_v23, %v3066_v53  ;;  %v894_v61 = vpop.f32.mrf.mxu0  ;;  %v13727_v23 = vmax.f32 %v3125_v31, %v3126_v8 }
 0x1dc   : > { %v1575_v62 = vcombine.high %v1567_v33, %v1567_v33  ;;  %v1576_v42 = vcombine.high %v1574_v29, %v1574_v29  ;;  %v3191_v54 = vsel %vm2462_vm1, %v1567_v33, -inf  ;;  %v3074_v14 = vmax.f32 %v3072_v32, %v3073_v6 }
 0x1dd   : > { %v3055_v27 = vmax.f32 %v3053_v13, %v3054_v19  ;;  %v3061_v58 = vrot.slane %v3060_v17, 2  ;;  %v3192_v59 = vrot.slane %v3191_v54, 4  ;;  %v3068_v22 = vrot.slane %v3067_v50, 2 }
 0x1de   : > { %v3198_v25 = vsel %vm2462_vm1, %v1575_v62, -inf  ;;  %v3205_v63 = vsel %vm2462_vm1, %v1574_v29, -inf  ;;  %v3212_v36 = vsel %vm2462_vm1, %v1576_v42, -inf  ;;  %v3075_v46 = vrot.slane %v3074_v14, 2 }
 0x1df   : > { %v3056_v15 = vrot.slane %v3055_v27, 1  ;;  %v3062_v38 = vmax.f32 %v3060_v17, %v3061_v58  ;;  %v3193_v48 = vmax.f32 %v3191_v54, %v3192_v59  ;;  %v3069_v1 = vmax.f32 %v3067_v50, %v3068_v22 }
 0x1e0   : > { %v3199_v49 = vrot.slane %v3198_v25, 4  ;;  %v3206_v44 = vrot.slane %v3205_v63, 4  ;;  %v3213_v21 = vrot.slane %v3212_v36, 4  ;;  %v13729_v12 = vmax.f32 %v3074_v14, %v3075_v46 }
 0x1e1   : > { %v3063_v13 = vrot.slane %v3062_v38, 1  ;;  %v3194_v53 = vrot.slane %v3193_v48, 2  ;;  %v3070_v32 = vrot.slane %v3069_v1, 1  ;;  %v13731_v6 = vmax.f32 %v3132_v35, %v3133_v45 }
 0x1e2   : > { %v3200_v33 = vmax.f32 %v3198_v25, %v3199_v49  ;;  %v3207_v29 = vmax.f32 %v3205_v63, %v3206_v44  ;;  %v3214_v19 = vmax.f32 %v3212_v36, %v3213_v21  ;;  %v13733_v17 = vmax.f32 %v3055_v27, %v3056_v15 }
 0x1e3   : > { %v3195_v62 = vmax.f32 %v3193_v48, %v3194_v53  ;;  %v1526_v50 = vcombine.high %v894_v61, %v894_v61  ;;  %v13735_v42 = vmax.f32 %v3062_v38, %v3063_v13  ;;  %v1533_v59 = vrot.slane %v894_v61, %v13138_v40 }
 0x1e4   : > { %v3201_v54 = vrot.slane %v3200_v33, 2  ;;  %v3208_v58 = vrot.slane %v3207_v29, 2  ;;  %v3215_v31 = vrot.slane %v3214_v19, 2  ;;  %v13740_v25 = vmax.f32 %v3069_v1, %v3070_v32 }
 0x1e5   : > { %v3196_v14 = vrot.slane %v3195_v62, 1  ;;  %v1540_v22 = vrot.slane %v1526_v50, %v13138_v40  ;;  %v1541_v36 = vcombine.high %v1533_v59, %v1533_v59  ;;  %v3135_v38 = vsel %vm2462_vm1, %v1533_v59, -inf }
 0x1e6   : > { %v3202_v35 = vmax.f32 %v3200_v33, %v3201_v54  ;;  %v3209_v45 = vmax.f32 %v3207_v29, %v3208_v58  ;;  %v3216_v27 = vmax.f32 %v3214_v19, %v3215_v31  ;;  %v3136_v44 = vrot.slane %v3135_v38, 4  ;;  %v12641_v19 = vld [vmem:[%s16634_s3 + $0x158] sm:$0xff]  }
 0x1e7   : > { %v3197_v63 = vmax.f32 %v3195_v62, %v3196_v14  ;;  %v1542_v15 = vcombine.high %v1540_v22, %v1540_v22  ;;  %v3142_v61 = vsel %vm2462_vm1, %v1541_v36, -inf  ;;  %v3149_v13 = vsel %vm2462_vm1, %v1540_v22, -inf  ;;  %v13753_v62 = vld [vmem:[%s16633_s2] ss:$0 sm:$0xff]  ;;  %v12643_v31 = vld [vmem:[%s16634_s3 + $0x118] sm:$0xff]   ;;  %12045 = vmatprep.subr.bf16.mxu0 %v12641_v19 }
 0x1e8   : > { %v3203_v46 = vrot.slane %v3202_v35, 1  ;;  %v3210_v48 = vrot.slane %v3209_v45, 1  ;;  %v3217_v49 = vrot.slane %v3216_v27, 1  ;;  %v3137_v29 = vmax.f32 %v3135_v38, %v3136_v44  ;;  %12046 = vmatpush3.bf16.msra.mxu0 %v12643_v31 }
 0x1e9   : > { %v4295_v21 = vmax.f32 %v13589_v24, %v3197_v63  ;;  %v3156_v1 = vsel %vm2462_vm1, %v1542_v15, -inf  ;;  %v3143_v50 = vrot.slane %v3142_v61, 4  ;;  %v3150_v54 = vrot.slane %v3149_v13, 4 }
 0x1ea   : > { %v3204_v53 = vmax.f32 %v3202_v35, %v3203_v46  ;;  %v3211_v32 = vmax.f32 %v3209_v45, %v3210_v48  ;;  %v3218_v33 = vmax.f32 %v3216_v27, %v3217_v49  ;;  %v3157_v58 = vrot.slane %v3156_v1, 4 }
 0x1eb   : > { %v4429_v24 = vadd.f32 %v13753_v62, %v4295_v21  ;;  %v3138_v35 = vrot.slane %v3137_v29, 2  ;;  %v3144_v27 = vmax.f32 %v3142_v61, %v3143_v50  ;;  %v3151_v63 = vmax.f32 %v3149_v13, %v3150_v54  ;;  %v12645_v21 = vld [vmem:[%s16634_s3 + $0x110] sm:$0xff]  }
 0x1ec   : > { %v4296_v14 = vmax.f32 %v13596_v26, %v3204_v53  ;;  %v4297_v59 = vmax.f32 %v13630_v34, %v3211_v32  ;;  %v4298_v22 = vmax.f32 %v13633_v11, %v3218_v33  ;;  %v3158_v36 = vmax.f32 %v3156_v1, %v3157_v58  ;;  %v12644_v26 = vld [vmem:[%s16634_s3 + $0x150] sm:$0xff]   ;;  %v12431_v32 = vpop.f32.mrf.mxu0 }
 0x1ed   : > { %v4557_v45 = vmax.f32 %v4429_v24, 0.0  ;;  %v3139_v48 = vmax.f32 %v3137_v29, %v3138_v35  ;;  %v3145_v11 = vrot.slane %v3144_v27, 2  ;;  %v3152_v49 = vrot.slane %v3151_v63, 2  ;;  %12047 = vmatprep.subr.bf16.mxu0 %v12644_v26 }
 0x1ee   : > { %v4430_v15 = vadd.f32 %v13753_v62, %v4296_v14  ;;  %v4431_v38 = vadd.f32 %v13753_v62, %v4297_v59  ;;  %v4432_v46 = vadd.f32 %v13753_v62, %v4298_v22  ;;  %v3159_v44 = vrot.slane %v3158_v36, 2  ;;  %12048 = vmatpush3.bf16.msra.mxu0 %v12645_v21 }
 0x1ef   : > { %v11749_v34 = vpack.c.bf16 %v4557_v45, %v4557_v45  ;;  %v3140_v53 = vrot.slane %v3139_v48, 1  ;;  %v3146_v29 = vmax.f32 %v3144_v27, %v3145_v11  ;;  %v3153_v19 = vmax.f32 %v3151_v63, %v3152_v49 }
 0x1f0   : > { %v4558_v61 = vmax.f32 %v4430_v15, 0.0  ;;  %v4559_v13 = vmax.f32 %v4431_v38, 0.0  ;;  %v4560_v1 = vmax.f32 %v4432_v46, 0.0  ;;  %v3160_v24 = vmax.f32 %v3158_v36, %v3159_v44 }
 0x1f1   : > { %v5197_v33 = vunpack.c.l.b16 %v11749_v34  ;;  %v3141_v31 = vmax.f32 %v3139_v48, %v3140_v53  ;;  %v3147_v14 = vrot.slane %v3146_v29, 1  ;;  %v3154_v59 = vrot.slane %v3153_v19, 1  ;;  %v897_v34 = vpop.f32.mrf.mxu0 }
 0x1f2   : > { %v11750_v50 = vpack.c.bf16 %v4558_v61, %v4558_v61  ;;  %v11751_v54 = vpack.c.bf16 %v4559_v13, %v4559_v13  ;;  %v13771_v58 = vpack.c.bf16 %v4560_v1, %v4560_v1  ;;  %v3161_v22 = vrot.slane %v3160_v24, 1 }
 0x1f3   : > { %v1577_v35 = vcombine.high %v12431_v32, %v12431_v32  ;;  %v13773_v38 = vrot.slane %v5197_v33, 7  ;;  %v4287_v46 = vmax.f32 %v13638_v37, %v3141_v31  ;;  %v3148_v26 = vmax.f32 %v3146_v29, %v3147_v14 }
 0x1f4   : > { %v5198_v45 = vunpack.c.l.b16 %v11750_v50  ;;  %v5199_v15 = vunpack.c.l.b16 %v11751_v54  ;;  %v3155_v27 = vmax.f32 %v3153_v19, %v3154_v59  ;;  %v3162_v63 = vmax.f32 %v3160_v24, %v3161_v22 }
 0x1f5   : > { %v1584_v36 = vrot.slane %v12431_v32, %v13138_v40  ;;  %v5200_v11 = vunpack.c.l.b16 %v13771_v58  ;;  %v4421_v44 = vadd.f32 %v13753_v62, %v4287_v46  ;;  %v4288_v21 = vmax.f32 %v13646_v4, %v3148_v26 }
 0x1f6   : > { %v13778_v49 = vrot.slane %v5198_v45, 6  ;;  %v13780_v48 = vrot.slane %v5199_v15, 5  ;;  %v4289_v61 = vmax.f32 %v13652_v47, %v3155_v27  ;;  %v4290_v37 = vmax.f32 %v13654_v18, %v3162_v63 }
 0x1f7   : > { %v1591_v13 = vrot.slane %v1577_v35, %v13138_v40  ;;  %v4549_v1 = vmax.f32 %v4421_v44, 0.0  ;;  %v1592_v53 = vcombine.high %v1584_v36, %v1584_v36  ;;  %v3219_v32 = vsel %vm2462_vm1, %v1584_v36, -inf }
 0x1f8   : > { %v1543_v33 = vcombine.high %v897_v34, %v897_v34  ;;  %v4422_v29 = vadd.f32 %v13753_v62, %v4288_v21  ;;  %v4423_v19 = vadd.f32 %v13753_v62, %v4289_v61  ;;  %v4424_v24 = vadd.f32 %v13753_v62, %v4290_v37 }
 0x1f9   : > { %v1593_v50 = vcombine.high %v1591_v13, %v1591_v13  ;;  %v11741_v54 = vpack.c.bf16 %v4549_v1, %v4549_v1  ;;  %v3220_v4 = vrot.slane %v3219_v32, 4  ;;  %v3226_v47 = vsel %vm2462_vm1, %v1592_v53, -inf }
 0x1fa   : > { %v3233_v18 = vsel %vm2462_vm1, %v1591_v13, -inf  ;;  %v4550_v31 = vmax.f32 %v4422_v29, 0.0  ;;  %v4551_v14 = vmax.f32 %v4423_v19, 0.0  ;;  %v4552_v59 = vmax.f32 %v4424_v24, 0.0 }
 0x1fb   : > { %v3227_v22 = vrot.slane %v3226_v47, 4  ;;  %v5189_v35 = vunpack.c.l.b16 %v11741_v54  ;;  %v3221_v45 = vmax.f32 %v3219_v32, %v3220_v4  ;;  %v3234_v15 = vrot.slane %v3233_v18, 4 }
 0x1fc   : > { %v3240_v46 = vsel %vm2462_vm1, %v1593_v50, -inf  ;;  %v11742_v26 = vpack.c.bf16 %v4550_v31, %v4550_v31  ;;  %v11743_v27 = vpack.c.bf16 %v4551_v14, %v4551_v14  ;;  %v11744_v63 = vpack.c.bf16 %v4552_v59, %v4552_v59 }
 0x1fd   : > { %v3228_v36 = vmax.f32 %v3226_v47, %v3227_v22  ;;  %v5347_v44 = vrot.slane %v5189_v35, 7  ;;  %v3222_v21 = vrot.slane %v3221_v45, 2  ;;  %v3235_v61 = vmax.f32 %v3233_v18, %v3234_v15 }
 0x1fe   : > { %v3241_v37 = vrot.slane %v3240_v46, 4  ;;  %v5190_v1 = vunpack.c.l.b16 %v11742_v26  ;;  %v5191_v53 = vunpack.c.l.b16 %v11743_v27  ;;  %v5192_v13 = vunpack.c.l.b16 %v11744_v63 }
 0x1ff   : > { %v3229_v29 = vrot.slane %v3228_v36, 2  ;;  %v3223_v19 = vmax.f32 %v3221_v45, %v3222_v21  ;;  %v3236_v24 = vrot.slane %v3235_v61, 2  ;;  %v1550_v32 = vrot.slane %v897_v34, %v13138_v40 }
 0x200   : > { %v3242_v8 = vmax.f32 %v3240_v46, %v3241_v37  ;;  %v5348_v54 = vrot.slane %v5190_v1, 6  ;;  %v5350_v4 = vrot.slane %v5191_v53, 5  ;;  %v13795_v50 = vrot.slane %v5192_v13, 4 }
 0x201   : > { %v3230_v31 = vmax.f32 %v3228_v36, %v3229_v29  ;;  %v3224_v14 = vrot.slane %v3223_v19, 1  ;;  %v3237_v47 = vmax.f32 %v3235_v61, %v3236_v24  ;;  %v1557_v18 = vrot.slane %v1543_v33, %v13138_v40 }
 0x202   : > { %v3243_v59 = vrot.slane %v3242_v8, 2  ;;  %v5349_v22 = vsel %vm5287_vm2, %v5348_v54, %v5347_v44  ;;  %v1558_v15 = vcombine.high %v1550_v32, %v1550_v32  ;;  %v3163_v45 = vsel %vm2462_vm1, %v1550_v32, -inf }
 0x203   : > { %v3231_v35 = vrot.slane %v3230_v31, 1  ;;  %v13801_v46 = vsel %vm5290_vm3, %v5350_v4, %v5349_v22  ;;  %v3225_v34 = vmax.f32 %v3223_v19, %v3224_v14  ;;  %v3238_v26 = vrot.slane %v3237_v47, 1 }
 0x204   : > { %v3244_v27 = vmax.f32 %v3242_v8, %v3243_v59  ;;  %v1559_v21 = vcombine.high %v1557_v18, %v1557_v18  ;;  %v3164_v36 = vrot.slane %v3163_v45, 4  ;;  %v3170_v61 = vsel %vm2462_vm1, %v1558_v15, -inf }
 0x205   : > { %v3232_v63 = vmax.f32 %v3230_v31, %v3231_v35  ;;  %v3239_v37 = vmax.f32 %v3237_v47, %v3238_v26  ;;  %v4299_v33 = vmax.f32 %v13658_v28, %v3225_v34  ;;  %v3171_v44 = vrot.slane %v3170_v61, 4 }
 0x206   : > { %v3245_v1 = vrot.slane %v3244_v27, 1  ;;  %v3165_v13 = vmax.f32 %v3163_v45, %v3164_v36  ;;  %v3177_v29 = vsel %vm2462_vm1, %v1557_v18, -inf  ;;  %v3184_v24 = vsel %vm2462_vm1, %v1559_v21, -inf }
 0x207   : > { %v4300_v53 = vmax.f32 %v13660_v3, %v3232_v63  ;;  %v4301_v8 = vmax.f32 %v13671_v51, %v3239_v37  ;;  %v4433_v32 = vadd.f32 %v13753_v62, %v4299_v33  ;;  %v3172_v54 = vmax.f32 %v3170_v61, %v3171_v44  ;;  %v12434_v37 = vpop.f32.mrf.mxu0 }
 0x208   : > { %v3246_v19 = vmax.f32 %v3244_v27, %v3245_v1  ;;  %v3166_v31 = vrot.slane %v3165_v13, 2  ;;  %v3178_v14 = vrot.slane %v3177_v29, 4  ;;  %v3185_v47 = vrot.slane %v3184_v24, 4 }
 0x209   : > { %v4434_v4 = vadd.f32 %v13753_v62, %v4300_v53  ;;  %v4435_v3 = vadd.f32 %v13753_v62, %v4301_v8  ;;  %v4561_v59 = vmax.f32 %v4433_v32, 0.0  ;;  %v3173_v22 = vrot.slane %v3172_v54, 2 }
 0x20a   : > { %v4302_v28 = vmax.f32 %v13673_v30, %v3246_v19  ;;  %v3167_v35 = vmax.f32 %v3165_v13, %v3166_v31  ;;  %v3179_v15 = vmax.f32 %v3177_v29, %v3178_v14  ;;  %v3186_v45 = vmax.f32 %v3184_v24, %v3185_v47  ;;  %v12646_v29 = vld [vmem:[%s16634_s3 + $0x148] sm:$0xff]  }
 0x20b   : > { %v4562_v18 = vmax.f32 %v4434_v4, 0.0  ;;  %v4563_v34 = vmax.f32 %v4435_v3, 0.0  ;;  %v11753_v26 = vpack.c.bf16 %v4561_v59, %v4561_v59  ;;  %v3174_v27 = vmax.f32 %v3172_v54, %v3173_v22  ;;  %v12648_v31 = vld [vmem:[%s16634_s3 + $0x108] sm:$0xff]   ;;  %v910_v59 = vpop.f32.mrf.mxu0  ;;  %12049 = vmatprep.subr.bf16.mxu0 %v12646_v29 }
 0x20c   : > { %v4436_v51 = vadd.f32 %v13753_v62, %v4302_v28  ;;  %v3168_v21 = vrot.slane %v3167_v35, 1  ;;  %v3180_v36 = vrot.slane %v3179_v15, 2  ;;  %v3187_v61 = vrot.slane %v3186_v45, 2  ;;  %12050 = vmatpush3.bf16.msra.mxu0 %v12648_v31 }
 0x20d   : > { %v11754_v63 = vpack.c.bf16 %v4562_v18, %v4562_v18  ;;  %v11755_v30 = vpack.c.bf16 %v4563_v34, %v4563_v34  ;;  %v5201_v33 = vunpack.c.l.b16 %v11753_v26  ;;  %v3175_v44 = vrot.slane %v3174_v27, 1 }
 0x20e   : > { %v4564_v1 = vmax.f32 %v4436_v51, 0.0  ;;  %v3169_v19 = vmax.f32 %v3167_v35, %v3168_v21  ;;  %v3181_v8 = vmax.f32 %v3179_v15, %v3180_v36  ;;  %v3188_v13 = vmax.f32 %v3186_v45, %v3187_v61 }
 0x20f   : > { %v5202_v53 = vunpack.c.l.b16 %v11754_v63  ;;  %v13819_v24 = vrot.slane %v5200_v11, 4  ;;  %v5203_v54 = vunpack.c.l.b16 %v11755_v30  ;;  %v3176_v4 = vmax.f32 %v3174_v27, %v3175_v44 }
 0x210   : > { %v13821_v32 = vpack.c.bf16 %v4564_v1, %v4564_v1  ;;  %v13826_v14 = vrot.slane %v5201_v33, 3  ;;  %v3182_v47 = vrot.slane %v3181_v8, 1  ;;  %v3189_v28 = vrot.slane %v3188_v13, 1 }
 0x211   : > { %v4291_v3 = vmax.f32 %v13675_v7, %v3169_v19  ;;  %v13829_v22 = vrot.slane %v5202_v53, 2  ;;  %v13831_v58 = vrot.slane %v5203_v54, 1  ;;  %v4292_v11 = vmax.f32 %v13679_v41, %v3176_v4  ;;  %v12649_v7 = vld [vmem:[%s16634_s3 + $0x140] sm:$0xff]  }
 0x212   : > { %v5353_v18 = vsel %vm5293_vm4, %v13795_v50, %v13801_v46  ;;  %v3183_v35 = vmax.f32 %v3181_v8, %v3182_v47  ;;  %v3190_v15 = vmax.f32 %v3188_v13, %v3189_v28  ;;  %v1628_v51 = vcombine.high %v12434_v37, %v12434_v37  ;;  %v12650_v50 = vld [vmem:[%s16634_s3 + $0x100] sm:$0xff]   ;;  %12051 = vmatprep.subr.bf16.mxu0 %v12649_v7 }
 0x213   : > { %v4425_v45 = vadd.f32 %v13753_v62, %v4291_v3  ;;  %v4426_v34 = vadd.f32 %v13753_v62, %v4292_v11  ;;  %v1635_v26 = vrot.slane %v12434_v37, %v13138_v40  ;;  %v1594_v27 = vcombine.high %v910_v59, %v910_v59  ;;  %12052 = vmatpush3.bf16.msra.mxu0 %v12650_v50 }
 0x214   : > { %v13844_v41 = vrot.slane %v910_v59, %v13138_v40  ;;  %v4293_v46 = vmax.f32 %v13681_v16, %v3183_v35  ;;  %v4294_v63 = vmax.f32 %v13683_v0, %v3190_v15  ;;  %v1642_v36 = vrot.slane %v1628_v51, %v13138_v40 }
 0x215   : > { %v4553_v21 = vmax.f32 %v4425_v45, 0.0  ;;  %v4554_v61 = vmax.f32 %v4426_v34, 0.0  ;;  %v1643_v1 = vcombine.high %v1635_v26, %v1635_v26  ;;  %v3303_v37 = vsel %vm2462_vm1, %v1635_v26, -inf }
 0x216   : > { %v13854_v30 = vrot.slane %v1594_v27, %v13138_v40  ;;  %v4427_v33 = vadd.f32 %v13753_v62, %v4293_v46  ;;  %v4428_v44 = vadd.f32 %v13753_v62, %v4294_v63  ;;  %v1644_v16 = vcombine.high %v1642_v36, %v1642_v36 }
 0x217   : > { %v11745_v53 = vpack.c.bf16 %v4553_v21, %v4553_v21  ;;  %v11746_v19 = vpack.c.bf16 %v4554_v61, %v4554_v61  ;;  %v3304_v0 = vrot.slane %v3303_v37, 4  ;;  %v3310_v8 = vsel %vm2462_vm1, %v1643_v1, -inf }
 0x218   : > { %v3317_v13 = vsel %vm2462_vm1, %v1642_v36, -inf  ;;  %v4555_v29 = vmax.f32 %v4427_v33, 0.0  ;;  %v4556_v54 = vmax.f32 %v4428_v44, 0.0  ;;  %v3311_v31 = vrot.slane %v3310_v8, 4 }
 0x219   : > { %v5193_v4 = vunpack.c.l.b16 %v11745_v53  ;;  %v5194_v47 = vunpack.c.l.b16 %v11746_v19  ;;  %v3305_v28 = vmax.f32 %v3303_v37, %v3304_v0  ;;  %v3318_v3 = vrot.slane %v3317_v13, 4 }
 0x21a   : > { %v3324_v59 = vsel %vm2462_vm1, %v1644_v16, -inf  ;;  %v11747_v11 = vpack.c.bf16 %v4555_v29, %v4555_v29  ;;  %v11748_v35 = vpack.c.bf16 %v4556_v54, %v4556_v54  ;;  %v3312_v45 = vmax.f32 %v3310_v8, %v3311_v31  ;;  %v5568_v29 = vld [vmem:[#allocation2 + $0x28] sm:$0xf] }
 0x21b   : > { %v5354_v15 = vrot.slane %v5193_v4, 3  ;;  %v5356_v51 = vrot.slane %v5194_v47, 2  ;;  %v3306_v7 = vrot.slane %v3305_v28, 2  ;;  %v3319_v34 = vmax.f32 %v3317_v13, %v3318_v3 }
 0x21c   : > { %v3325_v26 = vrot.slane %v3324_v59, 4  ;;  %v5195_v27 = vunpack.c.l.b16 %v11747_v11  ;;  %v5196_v50 = vunpack.c.l.b16 %v11748_v35  ;;  %v3313_v63 = vrot.slane %v3312_v45, 2 }
 0x21d   : > { %v5355_v46 = vsel %vm5296_vm5, %v5354_v15, %v5353_v18  ;;  %v3307_v36 = vmax.f32 %v3305_v28, %v3306_v7  ;;  %v3320_v61 = vrot.slane %v3319_v34, 2  ;;  %v1609_v53 = vcombine.high %v13844_v41, %v13844_v41 }
 0x21e   : > { %v5357_v21 = vsel %vm5299_vm6, %v5356_v51, %v5355_v46  ;;  %v3326_v1 = vmax.f32 %v3324_v59, %v3325_v26  ;;  %v5358_v37 = vrot.slane %v5195_v27, 1  ;;  %v5361_v33 = vsel %vm5305_vm8, %v13773_v38, %v5196_v50 }
 0x21f   : > { %v3314_v44 = vmax.f32 %v3312_v45, %v3313_v63  ;;  %v5363_v16 = vsel %vm5287_vm2, %v13778_v49, %v5361_v33  ;;  %v3308_v19 = vrot.slane %v3307_v36, 1  ;;  %v3321_v0 = vmax.f32 %v3319_v34, %v3320_v61 }
 0x220   : > { %v3327_v18 = vrot.slane %v3326_v1, 2  ;;  %v5359_v8 = vsel %vm5302_vm7, %v5358_v37, %v5357_v21  ;;  %v5365_v13 = vsel %vm5290_vm3, %v13780_v48, %v5363_v16  ;;  %v1610_v38 = vcombine.high %v13854_v30, %v13854_v30 }
 0x221   : > { %v3315_v54 = vrot.slane %v3314_v44, 1  ;;  %v5367_v4 = vsel %vm5293_vm4, %v13819_v24, %v5365_v13  ;;  %v5517_v31 = vpack.c.b16 %v5359_v8, %v5359_v8  ;;  %v3309_v47 = vmax.f32 %v3307_v36, %v3308_v19 }
 0x222   : > { %v3322_v28 = vrot.slane %v3321_v0, 1  ;;  %v5369_v49 = vsel %vm5296_vm5, %v13826_v14, %v5367_v4  ;;  %v3328_v59 = vmax.f32 %v3326_v1, %v3327_v18  ;;  %v3247_v11 = vsel %vm2462_vm1, %v13844_v41, -inf }
 0x223   : > { %v3316_v3 = vmax.f32 %v3314_v44, %v3315_v54  ;;  %v5371_v48 = vsel %vm5299_vm6, %v13829_v22, %v5369_v49  ;;  %v5569_v35 = vsel %vm13427_vm11, %v5517_v31, %v5568_v29  ;;  %v4311_v24 = vmax.f32 %v13685_v56, %v3309_v47  ;;  %v12435_v54 = vpop.f32.mrf.mxu0 }
 0x224   : > { %v3323_v15 = vmax.f32 %v3321_v0, %v3322_v28  ;;  %v5373_v45 = vsel %vm5302_vm7, %v13831_v58, %v5371_v48  ;;  %5570 = vst [vmem:[#allocation2 + $0x28] sm:$0xf] %v5569_v35  ;;  %v3329_v51 = vrot.slane %v3328_v59, 1  ;;  %v3248_v7 = vrot.slane %v3247_v11, 4 }
 0x225   : > { %v4312_v14 = vmax.f32 %v13690_v60, %v3316_v3  ;;  %v5518_v34 = vpack.c.b16 %v5373_v45, %v5373_v45  ;;  %v4445_v26 = vadd.f32 %v13753_v62, %v4311_v24  ;;  %v3254_v22 = vsel %vm2462_vm1, %v1609_v53, -inf }
 0x226   : > { %v4313_v41 = vmax.f32 %v13699_v5, %v3323_v15  ;;  %v3330_v27 = vmax.f32 %v3328_v59, %v3329_v51  ;;  %v3249_v46 = vmax.f32 %v3247_v11, %v3248_v7  ;;  %v3255_v56 = vrot.slane %v3254_v22, 4  ;;  %v13911_v7 = vpop.f32.mrf.mxu0 }
 0x227   : > { %v4446_v50 = vadd.f32 %v13753_v62, %v4312_v14  ;;  %5571 = vst [vmem:[#allocation2 + $0x2c] sm:$0xf] %v5518_v34  ;;  %v4573_v63 = vmax.f32 %v4445_v26, 0.0  ;;  %v3261_v60 = vsel %vm2462_vm1, %v13854_v30, -inf  ;;  %v3268_v21 = vsel %vm2462_vm1, %v1610_v38, -inf }
 0x228   : > { %v4447_v58 = vadd.f32 %v13753_v62, %v4313_v41  ;;  %v4314_v5 = vmax.f32 %v13701_v39, %v3330_v27  ;;  %v3250_v61 = vrot.slane %v3249_v46, 2  ;;  %v3256_v1 = vmax.f32 %v3254_v22, %v3255_v56 }
 0x229   : > { %v4574_v36 = vmax.f32 %v4446_v50, 0.0  ;;  %v11765_v33 = vpack.c.bf16 %v4573_v63, %v4573_v63  ;;  %v3262_v44 = vrot.slane %v3261_v60, 4  ;;  %v3269_v53 = vrot.slane %v3268_v21, 4 }
 0x22a   : > { %v4575_v37 = vmax.f32 %v4447_v58, 0.0  ;;  %v4448_v16 = vadd.f32 %v13753_v62, %v4314_v5  ;;  %v3251_v0 = vmax.f32 %v3249_v46, %v3250_v61  ;;  %v3257_v18 = vrot.slane %v3256_v1, 2 }
 0x22b   : > { %v11766_v19 = vpack.c.bf16 %v4574_v36, %v4574_v36  ;;  %v5213_v13 = vunpack.c.l.b16 %v11765_v33  ;;  %v3263_v30 = vmax.f32 %v3261_v60, %v3262_v44  ;;  %v3270_v29 = vmax.f32 %v3268_v21, %v3269_v53 }
 0x22c   : > { %v13898_v8 = vpack.c.bf16 %v4575_v37, %v4575_v37  ;;  %v4576_v38 = vmax.f32 %v4448_v16, 0.0  ;;  %v3252_v4 = vrot.slane %v3251_v0, 1  ;;  %v3258_v31 = vmax.f32 %v3256_v1, %v3257_v18 }
 0x22d   : > { %v5214_v39 = vunpack.c.l.b16 %v11766_v19  ;;  %v16673_v47 = vrot.slane %v13729_v12, 1  ;;  %v5204_v49 = vunpack.c.l.b16 %v13821_v32  ;;  %v3264_v3 = vrot.slane %v3263_v30, 2 }
 0x22e   : > { %v3271_v59 = vrot.slane %v3270_v29, 2  ;;  %v13906_v11 = vpack.c.bf16 %v4576_v38, %v4576_v38  ;;  %v5215_v48 = vunpack.c.l.b16 %v13898_v8  ;;  %v3253_v35 = vmax.f32 %v3251_v0, %v3252_v4 }
 0x22f   : > { %v13903_v28 = vmax.f32 %v13729_v12, %v16673_v47  ;;  %v3259_v15 = vrot.slane %v3258_v31, 1  ;;  %v13909_v24 = vrot.slane %v5213_v13, 7  ;;  %v3265_v45 = vmax.f32 %v3263_v30, %v3264_v3 }
 0x230   : > { %v3272_v51 = vmax.f32 %v3270_v29, %v3271_v59  ;;  %v1645_v14 = vcombine.high %v12435_v54, %v12435_v54  ;;  %v13913_v34 = vrot.slane %v5214_v39, 6  ;;  %v4303_v32 = vmax.f32 %v13703_v9, %v3253_v35 }
 0x231   : > { %v3260_v12 = vmax.f32 %v3258_v31, %v3259_v15  ;;  %v1652_v41 = vrot.slane %v12435_v54, %v13138_v40  ;;  %v5216_v26 = vunpack.c.l.b16 %v13906_v11  ;;  %v3266_v22 = vrot.slane %v3265_v45, 1 }
 0x232   : > { %v3273_v27 = vrot.slane %v3272_v51, 1  ;;  %v1659_v50 = vrot.slane %v1645_v14, %v13138_v40  ;;  %v4437_v56 = vadd.f32 %v13753_v62, %v4303_v32  ;;  %v1611_v63 = vcombine.high %v13911_v7, %v13911_v7 }
 0x233   : > { %v4304_v46 = vmax.f32 %v13710_v57, %v3260_v12  ;;  %v1660_v58 = vcombine.high %v1652_v41, %v1652_v41  ;;  %v3267_v60 = vmax.f32 %v3265_v45, %v3266_v22  ;;  %v3331_v9 = vsel %vm2462_vm1, %v1652_v41, -inf }
 0x234   : > { %v3274_v21 = vmax.f32 %v3272_v51, %v3273_v27  ;;  %v1661_v5 = vcombine.high %v1659_v50, %v1659_v50  ;;  %v4565_v61 = vmax.f32 %v4437_v56, 0.0  ;;  %v3332_v1 = vrot.slane %v3331_v9, 4 }
 0x235   : > { %v4438_v36 = vadd.f32 %v13753_v62, %v4304_v46  ;;  %v3338_v37 = vsel %vm2462_vm1, %v1660_v58, -inf  ;;  %v4305_v33 = vmax.f32 %v13705_v52, %v3267_v60  ;;  %v3345_v53 = vsel %vm2462_vm1, %v1659_v50, -inf }
 0x236   : > { %v4306_v57 = vmax.f32 %v13712_v43, %v3274_v21  ;;  %v3339_v44 = vrot.slane %v3338_v37, 4  ;;  %v11757_v19 = vpack.c.bf16 %v4565_v61, %v4565_v61  ;;  %v3333_v0 = vmax.f32 %v3331_v9, %v3332_v1 }
 0x237   : > { %v4566_v16 = vmax.f32 %v4438_v36, 0.0  ;;  %v3346_v18 = vrot.slane %v3345_v53, 4  ;;  %v4439_v8 = vadd.f32 %v13753_v62, %v4305_v33  ;;  %v3352_v29 = vsel %vm2462_vm1, %v1661_v5, -inf }
 0x238   : > { %v4440_v13 = vadd.f32 %v13753_v62, %v4306_v57  ;;  %v3340_v30 = vmax.f32 %v3338_v37, %v3339_v44  ;;  %v5205_v38 = vunpack.c.l.b16 %v11757_v19  ;;  %v3334_v39 = vrot.slane %v3333_v0, 2 }
 0x239   : > { %v11758_v54 = vpack.c.bf16 %v4566_v16, %v4566_v16  ;;  %v3347_v52 = vmax.f32 %v3345_v53, %v3346_v18  ;;  %v4567_v4 = vmax.f32 %v4439_v8, 0.0  ;;  %v3353_v47 = vrot.slane %v3352_v29, 4 }
 0x23a   : > { %v4568_v43 = vmax.f32 %v4440_v13, 0.0  ;;  %v3341_v31 = vrot.slane %v3340_v30, 2  ;;  %v5374_v59 = vrot.slane %v5205_v38, 7  ;;  %v3335_v11 = vmax.f32 %v3333_v0, %v3334_v39 }
 0x23b   : > { %v5206_v3 = vunpack.c.l.b16 %v11758_v54  ;;  %v3348_v35 = vrot.slane %v3347_v52, 2  ;;  %v11759_v15 = vpack.c.bf16 %v4567_v4, %v4567_v4  ;;  %v3354_v14 = vmax.f32 %v3352_v29, %v3353_v47 }
 0x23c   : > { %v11760_v45 = vpack.c.bf16 %v4568_v43, %v4568_v43  ;;  %v3342_v51 = vmax.f32 %v3340_v30, %v3341_v31  ;;  %v5375_v12 = vsel %vm5305_vm8, %v5374_v59, %v5204_v49  ;;  %v3336_v41 = vrot.slane %v3335_v11, 1 }
 0x23d   : > { %v5376_v32 = vrot.slane %v5206_v3, 6  ;;  %v3349_v22 = vmax.f32 %v3347_v52, %v3348_v35  ;;  %v13933_v27 = vrot.slane %v5215_v48, 5  ;;  %v5207_v50 = vunpack.c.l.b16 %v11759_v15 }
 0x23e   : > { %v3343_v46 = vrot.slane %v3342_v51, 1  ;;  %v3355_v56 = vrot.slane %v3354_v14, 2  ;;  %v13935_v58 = vrot.slane %v5216_v26, 4  ;;  %v3337_v60 = vmax.f32 %v3335_v11, %v3336_v41 }
 0x23f   : > { %v3350_v21 = vrot.slane %v3349_v22, 1  ;;  %v1618_v5 = vrot.slane %v13911_v7, %v13138_v40  ;;  %v5208_v9 = vunpack.c.l.b16 %v11760_v45  ;;  %v5377_v36 = vsel %vm5287_vm2, %v5376_v32, %v5375_v12 }
 0x240   : > { %v3344_v61 = vmax.f32 %v3342_v51, %v3343_v46  ;;  %v3356_v49 = vmax.f32 %v3354_v14, %v3355_v56  ;;  %v4315_v37 = vmax.f32 %v13714_v10, %v3337_v60  ;;  %v1625_v48 = vrot.slane %v1611_v63, %v13138_v40  ;;  %v12438_v60 = vpop.f32.mrf.mxu0 }
 0x241   : > { %v3351_v1 = vmax.f32 %v3349_v22, %v3350_v21  ;;  %v1626_v33 = vcombine.high %v1618_v5, %v1618_v5  ;;  %v5378_v57 = vrot.slane %v5207_v50, 5  ;;  %v3275_v53 = vsel %vm2462_vm1, %v1618_v5, -inf  ;;  %v5574_v50 = vld [vmem:[#allocation2 + $0x38] sm:$0x1] }
 0x242   : > { %v3357_v44 = vrot.slane %v3356_v49, 1  ;;  %v4316_v26 = vmax.f32 %v13718_v20, %v3344_v61  ;;  %v4449_v7 = vadd.f32 %v13753_v62, %v4315_v37  ;;  %v1627_v19 = vcombine.high %v1625_v48, %v1625_v48 }
 0x243   : > { %v4317_v16 = vmax.f32 %v13727_v23, %v3351_v1  ;;  %v3276_v0 = vrot.slane %v3275_v53, 4  ;;  %v3282_v10 = vsel %vm2462_vm1, %v1626_v33, -inf  ;;  %v3289_v63 = vsel %vm2462_vm1, %v1625_v48, -inf }
 0x244   : > { %v3358_v18 = vmax.f32 %v3356_v49, %v3357_v44  ;;  %v4450_v8 = vadd.f32 %v13753_v62, %v4316_v26  ;;  %v4577_v30 = vmax.f32 %v4449_v7, 0.0  ;;  %v3283_v20 = vrot.slane %v3282_v10, 4 }
 0x245   : > { %v4451_v13 = vadd.f32 %v13753_v62, %v4317_v16  ;;  %v3277_v29 = vmax.f32 %v3275_v53, %v3276_v0  ;;  %v3290_v23 = vrot.slane %v3289_v63, 4  ;;  %v3296_v39 = vsel %vm2462_vm1, %v1627_v19, -inf }
 0x246   : > { %v4318_v54 = vmax.f32 %v13731_v6, %v3358_v18  ;;  %v4578_v38 = vmax.f32 %v4450_v8, 0.0  ;;  %v11769_v4 = vpack.c.bf16 %v4577_v30, %v4577_v30  ;;  %v3284_v31 = vmax.f32 %v3282_v10, %v3283_v20 }
 0x247   : > { %v4579_v52 = vmax.f32 %v4451_v13, 0.0  ;;  %v3278_v43 = vrot.slane %v3277_v29, 2  ;;  %v3291_v59 = vmax.f32 %v3289_v63, %v3290_v23  ;;  %v3297_v11 = vrot.slane %v3296_v39, 4 }
 0x248   : > { %v4452_v47 = vadd.f32 %v13753_v62, %v4318_v54  ;;  %v11770_v3 = vpack.c.bf16 %v4578_v38, %v4578_v38  ;;  %v5217_v15 = vunpack.c.l.b16 %v11769_v4  ;;  %v3285_v51 = vrot.slane %v3284_v31, 2 }
 0x249   : > { %v11771_v35 = vpack.c.bf16 %v4579_v52, %v4579_v52  ;;  %v3279_v45 = vmax.f32 %v3277_v29, %v3278_v43  ;;  %v3292_v6 = vrot.slane %v3291_v59, 2  ;;  %v3298_v32 = vmax.f32 %v3296_v39, %v3297_v11 }
 0x24a   : > { %v4580_v14 = vmax.f32 %v4452_v47, 0.0  ;;  %v5218_v12 = vunpack.c.l.b16 %v11770_v3  ;;  %v5380_v41 = vrot.slane %v5208_v9, 4  ;;  %v3286_v56 = vmax.f32 %v3284_v31, %v3285_v51 }
 0x24b   : > { %v5219_v22 = vunpack.c.l.b16 %v11771_v35  ;;  %v3280_v46 = vrot.slane %v3279_v45, 1  ;;  %v5379_v21 = vsel %vm5290_vm3, %v5378_v57, %v5377_v36  ;;  %v3293_v61 = vmax.f32 %v3291_v59, %v3292_v6 }
 0x24c   : > { %v11838_v5 = vpack.c.bf16 %v4580_v14, %v4580_v14  ;;  %v3299_v49 = vrot.slane %v3298_v32, 2  ;;  %v13954_v1 = vrot.slane %v5217_v15, 3  ;;  %v13956_v37 = vrot.slane %v5218_v12, 2 }
 0x24d   : > { %v3281_v48 = vmax.f32 %v3279_v45, %v3280_v46  ;;  %v3287_v33 = vrot.slane %v3286_v56, 1  ;;  %v3294_v9 = vrot.slane %v3293_v61, 1  ;;  %v1696_v53 = vcombine.high %v12438_v60, %v12438_v60 }
 0x24e   : > { %v5575_v44 = vsel %vm13535_vm14, %v11838_v5, %v5574_v50  ;;  %v3300_v26 = vmax.f32 %v3298_v32, %v3299_v49  ;;  %v13960_v16 = vrot.slane %v5219_v22, 1  ;;  %v1703_v57 = vrot.slane %v12438_v60, %v13138_v40  ;;  %v13977_v49 = vld [vmem:[#allocation2] sm:$0xf] }
 0x24f   : > { %5576 = vst [vmem:[#allocation2 + $0x38] sm:$0x1] %v5575_v44  ;;  %v3288_v7 = vmax.f32 %v3286_v56, %v3287_v33  ;;  %v4307_v36 = vmax.f32 %v13733_v17, %v3281_v48  ;;  %v3295_v19 = vmax.f32 %v3293_v61, %v3294_v9  ;;  %v5381_v18 = vsel %vm5293_vm4, %v5380_v41, %v5379_v21 }
 0x250   : > { %v3301_v0 = vrot.slane %v3300_v26, 1  ;;  %v1710_v8 = vrot.slane %v1696_v53, %v13138_v40  ;;  %v1711_v13 = vcombine.high %v1703_v57, %v1703_v57  ;;  %v3415_v30 = vsel %vm2462_vm1, %v1703_v57, -inf }
 0x251   : > { %v4308_v10 = vmax.f32 %v13735_v42, %v3288_v7  ;;  %v4441_v63 = vadd.f32 %v13753_v62, %v4307_v36  ;;  %v4309_v20 = vmax.f32 %v13740_v25, %v3295_v19  ;;  %v3416_v17 = vrot.slane %v3415_v30, 4  ;;  %v926_v36 = vpop.f32.mrf.mxu0 }
 0x252   : > { %v3302_v29 = vmax.f32 %v3300_v26, %v3301_v0  ;;  %v1712_v54 = vcombine.high %v1710_v8, %v1710_v8  ;;  %v3422_v39 = vsel %vm2462_vm1, %v1711_v13, -inf  ;;  %v3429_v52 = vsel %vm2462_vm1, %v1710_v8, -inf  ;;  %v13981_v8 = vld [vmem:[#allocation2 + $0x4] sm:$0xf] }
 0x253   : > { %v4442_v38 = vadd.f32 %v13753_v62, %v4308_v10  ;;  %v4569_v23 = vmax.f32 %v4441_v63, 0.0  ;;  %v4443_v42 = vadd.f32 %v13753_v62, %v4309_v20  ;;  %v3417_v43 = vmax.f32 %v3415_v30, %v3416_v17  ;;  %16674 = vst [vmem:[#allocation10_spill] sm:$0xff] %v13981_v8  ;;  %v13989_v30 = vld [vmem:[#allocation2 + $0x8] sm:$0xf] }
 0x254   : > { %v4310_v4 = vmax.f32 %v13903_v28, %v3302_v29  ;;  %v3423_v31 = vrot.slane %v3422_v39, 4  ;;  %v3430_v59 = vrot.slane %v3429_v52, 4  ;;  %v3436_v25 = vsel %vm2462_vm1, %v1712_v54, -inf  ;;  %16675 = vst [vmem:[#allocation11_spill] sm:$0xff] %v13989_v30 }
 0x255   : > { %v4570_v47 = vmax.f32 %v4442_v38, 0.0  ;;  %v11761_v3 = vpack.c.bf16 %v4569_v23, %v4569_v23  ;;  %v4571_v35 = vmax.f32 %v4443_v42, 0.0  ;;  %v3418_v15 = vrot.slane %v3417_v43, 2 }
 0x256   : > { %v4444_v11 = vadd.f32 %v13753_v62, %v4310_v4  ;;  %v3424_v45 = vmax.f32 %v3422_v39, %v3423_v31  ;;  %v3431_v12 = vmax.f32 %v3429_v52, %v3430_v59  ;;  %v3437_v6 = vrot.slane %v3436_v25, 4  ;;  %v12439_v4 = vpop.f32.mrf.mxu0 }
 0x257   : > { %v11762_v51 = vpack.c.bf16 %v4570_v47, %v4570_v47  ;;  %v5209_v14 = vunpack.c.l.b16 %v11761_v3  ;;  %v11763_v28 = vpack.c.bf16 %v4571_v35, %v4571_v35  ;;  %v3419_v41 = vmax.f32 %v3417_v43, %v3418_v15 }
 0x258   : > { %v4572_v32 = vmax.f32 %v4444_v11, 0.0  ;;  %v3425_v22 = vrot.slane %v3424_v45, 2  ;;  %v3432_v56 = vrot.slane %v3431_v12, 2  ;;  %v3438_v60 = vmax.f32 %v3436_v25, %v3437_v6 }
 0x259   : > { %v5210_v50 = vunpack.c.l.b16 %v11762_v51  ;;  %v5382_v46 = vrot.slane %v5209_v14, 3  ;;  %v5211_v5 = vunpack.c.l.b16 %v11763_v28  ;;  %v3420_v61 = vrot.slane %v3419_v41, 1 }
 0x25a   : > { %v11764_v21 = vpack.c.bf16 %v4572_v32, %v4572_v32  ;;  %v3426_v62 = vmax.f32 %v3424_v45, %v3425_v22  ;;  %v3433_v44 = vmax.f32 %v3431_v12, %v3432_v56  ;;  %v3439_v9 = vrot.slane %v3438_v60, 2  ;;  %v14021_v12 = vpop.f32.mrf.mxu0 }
 0x25b   : > { %v5383_v48 = vsel %vm5296_vm5, %v5382_v46, %v5381_v18  ;;  %v5384_v33 = vrot.slane %v5210_v50, 2  ;;  %v5386_v53 = vrot.slane %v5211_v5, 1  ;;  %v5620_v10 = vshrl.u32 %v13977_v49, 16 }
 0x25c   : > { %v5212_v26 = vunpack.c.l.b16 %v11764_v21  ;;  %v3427_v7 = vrot.slane %v3426_v62, 1  ;;  %v3434_v19 = vrot.slane %v3433_v44, 1  ;;  %v3440_v0 = vmax.f32 %v3438_v60, %v3439_v9 }
 0x25d   : > { %v5385_v57 = vsel %vm5299_vm6, %v5384_v33, %v5383_v48  ;;  %v13987_v13 = vmax.f32 %v3419_v41, %v3420_v61  ;;  %v5623_v29 = vshll.u32 %v13977_v49, 16  ;;  %v5622_v39 = vrot.slane %v5620_v10, 4 }
 0x25e   : > { %v5387_v63 = vsel %vm5302_vm7, %v5386_v53, %v5385_v57  ;;  %v5389_v18 = vsel %vm5305_vm8, %v13909_v24, %v5212_v26  ;;  %v13994_v17 = vmax.f32 %v3426_v62, %v3427_v7  ;;  %v3441_v38 = vrot.slane %v3440_v0, 1 }
 0x25f   : > { %v5391_v20 = vsel %vm5287_vm2, %v13913_v34, %v5389_v18  ;;  %v5519_v54 = vpack.c.b16 %v5387_v63, %v5387_v63  ;;  %v5625_v52 = vrot.slane %v5623_v29, 5  ;;  %v5629_v24 = vshll.u32 %v13981_v8, 16 }
 0x260   : > { %v5393_v23 = vsel %vm5290_vm3, %v13933_v27, %v5391_v20  ;;  %v14001_v43 = vmax.f32 %v3433_v44, %v3434_v19  ;;  %v5633_v34 = vshrl.u32 %v13981_v8, 16  ;;  %v5639_v31 = vshll.u32 %v13989_v30, 16 }
 0x261   : > { %v5395_v42 = vsel %vm5293_vm4, %v13935_v58, %v5393_v23  ;;  %5572 = vst [vmem:[#allocation2 + $0x30] sm:$0xf] %v5519_v54  ;;  %v5626_v3 = vor.u32 %v5625_v52, %v5622_v39  ;;  %v5631_v27 = vrot.slane %v5629_v24, 5  ;;  %v5643_v59 = vshrl.u32 %v13989_v30, 16 }
 0x262   : > { %v5397_v47 = vsel %vm5296_vm5, %v13954_v1, %v5395_v42  ;;  %v14010_v11 = vmax.f32 %v3440_v0, %v3441_v38  ;;  %v16676_v58 = vmov 0  ;;  %v5635_v35 = vrot.slane %v5633_v34, 4 }
 0x263   : > { %v5399_v25 = vsel %vm5299_vm6, %v13956_v37, %v5397_v47  ;;  %v16677_v58 = vsel %vm14014_vm9, 4294967295, %v16676_v58  ;;  %v5641_v15 = vrot.slane %v5639_v31, 5  ;;  %v5627_v45 = vrot.slane %v5626_v3, 4 }
 0x264   : > { %16678 = vst [vmem:[#allocation12_spill] sm:$0xff] %v16677_v58  ;;  %v5401_v1 = vsel %vm5302_vm7, %v13960_v16, %v5399_v25  ;;  %v5645_v51 = vrot.slane %v5643_v59, 4  ;;  %v5636_v6 = vor.u32 %v5635_v35, %v5631_v27  ;;  %v11357_v28 = vcombine.low %v13977_v49, %v13981_v8 }
 0x265   : > { %v5520_v37 = vpack.c.b16 %v5401_v1, %v5401_v1  ;;  %v5632_v41 = vsel %vm14014_vm9, %v5627_v45, %v5631_v27  ;;  %v1662_v50 = vcombine.high %v926_v36, %v926_v36  ;;  %v1669_v16 = vrot.slane %v926_v36, %v13138_v40 }
 0x266   : > { %v5646_v22 = vor.u32 %v5645_v51, %v5641_v15  ;;  %v5637_v46 = vrot.slane %v5636_v6, 4  ;;  %v1713_v56 = vcombine.high %v12439_v4, %v12439_v4  ;;  %v1720_v60 = vrot.slane %v12439_v4, %v13138_v40 }
 0x267   : > { %5573 = vst [vmem:[#allocation2 + $0x34] sm:$0xf] %v5520_v37  ;;  %v1679_v21 = vcombine.high %v14021_v12, %v14021_v12  ;;  %v1676_v61 = vrot.slane %v1662_v50, %v13138_v40  ;;  %v1677_v62 = vcombine.high %v1669_v16, %v1669_v16  ;;  %v3359_v49 = vsel %vm2462_vm1, %v1669_v16, -inf }
 0x268   : > { %v14032_v5 = vrot.slane %v5646_v22, 4  ;;  %v5642_v48 = vsel %vm14014_vm9, %v5637_v46, %v5641_v15  ;;  %v3360_v33 = vrot.slane %v3359_v49, 4  ;;  %v1727_v44 = vrot.slane %v1713_v56, %v13138_v40 }
 0x269   : > { %v1728_v9 = vcombine.high %v1720_v60, %v1720_v60  ;;  %v11365_v26 = vcombine.low %v5632_v41, %v5642_v48  ;;  %v1678_v53 = vcombine.high %v1676_v61, %v1676_v61  ;;  %v3366_v7 = vsel %vm2462_vm1, %v1677_v62, -inf }
 0x26a   : > { %v3373_v36 = vsel %vm2462_vm1, %v1676_v61, -inf  ;;  %v3361_v57 = vmax.f32 %v3359_v49, %v3360_v33  ;;  %v3367_v19 = vrot.slane %v3366_v7, 4  ;;  %v1729_v10 = vcombine.high %v1727_v44, %v1727_v44 }
 0x26b   : > { %v3374_v0 = vrot.slane %v3373_v36, 4  ;;  %7327 = vmatprep.mubr.bf16.mxu1 %v11365_v26  ;;  %v3380_v63 = vsel %vm2462_vm1, %v1678_v53, -inf  ;;  %v3443_v18 = vsel %vm2462_vm1, %v1720_v60, -inf  ;;  %v3450_v29 = vsel %vm2462_vm1, %v1728_v9, -inf }
 0x26c   : > { %v3457_v20 = vsel %vm2462_vm1, %v1727_v44, -inf  ;;  %7328 = vmatmul.mubr.bf16.vlgmr.msra.gmra.mxu1 %v11357_v28  ;;  %v3362_v54 = vrot.slane %v3361_v57, 2  ;;  %v3368_v38 = vmax.f32 %v3366_v7, %v3367_v19  ;;  %v3381_v39 = vrot.slane %v3380_v63, 4 }
 0x26d   : > { %v3375_v23 = vmax.f32 %v3373_v36, %v3374_v0  ;;  %v3444_v52 = vrot.slane %v3443_v18, 4  ;;  %v3451_v24 = vrot.slane %v3450_v29, 4  ;;  %v3458_v4 = vrot.slane %v3457_v20, 4 }
 0x26e   : > { %v3464_v42 = vsel %vm2462_vm1, %v1729_v10, -inf  ;;  %v3363_v34 = vmax.f32 %v3361_v57, %v3362_v54  ;;  %v3369_v31 = vrot.slane %v3368_v38, 2  ;;  %v3382_v3 = vmax.f32 %v3380_v63, %v3381_v39  ;;  %v12442_v10 = vpop.f32.mrf.mxu0  ;;  %v14067_v54 = vld [vmem:[#allocation2 + $0xc] sm:$0xf] }
 0x26f   : > { %v3376_v47 = vrot.slane %v3375_v23, 2  ;;  %v3445_v27 = vmax.f32 %v3443_v18, %v3444_v52  ;;  %v3452_v59 = vmax.f32 %v3450_v29, %v3451_v24  ;;  %v3459_v25 = vmax.f32 %v3457_v20, %v3458_v4 }
 0x270   : > { %v3465_v35 = vrot.slane %v3464_v42, 4  ;;  %v3364_v15 = vrot.slane %v3363_v34, 1  ;;  %v3370_v1 = vmax.f32 %v3368_v38, %v3369_v31  ;;  %v3383_v51 = vrot.slane %v3382_v3, 2 }
 0x271   : > { %v3377_v45 = vmax.f32 %v3375_v23, %v3376_v47  ;;  %v3446_v37 = vrot.slane %v3445_v27, 2  ;;  %v3453_v6 = vrot.slane %v3452_v59, 2  ;;  %v3460_v28 = vrot.slane %v3459_v25, 2 }
 0x272   : > { %v3466_v41 = vmax.f32 %v3464_v42, %v3465_v35  ;;  %v14046_v22 = vmax.f32 %v3363_v34, %v3364_v15  ;;  %v3371_v50 = vrot.slane %v3370_v1, 1  ;;  %v3384_v46 = vmax.f32 %v3382_v3, %v3383_v51 }
 0x273   : > { %v3378_v16 = vrot.slane %v3377_v45, 1  ;;  %v3447_v56 = vmax.f32 %v3445_v27, %v3446_v37  ;;  %v3454_v60 = vmax.f32 %v3452_v59, %v3453_v6  ;;  %v3461_v61 = vmax.f32 %v3459_v25, %v3460_v28 }
 0x274   : > { %v3467_v62 = vrot.slane %v3466_v41, 2  ;;  %v14048_v49 = vmax.f32 %v3370_v1, %v3371_v50  ;;  %v3385_v33 = vrot.slane %v3384_v46, 1  ;;  %v1686_v44 = vrot.slane %v14021_v12, %v13138_v40 }
 0x275   : > { %v14050_v48 = vmax.f32 %v3377_v45, %v3378_v16  ;;  %v3448_v9 = vrot.slane %v3447_v56, 1  ;;  %v3455_v26 = vrot.slane %v3454_v60, 1  ;;  %v3462_v53 = vrot.slane %v3461_v61, 1 }
 0x276   : > { %v3468_v7 = vmax.f32 %v3466_v41, %v3467_v62  ;;  %v14054_v36 = vmax.f32 %v3384_v46, %v3385_v33  ;;  %v1693_v57 = vrot.slane %v1679_v21, %v13138_v40  ;;  %v1694_v19 = vcombine.high %v1686_v44, %v1686_v44 }
 0x277   : > { %v3387_v0 = vsel %vm2462_vm1, %v1686_v44, -inf  ;;  %v14061_v63 = vmax.f32 %v3447_v56, %v3448_v9  ;;  %v14063_v18 = vmax.f32 %v3454_v60, %v3455_v26  ;;  %v14065_v29 = vmax.f32 %v3461_v61, %v3462_v53 }
 0x278   : > { %v3469_v20 = vrot.slane %v3468_v7, 1  ;;  %v1695_v38 = vcombine.high %v1693_v57, %v1693_v57  ;;  %v3388_v23 = vrot.slane %v3387_v0, 4  ;;  %v3394_v39 = vsel %vm2462_vm1, %v1694_v19, -inf }
 0x279   : > { %v3401_v12 = vsel %vm2462_vm1, %v1693_v57, -inf  ;;  %v3395_v52 = vrot.slane %v3394_v39, 4  ;;  %v1764_v4 = vcombine.high %v12442_v10, %v12442_v10  ;;  %v1771_v31 = vrot.slane %v12442_v10, %v13138_v40 }
 0x27a   : > { %v14071_v21 = vmax.f32 %v3468_v7, %v3469_v20  ;;  %v3402_v24 = vrot.slane %v3401_v12, 4  ;;  %v3389_v42 = vmax.f32 %v3387_v0, %v3388_v23  ;;  %v3408_v34 = vsel %vm2462_vm1, %v1695_v38, -inf  ;;  %v5612_v23 = vld [vmem:[#allocation2 + $0x10] sm:$0x1] }
 0x27b   : > { %v5649_v47 = vshll.u32 %v14067_v54, 16  ;;  %v3396_v3 = vmax.f32 %v3394_v39, %v3395_v52  ;;  %v3409_v59 = vrot.slane %v3408_v34, 4  ;;  %v1778_v25 = vrot.slane %v1764_v4, %v13138_v40  ;;  %v942_v39 = vpop.f32.mrf.mxu0 }
 0x27c   : > { %v3403_v27 = vmax.f32 %v3401_v12, %v3402_v24  ;;  %v3390_v35 = vrot.slane %v3389_v42, 2  ;;  %v1779_v15 = vcombine.high %v1771_v31, %v1771_v31  ;;  %v3527_v1 = vsel %vm2462_vm1, %v1771_v31, -inf }
 0x27d   : > { %v14078_v45 = vrot.slane %v5649_v47, 5  ;;  %v3397_v51 = vrot.slane %v3396_v3, 2  ;;  %v3410_v6 = vmax.f32 %v3408_v34, %v3409_v59  ;;  %v1780_v28 = vcombine.high %v1778_v25, %v1778_v25 }
 0x27e   : > { %v3404_v37 = vrot.slane %v3403_v27, 2  ;;  %v3391_v41 = vmax.f32 %v3389_v42, %v3390_v35  ;;  %v3528_v50 = vrot.slane %v3527_v1, 4  ;;  %v3534_v16 = vsel %vm2462_vm1, %v1779_v15, -inf }
 0x27f   : > { %v3541_v46 = vsel %vm2462_vm1, %v1778_v25, -inf  ;;  %v3398_v56 = vmax.f32 %v3396_v3, %v3397_v51  ;;  %v3411_v61 = vrot.slane %v3410_v6, 2  ;;  %v3535_v62 = vrot.slane %v3534_v16, 4 }
 0x280   : > { %v3405_v60 = vmax.f32 %v3403_v27, %v3404_v37  ;;  %v3392_v33 = vrot.slane %v3391_v41, 1  ;;  %v3529_v44 = vmax.f32 %v3527_v1, %v3528_v50  ;;  %v3542_v9 = vrot.slane %v3541_v46, 4  ;;  %v12443_v37 = vpop.f32.mrf.mxu0 }
 0x281   : > { %v3548_v26 = vsel %vm2462_vm1, %v1780_v28, -inf  ;;  %v3399_v53 = vrot.slane %v3398_v56, 1  ;;  %v3412_v57 = vmax.f32 %v3410_v6, %v3411_v61  ;;  %v3536_v19 = vmax.f32 %v3534_v16, %v3535_v62 }
 0x282   : > { %v3406_v7 = vrot.slane %v3405_v60, 1  ;;  %v14083_v0 = vmax.f32 %v3391_v41, %v3392_v33  ;;  %v3530_v10 = vrot.slane %v3529_v44, 2  ;;  %v3543_v20 = vmax.f32 %v3541_v46, %v3542_v9 }
 0x283   : > { %v3549_v38 = vrot.slane %v3548_v26, 4  ;;  %v14085_v12 = vmax.f32 %v3398_v56, %v3399_v53  ;;  %v3413_v24 = vrot.slane %v3412_v57, 1  ;;  %v3537_v4 = vrot.slane %v3536_v19, 2 }
 0x284   : > { %v14087_v52 = vmax.f32 %v3405_v60, %v3406_v7  ;;  %v3531_v42 = vmax.f32 %v3529_v44, %v3530_v10  ;;  %v3544_v34 = vrot.slane %v3543_v20, 2  ;;  %v5652_v47 = vsel %vm14014_vm9, %v14032_v5, %v14078_v45 }
 0x285   : > { %v3550_v31 = vmax.f32 %v3548_v26, %v3549_v38  ;;  %v14093_v3 = vmax.f32 %v3412_v57, %v3413_v24  ;;  %v3538_v27 = vmax.f32 %v3536_v19, %v3537_v4  ;;  %v5653_v59 = vshrl.u32 %v14067_v54, 16 }
 0x286   : > { %v5659_v25 = vshll.u32 %v5612_v23, 16  ;;  %v3532_v35 = vrot.slane %v3531_v42, 1  ;;  %v3545_v15 = vmax.f32 %v3543_v20, %v3544_v34  ;;  %v11358_v51 = vcombine.low %v13989_v30, %v14067_v54 }
 0x287   : > { %v3551_v1 = vrot.slane %v3550_v31, 2  ;;  %v3539_v6 = vrot.slane %v3538_v27, 1  ;;  %v5655_v28 = vrot.slane %v5653_v59, 4  ;;  %v1730_v50 = vcombine.high %v942_v39, %v942_v39 }
 0x288   : > { %v5661_v41 = vrot.slane %v5659_v25, 5  ;;  %v14098_v16 = vmax.f32 %v3531_v42, %v3532_v35  ;;  %v3546_v5 = vrot.slane %v3545_v15, 1  ;;  %v1737_v56 = vrot.slane %v942_v39, %v13138_v40 }
 0x289   : > { %v3552_v46 = vmax.f32 %v3550_v31, %v3551_v1  ;;  %v14101_v60 = vmax.f32 %v3538_v27, %v3539_v6  ;;  %v5656_v61 = vor.u32 %v5655_v28, %v14078_v45  ;;  %v1744_v62 = vrot.slane %v1730_v50, %v13138_v40 }
 0x28a   : > { %v1781_v33 = vcombine.high %v12443_v37, %v12443_v37  ;;  %v14105_v44 = vmax.f32 %v3545_v15, %v3546_v5  ;;  %v1745_v9 = vcombine.high %v1737_v56, %v1737_v56  ;;  %v3471_v26 = vsel %vm2462_vm1, %v1737_v56, -inf }
 0x28b   : > { %v3553_v54 = vrot.slane %v3552_v46, 1  ;;  %v5657_v53 = vrot.slane %v5656_v61, 4  ;;  %v1746_v7 = vcombine.high %v1744_v62, %v1744_v62  ;;  %v3472_v57 = vrot.slane %v3471_v26, 4 }
 0x28c   : > { %v3485_v19 = vsel %vm2462_vm1, %v1744_v62, -inf  ;;  %v3478_v20 = vsel %vm2462_vm1, %v1745_v9, -inf  ;;  %v1788_v45 = vrot.slane %v12443_v37, %v13138_v40  ;;  %v1795_v27 = vrot.slane %v1781_v33, %v13138_v40 }
 0x28d   : > { %v14109_v10 = vmax.f32 %v3552_v46, %v3553_v54  ;;  %v3486_v38 = vrot.slane %v3485_v19, 4  ;;  %v5662_v23 = vsel %vm14014_vm9, %v5657_v53, %v5661_v41  ;;  %v3473_v39 = vmax.f32 %v3471_v26, %v3472_v57 }
 0x28e   : > { %v3479_v24 = vrot.slane %v3478_v20, 4  ;;  %v3492_v4 = vsel %vm2462_vm1, %v1746_v7, -inf  ;;  %v11366_v42 = vcombine.low %v5652_v47, %v5662_v23  ;;  %v1796_v35 = vcombine.high %v1788_v45, %v1788_v45 }
 0x28f   : > { %v3487_v34 = vmax.f32 %v3485_v19, %v3486_v38  ;;  %v3493_v31 = vrot.slane %v3492_v4, 4  ;;  %v3474_v59 = vrot.slane %v3473_v39, 2  ;;  %v3555_v15 = vsel %vm2462_vm1, %v1788_v45, -inf }
 0x290   : > { %v3480_v25 = vmax.f32 %v3478_v20, %v3479_v24  ;;  %7335 = vmatprep.mubr.bf16.mxu1 %v11366_v42  ;;  %v1797_v6 = vcombine.high %v1795_v27, %v1795_v27  ;;  %v3556_v28 = vrot.slane %v3555_v15, 4  ;;  %v3562_v5 = vsel %vm2462_vm1, %v1796_v35, -inf  ;;  %v14125_v42 = vld [vmem:[#allocation2 + $0x18] sm:$0xf]  ;;  %v945_v35 = vpop.f32.mrf.mxu0 }
 0x291   : > { %v3488_v1 = vrot.slane %v3487_v34, 2  ;;  %v3494_v37 = vmax.f32 %v3492_v4, %v3493_v31  ;;  %7336 = vmatmul.mubr.bf16.gmra.mxu1 %v11358_v51  ;;  %v3475_v41 = vmax.f32 %v3473_v39, %v3474_v59  ;;  %v3569_v47 = vsel %vm2462_vm1, %v1795_v27, -inf  ;;  %v14129_v59 = vld [vmem:[#allocation2 + $0x1c] sm:$0xf] }
 0x292   : > { %v3481_v50 = vrot.slane %v3480_v25, 2  ;;  %v3557_v61 = vmax.f32 %v3555_v15, %v3556_v28  ;;  %v3563_v62 = vrot.slane %v3562_v5, 4  ;;  %v3570_v9 = vrot.slane %v3569_v47, 4 }
 0x293   : > { %v3489_v46 = vmax.f32 %v3487_v34, %v3488_v1  ;;  %v3495_v56 = vrot.slane %v3494_v37, 2  ;;  %v3476_v33 = vrot.slane %v3475_v41, 1  ;;  %v3576_v26 = vsel %vm2462_vm1, %v1797_v6, -inf }
 0x294   : > { %v3482_v54 = vmax.f32 %v3480_v25, %v3481_v50  ;;  %v3558_v57 = vrot.slane %v3557_v61, 2  ;;  %v3564_v19 = vmax.f32 %v3562_v5, %v3563_v62  ;;  %v3571_v38 = vmax.f32 %v3569_v47, %v3570_v9  ;;  %v6070_v25 = vld [vmem:[#allocation2 + $0x14] sm:$0xe] }
 0x295   : > { %v3490_v53 = vrot.slane %v3489_v46, 1  ;;  %v3496_v7 = vmax.f32 %v3494_v37, %v3495_v56  ;;  %v14121_v51 = vmax.f32 %v3475_v41, %v3476_v33  ;;  %v3577_v45 = vrot.slane %v3576_v26, 4 }
 0x296   : > { %v3483_v20 = vrot.slane %v3482_v54, 1  ;;  %v3559_v24 = vmax.f32 %v3557_v61, %v3558_v57  ;;  %v3565_v4 = vrot.slane %v3564_v19, 2  ;;  %v3572_v31 = vrot.slane %v3571_v38, 2 }
 0x297   : > { %v14123_v23 = vmax.f32 %v3489_v46, %v3490_v53  ;;  %v3497_v39 = vrot.slane %v3496_v7, 1  ;;  %v3578_v27 = vmax.f32 %v3576_v26, %v3577_v45  ;;  %v5908_v50 = vshrl.u32 %v14125_v42, 16  ;;  %v12446_v26 = vpop.f32.mrf.mxu0 }
 0x298   : > { %v14127_v34 = vmax.f32 %v3482_v54, %v3483_v20  ;;  %v3560_v1 = vrot.slane %v3559_v24, 1  ;;  %v3566_v37 = vmax.f32 %v3564_v19, %v3565_v4  ;;  %v3573_v6 = vmax.f32 %v3571_v38, %v3572_v31 }
 0x299   : > { %16679 = vst [vmem:[#allocation13_spill] sm:$0xff] %v14123_v23  ;;  %v14131_v15 = vmax.f32 %v3496_v7, %v3497_v39  ;;  %v3579_v28 = vrot.slane %v3578_v27, 2  ;;  %v16682_v46 = vmov 0  ;;  %v11349_v61 = vrot.slane %v6070_v25, 9 }
 0x29a   : > { %v14135_v5 = vmax.f32 %v3559_v24, %v3560_v1  ;;  %v3567_v47 = vrot.slane %v3566_v37, 1  ;;  %v16683_v46 = vsel %vm14137_vm13, 4294967295, %v16682_v46  ;;  %v3574_v62 = vrot.slane %v3573_v6, 1 }
 0x29b   : > { %16680 = vst [vmem:[#allocation14_spill] sm:$0xff] %v14131_v15  ;;  %16684 = vst [vmem:[#allocation16_spill] sm:$0xff] %v16683_v46  ;;  %v3580_v33 = vmax.f32 %v3578_v27, %v3579_v28  ;;  %v14142_v54 = vrot.slane %v5908_v50, 4  ;;  %v6096_v9 = vrot.slane %v14125_v42, 5  ;;  %v16643_v7 = vrot.slane %v14129_v59, 5 }
 0x29c   : > { %16681 = vst [vmem:[#allocation15_spill] sm:$0xff] %v14135_v5  ;;  %v14145_v53 = vmax.f32 %v3566_v37, %v3567_v47  ;;  %v1747_v57 = vcombine.high %v945_v35, %v945_v35  ;;  %v1754_v19 = vrot.slane %v945_v35, %v13138_v40  ;;  %v14149_v20 = vmax.f32 %v3573_v6, %v3574_v62  ;;  %v14162_v6 = vld [vmem:[#allocation2 + $0x14] sm:$0xf] }
 0x29d   : > { %v3581_v38 = vrot.slane %v3580_v33, 1  ;;  %v6097_v45 = vsel %vm14137_vm13, %v11349_v61, %v6096_v9  ;;  %v6098_v39 = vrot.slane %v6096_v9, 4  ;;  %v1832_v27 = vcombine.high %v12446_v26, %v12446_v26 }
 0x29e   : > { %16685 = vst [vmem:[#allocation17_spill] sm:$0xff] %v14145_v53  ;;  %16686 = vst [vmem:[#allocation18_spill] sm:$0xff] %v14149_v20  ;;  %v1761_v24 = vrot.slane %v1747_v57, %v13138_v40  ;;  %v1762_v4 = vcombine.high %v1754_v19, %v1754_v19  ;;  %v3499_v31 = vsel %vm2462_vm1, %v1754_v19, -inf  ;;  %v1839_v37 = vrot.slane %v12446_v26, %v13138_v40 }
 0x29f   : > { %v14155_v25 = vmax.f32 %v3580_v33, %v3581_v38  ;;  %v6100_v35 = vsel %vm14137_vm13, %v6098_v39, %v16643_v7  ;;  %v3500_v1 = vrot.slane %v3499_v31, 4  ;;  %v1846_v57 = vrot.slane %v1832_v27, %v13138_v40 }
 0x2a0   : > { %v11397_v28 = vcombine.low %v6097_v45, %v6100_v35  ;;  %v1763_v50 = vcombine.high %v1761_v24, %v1761_v24  ;;  %v3506_v47 = vsel %vm2462_vm1, %v1762_v4, -inf  ;;  %v3513_v61 = vsel %vm2462_vm1, %v1761_v24, -inf }
 0x2a1   : > { %16687 = vst [vmem:[#allocation19_spill] sm:$0xff] %v14155_v25  ;;  %v3501_v62 = vmax.f32 %v3499_v31, %v3500_v1  ;;  %v3507_v9 = vrot.slane %v3506_v47, 4  ;;  %v3514_v33 = vrot.slane %v3513_v61, 4  ;;  %v1847_v38 = vcombine.high %v1839_v37, %v1839_v37 }
 0x2a2   : > { %7521 = vmatprep.mubr.bf16.mxu0 %v11397_v28  ;;  %v3520_v19 = vsel %vm2462_vm1, %v1763_v50, -inf  ;;  %v3639_v39 = vsel %vm2462_vm1, %v1839_v37, -inf  ;;  %v5664_v26 = vshrl.u32 %v14162_v6, 16  ;;  %v1848_v4 = vcombine.high %v1846_v57, %v1846_v57 }
 0x2a3   : > { %v3502_v32 = vrot.slane %v3501_v62, 2  ;;  %v3508_v45 = vmax.f32 %v3506_v47, %v3507_v9  ;;  %v3515_v35 = vmax.f32 %v3513_v61, %v3514_v33  ;;  %v3521_v14 = vrot.slane %v3520_v19, 4 }
 0x2a4   : > { %v3640_v7 = vrot.slane %v3639_v39, 4  ;;  %v3646_v24 = vsel %vm2462_vm1, %v1847_v38, -inf  ;;  %v3653_v31 = vsel %vm2462_vm1, %v1846_v57, -inf  ;;  %v3660_v37 = vsel %vm2462_vm1, %v1848_v4, -inf }
 0x2a5   : > { %v3503_v1 = vmax.f32 %v3501_v62, %v3502_v32  ;;  %v3509_v27 = vrot.slane %v3508_v45, 2  ;;  %v3516_v28 = vrot.slane %v3515_v35, 2  ;;  %v3522_v56 = vmax.f32 %v3520_v19, %v3521_v14 }
 0x2a6   : > { %v3641_v50 = vmax.f32 %v3639_v39, %v3640_v7  ;;  %v3647_v41 = vrot.slane %v3646_v24, 4  ;;  %v3654_v30 = vrot.slane %v3653_v31, 4  ;;  %v3661_v20 = vrot.slane %v3660_v37, 4  ;;  %v14175_v39 = vld [vmem:[#allocation2 + $0x18] sm:$0xf] }
 0x2a7   : > { %v3504_v8 = vrot.slane %v3503_v1, 1  ;;  %v3510_v55 = vmax.f32 %v3508_v45, %v3509_v27  ;;  %v3517_v47 = vmax.f32 %v3515_v35, %v3516_v28  ;;  %v3523_v61 = vrot.slane %v3522_v56, 2 }
 0x2a8   : > { %v3642_v9 = vrot.slane %v3641_v50, 2  ;;  %v3648_v33 = vmax.f32 %v3646_v24, %v3647_v41  ;;  %v3655_v25 = vmax.f32 %v3653_v31, %v3654_v30  ;;  %v3662_v19 = vmax.f32 %v3660_v37, %v3661_v20  ;;  %v14181_v31 = vld [vmem:[#allocation2 + $0x1c] sm:$0xf] }
 0x2a9   : > { %v14173_v38 = vmax.f32 %v3503_v1, %v3504_v8  ;;  %v3511_v57 = vrot.slane %v3510_v55, 1  ;;  %v3518_v32 = vrot.slane %v3517_v47, 1  ;;  %v3524_v62 = vmax.f32 %v3522_v56, %v3523_v61  ;;  %v5874_v61 = vld [vmem:[#allocation2 + $0x14] sm:$0xf] }
 0x2aa   : > { %v3643_v53 = vmax.f32 %v3641_v50, %v3642_v9  ;;  %v3649_v14 = vrot.slane %v3648_v33, 2  ;;  %v3656_v7 = vrot.slane %v3655_v25, 2  ;;  %v5666_v27 = vrot.slane %v5664_v26, 4 }
 0x2ab   : > { %16688 = vst [vmem:[#allocation20_spill] sm:$0xff] %v14173_v38  ;;  %v14177_v4 = vmax.f32 %v3510_v55, %v3511_v57  ;;  %v14179_v45 = vmax.f32 %v3517_v47, %v3518_v32  ;;  %v3525_v35 = vrot.slane %v3524_v62, 1  ;;  %v3663_v8 = vrot.slane %v3662_v19, 2 }
 0x2ac   : > { %v3644_v41 = vrot.slane %v3643_v53, 1  ;;  %v3650_v30 = vmax.f32 %v3648_v33, %v3649_v14  ;;  %v3657_v24 = vmax.f32 %v3655_v25, %v3656_v7  ;;  %v5667_v56 = vshll.u32 %v14162_v6, 16 }
 0x2ad   : > { %16689 = vst [vmem:[#allocation21_spill] sm:$0xff] %v14177_v4  ;;  %16690 = vst [vmem:[#allocation22_spill] sm:$0xff] %v14179_v45  ;;  %v14183_v1 = vmax.f32 %v3524_v62, %v3525_v35  ;;  %v5673_v20 = vshll.u32 %v14175_v39, 16  ;;  %v5677_v28 = vshrl.u32 %v14175_v39, 16  ;;  %v3664_v47 = vmax.f32 %v3662_v19, %v3663_v8  ;;  %v14197_v8 = vld [vmem:[%s16633_s2] ss:$0 sm:$0xff] }
 0x2ae   : > { %v3645_v55 = vmax.f32 %v3643_v53, %v3644_v41  ;;  %v3651_v50 = vrot.slane %v3650_v30, 1  ;;  %v3658_v37 = vrot.slane %v3657_v24, 1  ;;  %v5669_v26 = vrot.slane %v5667_v56, 5 }
 0x2af   : > { %16691 = vst [vmem:[#allocation23_spill] sm:$0xff] %v14183_v1  ;;  %v5675_v9 = vrot.slane %v5673_v20, 5  ;;  %v5679_v33 = vrot.slane %v5677_v28, 4  ;;  %v5683_v25 = vshll.u32 %v14181_v31, 16  ;;  %v3665_v62 = vrot.slane %v3664_v47, 1 }
 0x2b0   : > { %v3652_v57 = vmax.f32 %v3650_v30, %v3651_v50  ;;  %v3659_v32 = vmax.f32 %v3657_v24, %v3658_v37  ;;  %v4327_v14 = vmax.f32 %v13987_v13, %v3645_v55  ;;  %v5670_v7 = vor.u32 %v5669_v26, %v5666_v27 }
 0x2b1   : > { %v5680_v35 = vor.u32 %v5679_v33, %v5675_v9  ;;  %v14190_v1 = vrot.slane %v5683_v25, 5  ;;  %v5895_v45 = vshrl.u32 %v5874_v61, 16  ;;  %v3666_v53 = vmax.f32 %v3664_v47, %v3665_v62  ;;  %v958_v25 = vpop.f32.mrf.mxu0 }
 0x2b2   : > { %v4328_v41 = vmax.f32 %v13994_v17, %v3652_v57  ;;  %v4329_v19 = vmax.f32 %v14001_v43, %v3659_v32  ;;  %v4461_v30 = vadd.f32 %v14197_v8, %v4327_v14  ;;  %v5671_v24 = vrot.slane %v5670_v7, 4 }
 0x2b3   : > { %v5681_v56 = vrot.slane %v5680_v35, 4  ;;  %v5897_v13 = vrot.slane %v5895_v45, 4  ;;  %v5898_v27 = vshll.u32 %v5874_v61, 16  ;;  %v4330_v20 = vmax.f32 %v14010_v11, %v3666_v53 }
 0x2b4   : > { %v4462_v28 = vadd.f32 %v14197_v8, %v4328_v41  ;;  %v4463_v55 = vadd.f32 %v14197_v8, %v4329_v19  ;;  %v4589_v17 = vmax.f32 %v4461_v30, 0.0  ;;  %v5676_v43 = vsel %vm14014_vm9, %v5671_v24, %v5675_v9 }
 0x2b5   : > { %v5686_v50 = vsel %vm14014_vm9, %v5681_v56, %v14190_v1  ;;  %v5900_v37 = vrot.slane %v5898_v27, 5  ;;  %v16692_v47 = vshll.u32 %v14125_v42, 16  ;;  %v4464_v45 = vadd.f32 %v14197_v8, %v4330_v20 }
 0x2b6   : > { %v4590_v61 = vmax.f32 %v4462_v28, 0.0  ;;  %v4591_v11 = vmax.f32 %v4463_v55, 0.0  ;;  %v11781_v33 = vpack.c.bf16 %v4589_v17, %v4589_v17  ;;  %v11367_v57 = vcombine.low %v5676_v43, %v5686_v50  ;;  %v12447_v43 = vpop.f32.mrf.mxu0 }
 0x2b7   : > { %v5906_v26 = vrot.slane %v16692_v47, 5  ;;  %v5901_v32 = vor.u32 %v5900_v37, %v5897_v13  ;;  %v16693_v9 = vshll.u32 %v14129_v59, 16  ;;  %v4592_v7 = vmax.f32 %v4464_v45, 0.0 }
 0x2b8   : > { %v11782_v35 = vpack.c.bf16 %v4590_v61, %v4590_v61  ;;  %v11783_v53 = vpack.c.bf16 %v4591_v11, %v4591_v11  ;;  %v5229_v41 = vunpack.c.l.b16 %v11781_v33  ;;  %7343 = vmatprep.mubr.bf16.mxu1 %v11367_v57  ;;  %v11359_v30 = vcombine.low %v14162_v6, %v14175_v39  ;;  %v12653_v11 = vld [vmem:[%s16634_s3 + $0xf8] sm:$0xff]  }
 0x2b9   : > { %v5911_v62 = vor.u32 %v14142_v54, %v5906_v26  ;;  %v14214_v14 = vrot.slane %v16693_v9, 5  ;;  %v5902_v42 = vrot.slane %v5901_v32, 4  ;;  %v1798_v24 = vcombine.high %v958_v25, %v958_v25  ;;  %v12654_v9 = vld [vmem:[%s16634_s3 + $0xb8] sm:$0xff]   ;;  %11973 = vmatprep.subr.bf16.mxu1 %v12653_v11 }
 0x2ba   : > { %v11784_v56 = vpack.c.bf16 %v4592_v7, %v4592_v7  ;;  %v5230_v27 = vunpack.c.l.b16 %v11782_v35  ;;  %v5231_v13 = vunpack.c.l.b16 %v11783_v53  ;;  %v14218_v20 = vrot.slane %v5229_v41, 7  ;;  %7344 = vmatmul.mubr.bf16.gmra.mxu1 %v11359_v30 }
 0x2bb   : > { %v5912_v19 = vrot.slane %v5911_v62, 4  ;;  %v5907_v54 = vsel %vm14014_vm9, %v5902_v42, %v5906_v26  ;;  %v1805_v55 = vrot.slane %v958_v25, %v13138_v40  ;;  %v1812_v17 = vrot.slane %v1798_v24, %v13138_v40  ;;  %v14238_v62 = vld [vmem:[#allocation2 + $0x20] sm:$0xf]  ;;  %11974 = vmatpush3.bf16.msra.mxu1 %v12654_v9 }
 0x2bc   : > { %v5232_v6 = vunpack.c.l.b16 %v11784_v56  ;;  %v14227_v39 = vrot.slane %v5230_v27, 6  ;;  %v14229_v50 = vrot.slane %v5231_v13, 5  ;;  %v1849_v32 = vcombine.high %v12447_v43, %v12447_v43 }
 0x2bd   : > { %v5917_v28 = vsel %vm14014_vm9, %v5912_v19, %v14214_v14  ;;  %v1813_v47 = vcombine.high %v1805_v55, %v1805_v55  ;;  %v1814_v45 = vcombine.high %v1812_v17, %v1812_v17  ;;  %v3583_v26 = vsel %vm2462_vm1, %v1805_v55, -inf }
 0x2be   : > { %v11389_v37 = vcombine.low %v5907_v54, %v5917_v28  ;;  %v3597_v61 = vsel %vm2462_vm1, %v1812_v17, -inf  ;;  %v14236_v33 = vrot.slane %v5232_v6, 4  ;;  %v3584_v25 = vrot.slane %v3583_v26, 4 }
 0x2bf   : > { %v3598_v57 = vrot.slane %v3597_v61, 4  ;;  %v3590_v7 = vsel %vm2462_vm1, %v1813_v47, -inf  ;;  %v3604_v35 = vsel %vm2462_vm1, %v1814_v45, -inf  ;;  %v1856_v53 = vrot.slane %v12447_v43, %v13138_v40 }
 0x2c0   : > { %7522 = vmatmul.mubr.bf16.vlgmr.msra.gmra.mxu0 %v11389_v37  ;;  %v16694_v41 = vrot.slane %v14129_v59, 5  ;;  %v3585_v19 = vmax.f32 %v3583_v26, %v3584_v25  ;;  %v3591_v30 = vrot.slane %v3590_v7, 4  ;;  %v3605_v56 = vrot.slane %v3604_v35, 4 }
 0x2c1   : > { %v3599_v24 = vmax.f32 %v3597_v61, %v3598_v57  ;;  %v1863_v27 = vrot.slane %v1849_v32, %v13138_v40  ;;  %v1864_v13 = vcombine.high %v1856_v53, %v1856_v53  ;;  %v3667_v54 = vsel %vm2462_vm1, %v1856_v53, -inf }
 0x2c2   : > { %v14248_v42 = vrot.slane %v16694_v41, 4  ;;  %v3586_v55 = vrot.slane %v3585_v19, 2  ;;  %v3592_v17 = vmax.f32 %v3590_v7, %v3591_v30  ;;  %v3606_v6 = vmax.f32 %v3604_v35, %v3605_v56 }
 0x2c3   : > { %v3600_v43 = vrot.slane %v3599_v24, 2  ;;  %v1865_v37 = vcombine.high %v1863_v27, %v1863_v27  ;;  %v3668_v47 = vrot.slane %v3667_v54, 4  ;;  %v3674_v45 = vsel %vm2462_vm1, %v1864_v13, -inf }
 0x2c4   : > { %v3681_v26 = vsel %vm2462_vm1, %v1863_v27, -inf  ;;  %v3587_v61 = vmax.f32 %v3585_v19, %v3586_v55  ;;  %v3593_v11 = vrot.slane %v3592_v17, 2  ;;  %v3607_v57 = vrot.slane %v3606_v6, 2 }
 0x2c5   : > { %v3601_v25 = vmax.f32 %v3599_v24, %v3600_v43  ;;  %v3669_v32 = vmax.f32 %v3667_v54, %v3668_v47  ;;  %v3675_v9 = vrot.slane %v3674_v45, 4  ;;  %v3682_v41 = vrot.slane %v3681_v26, 4 }
 0x2c6   : > { %v3688_v53 = vsel %vm2462_vm1, %v1865_v37, -inf  ;;  %v3588_v28 = vrot.slane %v3587_v61, 1  ;;  %v3594_v4 = vmax.f32 %v3592_v17, %v3593_v11  ;;  %v3608_v30 = vmax.f32 %v3606_v6, %v3607_v57 }
 0x2c7   : > { %v3602_v7 = vrot.slane %v3601_v25, 1  ;;  %v3670_v35 = vrot.slane %v3669_v32, 2  ;;  %v3676_v56 = vmax.f32 %v3674_v45, %v3675_v9  ;;  %v3683_v38 = vmax.f32 %v3681_v26, %v3682_v41 }
 0x2c8   : > { %v3689_v5 = vrot.slane %v3688_v53, 4  ;;  %v3589_v13 = vmax.f32 %v3587_v61, %v3588_v28  ;;  %v3595_v15 = vrot.slane %v3594_v4, 1  ;;  %v3609_v19 = vrot.slane %v3608_v30, 1 }
 0x2c9   : > { %v3603_v27 = vmax.f32 %v3601_v25, %v3602_v7  ;;  %v3671_v55 = vmax.f32 %v3669_v32, %v3670_v35  ;;  %v3677_v24 = vrot.slane %v3676_v56, 2  ;;  %v3684_v43 = vrot.slane %v3683_v38, 2 }
 0x2ca   : > { %v3690_v54 = vmax.f32 %v3688_v53, %v3689_v5  ;;  %v3596_v47 = vmax.f32 %v3594_v4, %v3595_v15  ;;  %v3610_v23 = vmax.f32 %v3608_v30, %v3609_v19  ;;  %v4319_v37 = vmax.f32 %v14046_v22, %v3589_v13 }
 0x2cb   : > { %v4321_v17 = vmax.f32 %v14050_v48, %v3603_v27  ;;  %v3672_v11 = vrot.slane %v3671_v55, 1  ;;  %v3678_v6 = vmax.f32 %v3676_v56, %v3677_v24  ;;  %v3685_v57 = vmax.f32 %v3683_v38, %v3684_v43 }
 0x2cc   : > { %v3691_v45 = vrot.slane %v3690_v54, 2  ;;  %v4320_v26 = vmax.f32 %v14048_v49, %v3596_v47  ;;  %v4322_v28 = vmax.f32 %v14054_v36, %v3610_v23  ;;  %v4453_v61 = vadd.f32 %v14197_v8, %v4319_v37 }
 0x2cd   : > { %v4455_v25 = vadd.f32 %v14197_v8, %v4321_v17  ;;  %v3673_v32 = vmax.f32 %v3671_v55, %v3672_v11  ;;  %v3679_v5 = vrot.slane %v3678_v6, 1  ;;  %v3686_v15 = vrot.slane %v3685_v57, 1  ;;  %v12655_v55 = vld [vmem:[%s16634_s3 + $0xf0] sm:$0xff]  }
 0x2ce   : > { %v3692_v4 = vmax.f32 %v3690_v54, %v3691_v45  ;;  %v4454_v22 = vadd.f32 %v14197_v8, %v4320_v26  ;;  %v4456_v48 = vadd.f32 %v14197_v8, %v4322_v28  ;;  %v4581_v9 = vmax.f32 %v4453_v61, 0.0  ;;  %11975 = vmatprep.subr.bf16.mxu1 %v12655_v55 }
 0x2cf   : > { %v4583_v41 = vmax.f32 %v4455_v25, 0.0  ;;  %v3680_v38 = vmax.f32 %v3678_v6, %v3679_v5  ;;  %v3687_v53 = vmax.f32 %v3685_v57, %v3686_v15  ;;  %v4331_v49 = vmax.f32 %v14061_v63, %v3673_v32  ;;  %v12656_v63 = vld [vmem:[%s16634_s3 + $0xb0] sm:$0xff]   ;;  %v14278_v32 = vld [vmem:[#allocation2 + $0x24] sm:$0x1]  ;;  %v961_v5 = vpop.f32.mrf.mxu0 }
 0x2d0   : > { %v3693_v7 = vrot.slane %v3692_v4, 1  ;;  %v4582_v36 = vmax.f32 %v4454_v22, 0.0  ;;  %v4584_v23 = vmax.f32 %v4456_v48, 0.0  ;;  %v11773_v30 = vpack.c.bf16 %v4581_v9, %v4581_v9  ;;  %11976 = vmatpush3.bf16.msra.mxu1 %v12656_v63 }
 0x2d1   : > { %v11775_v35 = vpack.c.bf16 %v4583_v41, %v4583_v41  ;;  %v4332_v13 = vmax.f32 %v14063_v18, %v3680_v38  ;;  %v4333_v27 = vmax.f32 %v14065_v29, %v3687_v53  ;;  %v4465_v19 = vadd.f32 %v14197_v8, %v4331_v49 }
 0x2d2   : > { %v3694_v56 = vmax.f32 %v3692_v4, %v3693_v7  ;;  %v11774_v24 = vpack.c.bf16 %v4582_v36, %v4582_v36  ;;  %v11776_v43 = vpack.c.bf16 %v4584_v23, %v4584_v23  ;;  %v5221_v54 = vunpack.c.l.b16 %v11773_v30 }
 0x2d3   : > { %v5223_v47 = vunpack.c.l.b16 %v11775_v35  ;;  %v4466_v18 = vadd.f32 %v14197_v8, %v4332_v13  ;;  %v4467_v29 = vadd.f32 %v14197_v8, %v4333_v27  ;;  %v4593_v17 = vmax.f32 %v4465_v19, 0.0 }
 0x2d4   : > { %v4334_v37 = vmax.f32 %v14071_v21, %v3694_v56  ;;  %v5222_v11 = vunpack.c.l.b16 %v11774_v24  ;;  %v5224_v6 = vunpack.c.l.b16 %v11776_v43  ;;  %v5402_v57 = vrot.slane %v5221_v54, 7 }
 0x2d5   : > { %v5405_v45 = vrot.slane %v5223_v47, 5  ;;  %v4594_v28 = vmax.f32 %v4466_v18, 0.0  ;;  %v4595_v61 = vmax.f32 %v4467_v29, 0.0  ;;  %v11785_v25 = vpack.c.bf16 %v4593_v17, %v4593_v17 }
 0x2d6   : > { %v4468_v26 = vadd.f32 %v14197_v8, %v4334_v37  ;;  %v5403_v21 = vrot.slane %v5222_v11, 6  ;;  %v5407_v15 = vrot.slane %v5224_v6, 4  ;;  %v16695_v4 = vrot.slane %v14238_v62, 5  ;;  %v12450_v37 = vpop.f32.mrf.mxu0 }
 0x2d7   : > { %v11786_v38 = vpack.c.bf16 %v4594_v28, %v4594_v28  ;;  %v11787_v53 = vpack.c.bf16 %v4595_v61, %v4595_v61  ;;  %v5233_v7 = vunpack.c.l.b16 %v11785_v25  ;;  %v6105_v36 = vrot.slane %v14278_v32, 5 }
 0x2d8   : > { %v6103_v22 = vsel %vm14137_vm13, %v14248_v42, %v16695_v4  ;;  %v16696_v48 = vmov %v16695_v4  ;;  %v4596_v41 = vmax.f32 %v4468_v26, 0.0  ;;  %v5404_v49 = vsel %vm5287_vm2, %v5403_v21, %v5402_v57 }
 0x2d9   : > { %v6104_v9 = vrot.slane %v16696_v48, 4  ;;  %v1815_v23 = vcombine.high %v961_v5, %v961_v5  ;;  %v1822_v30 = vrot.slane %v961_v5, %v13138_v40  ;;  %v5406_v35 = vsel %vm5290_vm3, %v5405_v45, %v5404_v49 }
 0x2da   : > { %v14291_v56 = vpack.c.bf16 %v4596_v41, %v4596_v41  ;;  %v5234_v13 = vunpack.c.l.b16 %v11786_v38  ;;  %v5235_v42 = vunpack.c.l.b16 %v11787_v53  ;;  %v14293_v27 = vrot.slane %v5233_v7, 3 }
 0x2db   : > { %v6106_v19 = vsel %vm14137_vm13, %v6104_v9, %v6105_v36  ;;  %v1829_v55 = vrot.slane %v1815_v23, %v13138_v40  ;;  %v1830_v24 = vcombine.high %v1822_v30, %v1822_v30  ;;  %v3611_v29 = vsel %vm2462_vm1, %v1822_v30, -inf }
 0x2dc   : > { %v5236_v43 = vunpack.c.l.b16 %v14291_v56  ;;  %v14299_v54 = vrot.slane %v5234_v13, 2  ;;  %v14301_v47 = vrot.slane %v5235_v42, 1  ;;  %v11398_v63 = vcombine.low %v6103_v22, %v6106_v19 }
 0x2dd   : > { %v1831_v18 = vcombine.high %v1829_v55, %v1829_v55  ;;  %v3618_v17 = vsel %vm2462_vm1, %v1830_v24, -inf  ;;  %v3625_v11 = vsel %vm2462_vm1, %v1829_v55, -inf  ;;  %v3612_v6 = vrot.slane %v3611_v29, 4 }
 0x2de   : > { %7529 = vmatprep.mubr.bf16.mxu0 %v11398_v63  ;;  %v3619_v57 = vrot.slane %v3618_v17, 4  ;;  %v3626_v45 = vrot.slane %v3625_v11, 4  ;;  %v14307_v26 = vsel %vm5293_vm4, %v5407_v15, %v5406_v35  ;;  %v1900_v61 = vcombine.high %v12450_v37, %v12450_v37 }
 0x2df   : > { %v3632_v28 = vsel %vm2462_vm1, %v1831_v18, -inf  ;;  %v1907_v25 = vrot.slane %v12450_v37, %v13138_v40  ;;  %v5687_v5 = vshrl.u32 %v14181_v31, 16  ;;  %v3613_v21 = vmax.f32 %v3611_v29, %v3612_v6 }
 0x2e0   : > { %v3620_v4 = vmax.f32 %v3618_v17, %v3619_v57  ;;  %v3627_v22 = vmax.f32 %v3625_v11, %v3626_v45  ;;  %v3633_v48 = vrot.slane %v3632_v28, 4  ;;  %v1914_v9 = vrot.slane %v1900_v61, %v13138_v40 }
 0x2e1   : > { %v1915_v41 = vcombine.high %v1907_v25, %v1907_v25  ;;  %v3751_v38 = vsel %vm2462_vm1, %v1907_v25, -inf  ;;  %v14314_v53 = vrot.slane %v5687_v5, 4  ;;  %v3614_v15 = vrot.slane %v3613_v21, 2 }
 0x2e2   : > { %v3621_v7 = vrot.slane %v3620_v4, 2  ;;  %v3628_v49 = vrot.slane %v3627_v22, 2  ;;  %v3634_v36 = vmax.f32 %v3632_v28, %v3633_v48  ;;  %v1916_v23 = vcombine.high %v1914_v9, %v1914_v9 }
 0x2e3   : > { %v3752_v30 = vrot.slane %v3751_v38, 4  ;;  %v3758_v35 = vsel %vm2462_vm1, %v1915_v41, -inf  ;;  %v3765_v13 = vsel %vm2462_vm1, %v1914_v9, -inf  ;;  %v3615_v42 = vmax.f32 %v3613_v21, %v3614_v15 }
 0x2e4   : > { %v3622_v19 = vmax.f32 %v3620_v4, %v3621_v7  ;;  %v3629_v55 = vmax.f32 %v3627_v22, %v3628_v49  ;;  %v3635_v24 = vrot.slane %v3634_v36, 2  ;;  %v3759_v37 = vrot.slane %v3758_v35, 4 }
 0x2e5   : > { %v3753_v63 = vmax.f32 %v3751_v38, %v3752_v30  ;;  %v3766_v18 = vrot.slane %v3765_v13, 4  ;;  %v3772_v29 = vsel %vm2462_vm1, %v1916_v23, -inf  ;;  %v3616_v17 = vrot.slane %v3615_v42, 1 }
 0x2e6   : > { %v3623_v11 = vrot.slane %v3622_v19, 1  ;;  %v3630_v6 = vrot.slane %v3629_v55, 1  ;;  %v3636_v57 = vmax.f32 %v3634_v36, %v3635_v24  ;;  %v3760_v28 = vmax.f32 %v3758_v35, %v3759_v37 }
 0x2e7   : > { %v3754_v45 = vrot.slane %v3753_v63, 2  ;;  %v3767_v61 = vmax.f32 %v3765_v13, %v3766_v18  ;;  %v3773_v25 = vrot.slane %v3772_v29, 4  ;;  %v3617_v5 = vmax.f32 %v3615_v42, %v3616_v17 }
 0x2e8   : > { %v3624_v48 = vmax.f32 %v3622_v19, %v3623_v11  ;;  %v3631_v9 = vmax.f32 %v3629_v55, %v3630_v6  ;;  %v3637_v21 = vrot.slane %v3636_v57, 1  ;;  %v3761_v22 = vrot.slane %v3760_v28, 2 }
 0x2e9   : > { %v3755_v4 = vmax.f32 %v3753_v63, %v3754_v45  ;;  %v3768_v41 = vrot.slane %v3767_v61, 2  ;;  %v3774_v38 = vmax.f32 %v3772_v29, %v3773_v25  ;;  %v4323_v7 = vmax.f32 %v14083_v0, %v3617_v5 }
 0x2ea   : > { %v3638_v15 = vmax.f32 %v3636_v57, %v3637_v21  ;;  %v4324_v49 = vmax.f32 %v14085_v12, %v3624_v48  ;;  %v4325_v23 = vmax.f32 %v14087_v52, %v3631_v9  ;;  %v3762_v30 = vmax.f32 %v3760_v28, %v3761_v22 }
 0x2eb   : > { %v3756_v36 = vrot.slane %v3755_v4, 1  ;;  %v3769_v35 = vmax.f32 %v3767_v61, %v3768_v41  ;;  %v3775_v13 = vrot.slane %v3774_v38, 2  ;;  %v4457_v19 = vadd.f32 %v14197_v8, %v4323_v7 }
 0x2ec   : > { %v4326_v42 = vmax.f32 %v14093_v3, %v3638_v15  ;;  %v4458_v55 = vadd.f32 %v14197_v8, %v4324_v49  ;;  %v4459_v24 = vadd.f32 %v14197_v8, %v4325_v23  ;;  %v3763_v37 = vrot.slane %v3762_v30, 1  ;;  %v14334_v23 = vld [vmem:[#allocation2 + $0x20] sm:$0xf] }
 0x2ed   : > { %v3757_v63 = vmax.f32 %v3755_v4, %v3756_v36  ;;  %v3770_v18 = vrot.slane %v3769_v35, 1  ;;  %v3776_v0 = vmax.f32 %v3774_v38, %v3775_v13  ;;  %v4585_v29 = vmax.f32 %v4457_v19, 0.0 }
 0x2ee   : > { %v4460_v12 = vadd.f32 %v14197_v8, %v4326_v42  ;;  %v4586_v52 = vmax.f32 %v4458_v55, 0.0  ;;  %v4587_v17 = vmax.f32 %v4459_v24, 0.0  ;;  %v3764_v11 = vmax.f32 %v3762_v30, %v3763_v37 }
 0x2ef   : > { %v3771_v6 = vmax.f32 %v3769_v35, %v3770_v18  ;;  %v3777_v57 = vrot.slane %v3776_v0, 1  ;;  %v4343_v3 = vmax.f32 %v14098_v16, %v3757_v63  ;;  %v11777_v28 = vpack.c.bf16 %v4585_v29, %v4585_v29 }
 0x2f0   : > { %v4588_v45 = vmax.f32 %v4460_v12, 0.0  ;;  %v11778_v61 = vpack.c.bf16 %v4586_v52, %v4586_v52  ;;  %v11779_v25 = vpack.c.bf16 %v4587_v17, %v4587_v17  ;;  %v4344_v48 = vmax.f32 %v14101_v60, %v3764_v11  ;;  %v5577_v52 = vld [vmem:[#allocation2 + $0x3c] sm:$0xf] }
 0x2f1   : > { %v3778_v5 = vmax.f32 %v3776_v0, %v3777_v57  ;;  %v4345_v9 = vmax.f32 %v14105_v44, %v3771_v6  ;;  %v4477_v21 = vadd.f32 %v14197_v8, %v4343_v3  ;;  %v5225_v22 = vunpack.c.l.b16 %v11777_v28 }
 0x2f2   : > { %v11780_v4 = vpack.c.bf16 %v4588_v45, %v4588_v45  ;;  %v5226_v41 = vunpack.c.l.b16 %v11778_v61  ;;  %v5227_v38 = vunpack.c.l.b16 %v11779_v25  ;;  %v4478_v7 = vadd.f32 %v14197_v8, %v4344_v48  ;;  %v5613_v45 = vld [vmem:[#allocation2 + $0x24] sm:$0x1]  ;;  %v974_v61 = vpop.f32.mrf.mxu0 }
 0x2f3   : > { %v4346_v15 = vmax.f32 %v14109_v10, %v3778_v5  ;;  %v4479_v16 = vadd.f32 %v14197_v8, %v4345_v9  ;;  %v4605_v49 = vmax.f32 %v4477_v21, 0.0  ;;  %v5409_v30 = vrot.slane %v5225_v22, 3 }
 0x2f4   : > { %v5228_v36 = vunpack.c.l.b16 %v11780_v4  ;;  %v5411_v60 = vrot.slane %v5226_v41, 2  ;;  %v5413_v35 = vrot.slane %v5227_v38, 1  ;;  %v4606_v13 = vmax.f32 %v4478_v7, 0.0 }
 0x2f5   : > { %v4480_v44 = vadd.f32 %v14197_v8, %v4346_v15  ;;  %v4607_v42 = vmax.f32 %v4479_v16, 0.0  ;;  %v11797_v19 = vpack.c.bf16 %v4605_v49, %v4605_v49  ;;  %v5410_v55 = vsel %vm5296_vm5, %v5409_v30, %v14307_v26  ;;  %v12451_v16 = vpop.f32.mrf.mxu0 }
 0x2f6   : > { %v5416_v10 = vsel %vm5305_vm8, %v14218_v20, %v5228_v36  ;;  %v5690_v24 = vor.u32 %v14314_v53, %v14190_v1  ;;  %v5693_v63 = vshll.u32 %v14334_v23, 16  ;;  %v5412_v37 = vsel %vm5299_vm6, %v5411_v60, %v5410_v55 }
 0x2f7   : > { %v5418_v18 = vsel %vm5287_vm2, %v14227_v39, %v5416_v10  ;;  %v4608_v0 = vmax.f32 %v4480_v44, 0.0  ;;  %v11798_v12 = vpack.c.bf16 %v4606_v13, %v4606_v13  ;;  %v5414_v29 = vsel %vm5302_vm7, %v5413_v35, %v5412_v37 }
 0x2f8   : > { %v5420_v26 = vsel %vm5290_vm3, %v14229_v50, %v5418_v18  ;;  %v11799_v17 = vpack.c.bf16 %v4607_v42, %v4607_v42  ;;  %v5245_v20 = vunpack.c.l.b16 %v11797_v19  ;;  %v5522_v53 = vpack.c.b16 %v5414_v29, %v5414_v29 }
 0x2f9   : > { %v5422_v1 = vsel %vm5293_vm4, %v14236_v33, %v5420_v26  ;;  %v11800_v11 = vpack.c.bf16 %v4608_v0, %v4608_v0  ;;  %v5246_v6 = vunpack.c.l.b16 %v11798_v12  ;;  %v5691_v28 = vrot.slane %v5690_v24, 4 }
 0x2fa   : > { %v5424_v57 = vsel %vm5296_vm5, %v14293_v27, %v5422_v1  ;;  %v5247_v39 = vunpack.c.l.b16 %v11799_v17  ;;  %v14354_v3 = vrot.slane %v5245_v20, 7  ;;  %v5578_v25 = vsel %vm13427_vm11, %v5522_v53, %v5577_v52 }
 0x2fb   : > { %v5426_v50 = vsel %vm5299_vm6, %v14299_v54, %v5424_v57  ;;  %v5248_v5 = vunpack.c.l.b16 %v11800_v11  ;;  %v14360_v33 = vrot.slane %v5246_v6, 6  ;;  %5579 = vst [vmem:[#allocation2 + $0x3c] sm:$0xf] %v5578_v25  ;;  %v5695_v9 = vrot.slane %v5693_v63, 5 }
 0x2fc   : > { %v5428_v48 = vsel %vm5302_vm7, %v14301_v47, %v5426_v50  ;;  %v14364_v27 = vrot.slane %v5247_v39, 5  ;;  %v5697_v21 = vshrl.u32 %v14334_v23, 16  ;;  %v5703_v41 = vshll.u32 %v5613_v45, 16 }
 0x2fd   : > { %v5523_v4 = vpack.c.b16 %v5428_v48, %v5428_v48  ;;  %v14367_v22 = vrot.slane %v5248_v5, 4  ;;  %v5918_v54 = vshrl.u32 %v14129_v59, 16  ;;  %v5696_v38 = vsel %vm14014_vm9, %v5691_v28, %v5695_v9 }
 0x2fe   : > { %v5699_v15 = vrot.slane %v5697_v21, 4  ;;  %v5924_v7 = vshll.u32 %v14238_v62, 16  ;;  %v5928_v47 = vshrl.u32 %v14238_v62, 16  ;;  %v5705_v49 = vrot.slane %v5703_v41, 5 }
 0x2ff   : > { %5580 = vst [vmem:[#allocation2 + $0x40] sm:$0xf] %v5523_v4  ;;  %v5920_v36 = vrot.slane %v5918_v54, 4  ;;  %v5934_v30 = vshll.u32 %v14278_v32, 16  ;;  %v11360_v60 = vcombine.low %v14181_v31, %v14334_v23  ;;  %v1866_v13 = vcombine.high %v974_v61, %v974_v61 }
 0x300   : > { %v5700_v35 = vor.u32 %v5699_v15, %v5695_v9  ;;  %v5926_v44 = vrot.slane %v5924_v7, 5  ;;  %v5930_v59 = vrot.slane %v5928_v47, 4  ;;  %v1873_v55 = vrot.slane %v974_v61, %v13138_v40 }
 0x301   : > { %v5921_v42 = vor.u32 %v5920_v36, %v14214_v14  ;;  %v5936_v19 = vrot.slane %v5934_v30, 5  ;;  %v1917_v10 = vcombine.high %v12451_v16, %v12451_v16  ;;  %v1880_v63 = vrot.slane %v1866_v13, %v13138_v40  ;;  %v12657_v36 = vld [vmem:[%s16634_s3 + $0xe8] sm:$0xff]  }
 0x302   : > { %v5701_v62 = vrot.slane %v5700_v35, 4  ;;  %v5931_v24 = vor.u32 %v5930_v59, %v5926_v44  ;;  %v1924_v37 = vrot.slane %v12451_v16, %v13138_v40  ;;  %v1881_v18 = vcombine.high %v1873_v55, %v1873_v55  ;;  %11977 = vmatprep.subr.bf16.mxu1 %v12657_v36 }
 0x303   : > { %v5922_v32 = vrot.slane %v5921_v42, 4  ;;  %v3695_v31 = vsel %vm2462_vm1, %v1873_v55, -inf  ;;  %v1931_v23 = vrot.slane %v1917_v10, %v13138_v40  ;;  %v1882_v12 = vcombine.high %v1880_v63, %v1880_v63 }
 0x304   : > { %v5706_v0 = vsel %vm14014_vm9, %v5701_v62, %v5705_v49  ;;  %v5932_v14 = vrot.slane %v5931_v24, 4  ;;  %v3696_v29 = vrot.slane %v3695_v31, 4  ;;  %v3702_v17 = vsel %vm2462_vm1, %v1881_v18, -inf }
 0x305   : > { %v11368_v26 = vcombine.low %v5696_v38, %v5706_v0  ;;  %v5927_v52 = vsel %vm14014_vm9, %v5922_v32, %v5926_v44  ;;  %v3709_v20 = vsel %vm2462_vm1, %v1880_v63, -inf  ;;  %v3703_v11 = vrot.slane %v3702_v17, 4 }
 0x306   : > { %v5937_v1 = vsel %vm14014_vm9, %v5932_v14, %v5936_v19  ;;  %v3697_v53 = vmax.f32 %v3695_v31, %v3696_v29  ;;  %v3710_v6 = vrot.slane %v3709_v20, 4  ;;  %v3716_v39 = vsel %vm2462_vm1, %v1882_v12, -inf }
 0x307   : > { %7351 = vmatprep.mubr.bf16.mxu1 %v11368_v26  ;;  %v11390_v57 = vcombine.low %v5927_v52, %v5937_v1  ;;  %v1932_v45 = vcombine.high %v1924_v37, %v1924_v37  ;;  %v1933_v28 = vcombine.high %v1931_v23, %v1931_v23  ;;  %v3704_v50 = vmax.f32 %v3702_v17, %v3703_v11  ;;  %v12659_v17 = vld [vmem:[%s16634_s3 + $0xa8] sm:$0xff]  }
 0x308   : > { %7352 = vmatmul.mubr.bf16.gmra.mxu1 %v11360_v60  ;;  %v3698_v61 = vrot.slane %v3697_v53, 2  ;;  %v3711_v25 = vmax.f32 %v3709_v20, %v3710_v6  ;;  %v3717_v5 = vrot.slane %v3716_v39, 4  ;;  %v3779_v48 = vsel %vm2462_vm1, %v1924_v37, -inf }
 0x309   : > { %7530 = vmatmul.mubr.bf16.gmra.mxu0 %v11390_v57  ;;  %v3786_v9 = vsel %vm2462_vm1, %v1932_v45, -inf  ;;  %v3793_v21 = vsel %vm2462_vm1, %v1931_v23, -inf  ;;  %v3800_v4 = vsel %vm2462_vm1, %v1933_v28, -inf  ;;  %v3705_v54 = vrot.slane %v3704_v50, 2  ;;  %11978 = vmatpush3.bf16.msra.mxu1 %v12659_v17 }
 0x30a   : > { %v3699_v41 = vmax.f32 %v3697_v53, %v3698_v61  ;;  %v3712_v38 = vrot.slane %v3711_v25, 2  ;;  %v3718_v15 = vmax.f32 %v3716_v39, %v3717_v5  ;;  %v3780_v7 = vrot.slane %v3779_v48, 4  ;;  %v16697_v53 = vld [vmem:[#allocation13_spill] sm:$0xff] }
 0x30b   : > { %v3787_v47 = vrot.slane %v3786_v9, 4  ;;  %v3794_v16 = vrot.slane %v3793_v21, 4  ;;  %v3801_v49 = vrot.slane %v3800_v4, 4  ;;  %v3706_v60 = vmax.f32 %v3704_v50, %v3705_v54 }
 0x30c   : > { %v3700_v30 = vrot.slane %v3699_v41, 1  ;;  %v3713_v35 = vmax.f32 %v3711_v25, %v3712_v38  ;;  %v3719_v44 = vrot.slane %v3718_v15, 2  ;;  %v3781_v59 = vmax.f32 %v3779_v48, %v3780_v7 }
 0x30d   : > { %v3788_v13 = vmax.f32 %v3786_v9, %v3787_v47  ;;  %v3795_v42 = vmax.f32 %v3793_v21, %v3794_v16  ;;  %v3802_v19 = vmax.f32 %v3800_v4, %v3801_v49  ;;  %v3707_v10 = vrot.slane %v3706_v60, 1  ;;  %v16700_v47 = vld [vmem:[#allocation17_spill] sm:$0xff]  ;;  %v16701_v49 = vld [vmem:[#allocation18_spill] sm:$0xff] }
 0x30e   : > { %v3701_v55 = vmax.f32 %v3699_v41, %v3700_v30  ;;  %v3714_v62 = vrot.slane %v3713_v35, 1  ;;  %v3720_v24 = vmax.f32 %v3718_v15, %v3719_v44  ;;  %v3782_v63 = vrot.slane %v3781_v59, 2  ;;  %v16699_v15 = vld [vmem:[#allocation15_spill] sm:$0xff] }
 0x30f   : > { %v3789_v37 = vrot.slane %v3788_v13, 2  ;;  %v3796_v32 = vrot.slane %v3795_v42, 2  ;;  %v3803_v18 = vrot.slane %v3802_v19, 2  ;;  %v3708_v31 = vmax.f32 %v3706_v60, %v3707_v10  ;;  %v16702_v30 = vld [vmem:[#allocation19_spill] sm:$0xff] }
 0x310   : > { %v3715_v23 = vmax.f32 %v3713_v35, %v3714_v62  ;;  %v3721_v0 = vrot.slane %v3720_v24, 1  ;;  %v4335_v14 = vmax.f32 %v14121_v51, %v3701_v55  ;;  %v3783_v12 = vmax.f32 %v3781_v59, %v3782_v63  ;;  %v16698_v51 = vld [vmem:[#allocation14_spill] sm:$0xff] }
 0x311   : > { %v3790_v29 = vmax.f32 %v3788_v13, %v3789_v37  ;;  %v3797_v26 = vmax.f32 %v3795_v42, %v3796_v32  ;;  %v3804_v52 = vmax.f32 %v3802_v19, %v3803_v18  ;;  %v4336_v1 = vmax.f32 %v14127_v34, %v3708_v31 }
 0x312   : > { %v3722_v20 = vmax.f32 %v3720_v24, %v3721_v0  ;;  %v4337_v11 = vmax.f32 %v16697_v53, %v3715_v23  ;;  %v4469_v6 = vadd.f32 %v14197_v8, %v4335_v14  ;;  %v3784_v57 = vrot.slane %v3783_v12, 1  ;;  %v977_v0 = vpop.f32.mrf.mxu0 }
 0x313   : > { %v3791_v39 = vrot.slane %v3790_v29, 1  ;;  %v3798_v45 = vrot.slane %v3797_v26, 1  ;;  %v3805_v28 = vrot.slane %v3804_v52, 1  ;;  %v4470_v50 = vadd.f32 %v14197_v8, %v4336_v1  ;;  %v5583_v1 = vld [vmem:[#allocation2 + $0x4c] sm:$0x1] }
 0x314   : > { %v4338_v61 = vmax.f32 %v16698_v51, %v3722_v20  ;;  %v4471_v25 = vadd.f32 %v14197_v8, %v4337_v11  ;;  %v4597_v5 = vmax.f32 %v4469_v6, 0.0  ;;  %v3785_v48 = vmax.f32 %v3783_v12, %v3784_v57  ;;  %v12454_v51 = vpop.f32.mrf.mxu0 }
 0x315   : > { %v3792_v9 = vmax.f32 %v3790_v29, %v3791_v39  ;;  %v3799_v21 = vmax.f32 %v3797_v26, %v3798_v45  ;;  %v3806_v34 = vmax.f32 %v3804_v52, %v3805_v28  ;;  %v4598_v41 = vmax.f32 %v4470_v50, 0.0 }
 0x316   : > { %v4472_v4 = vadd.f32 %v14197_v8, %v4338_v61  ;;  %v4599_v54 = vmax.f32 %v4471_v25, 0.0  ;;  %v11789_v38 = vpack.c.bf16 %v4597_v5, %v4597_v5  ;;  %v4347_v7 = vmax.f32 %v16699_v15, %v3785_v48 }
 0x317   : > { %v4348_v16 = vmax.f32 %v16700_v47, %v3792_v9  ;;  %v4349_v36 = vmax.f32 %v16701_v49, %v3799_v21  ;;  %v4350_v60 = vmax.f32 %v16702_v30, %v3806_v34  ;;  %v11790_v44 = vpack.c.bf16 %v4598_v41, %v4598_v41  ;;  %v990_v49 = vpop.f32.mrf.mxu0 }
 0x318   : > { %v4600_v35 = vmax.f32 %v4472_v4, 0.0  ;;  %v11791_v59 = vpack.c.bf16 %v4599_v54, %v4599_v54  ;;  %v5237_v13 = vunpack.c.l.b16 %v11789_v38  ;;  %v4481_v42 = vadd.f32 %v14197_v8, %v4347_v7 }
 0x319   : > { %v4482_v19 = vadd.f32 %v14197_v8, %v4348_v16  ;;  %v4483_v55 = vadd.f32 %v14197_v8, %v4349_v36  ;;  %v4484_v10 = vadd.f32 %v14197_v8, %v4350_v60  ;;  %v5238_v24 = vunpack.c.l.b16 %v11790_v44 }
 0x31a   : > { %v11792_v62 = vpack.c.bf16 %v4600_v35, %v4600_v35  ;;  %v5239_v63 = vunpack.c.l.b16 %v11791_v59  ;;  %v5429_v37 = vrot.slane %v5237_v13, 7  ;;  %v4609_v32 = vmax.f32 %v4481_v42, 0.0 }
 0x31b   : > { %v4610_v18 = vmax.f32 %v4482_v19, 0.0  ;;  %v4611_v31 = vmax.f32 %v4483_v55, 0.0  ;;  %v4612_v23 = vmax.f32 %v4484_v10, 0.0  ;;  %v5431_v29 = vrot.slane %v5238_v24, 6 }
 0x31c   : > { %v5240_v14 = vunpack.c.l.b16 %v11792_v62  ;;  %v5430_v12 = vsel %vm5305_vm8, %v5429_v37, %v5236_v43  ;;  %v5433_v26 = vrot.slane %v5239_v63, 5  ;;  %v11801_v52 = vpack.c.bf16 %v4609_v32, %v4609_v32 }
 0x31d   : > { %v11802_v17 = vpack.c.bf16 %v4610_v18, %v4610_v18  ;;  %v11803_v20 = vpack.c.bf16 %v4611_v31, %v4611_v31  ;;  %v11839_v8 = vpack.c.bf16 %v4612_v23, %v4612_v23  ;;  %v5432_v53 = vsel %vm5287_vm2, %v5431_v29, %v5430_v12 }
 0x31e   : > { %v5435_v11 = vrot.slane %v5240_v14, 4  ;;  %v1883_v6 = vcombine.high %v977_v0, %v977_v0  ;;  %v1890_v57 = vrot.slane %v977_v0, %v13138_v40  ;;  %v5434_v39 = vsel %vm5290_vm3, %v5433_v26, %v5432_v53 }
 0x31f   : > { %v5249_v45 = vunpack.c.l.b16 %v11801_v52  ;;  %v5250_v28 = vunpack.c.l.b16 %v11802_v17  ;;  %v5251_v56 = vunpack.c.l.b16 %v11803_v20  ;;  %v5584_v61 = vsel %vm13535_vm14, %v11839_v8, %v5583_v1 }
 0x320   : > { %v1897_v50 = vrot.slane %v1883_v6, %v13138_v40  ;;  %v1898_v25 = vcombine.high %v1890_v57, %v1890_v57  ;;  %v3723_v5 = vsel %vm2462_vm1, %v1890_v57, -inf  ;;  %5585 = vst [vmem:[#allocation2 + $0x4c] sm:$0x1] %v5584_v61  ;;  %v14437_v38 = vsel %vm5293_vm4, %v5435_v11, %v5434_v39 }
 0x321   : > { %v14428_v48 = vrot.slane %v5249_v45, 3  ;;  %v14430_v9 = vrot.slane %v5250_v28, 2  ;;  %v14432_v21 = vrot.slane %v5251_v56, 1  ;;  %v3724_v34 = vrot.slane %v3723_v5, 4 }
 0x322   : > { %v1899_v4 = vcombine.high %v1897_v50, %v1897_v50  ;;  %v3730_v41 = vsel %vm2462_vm1, %v1898_v25, -inf  ;;  %v3737_v54 = vsel %vm2462_vm1, %v1897_v50, -inf  ;;  %v1968_v16 = vcombine.high %v12454_v51, %v12454_v51  ;;  %v16704_v50 = vld [vmem:[#allocation20_spill] sm:$0xff] }
 0x323   : > { %v3725_v15 = vmax.f32 %v3723_v5, %v3724_v34  ;;  %v3731_v7 = vrot.slane %v3730_v41, 4  ;;  %v3738_v47 = vrot.slane %v3737_v54, 4  ;;  %v1975_v30 = vrot.slane %v12454_v51, %v13138_v40 }
 0x324   : > { %v3744_v36 = vsel %vm2462_vm1, %v1899_v4, -inf  ;;  %v1934_v60 = vcombine.high %v990_v49, %v990_v49  ;;  %v14442_v35 = vrot.slane %v990_v49, %v13138_v40  ;;  %v1982_v19 = vrot.slane %v1968_v16, %v13138_v40  ;;  %v14458_v49 = vld [vmem:[%s16633_s2] ss:$0 sm:$0xff] }
 0x325   : > { %v3726_v44 = vrot.slane %v3725_v15, 2  ;;  %v3732_v59 = vmax.f32 %v3730_v41, %v3731_v7  ;;  %v3739_v13 = vmax.f32 %v3737_v54, %v3738_v47  ;;  %v3745_v42 = vrot.slane %v3744_v36, 4  ;;  %v16706_v47 = vld [vmem:[#allocation22_spill] sm:$0xff] }
 0x326   : > { %v1983_v55 = vcombine.high %v1975_v30, %v1975_v30  ;;  %v3863_v10 = vsel %vm2462_vm1, %v1975_v30, -inf  ;;  %v14447_v62 = vrot.slane %v1934_v60, %v13138_v40  ;;  %v1984_v18 = vcombine.high %v1982_v19, %v1982_v19 }
 0x327   : > { %v3727_v24 = vmax.f32 %v3725_v15, %v3726_v44  ;;  %v3733_v63 = vrot.slane %v3732_v59, 2  ;;  %v3740_v37 = vrot.slane %v3739_v13, 2  ;;  %v3746_v32 = vmax.f32 %v3744_v36, %v3745_v42  ;;  %v16705_v15 = vld [vmem:[#allocation21_spill] sm:$0xff] }
 0x328   : > { %v3864_v31 = vrot.slane %v3863_v10, 4  ;;  %v3870_v23 = vsel %vm2462_vm1, %v1983_v55, -inf  ;;  %v3877_v0 = vsel %vm2462_vm1, %v1982_v19, -inf  ;;  %v3884_v8 = vsel %vm2462_vm1, %v1984_v18, -inf }
 0x329   : > { %v3728_v14 = vrot.slane %v3727_v24, 1  ;;  %v3734_v12 = vmax.f32 %v3732_v59, %v3733_v63  ;;  %v3741_v29 = vmax.f32 %v3739_v13, %v3740_v37  ;;  %v3747_v26 = vrot.slane %v3746_v32, 2  ;;  %v16707_v13 = vld [vmem:[#allocation23_spill] sm:$0xff] }
 0x32a   : > { %v3865_v52 = vmax.f32 %v3863_v10, %v3864_v31  ;;  %v3871_v17 = vrot.slane %v3870_v23, 4  ;;  %v3878_v20 = vrot.slane %v3877_v0, 4  ;;  %v3885_v28 = vrot.slane %v3884_v8, 4 }
 0x32b   : > { %v3729_v1 = vmax.f32 %v3727_v24, %v3728_v14  ;;  %v3735_v53 = vrot.slane %v3734_v12, 1  ;;  %v3742_v11 = vrot.slane %v3741_v29, 1  ;;  %v3748_v6 = vmax.f32 %v3746_v32, %v3747_v26 }
 0x32c   : > { %v3866_v57 = vrot.slane %v3865_v52, 2  ;;  %v3872_v39 = vmax.f32 %v3870_v23, %v3871_v17  ;;  %v3879_v45 = vmax.f32 %v3877_v0, %v3878_v20  ;;  %v3886_v41 = vmax.f32 %v3884_v8, %v3885_v28 }
 0x32d   : > { %v3736_v56 = vmax.f32 %v3734_v12, %v3735_v53  ;;  %v3743_v51 = vmax.f32 %v3741_v29, %v3742_v11  ;;  %v3749_v61 = vrot.slane %v3748_v6, 1  ;;  %v4339_v25 = vmax.f32 %v16704_v50, %v3729_v1 }
 0x32e   : > { %v3867_v5 = vmax.f32 %v3865_v52, %v3866_v57  ;;  %v3873_v34 = vrot.slane %v3872_v39, 2  ;;  %v3880_v4 = vrot.slane %v3879_v45, 2  ;;  %v3887_v59 = vrot.slane %v3886_v41, 2 }
 0x32f   : > { %v3750_v54 = vmax.f32 %v3748_v6, %v3749_v61  ;;  %v4340_v7 = vmax.f32 %v16705_v15, %v3736_v56  ;;  %v4341_v16 = vmax.f32 %v16706_v47, %v3743_v51  ;;  %v4473_v36 = vadd.f32 %v14458_v49, %v4339_v25 }
 0x330   : > { %v3868_v30 = vrot.slane %v3867_v5, 1  ;;  %v3874_v60 = vmax.f32 %v3872_v39, %v3873_v34  ;;  %v3881_v44 = vmax.f32 %v3879_v45, %v3880_v4  ;;  %v3888_v32 = vmax.f32 %v3886_v41, %v3887_v59 }
 0x331   : > { %v4342_v42 = vmax.f32 %v16707_v13, %v3750_v54  ;;  %v4474_v19 = vadd.f32 %v14458_v49, %v4340_v7  ;;  %v4475_v55 = vadd.f32 %v14458_v49, %v4341_v16  ;;  %v4601_v10 = vmax.f32 %v4473_v36, 0.0  ;;  %v12455_v7 = vpop.f32.mrf.mxu0 }
 0x332   : > { %v14464_v24 = vmax.f32 %v3867_v5, %v3868_v30  ;;  %v3875_v63 = vrot.slane %v3874_v60, 1  ;;  %v3882_v37 = vrot.slane %v3881_v44, 1  ;;  %v3889_v29 = vrot.slane %v3888_v32, 1 }
 0x333   : > { %v4476_v18 = vadd.f32 %v14458_v49, %v4342_v42  ;;  %v4602_v31 = vmax.f32 %v4474_v19, 0.0  ;;  %v4603_v23 = vmax.f32 %v4475_v55, 0.0  ;;  %v11793_v0 = vpack.c.bf16 %v4601_v10, %v4601_v10 }
 0x334   : > { %v14467_v14 = vmax.f32 %v3874_v60, %v3875_v63  ;;  %v14469_v12 = vmax.f32 %v3881_v44, %v3882_v37  ;;  %v1949_v26 = vcombine.high %v14442_v35, %v14442_v35  ;;  %v14473_v1 = vmax.f32 %v3888_v32, %v3889_v29 }
 0x335   : > { %v4604_v52 = vmax.f32 %v4476_v18, 0.0  ;;  %v11794_v17 = vpack.c.bf16 %v4602_v31, %v4602_v31  ;;  %v11795_v20 = vpack.c.bf16 %v4603_v23, %v4603_v23  ;;  %v5241_v8 = vunpack.c.l.b16 %v11793_v0 }
 0x336   : > { %v1950_v53 = vcombine.high %v14447_v62, %v14447_v62  ;;  %v3807_v11 = vsel %vm2462_vm1, %v14442_v35, -inf  ;;  %v3814_v6 = vsel %vm2462_vm1, %v1949_v26, -inf  ;;  %v3821_v61 = vsel %vm2462_vm1, %v14447_v62, -inf }
 0x337   : > { %v11796_v57 = vpack.c.bf16 %v4604_v52, %v4604_v52  ;;  %v5242_v39 = vunpack.c.l.b16 %v11794_v17  ;;  %v5243_v45 = vunpack.c.l.b16 %v11795_v20  ;;  %v5437_v28 = vrot.slane %v5241_v8, 3 }
 0x338   : > { %v3808_v56 = vrot.slane %v3807_v11, 4  ;;  %v3815_v51 = vrot.slane %v3814_v6, 4  ;;  %v3828_v50 = vsel %vm2462_vm1, %v1950_v53, -inf  ;;  %v3822_v54 = vrot.slane %v3821_v61, 4  ;;  %v993_v53 = vpop.f32.mrf.mxu0 }
 0x339   : > { %v5244_v25 = vunpack.c.l.b16 %v11796_v57  ;;  %v5438_v5 = vsel %vm5296_vm5, %v5437_v28, %v14437_v38  ;;  %v5439_v34 = vrot.slane %v5242_v39, 2  ;;  %v5441_v4 = vrot.slane %v5243_v45, 1 }
 0x33a   : > { %v3809_v35 = vmax.f32 %v3807_v11, %v3808_v56  ;;  %v3816_v41 = vmax.f32 %v3814_v6, %v3815_v51  ;;  %v3829_v15 = vrot.slane %v3828_v50, 4  ;;  %v1985_v36 = vcombine.high %v12455_v7, %v12455_v7 }
 0x33b   : > { %v5440_v47 = vsel %vm5299_vm6, %v5439_v34, %v5438_v5  ;;  %v5444_v16 = vsel %vm5305_vm8, %v14354_v3, %v5244_v25  ;;  %v1992_v62 = vrot.slane %v12455_v7, %v13138_v40  ;;  %v3823_v42 = vmax.f32 %v3821_v61, %v3822_v54 }
 0x33c   : > { %v5442_v30 = vsel %vm5302_vm7, %v5441_v4, %v5440_v47  ;;  %v5446_v38 = vsel %vm5287_vm2, %v14360_v33, %v5444_v16  ;;  %v3810_v60 = vrot.slane %v3809_v35, 2  ;;  %v3817_v44 = vrot.slane %v3816_v41, 2 }
 0x33d   : > { %v5448_v59 = vsel %vm5290_vm3, %v14364_v27, %v5446_v38  ;;  %v5524_v13 = vpack.c.b16 %v5442_v30, %v5442_v30  ;;  %v3830_v19 = vmax.f32 %v3828_v50, %v3829_v15  ;;  %v1999_v63 = vrot.slane %v1985_v36, %v13138_v40 }
 0x33e   : > { %v5450_v55 = vsel %vm5293_vm4, %v14367_v22, %v5448_v59  ;;  %v3811_v3 = vmax.f32 %v3809_v35, %v3810_v60  ;;  %v3818_v10 = vmax.f32 %v3816_v41, %v3817_v44  ;;  %v3824_v33 = vrot.slane %v3823_v42, 2  ;;  %v12458_v35 = vpop.f32.mrf.mxu0 }
 0x33f   : > { %v5452_v37 = vsel %vm5296_vm5, %v14428_v48, %v5450_v55  ;;  %5581 = vst [vmem:[#allocation2 + $0x44] sm:$0xf] %v5524_v13  ;;  %v3831_v32 = vrot.slane %v3830_v19, 2  ;;  %v2000_v18 = vcombine.high %v1992_v62, %v1992_v62  ;;  %v2001_v0 = vcombine.high %v1999_v63, %v1999_v63 }
 0x340   : > { %v5454_v27 = vsel %vm5299_vm6, %v14430_v9, %v5452_v37  ;;  %v3812_v31 = vrot.slane %v3811_v3, 1  ;;  %v3819_v23 = vrot.slane %v3818_v10, 1  ;;  %v3825_v29 = vmax.f32 %v3823_v42, %v3824_v33 }
 0x341   : > { %v5456_v22 = vsel %vm5302_vm7, %v14432_v21, %v5454_v27  ;;  %v3832_v26 = vmax.f32 %v3830_v19, %v3831_v32  ;;  %v3891_v52 = vsel %vm2462_vm1, %v1992_v62, -inf  ;;  %v3898_v9 = vsel %vm2462_vm1, %v2000_v18, -inf }
 0x342   : > { %v5525_v17 = vpack.c.b16 %v5456_v22, %v5456_v22  ;;  %v14504_v20 = vmax.f32 %v3811_v3, %v3812_v31  ;;  %v14506_v48 = vmax.f32 %v3818_v10, %v3819_v23  ;;  %v3892_v8 = vrot.slane %v3891_v52, 4 }
 0x343   : > { %v3826_v11 = vrot.slane %v3825_v29, 1  ;;  %v3833_v6 = vrot.slane %v3832_v26, 1  ;;  %v3905_v57 = vsel %vm2462_vm1, %v1999_v63, -inf  ;;  %v3899_v21 = vrot.slane %v3898_v9, 4 }
 0x344   : > { %5582 = vst [vmem:[#allocation2 + $0x48] sm:$0xf] %v5525_v17  ;;  %v3893_v39 = vmax.f32 %v3891_v52, %v3892_v8  ;;  %v3906_v45 = vrot.slane %v3905_v57, 4  ;;  %v3912_v28 = vsel %vm2462_vm1, %v2001_v0, -inf  ;;  %v1951_v50 = vcombine.high %v993_v53, %v993_v53 }
 0x345   : > { %v14511_v56 = vmax.f32 %v3825_v29, %v3826_v11  ;;  %v14513_v51 = vmax.f32 %v3832_v26, %v3833_v6  ;;  %v3913_v61 = vrot.slane %v3912_v28, 4  ;;  %v3900_v5 = vmax.f32 %v3898_v9, %v3899_v21 }
 0x346   : > { %v3894_v25 = vrot.slane %v3893_v39, 2  ;;  %v3907_v34 = vmax.f32 %v3905_v57, %v3906_v45  ;;  %v1958_v4 = vrot.slane %v993_v53, %v13138_v40  ;;  %v1965_v54 = vrot.slane %v1951_v50, %v13138_v40 }
 0x347   : > { %v3914_v41 = vmax.f32 %v3912_v28, %v3913_v61  ;;  %v2036_v15 = vcombine.high %v12458_v35, %v12458_v35  ;;  %v2043_v7 = vrot.slane %v12458_v35, %v13138_v40  ;;  %v3901_v16 = vrot.slane %v3900_v5, 2 }
 0x348   : > { %v3895_v47 = vmax.f32 %v3893_v39, %v3894_v25  ;;  %v3908_v36 = vrot.slane %v3907_v34, 2  ;;  %v1966_v62 = vcombine.high %v1958_v4, %v1958_v4  ;;  %v1967_v38 = vcombine.high %v1965_v54, %v1965_v54 }
 0x349   : > { %v3915_v30 = vrot.slane %v3914_v41, 2  ;;  %v3835_v60 = vsel %vm2462_vm1, %v1958_v4, -inf  ;;  %v3849_v44 = vsel %vm2462_vm1, %v1965_v54, -inf  ;;  %v3902_v13 = vmax.f32 %v3900_v5, %v3901_v16 }
 0x34a   : > { %v3896_v59 = vrot.slane %v3895_v47, 1  ;;  %v3909_v42 = vmax.f32 %v3907_v34, %v3908_v36  ;;  %v3836_v19 = vrot.slane %v3835_v60, 4  ;;  %v3842_v3 = vsel %vm2462_vm1, %v1966_v62, -inf  ;;  %v1006_v36 = vpop.f32.mrf.mxu0 }
 0x34b   : > { %v3916_v55 = vmax.f32 %v3914_v41, %v3915_v30  ;;  %v3850_v10 = vrot.slane %v3849_v44, 4  ;;  %v3856_v63 = vsel %vm2462_vm1, %v1967_v38, -inf  ;;  %v3903_v33 = vrot.slane %v3902_v13, 1 }
 0x34c   : > { %v14522_v37 = vmax.f32 %v3895_v47, %v3896_v59  ;;  %v3910_v32 = vrot.slane %v3909_v42, 1  ;;  %v3837_v18 = vmax.f32 %v3835_v60, %v3836_v19  ;;  %v3843_v31 = vrot.slane %v3842_v3, 4 }
 0x34d   : > { %v3917_v27 = vrot.slane %v3916_v55, 1  ;;  %v3851_v23 = vmax.f32 %v3849_v44, %v3850_v10  ;;  %v3857_v0 = vrot.slane %v3856_v63, 4  ;;  %v14524_v22 = vmax.f32 %v3902_v13, %v3903_v33  ;;  %v12660_v44 = vld [vmem:[%s16634_s3 + $0xe0] sm:$0xff]  }
 0x34e   : > { %v14526_v29 = vmax.f32 %v3909_v42, %v3910_v32  ;;  %v3838_v26 = vrot.slane %v3837_v18, 2  ;;  %v2050_v52 = vrot.slane %v2036_v15, %v13138_v40  ;;  %v3844_v8 = vmax.f32 %v3842_v3, %v3843_v31  ;;  %11979 = vmatprep.subr.bf16.mxu1 %v12660_v44  ;;  %v12459_v31 = vpop.f32.mrf.mxu0 }
 0x34f   : > { %v14529_v17 = vmax.f32 %v3916_v55, %v3917_v27  ;;  %v3852_v53 = vrot.slane %v3851_v23, 2  ;;  %v3858_v11 = vmax.f32 %v3856_v63, %v3857_v0  ;;  %v2051_v9 = vcombine.high %v2043_v7, %v2043_v7 }
 0x350   : > { %v3839_v6 = vmax.f32 %v3837_v18, %v3838_v26  ;;  %v2052_v57 = vcombine.high %v2050_v52, %v2050_v52  ;;  %v3975_v39 = vsel %vm2462_vm1, %v2043_v7, -inf  ;;  %v3845_v21 = vrot.slane %v3844_v8, 2 }
 0x351   : > { %v3853_v45 = vmax.f32 %v3851_v23, %v3852_v53  ;;  %v3859_v28 = vrot.slane %v3858_v11, 2  ;;  %v3976_v61 = vrot.slane %v3975_v39, 4  ;;  %v3982_v25 = vsel %vm2462_vm1, %v2051_v9, -inf  ;;  %v12662_v23 = vld [vmem:[%s16634_s3 + $0xa0] sm:$0xff]  }
 0x352   : > { %v3840_v50 = vrot.slane %v3839_v6, 1  ;;  %v3989_v5 = vsel %vm2462_vm1, %v2050_v52, -inf  ;;  %v3996_v34 = vsel %vm2462_vm1, %v2052_v57, -inf  ;;  %v3846_v4 = vmax.f32 %v3844_v8, %v3845_v21  ;;  %11980 = vmatpush3.bf16.msra.mxu1 %v12662_v23 }
 0x353   : > { %v3854_v35 = vrot.slane %v3853_v45, 1  ;;  %v3860_v41 = vmax.f32 %v3858_v11, %v3859_v28  ;;  %v3977_v54 = vmax.f32 %v3975_v39, %v3976_v61  ;;  %v3983_v47 = vrot.slane %v3982_v25, 4 }
 0x354   : > { %v14535_v15 = vmax.f32 %v3839_v6, %v3840_v50  ;;  %v3990_v16 = vrot.slane %v3989_v5, 4  ;;  %v3997_v7 = vrot.slane %v3996_v34, 4  ;;  %v3847_v62 = vrot.slane %v3846_v4, 1 }
 0x355   : > { %v14537_v30 = vmax.f32 %v3853_v45, %v3854_v35  ;;  %v3861_v38 = vrot.slane %v3860_v41, 1  ;;  %v3978_v60 = vrot.slane %v3977_v54, 2  ;;  %v3984_v59 = vmax.f32 %v3982_v25, %v3983_v47 }
 0x356   : > { %v3991_v13 = vmax.f32 %v3989_v5, %v3990_v16  ;;  %v3998_v42 = vmax.f32 %v3996_v34, %v3997_v7  ;;  %v2002_v19 = vcombine.high %v1006_v36, %v1006_v36  ;;  %v14542_v55 = vmax.f32 %v3846_v4, %v3847_v62 }
 0x357   : > { %v14544_v3 = vmax.f32 %v3860_v41, %v3861_v38  ;;  %v3979_v10 = vmax.f32 %v3977_v54, %v3978_v60  ;;  %v2009_v63 = vrot.slane %v1006_v36, %v13138_v40  ;;  %v3985_v33 = vrot.slane %v3984_v59, 2  ;;  %v6071_v41 = vld [vmem:[#allocation2 + $0x28] sm:$0xe] }
 0x358   : > { %v3992_v32 = vrot.slane %v3991_v13, 2  ;;  %v3999_v18 = vrot.slane %v3998_v42, 2  ;;  %v2016_v27 = vrot.slane %v2002_v19, %v13138_v40  ;;  %v2053_v8 = vcombine.high %v12459_v31, %v12459_v31 }
 0x359   : > { %v3980_v0 = vrot.slane %v3979_v10, 1  ;;  %v2017_v26 = vcombine.high %v2009_v63, %v2009_v63  ;;  %v3919_v52 = vsel %vm2462_vm1, %v2009_v63, -inf  ;;  %v3986_v53 = vmax.f32 %v3984_v59, %v3985_v33 }
 0x35a   : > { %v3993_v11 = vmax.f32 %v3991_v13, %v3992_v32  ;;  %v4000_v6 = vmax.f32 %v3998_v42, %v3999_v18  ;;  %v2018_v9 = vcombine.high %v2016_v27, %v2016_v27  ;;  %v3920_v39 = vrot.slane %v3919_v52, 4 }
 0x35b   : > { %v14552_v57 = vmax.f32 %v3979_v10, %v3980_v0  ;;  %v3926_v21 = vsel %vm2462_vm1, %v2017_v26, -inf  ;;  %v3933_v45 = vsel %vm2462_vm1, %v2016_v27, -inf  ;;  %v3987_v28 = vrot.slane %v3986_v53, 1 }
 0x35c   : > { %v3994_v61 = vrot.slane %v3993_v11, 1  ;;  %v4001_v50 = vrot.slane %v4000_v6, 1  ;;  %v3927_v25 = vrot.slane %v3926_v21, 4  ;;  %v3921_v5 = vmax.f32 %v3919_v52, %v3920_v39 }
 0x35d   : > { %v3934_v34 = vrot.slane %v3933_v45, 4  ;;  %v3940_v4 = vsel %vm2462_vm1, %v2018_v9, -inf  ;;  %v2060_v35 = vrot.slane %v12459_v31, %v13138_v40  ;;  %v14558_v54 = vmax.f32 %v3986_v53, %v3987_v28  ;;  %v14569_v9 = vld [vmem:[#allocation2 + $0x2c] sm:$0xf] }
 0x35e   : > { %v14560_v47 = vmax.f32 %v3993_v11, %v3994_v61  ;;  %v14562_v16 = vmax.f32 %v4000_v6, %v4001_v50  ;;  %v3928_v7 = vmax.f32 %v3926_v21, %v3927_v25  ;;  %v3922_v36 = vrot.slane %v3921_v5, 2  ;;  %v14573_v61 = vld [vmem:[#allocation2 + $0x30] sm:$0xf] }
 0x35f   : > { %v3935_v62 = vmax.f32 %v3933_v45, %v3934_v34  ;;  %v3941_v38 = vrot.slane %v3940_v4, 4  ;;  %v2067_v60 = vrot.slane %v2053_v8, %v13138_v40  ;;  %v2068_v59 = vcombine.high %v2060_v35, %v2060_v35 }
 0x360   : > { %v3929_v44 = vrot.slane %v3928_v7, 2  ;;  %v4003_v13 = vsel %vm2462_vm1, %v2060_v35, -inf  ;;  %v11350_v42 = vrot.slane %v6071_v41, 9  ;;  %v3923_v19 = vmax.f32 %v3921_v5, %v3922_v36 }
 0x361   : > { %v3936_v10 = vrot.slane %v3935_v62, 2  ;;  %v3942_v63 = vmax.f32 %v3940_v4, %v3941_v38  ;;  %v2069_v33 = vcombine.high %v2067_v60, %v2067_v60  ;;  %v4004_v18 = vrot.slane %v4003_v13, 4  ;;  %v1009_v4 = vpop.f32.mrf.mxu0 }
 0x362   : > { %v3930_v32 = vmax.f32 %v3928_v7, %v3929_v44  ;;  %v4010_v27 = vsel %vm2462_vm1, %v2068_v59, -inf  ;;  %v4017_v31 = vsel %vm2462_vm1, %v2067_v60, -inf  ;;  %v3924_v23 = vrot.slane %v3923_v19, 1 }
 0x363   : > { %v3937_v0 = vmax.f32 %v3935_v62, %v3936_v10  ;;  %v3943_v26 = vrot.slane %v3942_v63, 2  ;;  %v4011_v52 = vrot.slane %v4010_v27, 4  ;;  %v4005_v53 = vmax.f32 %v4003_v13, %v4004_v18 }
 0x364   : > { %v3931_v8 = vrot.slane %v3930_v32, 1  ;;  %v4018_v11 = vrot.slane %v4017_v31, 4  ;;  %v4024_v6 = vsel %vm2462_vm1, %v2069_v33, -inf  ;;  %v14571_v39 = vmax.f32 %v3923_v19, %v3924_v23 }
 0x365   : > { %v3938_v21 = vrot.slane %v3937_v0, 1  ;;  %v3944_v45 = vmax.f32 %v3942_v63, %v3943_v26  ;;  %v4012_v28 = vmax.f32 %v4010_v27, %v4011_v52  ;;  %v4006_v25 = vrot.slane %v4005_v53, 2  ;;  %v12462_v27 = vpop.f32.mrf.mxu0 }
 0x366   : > { %v14575_v50 = vmax.f32 %v3930_v32, %v3931_v8  ;;  %v4019_v5 = vmax.f32 %v4017_v31, %v4018_v11  ;;  %v4025_v34 = vrot.slane %v4024_v6, 4  ;;  %v6109_v36 = vrot.slane %v14569_v9, 5 }
 0x367   : > { %v14577_v35 = vmax.f32 %v3937_v0, %v3938_v21  ;;  %v3945_v41 = vrot.slane %v3944_v45, 1  ;;  %v4013_v7 = vrot.slane %v4012_v28, 2  ;;  %v4007_v62 = vmax.f32 %v4005_v53, %v4006_v25 }
 0x368   : > { %v4020_v38 = vrot.slane %v4019_v5, 2  ;;  %v4026_v60 = vmax.f32 %v4024_v6, %v4025_v34  ;;  %v16650_v44 = vrot.slane %v14573_v61, 5  ;;  %v6110_v19 = vsel %vm14137_vm13, %v11350_v42, %v6109_v36 }
 0x369   : > { %v14581_v59 = vmax.f32 %v3944_v45, %v3945_v41  ;;  %v4014_v13 = vmax.f32 %v4012_v28, %v4013_v7  ;;  %v6111_v10 = vrot.slane %v6109_v36, 4  ;;  %v4008_v63 = vrot.slane %v4007_v62, 1 }
 0x36a   : > { %v4021_v33 = vmax.f32 %v4019_v5, %v4020_v38  ;;  %v4027_v32 = vrot.slane %v4026_v60, 2  ;;  %v2019_v18 = vcombine.high %v1009_v4, %v1009_v4  ;;  %v2026_v0 = vrot.slane %v1009_v4, %v13138_v40 }
 0x36b   : > { %16708 = vst [vmem:[#allocation13_spill] sm:$0xff] %v14581_v59  ;;  %v4015_v31 = vrot.slane %v4014_v13, 1  ;;  %v6113_v23 = vsel %vm14137_vm13, %v6111_v10, %v16650_v44  ;;  %v2104_v26 = vcombine.high %v12462_v27, %v12462_v27  ;;  %v14590_v52 = vmax.f32 %v4007_v62, %v4008_v63 }
 0x36c   : > { %v4022_v8 = vrot.slane %v4021_v33, 1  ;;  %v4028_v53 = vmax.f32 %v4026_v60, %v4027_v32  ;;  %v11399_v42 = vcombine.low %v6110_v19, %v6113_v23  ;;  %v2033_v6 = vrot.slane %v2019_v18, %v13138_v40 }
 0x36d   : > { %16709 = vst [vmem:[#allocation14_spill] sm:$0xff] %v14590_v52  ;;  %v14592_v11 = vmax.f32 %v4014_v13, %v4015_v31  ;;  %v2034_v21 = vcombine.high %v2026_v0, %v2026_v0  ;;  %v3947_v45 = vsel %vm2462_vm1, %v2026_v0, -inf  ;;  %v2111_v34 = vrot.slane %v12462_v27, %v13138_v40 }
 0x36e   : > { %v14596_v28 = vmax.f32 %v4021_v33, %v4022_v8  ;;  %v4029_v25 = vrot.slane %v4028_v53, 1  ;;  %7537 = vmatprep.mubr.bf16.mxu0 %v11399_v42  ;;  %v3948_v5 = vrot.slane %v3947_v45, 4  ;;  %v2035_v4 = vcombine.high %v2033_v6, %v2033_v6 }
 0x36f   : > { %16710 = vst [vmem:[#allocation15_spill] sm:$0xff] %v14592_v11  ;;  %v3954_v41 = vsel %vm2462_vm1, %v2034_v21, -inf  ;;  %v3961_v7 = vsel %vm2462_vm1, %v2033_v6, -inf  ;;  %v2118_v36 = vrot.slane %v2104_v26, %v13138_v40  ;;  %v2119_v10 = vcombine.high %v2111_v34, %v2111_v34 }
 0x370   : > { %16711 = vst [vmem:[#allocation17_spill] sm:$0xff] %v14596_v28  ;;  %v14602_v62 = vmax.f32 %v4028_v53, %v4029_v25  ;;  %v3949_v38 = vmax.f32 %v3947_v45, %v3948_v5  ;;  %v3955_v60 = vrot.slane %v3954_v41, 4  ;;  %v3962_v13 = vrot.slane %v3961_v7, 4  ;;  %v14613_v28 = vld [vmem:[#allocation2 + $0x2c] sm:$0xf] }
 0x371   : > { %v3968_v19 = vsel %vm2462_vm1, %v2035_v4, -inf  ;;  %v2120_v63 = vcombine.high %v2118_v36, %v2118_v36  ;;  %v4087_v33 = vsel %vm2462_vm1, %v2111_v34, -inf  ;;  %v4094_v0 = vsel %vm2462_vm1, %v2119_v10, -inf }
 0x372   : > { %16712 = vst [vmem:[#allocation18_spill] sm:$0xff] %v14602_v62  ;;  %v3950_v32 = vrot.slane %v3949_v38, 2  ;;  %v3956_v18 = vmax.f32 %v3954_v41, %v3955_v60  ;;  %v3963_v27 = vmax.f32 %v3961_v7, %v3962_v13  ;;  %v3969_v31 = vrot.slane %v3968_v19, 4  ;;  %v14609_v62 = vld [vmem:[#allocation2 + $0x28] sm:$0xf] }
 0x373   : > { %v4088_v23 = vrot.slane %v4087_v33, 4  ;;  %v4101_v26 = vsel %vm2462_vm1, %v2118_v36, -inf  ;;  %v4108_v8 = vsel %vm2462_vm1, %v2120_v63, -inf  ;;  %v4095_v25 = vrot.slane %v4094_v0, 4 }
 0x374   : > { %v3951_v53 = vmax.f32 %v3949_v38, %v3950_v32  ;;  %v3957_v42 = vrot.slane %v3956_v18, 2  ;;  %v3964_v6 = vrot.slane %v3963_v27, 2  ;;  %v3970_v21 = vmax.f32 %v3968_v19, %v3969_v31 }
 0x375   : > { %v4089_v45 = vmax.f32 %v4087_v33, %v4088_v23  ;;  %v4102_v5 = vrot.slane %v4101_v26, 4  ;;  %v4109_v4 = vrot.slane %v4108_v8, 4  ;;  %v4096_v13 = vmax.f32 %v4094_v0, %v4095_v25  ;;  %v14620_v25 = vld [vmem:[#allocation2 + $0x30] sm:$0xf] }
 0x376   : > { %v3952_v34 = vrot.slane %v3951_v53, 1  ;;  %v3958_v44 = vmax.f32 %v3956_v18, %v3957_v42  ;;  %v3965_v41 = vmax.f32 %v3963_v27, %v3964_v6  ;;  %v3971_v7 = vrot.slane %v3970_v21, 2 }
 0x377   : > { %v4090_v60 = vrot.slane %v4089_v45, 2  ;;  %v4103_v43 = vmax.f32 %v4101_v26, %v4102_v5  ;;  %v4110_v10 = vmax.f32 %v4108_v8, %v4109_v4  ;;  %v4097_v33 = vrot.slane %v4096_v13, 2 }
 0x378   : > { %v14611_v36 = vmax.f32 %v3951_v53, %v3952_v34  ;;  %v3959_v38 = vrot.slane %v3958_v44, 1  ;;  %v3966_v63 = vrot.slane %v3965_v41, 1  ;;  %v3972_v32 = vmax.f32 %v3970_v21, %v3971_v7 }
 0x379   : > { %v4091_v19 = vmax.f32 %v4089_v45, %v4090_v60  ;;  %v4104_v31 = vrot.slane %v4103_v43, 2  ;;  %v4111_v23 = vrot.slane %v4110_v10, 2  ;;  %v5708_v26 = vshrl.u32 %v14609_v62, 16  ;;  %v5878_v60 = vld [vmem:[#allocation2 + $0x28] sm:$0xf] }
 0x37a   : > { %16713 = vst [vmem:[#allocation19_spill] sm:$0xff] %v14611_v36  ;;  %v14615_v18 = vmax.f32 %v3958_v44, %v3959_v38  ;;  %v14617_v27 = vmax.f32 %v3965_v41, %v3966_v63  ;;  %v3973_v0 = vrot.slane %v3972_v32, 1  ;;  %v4098_v42 = vmax.f32 %v4096_v13, %v4097_v33  ;;  %v12663_v13 = vld [vmem:[%s16634_s3 + $0xd8] sm:$0xff]  }
 0x37b   : > { %v4092_v8 = vrot.slane %v4091_v19, 1  ;;  %v4105_v53 = vmax.f32 %v4103_v43, %v4104_v31  ;;  %v4112_v6 = vmax.f32 %v4110_v10, %v4111_v23  ;;  %v5710_v45 = vrot.slane %v5708_v26, 4  ;;  %11981 = vmatprep.subr.bf16.mxu1 %v12663_v13 }
 0x37c   : > { %16714 = vst [vmem:[#allocation20_spill] sm:$0xff] %v14615_v18  ;;  %16715 = vst [vmem:[#allocation21_spill] sm:$0xff] %v14617_v27  ;;  %v14622_v21 = vmax.f32 %v3972_v32, %v3973_v0  ;;  %v5711_v5 = vshll.u32 %v14609_v62, 16  ;;  %v5717_v4 = vshll.u32 %v14613_v28, 16  ;;  %v4099_v34 = vrot.slane %v4098_v42, 1  ;;  %v12664_v32 = vld [vmem:[%s16634_s3 + $0x98] sm:$0xff]  }
 0x37d   : > { %v4093_v44 = vmax.f32 %v4091_v19, %v4092_v8  ;;  %v4106_v41 = vrot.slane %v4105_v53, 1  ;;  %v4113_v7 = vrot.slane %v4112_v6, 1  ;;  %v5721_v38 = vshrl.u32 %v14613_v28, 16  ;;  %11982 = vmatpush3.bf16.msra.mxu1 %v12664_v32 }
 0x37e   : > { %16716 = vst [vmem:[#allocation22_spill] sm:$0xff] %v14622_v21  ;;  %v5713_v43 = vrot.slane %v5711_v5, 5  ;;  %v5719_v10 = vrot.slane %v5717_v4, 5  ;;  %v5727_v63 = vshll.u32 %v14620_v25, 16  ;;  %v4100_v33 = vmax.f32 %v4098_v42, %v4099_v34  ;;  %v12665_v42 = vld [vmem:[%s16634_s3 + $0xd0] sm:$0xff]  }
 0x37f   : > { %v4107_v19 = vmax.f32 %v4105_v53, %v4106_v41  ;;  %v4114_v31 = vmax.f32 %v4112_v6, %v4113_v7  ;;  %v4359_v23 = vmax.f32 %v14464_v24, %v4093_v44  ;;  %v5723_v26 = vrot.slane %v5721_v38, 4  ;;  %v12666_v44 = vld [vmem:[%s16634_s3 + $0x90] sm:$0xff]   ;;  %11983 = vmatprep.subr.bf16.mxu1 %v12665_v42 }
 0x380   : > { %v5714_v0 = vor.u32 %v5713_v43, %v5710_v45  ;;  %v14635_v8 = vrot.slane %v5727_v63, 5  ;;  %v5939_v5 = vshrl.u32 %v5878_v60, 16  ;;  %v4360_v4 = vmax.f32 %v14467_v14, %v4100_v33 }
 0x381   : > { %v4361_v21 = vmax.f32 %v14469_v12, %v4107_v19  ;;  %v4362_v27 = vmax.f32 %v14473_v1, %v4114_v31  ;;  %v4493_v18 = vadd.f32 %v14458_v49, %v4359_v23  ;;  %v5724_v53 = vor.u32 %v5723_v26, %v5719_v10  ;;  %11984 = vmatpush3.bf16.msra.mxu1 %v12666_v44 }
 0x382   : > { %v5715_v24 = vrot.slane %v5714_v0, 4  ;;  %v5941_v6 = vrot.slane %v5939_v5, 4  ;;  %v5942_v45 = vshll.u32 %v5878_v60, 16  ;;  %v4494_v14 = vadd.f32 %v14458_v49, %v4360_v4  ;;  %v1022_v0 = vpop.f32.mrf.mxu0 }
 0x383   : > { %v4495_v12 = vadd.f32 %v14458_v49, %v4361_v21  ;;  %v4496_v1 = vadd.f32 %v14458_v49, %v4362_v27  ;;  %v4621_v34 = vmax.f32 %v4493_v18, 0.0  ;;  %v5725_v7 = vrot.slane %v5724_v53, 4 }
 0x384   : > { %v5720_v41 = vsel %vm14014_vm9, %v5715_v24, %v5719_v10  ;;  %v5944_v13 = vrot.slane %v5942_v45, 5  ;;  %v5948_v43 = vshll.u32 %v14569_v9, 16  ;;  %v4622_v60 = vmax.f32 %v4494_v14, 0.0 }
 0x385   : > { %v4623_v38 = vmax.f32 %v4495_v12, 0.0  ;;  %v4624_v63 = vmax.f32 %v4496_v1, 0.0  ;;  %v11813_v32 = vpack.c.bf16 %v4621_v34, %v4621_v34  ;;  %v5730_v21 = vsel %vm14014_vm9, %v5725_v7, %v14635_v8  ;;  %v14666_v1 = vld [vmem:[#allocation2 + $0x34] sm:$0xf]  ;;  %v14668_v34 = vld [vmem:[#allocation2 + $0x38] sm:$0x1] }
 0x386   : > { %v5945_v33 = vor.u32 %v5944_v13, %v5941_v6  ;;  %v5950_v27 = vrot.slane %v5948_v43, 5  ;;  %v5952_v18 = vshrl.u32 %v14569_v9, 16  ;;  %v11814_v19 = vpack.c.bf16 %v4622_v60, %v4622_v60  ;;  %v12463_v60 = vpop.f32.mrf.mxu0 }
 0x387   : > { %v11815_v31 = vpack.c.bf16 %v4623_v38, %v4623_v38  ;;  %v11816_v10 = vpack.c.bf16 %v4624_v63, %v4624_v63  ;;  %v5261_v23 = vunpack.c.l.b16 %v11813_v32  ;;  %v11369_v26 = vcombine.low %v5720_v41, %v5730_v21  ;;  %v12667_v38 = vld [vmem:[%s16634_s3 + $0xc8] sm:$0xff]  }
 0x388   : > { %v5946_v5 = vrot.slane %v5945_v33, 4  ;;  %v5954_v4 = vrot.slane %v5952_v18, 4  ;;  %v5958_v42 = vshll.u32 %v14573_v61, 16  ;;  %v5262_v24 = vunpack.c.l.b16 %v11814_v19  ;;  %11985 = vmatprep.subr.bf16.mxu1 %v12667_v38 }
 0x389   : > { %v5263_v53 = vunpack.c.l.b16 %v11815_v31  ;;  %v5264_v45 = vunpack.c.l.b16 %v11816_v10  ;;  %v14658_v44 = vrot.slane %v5261_v23, 7  ;;  %7359 = vmatprep.mubr.bf16.mxu1 %v11369_v26  ;;  %v11361_v12 = vcombine.low %v14609_v62, %v14613_v28 }
 0x38a   : > { %v5951_v6 = vsel %vm14014_vm9, %v5946_v5, %v5950_v27  ;;  %v5955_v9 = vor.u32 %v5954_v4, %v5950_v27  ;;  %v14662_v14 = vrot.slane %v5958_v42, 5  ;;  %v14670_v41 = vrot.slane %v5262_v24, 6 }
 0x38b   : > { %v14672_v7 = vrot.slane %v5263_v53, 5  ;;  %v14674_v13 = vrot.slane %v5264_v45, 4  ;;  %v2070_v43 = vcombine.high %v1022_v0, %v1022_v0  ;;  %7360 = vmatmul.mubr.bf16.gmra.mxu1 %v11361_v12  ;;  %v2077_v28 = vrot.slane %v1022_v0, %v13138_v40 }
 0x38c   : > { %v5956_v63 = vrot.slane %v5955_v9, 4  ;;  %v2121_v62 = vcombine.high %v12463_v60, %v12463_v60  ;;  %v2128_v32 = vrot.slane %v12463_v60, %v13138_v40  ;;  %v16717_v33 = vrot.slane %v14573_v61, 5 }
 0x38d   : > { %v2084_v21 = vrot.slane %v2070_v43, %v13138_v40  ;;  %v2085_v10 = vcombine.high %v2077_v28, %v2077_v28  ;;  %v4031_v23 = vsel %vm2462_vm1, %v2077_v28, -inf }
 0x38e   : > { %v14684_v27 = vrot.slane %v16717_v33, 4  ;;  %v5961_v31 = vsel %vm14014_vm9, %v5956_v63, %v14662_v14  ;;  %v2135_v0 = vrot.slane %v2121_v62, %v13138_v40  ;;  %v4032_v4 = vrot.slane %v4031_v23, 4 }
 0x38f   : > { %v11391_v26 = vcombine.low %v5951_v6, %v5961_v31  ;;  %v2086_v5 = vcombine.high %v2084_v21, %v2084_v21  ;;  %v4045_v42 = vsel %vm2462_vm1, %v2084_v21, -inf  ;;  %v4038_v24 = vsel %vm2462_vm1, %v2085_v10, -inf }
 0x390   : > { %v4046_v53 = vrot.slane %v4045_v42, 4  ;;  %v2136_v45 = vcombine.high %v2128_v32, %v2128_v32  ;;  %v2137_v9 = vcombine.high %v2135_v0, %v2135_v0  ;;  %v4033_v12 = vmax.f32 %v4031_v23, %v4032_v4 }
 0x391   : > { %7538 = vmatmul.mubr.bf16.gmra.mxu0 %v11391_v26  ;;  %v4039_v43 = vrot.slane %v4038_v24, 4  ;;  %v4052_v60 = vsel %vm2462_vm1, %v2086_v5, -inf  ;;  %v4115_v38 = vsel %vm2462_vm1, %v2128_v32, -inf  ;;  %v4129_v10 = vsel %vm2462_vm1, %v2135_v0, -inf  ;;  %v12669_v26 = vld [vmem:[%s16634_s3 + $0x88] sm:$0xff]   ;;  %v12670_v0 = vld [vmem:[%s16634_s3 + $0xc0] sm:$0xff]  }
 0x392   : > { %v4047_v63 = vmax.f32 %v4045_v42, %v4046_v53  ;;  %v4053_v28 = vrot.slane %v4052_v60, 4  ;;  %v4116_v62 = vrot.slane %v4115_v38, 4  ;;  %v4122_v6 = vsel %vm2462_vm1, %v2136_v45, -inf  ;;  %11986 = vmatpush3.bf16.msra.mxu1 %v12669_v26 }
 0x393   : > { %v4034_v33 = vrot.slane %v4033_v12, 2  ;;  %v4040_v31 = vmax.f32 %v4038_v24, %v4039_v43  ;;  %v4123_v21 = vrot.slane %v4122_v6, 4  ;;  %v4130_v5 = vrot.slane %v4129_v10, 4  ;;  %11987 = vmatprep.subr.bf16.mxu1 %v12670_v0 }
 0x394   : > { %v4048_v23 = vrot.slane %v4047_v63, 2  ;;  %v4054_v4 = vmax.f32 %v4052_v60, %v4053_v28  ;;  %v4117_v19 = vmax.f32 %v4115_v38, %v4116_v62  ;;  %v4136_v53 = vsel %vm2462_vm1, %v2137_v9, -inf }
 0x395   : > { %v4035_v18 = vmax.f32 %v4033_v12, %v4034_v33  ;;  %v4041_v32 = vrot.slane %v4040_v31, 2  ;;  %v4124_v42 = vmax.f32 %v4122_v6, %v4123_v21  ;;  %v4131_v43 = vmax.f32 %v4129_v10, %v4130_v5  ;;  %v12672_v21 = vld [vmem:[%s16634_s3 + $0x80] sm:$0xff]   ;;  %v12674_v10 = vld [vmem:[%s16634_s3 + $0x1f8] sm:$0xff]  }
 0x396   : > { %v4049_v45 = vmax.f32 %v4047_v63, %v4048_v23  ;;  %v4055_v36 = vrot.slane %v4054_v4, 2  ;;  %v4118_v24 = vrot.slane %v4117_v19, 2  ;;  %v4137_v60 = vrot.slane %v4136_v53, 4  ;;  %11988 = vmatpush3.bf16.msra.mxu1 %v12672_v21 }
 0x397   : > { %v4036_v11 = vrot.slane %v4035_v18, 1  ;;  %v4042_v52 = vmax.f32 %v4040_v31, %v4041_v32  ;;  %v4125_v59 = vrot.slane %v4124_v42, 2  ;;  %v4132_v62 = vrot.slane %v4131_v43, 2  ;;  %v12675_v31 = vld [vmem:[%s16634_s3 + $0x238] sm:$0xff]   ;;  %12101 = vmatprep.subr.bf16.mxu1 %v12674_v10 }
 0x398   : > { %v4050_v38 = vrot.slane %v4049_v45, 1  ;;  %v4056_v28 = vmax.f32 %v4054_v4, %v4055_v36  ;;  %v4119_v12 = vmax.f32 %v4117_v19, %v4118_v24  ;;  %v4138_v63 = vmax.f32 %v4136_v53, %v4137_v60  ;;  %12468 = vmatprep.subr.bf16.mxu0 %v12675_v31 }
 0x399   : > { %v4037_v6 = vmax.f32 %v4035_v18, %v4036_v11  ;;  %v4043_v9 = vrot.slane %v4042_v52, 1  ;;  %v4126_v33 = vmax.f32 %v4124_v42, %v4125_v59  ;;  %v4133_v23 = vmax.f32 %v4131_v43, %v4132_v62  ;;  %12469 = vmatpush3.bf16.msra.mxu0 %v12675_v31 }
 0x39a   : > { %v4051_v36 = vmax.f32 %v4049_v45, %v4050_v38  ;;  %v4057_v19 = vrot.slane %v4056_v28, 1  ;;  %v4120_v26 = vrot.slane %v4119_v12, 1  ;;  %v4139_v4 = vrot.slane %v4138_v63, 2 }
 0x39b   : > { %v4044_v11 = vmax.f32 %v4042_v52, %v4043_v9  ;;  %v4351_v59 = vmax.f32 %v14504_v20, %v4037_v6  ;;  %v4127_v18 = vrot.slane %v4126_v33, 1  ;;  %v4134_v53 = vrot.slane %v4133_v23, 1 }
 0x39c   : > { %v4058_v5 = vmax.f32 %v4056_v28, %v4057_v19  ;;  %v4353_v32 = vmax.f32 %v14511_v56, %v4051_v36  ;;  %v4121_v42 = vmax.f32 %v4119_v12, %v4120_v26  ;;  %v4140_v43 = vmax.f32 %v4138_v63, %v4139_v4 }
 0x39d   : > { %v4352_v24 = vmax.f32 %v14506_v48, %v4044_v11  ;;  %v4485_v45 = vadd.f32 %v14458_v49, %v4351_v59  ;;  %v4128_v0 = vmax.f32 %v4126_v33, %v4127_v18  ;;  %v4135_v60 = vmax.f32 %v4133_v23, %v4134_v53 }
 0x39e   : > { %v4354_v52 = vmax.f32 %v14513_v51, %v4058_v5  ;;  %v4487_v20 = vadd.f32 %v14458_v49, %v4353_v32  ;;  %v4363_v38 = vmax.f32 %v14522_v37, %v4121_v42  ;;  %v4141_v12 = vrot.slane %v4140_v43, 1  ;;  %v12678_v51 = vld [vmem:[%s16634_s3 + $0x230] sm:$0xff]  }
 0x39f   : > { %v4486_v28 = vadd.f32 %v14458_v49, %v4352_v24  ;;  %v4613_v56 = vmax.f32 %v4485_v45, 0.0  ;;  %v4364_v62 = vmax.f32 %v14524_v22, %v4128_v0  ;;  %v4365_v9 = vmax.f32 %v14526_v29, %v4135_v60  ;;  %v12680_v22 = vld [vmem:[%s16634_s3 + $0x228] sm:$0xff]   ;;  %12470 = vmatprep.subr.bf16.mxu0 %v12678_v51  ;;  %v14739_v24 = vld [vmem:[%s16633_s2] ss:$0 sm:$0xff] }
 0x3a0   : > { %v4488_v6 = vadd.f32 %v14458_v49, %v4354_v52  ;;  %v4615_v48 = vmax.f32 %v4487_v20, 0.0  ;;  %v4497_v33 = vadd.f32 %v14458_v49, %v4363_v38  ;;  %v4142_v37 = vmax.f32 %v4140_v43, %v4141_v12  ;;  %12471 = vmatpush3.bf16.msra.mxu0 %v12678_v51  ;;  %v1025_v20 = vpop.f32.mrf.mxu0  ;;  %v12683_v51 = vld [vmem:[%s16634_s3 + $0x220] sm:$0xff]  }
 0x3a1   : > { %v4614_v63 = vmax.f32 %v4486_v28, 0.0  ;;  %v11805_v21 = vpack.c.bf16 %v4613_v56, %v4613_v56  ;;  %v4498_v10 = vadd.f32 %v14458_v49, %v4364_v62  ;;  %v4499_v19 = vadd.f32 %v14458_v49, %v4365_v9  ;;  %12472 = vmatprep.subr.bf16.mxu0 %v12680_v22 }
 0x3a2   : > { %v4616_v31 = vmax.f32 %v4488_v6, 0.0  ;;  %v11807_v36 = vpack.c.bf16 %v4615_v48, %v4615_v48  ;;  %v4625_v29 = vmax.f32 %v4497_v33, 0.0  ;;  %v4366_v11 = vmax.f32 %v14529_v17, %v4142_v37 }
 0x3a3   : > { %v11806_v26 = vpack.c.bf16 %v4614_v63, %v4614_v63  ;;  %v5253_v23 = vunpack.c.l.b16 %v11805_v21  ;;  %v4626_v59 = vmax.f32 %v4498_v10, 0.0  ;;  %v4627_v5 = vmax.f32 %v4499_v19, 0.0  ;;  %v12685_v63 = vld [vmem:[%s16634_s3 + $0x218] sm:$0xff]  }
 0x3a4   : > { %v11808_v18 = vpack.c.bf16 %v4616_v31, %v4616_v31  ;;  %v5255_v4 = vunpack.c.l.b16 %v11807_v36  ;;  %v11817_v32 = vpack.c.bf16 %v4625_v29, %v4625_v29  ;;  %v4500_v49 = vadd.f32 %v14739_v24, %v4366_v11  ;;  %12473 = vmatpush3.bf16.msra.mxu0 %v12680_v22 }
 0x3a5   : > { %v5254_v42 = vunpack.c.l.b16 %v11806_v26  ;;  %v5457_v53 = vrot.slane %v5253_v23, 7  ;;  %v11818_v45 = vpack.c.bf16 %v4626_v59, %v4626_v59  ;;  %v11819_v17 = vpack.c.bf16 %v4627_v5, %v4627_v5  ;;  %12474 = vmatprep.subr.bf16.mxu0 %v12683_v51 }
 0x3a6   : > { %v5256_v0 = vunpack.c.l.b16 %v11808_v18  ;;  %v5460_v43 = vrot.slane %v5255_v4, 5  ;;  %v5265_v52 = vunpack.c.l.b16 %v11817_v32  ;;  %v4628_v38 = vmax.f32 %v4500_v49, 0.0  ;;  %v12466_v18 = vpop.f32.mrf.mxu0 }
 0x3a7   : > { %v5458_v60 = vrot.slane %v5254_v42, 6  ;;  %v5266_v28 = vunpack.c.l.b16 %v11818_v45  ;;  %v16718_v56 = vrot.slane %v14666_v1, 5  ;;  %v5267_v6 = vunpack.c.l.b16 %v11819_v17 }
 0x3a8   : > { %v5462_v62 = vrot.slane %v5256_v0, 4  ;;  %v14747_v48 = vrot.slane %v5265_v52, 3  ;;  %v14758_v37 = vpack.c.bf16 %v4628_v38, %v4628_v38  ;;  %v2087_v10 = vcombine.high %v1025_v20, %v1025_v20  ;;  %12475 = vmatpush3.bf16.msra.mxu0 %v12683_v51  ;;  %v12690_v51 = vld [vmem:[%s16634_s3 + $0x208] sm:$0xff]  }
 0x3a9   : > { %v6116_v12 = vsel %vm14137_vm13, %v14684_v27, %v16718_v56  ;;  %v16719_v9 = vmov %v16718_v56  ;;  %v5459_v21 = vsel %vm5287_vm2, %v5458_v60, %v5457_v53  ;;  %v14760_v27 = vrot.slane %v5266_v28, 2  ;;  %12476 = vmatprep.subr.bf16.mxu0 %v12685_v63 }
 0x3aa   : > { %v6117_v33 = vrot.slane %v16719_v9, 4  ;;  %v5461_v22 = vsel %vm5290_vm3, %v5460_v43, %v5459_v21  ;;  %v14763_v31 = vrot.slane %v5267_v6, 1  ;;  %v16720_v36 = vrot.slane %v14668_v34, 5 }
 0x3ab   : > { %v2094_v29 = vrot.slane %v1025_v20, %v13138_v40  ;;  %v2101_v11 = vrot.slane %v2087_v10, %v13138_v40  ;;  %v14773_v59 = vsel %vm5293_vm4, %v5462_v62, %v5461_v22  ;;  %v2172_v32 = vcombine.high %v12466_v18, %v12466_v18 }
 0x3ac   : > { %v6119_v19 = vsel %vm14137_vm13, %v6117_v33, %v16720_v36  ;;  %v2179_v42 = vrot.slane %v12466_v18, %v13138_v40  ;;  %v5731_v0 = vshrl.u32 %v14620_v25, 16  ;;  %12477 = vmatpush3.bf16.msra.mxu0 %v12685_v63  ;;  %v12688_v33 = vld [vmem:[%s16634_s3 + $0x210] sm:$0xff]  }
 0x3ad   : > { %v11400_v23 = vcombine.low %v6116_v12, %v6119_v19  ;;  %v2102_v4 = vcombine.high %v2094_v29, %v2094_v29  ;;  %v4059_v5 = vsel %vm2462_vm1, %v2094_v29, -inf  ;;  %v2103_v53 = vcombine.high %v2101_v11, %v2101_v11  ;;  %12478 = vmatprep.subr.bf16.mxu0 %v12688_v33 }
 0x3ae   : > { %v4060_v49 = vrot.slane %v4059_v5, 4  ;;  %v4073_v45 = vsel %vm2462_vm1, %v2101_v11, -inf  ;;  %v2186_v52 = vrot.slane %v2172_v32, %v13138_v40  ;;  %v2187_v20 = vcombine.high %v2179_v42, %v2179_v42 }
 0x3af   : > { %7545 = vmatprep.mubr.bf16.mxu0 %v11400_v23  ;;  %v4066_v43 = vsel %vm2462_vm1, %v2102_v4, -inf  ;;  %v4074_v17 = vrot.slane %v4073_v45, 4  ;;  %v4080_v28 = vsel %vm2462_vm1, %v2103_v53, -inf  ;;  %v4199_v56 = vsel %vm2462_vm1, %v2179_v42, -inf }
 0x3b0   : > { %v4061_v60 = vmax.f32 %v4059_v5, %v4060_v49  ;;  %v4067_v38 = vrot.slane %v4066_v43, 4  ;;  %v4081_v62 = vrot.slane %v4080_v28, 4  ;;  %v2188_v6 = vcombine.high %v2186_v52, %v2186_v52  ;;  %12479 = vmatpush3.bf16.msra.mxu0 %v12688_v33 }
 0x3b1   : > { %v4075_v12 = vmax.f32 %v4073_v45, %v4074_v17  ;;  %v4200_v9 = vrot.slane %v4199_v56, 4  ;;  %v4206_v22 = vsel %vm2462_vm1, %v2187_v20, -inf  ;;  %v4213_v36 = vsel %vm2462_vm1, %v2186_v52, -inf  ;;  %12480 = vmatprep.subr.bf16.mxu0 %v12690_v51 }
 0x3b2   : > { %v4062_v21 = vrot.slane %v4061_v60, 2  ;;  %v4068_v10 = vmax.f32 %v4066_v43, %v4067_v38  ;;  %v4082_v63 = vmax.f32 %v4080_v28, %v4081_v62  ;;  %v4207_v23 = vrot.slane %v4206_v22, 4 }
 0x3b3   : > { %v4076_v19 = vrot.slane %v4075_v12, 2  ;;  %v4201_v29 = vmax.f32 %v4199_v56, %v4200_v9  ;;  %v4214_v4 = vrot.slane %v4213_v36, 4  ;;  %v4220_v5 = vsel %vm2462_vm1, %v2188_v6, -inf }
 0x3b4   : > { %v4063_v11 = vmax.f32 %v4061_v60, %v4062_v21  ;;  %v4069_v18 = vrot.slane %v4068_v10, 2  ;;  %v4083_v42 = vrot.slane %v4082_v63, 2  ;;  %v4208_v49 = vmax.f32 %v4206_v22, %v4207_v23  ;;  %12481 = vmatpush3.bf16.msra.mxu0 %v12690_v51 }
 0x3b5   : > { %v4077_v32 = vmax.f32 %v4075_v12, %v4076_v19  ;;  %v4202_v53 = vrot.slane %v4201_v29, 2  ;;  %v4215_v17 = vmax.f32 %v4213_v36, %v4214_v4  ;;  %v4221_v52 = vrot.slane %v4220_v5, 4  ;;  %v12693_v36 = vld [vmem:[%s16634_s3 + $0x200] sm:$0xff]  }
 0x3b6   : > { %v4064_v45 = vrot.slane %v4063_v11, 1  ;;  %v4070_v43 = vmax.f32 %v4068_v10, %v4069_v18  ;;  %v4084_v38 = vmax.f32 %v4082_v63, %v4083_v42  ;;  %v4209_v56 = vrot.slane %v4208_v49, 2  ;;  %12482 = vmatprep.subr.bf16.mxu0 %v12693_v36 }
 0x3b7   : > { %v4078_v20 = vrot.slane %v4077_v32, 1  ;;  %v4203_v28 = vmax.f32 %v4201_v29, %v4202_v53  ;;  %v4216_v9 = vrot.slane %v4215_v17, 2  ;;  %v4222_v21 = vmax.f32 %v4220_v5, %v4221_v52 }
 0x3b8   : > { %v4065_v62 = vmax.f32 %v4063_v11, %v4064_v45  ;;  %v4071_v60 = vrot.slane %v4070_v43, 1  ;;  %v4085_v33 = vrot.slane %v4084_v38, 1  ;;  %v4210_v19 = vmax.f32 %v4208_v49, %v4209_v56  ;;  %12483 = vmatpush3.bf16.msra.mxu0 %v12693_v36 }
 0x3b9   : > { %v4079_v6 = vmax.f32 %v4077_v32, %v4078_v20  ;;  %v4204_v12 = vrot.slane %v4203_v28, 1  ;;  %v4217_v23 = vmax.f32 %v4215_v17, %v4216_v9  ;;  %v4223_v10 = vrot.slane %v4222_v21, 2 }
 0x3ba   : > { %v4072_v26 = vmax.f32 %v4070_v43, %v4071_v60  ;;  %v4355_v22 = vmax.f32 %v14535_v15, %v4065_v62  ;;  %v4086_v63 = vmax.f32 %v4084_v38, %v4085_v33  ;;  %v4211_v18 = vrot.slane %v4210_v19, 1 }
 0x3bb   : > { %v4357_v29 = vmax.f32 %v14537_v30, %v4079_v6  ;;  %v4205_v11 = vmax.f32 %v4203_v28, %v4204_v12  ;;  %v4218_v5 = vrot.slane %v4217_v23, 1  ;;  %v4224_v32 = vmax.f32 %v4222_v21, %v4223_v10 }
 0x3bc   : > { %v4356_v51 = vmax.f32 %v14542_v55, %v4072_v26  ;;  %v4489_v4 = vadd.f32 %v14739_v24, %v4355_v22  ;;  %v4358_v15 = vmax.f32 %v14544_v3, %v4086_v63  ;;  %v4212_v53 = vmax.f32 %v4210_v19, %v4211_v18 }
 0x3bd   : > { %v4491_v42 = vadd.f32 %v14739_v24, %v4357_v29  ;;  %v4375_v49 = vmax.f32 %v14552_v57, %v4205_v11  ;;  %v4219_v43 = vmax.f32 %v4217_v23, %v4218_v5  ;;  %v4225_v17 = vrot.slane %v4224_v32, 1 }
 0x3be   : > { %v4490_v45 = vadd.f32 %v14739_v24, %v4356_v51  ;;  %v4617_v30 = vmax.f32 %v4489_v4, 0.0  ;;  %v4492_v55 = vadd.f32 %v14739_v24, %v4358_v15  ;;  %v4376_v52 = vmax.f32 %v14558_v54, %v4212_v53 }
 0x3bf   : > { %v4619_v26 = vmax.f32 %v4491_v42, 0.0  ;;  %v4509_v20 = vadd.f32 %v14739_v24, %v4375_v49  ;;  %v4226_v28 = vmax.f32 %v4224_v32, %v4225_v17  ;;  %v4377_v56 = vmax.f32 %v14560_v47, %v4219_v43 }
 0x3c0   : > { %v4618_v38 = vmax.f32 %v4490_v45, 0.0  ;;  %v11809_v3 = vpack.c.bf16 %v4617_v30, %v4617_v30  ;;  %v4620_v62 = vmax.f32 %v4492_v55, 0.0  ;;  %v4510_v60 = vadd.f32 %v14739_v24, %v4376_v52 }
 0x3c1   : > { %v11811_v57 = vpack.c.bf16 %v4619_v26, %v4619_v26  ;;  %v4637_v9 = vmax.f32 %v4509_v20, 0.0  ;;  %v4378_v33 = vmax.f32 %v14562_v16, %v4226_v28  ;;  %v4511_v12 = vadd.f32 %v14739_v24, %v4377_v56  ;;  %v5586_v26 = vld [vmem:[#allocation2 + $0x50] sm:$0xf]  ;;  %v5614_v20 = vld [vmem:[#allocation2 + $0x38] sm:$0x1] }
 0x3c2   : > { %v11810_v21 = vpack.c.bf16 %v4618_v38, %v4618_v38  ;;  %v5257_v6 = vunpack.c.l.b16 %v11809_v3  ;;  %v11812_v19 = vpack.c.bf16 %v4620_v62, %v4620_v62  ;;  %v4638_v22 = vmax.f32 %v4510_v60, 0.0 }
 0x3c3   : > { %v5259_v54 = vunpack.c.l.b16 %v11811_v57  ;;  %v11829_v23 = vpack.c.bf16 %v4637_v9, %v4637_v9  ;;  %v4512_v63 = vadd.f32 %v14739_v24, %v4378_v33  ;;  %v4639_v47 = vmax.f32 %v4511_v12, 0.0  ;;  %v1038_v12 = vpop.f32.mrf.mxu0 }
 0x3c4   : > { %v5258_v10 = vunpack.c.l.b16 %v11810_v21  ;;  %v5464_v36 = vrot.slane %v5257_v6, 3  ;;  %v5260_v29 = vunpack.c.l.b16 %v11812_v19  ;;  %v11830_v18 = vpack.c.bf16 %v4638_v22, %v4638_v22 }
 0x3c5   : > { %v5468_v11 = vrot.slane %v5259_v54, 1  ;;  %v5277_v51 = vunpack.c.l.b16 %v11829_v23  ;;  %v4640_v16 = vmax.f32 %v4512_v63, 0.0  ;;  %v11831_v32 = vpack.c.bf16 %v4639_v47, %v4639_v47 }
 0x3c6   : > { %v5465_v4 = vsel %vm5296_vm5, %v5464_v36, %v14773_v59  ;;  %v5466_v5 = vrot.slane %v5258_v10, 2  ;;  %v5471_v15 = vsel %vm5305_vm8, %v14658_v44, %v5260_v29  ;;  %v5278_v42 = vunpack.c.l.b16 %v11830_v18  ;;  %v14822_v59 = vld [vmem:[#allocation2 + $0x34] sm:$0xf] }
 0x3c7   : > { %v14815_v53 = vrot.slane %v5277_v51, 7  ;;  %v5733_v49 = vrot.slane %v5731_v0, 4  ;;  %v5473_v30 = vsel %vm5287_vm2, %v14670_v41, %v5471_v15  ;;  %v11832_v43 = vpack.c.bf16 %v4640_v16, %v4640_v16 }
 0x3c8   : > { %v5467_v45 = vsel %vm5299_vm6, %v5466_v5, %v5465_v4  ;;  %v5279_v17 = vunpack.c.l.b16 %v11831_v32  ;;  %v5475_v44 = vsel %vm5290_vm3, %v14672_v7, %v5473_v30  ;;  %v14827_v52 = vrot.slane %v5278_v42, 6  ;;  %v12467_v4 = vpop.f32.mrf.mxu0 }
 0x3c9   : > { %v5469_v55 = vsel %vm5302_vm7, %v5468_v11, %v5467_v45  ;;  %v5734_v0 = vor.u32 %v5733_v49, %v14635_v8  ;;  %v5477_v38 = vsel %vm5293_vm4, %v14674_v13, %v5475_v44  ;;  %v5280_v41 = vunpack.c.l.b16 %v11832_v43 }
 0x3ca   : > { %v5527_v3 = vpack.c.b16 %v5469_v55, %v5469_v55  ;;  %v14832_v28 = vrot.slane %v5279_v17, 5  ;;  %v5479_v56 = vsel %vm5296_vm5, %v14747_v48, %v5477_v38  ;;  %v5737_v57 = vshll.u32 %v14822_v59, 16 }
 0x3cb   : > { %v5735_v62 = vrot.slane %v5734_v0, 4  ;;  %v5741_v7 = vshrl.u32 %v14822_v59, 16  ;;  %v5481_v60 = vsel %vm5299_vm6, %v14760_v27, %v5479_v56  ;;  %v14842_v9 = vrot.slane %v5280_v41, 4 }
 0x3cc   : > { %v5587_v8 = vsel %vm13427_vm11, %v5527_v3, %v5586_v26  ;;  %v5747_v13 = vshll.u32 %v5614_v20, 16  ;;  %v5483_v21 = vsel %vm5302_vm7, %v14763_v31, %v5481_v60  ;;  %v5739_v6 = vrot.slane %v5737_v57, 5 }
 0x3cd   : > { %5588 = vst [vmem:[#allocation2 + $0x50] sm:$0xf] %v5587_v8  ;;  %v5743_v48 = vrot.slane %v5741_v7, 4  ;;  %v5962_v33 = vshrl.u32 %v14573_v61, 16  ;;  %v5528_v19 = vpack.c.b16 %v5483_v21, %v5483_v21  ;;  %v5968_v22 = vshll.u32 %v14666_v1, 16 }
 0x3ce   : > { %v5749_v54 = vrot.slane %v5747_v13, 5  ;;  %v5972_v27 = vshrl.u32 %v14666_v1, 16  ;;  %v5740_v23 = vsel %vm14014_vm9, %v5735_v62, %v5739_v6  ;;  %v5978_v63 = vshll.u32 %v14668_v34, 16 }
 0x3cf   : > { %v5744_v10 = vor.u32 %v5743_v48, %v5739_v6  ;;  %v5964_v36 = vrot.slane %v5962_v33, 4  ;;  %5589 = vst [vmem:[#allocation2 + $0x54] sm:$0xf] %v5528_v19  ;;  %v5970_v31 = vrot.slane %v5968_v22, 5  ;;  %v11362_v61 = vcombine.low %v14620_v25, %v14822_v59 }
 0x3d0   : > { %v5974_v47 = vrot.slane %v5972_v27, 4  ;;  %v2138_v29 = vcombine.high %v1038_v12, %v1038_v12  ;;  %v5980_v51 = vrot.slane %v5978_v63, 5  ;;  %v2145_v1 = vrot.slane %v1038_v12, %v13138_v40 }
 0x3d1   : > { %v5745_v11 = vrot.slane %v5744_v10, 4  ;;  %v5965_v18 = vor.u32 %v5964_v36, %v14662_v14  ;;  %v2189_v32 = vcombine.high %v12467_v4, %v12467_v4  ;;  %v2196_v34 = vrot.slane %v12467_v4, %v13138_v40 }
 0x3d2   : > { %v5975_v5 = vor.u32 %v5974_v47, %v5970_v31  ;;  %v2152_v16 = vrot.slane %v2138_v29, %v13138_v40  ;;  %v2153_v49 = vcombine.high %v2145_v1, %v2145_v1  ;;  %v4143_v25 = vsel %vm2462_vm1, %v2145_v1, -inf }
 0x3d3   : > { %v5750_v15 = vsel %vm14014_vm9, %v5745_v11, %v5749_v54  ;;  %v5966_v42 = vrot.slane %v5965_v18, 4  ;;  %v4144_v43 = vrot.slane %v4143_v25, 4  ;;  %v2203_v44 = vrot.slane %v2189_v32, %v13138_v40 }
 0x3d4   : > { %v11370_v45 = vcombine.low %v5740_v23, %v5750_v15  ;;  %v5976_v30 = vrot.slane %v5975_v5, 4  ;;  %v2154_v14 = vcombine.high %v2152_v16, %v2152_v16  ;;  %v4150_v59 = vsel %vm2462_vm1, %v2153_v49, -inf }
 0x3d5   : > { %v5971_v17 = vsel %vm14014_vm9, %v5966_v42, %v5970_v31  ;;  %v4157_v55 = vsel %vm2462_vm1, %v2152_v16, -inf  ;;  %v4145_v20 = vmax.f32 %v4143_v25, %v4144_v43  ;;  %v4151_v0 = vrot.slane %v4150_v59, 4 }
 0x3d6   : > { %7367 = vmatprep.mubr.bf16.mxu1 %v11370_v45  ;;  %v5981_v26 = vsel %vm14014_vm9, %v5976_v30, %v5980_v51  ;;  %v4158_v38 = vrot.slane %v4157_v55, 4  ;;  %v4164_v41 = vsel %vm2462_vm1, %v2154_v14, -inf  ;;  %v2204_v56 = vcombine.high %v2196_v34, %v2196_v34 }
 0x3d7   : > { %v11392_v3 = vcombine.low %v5971_v17, %v5981_v26  ;;  %7368 = vmatmul.mubr.bf16.gmra.mxu1 %v11362_v61  ;;  %v2205_v62 = vcombine.high %v2203_v44, %v2203_v44  ;;  %v4146_v57 = vrot.slane %v4145_v20, 2  ;;  %v4152_v7 = vmax.f32 %v4150_v59, %v4151_v0 }
 0x3d8   : > { %v4159_v60 = vmax.f32 %v4157_v55, %v4158_v38  ;;  %v4165_v8 = vrot.slane %v4164_v41, 4  ;;  %v4227_v13 = vsel %vm2462_vm1, %v2196_v34, -inf  ;;  %v4234_v21 = vsel %vm2462_vm1, %v2204_v56, -inf }
 0x3d9   : > { %7546 = vmatmul.mubr.bf16.gmra.mxu0 %v11392_v3  ;;  %v4241_v6 = vsel %vm2462_vm1, %v2203_v44, -inf  ;;  %v4248_v48 = vsel %vm2462_vm1, %v2205_v62, -inf  ;;  %v4147_v33 = vmax.f32 %v4145_v20, %v4146_v57  ;;  %v4153_v12 = vrot.slane %v4152_v7, 2 }
 0x3da   : > { %v4160_v19 = vrot.slane %v4159_v60, 2  ;;  %v4166_v54 = vmax.f32 %v4164_v41, %v4165_v8  ;;  %v4228_v22 = vrot.slane %v4227_v13, 4  ;;  %v4235_v27 = vrot.slane %v4234_v21, 4  ;;  %v16721_v41 = vld [vmem:[#allocation13_spill] sm:$0xff] }
 0x3db   : > { %v4242_v23 = vrot.slane %v4241_v6, 4  ;;  %v4249_v10 = vrot.slane %v4248_v48, 4  ;;  %v4148_v36 = vrot.slane %v4147_v33, 1  ;;  %v4154_v63 = vmax.f32 %v4152_v7, %v4153_v12  ;;  %v16723_v12 = vld [vmem:[#allocation15_spill] sm:$0xff] }
 0x3dc   : > { %v4161_v31 = vmax.f32 %v4159_v60, %v4160_v19  ;;  %v4167_v47 = vrot.slane %v4166_v54, 2  ;;  %v4229_v61 = vmax.f32 %v4227_v13, %v4228_v22  ;;  %v4236_v29 = vmax.f32 %v4234_v21, %v4235_v27  ;;  %v16725_v27 = vld [vmem:[#allocation18_spill] sm:$0xff] }
 0x3dd   : > { %v4243_v11 = vmax.f32 %v4241_v6, %v4242_v23  ;;  %v4250_v18 = vmax.f32 %v4248_v48, %v4249_v10  ;;  %v4149_v51 = vmax.f32 %v4147_v33, %v4148_v36  ;;  %v4155_v1 = vrot.slane %v4154_v63, 1  ;;  %v16722_v48 = vld [vmem:[#allocation14_spill] sm:$0xff] }
 0x3de   : > { %v4162_v4 = vrot.slane %v4161_v31, 1  ;;  %v4168_v5 = vmax.f32 %v4166_v54, %v4167_v47  ;;  %v4230_v16 = vrot.slane %v4229_v61, 2  ;;  %v4237_v32 = vrot.slane %v4236_v29, 2  ;;  %v16724_v54 = vld [vmem:[#allocation17_spill] sm:$0xff] }
 0x3df   : > { %v4244_v34 = vrot.slane %v4243_v11, 2  ;;  %v4251_v15 = vrot.slane %v4250_v18, 2  ;;  %v4156_v42 = vmax.f32 %v4154_v63, %v4155_v1  ;;  %v4367_v45 = vmax.f32 %v14571_v39, %v4149_v51 }
 0x3e0   : > { %v4163_v49 = vmax.f32 %v4161_v31, %v4162_v4  ;;  %v4169_v25 = vrot.slane %v4168_v5, 1  ;;  %v4231_v30 = vmax.f32 %v4229_v61, %v4230_v16  ;;  %v4238_v14 = vmax.f32 %v4236_v29, %v4237_v32 }
 0x3e1   : > { %v4245_v43 = vmax.f32 %v4243_v11, %v4244_v34  ;;  %v4252_v17 = vmax.f32 %v4250_v18, %v4251_v15  ;;  %v4368_v55 = vmax.f32 %v14575_v50, %v4156_v42  ;;  %v4501_v26 = vadd.f32 %v14739_v24, %v4367_v45  ;;  %v1041_v15 = vpop.f32.mrf.mxu0 }
 0x3e2   : > { %v4170_v59 = vmax.f32 %v4168_v5, %v4169_v25  ;;  %v4369_v44 = vmax.f32 %v14577_v35, %v4163_v49  ;;  %v4232_v20 = vrot.slane %v4231_v30, 1  ;;  %v4239_v0 = vrot.slane %v4238_v14, 1 }
 0x3e3   : > { %v4246_v38 = vrot.slane %v4245_v43, 1  ;;  %v4253_v3 = vrot.slane %v4252_v17, 1  ;;  %v4502_v62 = vadd.f32 %v14739_v24, %v4368_v55  ;;  %v4629_v57 = vmax.f32 %v4501_v26, 0.0  ;;  %v5592_v55 = vld [vmem:[#allocation2 + $0x60] sm:$0x1] }
 0x3e4   : > { %v4370_v56 = vmax.f32 %v16721_v41, %v4170_v59  ;;  %v4503_v39 = vadd.f32 %v14739_v24, %v4369_v44  ;;  %v4233_v7 = vmax.f32 %v4231_v30, %v4232_v20  ;;  %v4240_v60 = vmax.f32 %v4238_v14, %v4239_v0 }
 0x3e5   : > { %v4247_v8 = vmax.f32 %v4245_v43, %v4246_v38  ;;  %v4254_v13 = vmax.f32 %v4252_v17, %v4253_v3  ;;  %v4630_v35 = vmax.f32 %v4502_v62, 0.0  ;;  %v11821_v6 = vpack.c.bf16 %v4629_v57, %v4629_v57 }
 0x3e6   : > { %v4504_v50 = vadd.f32 %v14739_v24, %v4370_v56  ;;  %v4631_v21 = vmax.f32 %v4503_v39, 0.0  ;;  %v4379_v33 = vmax.f32 %v16722_v48, %v4233_v7  ;;  %v4380_v19 = vmax.f32 %v16723_v12, %v4240_v60  ;;  %v6072_v56 = vld [vmem:[#allocation2 + $0x3c] sm:$0xe]  ;;  %v14909_v48 = vld [vmem:[#allocation2 + $0x44] sm:$0xf] }
 0x3e7   : > { %v4381_v22 = vmax.f32 %v16724_v54, %v4247_v8  ;;  %v4382_v23 = vmax.f32 %v16725_v27, %v4254_v13  ;;  %v11822_v36 = vpack.c.bf16 %v4630_v35, %v4630_v35  ;;  %v5269_v31 = vunpack.c.l.b16 %v11821_v6  ;;  %v14899_v8 = vld [vmem:[#allocation2 + $0x40] sm:$0xf]  ;;  %v14901_v13 = vld [vmem:[#allocation2 + $0x3c] sm:$0xf] }
 0x3e8   : > { %v4632_v10 = vmax.f32 %v4504_v50, 0.0  ;;  %v11823_v63 = vpack.c.bf16 %v4631_v21, %v4631_v21  ;;  %v4513_v47 = vadd.f32 %v14739_v24, %v4379_v33  ;;  %v4514_v61 = vadd.f32 %v14739_v24, %v4380_v19 }
 0x3e9   : > { %v4515_v29 = vadd.f32 %v14739_v24, %v4381_v22  ;;  %v4516_v11 = vadd.f32 %v14739_v24, %v4382_v23  ;;  %v5270_v51 = vunpack.c.l.b16 %v11822_v36  ;;  %v5484_v4 = vrot.slane %v5269_v31, 7 }
 0x3ea   : > { %v11824_v18 = vpack.c.bf16 %v4632_v10, %v4632_v10  ;;  %v5271_v1 = vunpack.c.l.b16 %v11823_v63  ;;  %v4641_v5 = vmax.f32 %v4513_v47, 0.0  ;;  %v4642_v16 = vmax.f32 %v4514_v61, 0.0 }
 0x3eb   : > { %v4643_v32 = vmax.f32 %v4515_v29, 0.0  ;;  %v4644_v34 = vmax.f32 %v4516_v11, 0.0  ;;  %v16726_v49 = vunpack.c.l.b16 %v14758_v37  ;;  %v5486_v45 = vrot.slane %v5270_v51, 6  ;;  %v14920_v51 = vld [vmem:[#allocation2 + $0x40] sm:$0xf] }
 0x3ec   : > { %v5272_v42 = vunpack.c.l.b16 %v11824_v18  ;;  %v5488_v30 = vrot.slane %v5271_v1, 5  ;;  %v11833_v14 = vpack.c.bf16 %v4641_v5, %v4641_v5  ;;  %v11834_v43 = vpack.c.bf16 %v4642_v16, %v4642_v16 }
 0x3ed   : > { %v5485_v25 = vsel %vm5305_vm8, %v5484_v4, %v16726_v49  ;;  %v11835_v17 = vpack.c.bf16 %v4643_v32, %v4643_v32  ;;  %v11840_v59 = vpack.c.bf16 %v4644_v34, %v4644_v34  ;;  %v2155_v20 = vcombine.high %v1041_v15, %v1041_v15 }
 0x3ee   : > { %v5487_v44 = vsel %vm5287_vm2, %v5486_v45, %v5485_v25  ;;  %v5490_v26 = vrot.slane %v5272_v42, 4  ;;  %v2162_v0 = vrot.slane %v1041_v15, %v13138_v40  ;;  %v5281_v3 = vunpack.c.l.b16 %v11833_v14 }
 0x3ef   : > { %v5489_v38 = vsel %vm5290_vm3, %v5488_v30, %v5487_v44  ;;  %v5282_v41 = vunpack.c.l.b16 %v11834_v43  ;;  %v5283_v37 = vunpack.c.l.b16 %v11835_v17  ;;  %v5593_v39 = vsel %vm13535_vm14, %v11840_v59, %v5592_v55  ;;  %v14931_v55 = vld [vmem:[#allocation2 + $0x44] sm:$0xf]  ;;  %v14933_v44 = vld [vmem:[#allocation2 + $0x3c] sm:$0xf] }
 0x3f0   : > { %v2169_v57 = vrot.slane %v2155_v20, %v13138_v40  ;;  %v2170_v7 = vcombine.high %v2162_v0, %v2162_v0  ;;  %v4171_v60 = vsel %vm2462_vm1, %v2162_v0, -inf  ;;  %v14903_v50 = vrot.slane %v5281_v3, 3  ;;  %5594 = vst [vmem:[#allocation2 + $0x60] sm:$0x1] %v5593_v39 }
 0x3f1   : > { %v14905_v35 = vrot.slane %v5282_v41, 2  ;;  %v14907_v21 = vrot.slane %v5283_v37, 1  ;;  %v4172_v6 = vrot.slane %v4171_v60, 4  ;;  %v14914_v54 = vsel %vm5293_vm4, %v5490_v26, %v5489_v38 }
 0x3f2   : > { %v2171_v33 = vcombine.high %v2169_v57, %v2169_v57  ;;  %v4178_v12 = vsel %vm2462_vm1, %v2170_v7, -inf  ;;  %v4185_v19 = vsel %vm2462_vm1, %v2169_v57, -inf  ;;  %v11351_v10 = vrot.slane %v6072_v56, 9 }
 0x3f3   : > { %v4173_v22 = vmax.f32 %v4171_v60, %v4172_v6  ;;  %v4179_v27 = vrot.slane %v4178_v12, 4  ;;  %v4186_v23 = vrot.slane %v4185_v19, 4  ;;  %v6122_v63 = vrot.slane %v14899_v8, 5 }
 0x3f4   : > { %v4192_v36 = vsel %vm2462_vm1, %v2171_v33, -inf  ;;  %v6125_v31 = vrot.slane %v14909_v48, 5  ;;  %v5752_v47 = vshrl.u32 %v14901_v13, 16  ;;  %v5755_v16 = vshll.u32 %v14901_v13, 16 }
 0x3f5   : > { %v4174_v61 = vrot.slane %v4173_v22, 2  ;;  %v4180_v29 = vmax.f32 %v4178_v12, %v4179_v27  ;;  %v4187_v11 = vmax.f32 %v4185_v19, %v4186_v23  ;;  %v4193_v18 = vrot.slane %v4192_v36, 4  ;;  %v16728_v19 = vld [vmem:[#allocation19_spill] sm:$0xff] }
 0x3f6   : > { %v6123_v1 = vsel %vm14137_vm13, %v11351_v10, %v6122_v63  ;;  %v6124_v4 = vrot.slane %v6122_v63, 4  ;;  %v5754_v5 = vrot.slane %v5752_v47, 4  ;;  %v5757_v25 = vrot.slane %v5755_v16, 5  ;;  %v16729_v47 = vld [vmem:[#allocation20_spill] sm:$0xff] }
 0x3f7   : > { %v4175_v32 = vmax.f32 %v4173_v22, %v4174_v61  ;;  %v4181_v34 = vrot.slane %v4180_v29, 2  ;;  %v4188_v15 = vrot.slane %v4187_v11, 2  ;;  %v4194_v42 = vmax.f32 %v4192_v36, %v4193_v18 }
 0x3f8   : > { %v6126_v49 = vsel %vm14137_vm13, %v6124_v4, %v6125_v31  ;;  %v5761_v45 = vshll.u32 %v14920_v51, 16  ;;  %v5765_v30 = vshrl.u32 %v14920_v51, 16  ;;  %v5758_v20 = vor.u32 %v5757_v25, %v5754_v5 }
 0x3f9   : > { %v4176_v14 = vrot.slane %v4175_v32, 1  ;;  %v4182_v43 = vmax.f32 %v4180_v29, %v4181_v34  ;;  %v4189_v17 = vmax.f32 %v4187_v11, %v4188_v15  ;;  %v4195_v59 = vrot.slane %v4194_v42, 2  ;;  %v16730_v29 = vld [vmem:[#allocation21_spill] sm:$0xff] }
 0x3fa   : > { %v11401_v26 = vcombine.low %v6123_v1, %v6126_v49  ;;  %v5763_v0 = vrot.slane %v5761_v45, 5  ;;  %v5767_v38 = vrot.slane %v5765_v30, 4  ;;  %v5759_v39 = vrot.slane %v5758_v20, 4 }
 0x3fb   : > { %v4177_v3 = vmax.f32 %v4175_v32, %v4176_v14  ;;  %v4183_v41 = vrot.slane %v4182_v43, 1  ;;  %v4190_v37 = vrot.slane %v4189_v17, 1  ;;  %v4196_v56 = vmax.f32 %v4194_v42, %v4195_v59  ;;  %v16731_v32 = vld [vmem:[#allocation22_spill] sm:$0xff] }
 0x3fc   : > { %7553 = vmatprep.mubr.bf16.mxu0 %v11401_v26  ;;  %v5768_v57 = vor.u32 %v5767_v38, %v5763_v0  ;;  %v5771_v7 = vshll.u32 %v14931_v55, 16  ;;  %v5983_v60 = vshrl.u32 %v14933_v44, 16  ;;  %v5764_v27 = vsel %vm14014_vm9, %v5759_v39, %v5763_v0 }
 0x3fd   : > { %v4184_v6 = vmax.f32 %v4182_v43, %v4183_v41  ;;  %v4191_v33 = vmax.f32 %v4189_v17, %v4190_v37  ;;  %v4197_v12 = vrot.slane %v4196_v56, 1  ;;  %v4371_v22 = vmax.f32 %v16728_v19, %v4177_v3 }
 0x3fe   : > { %v5769_v23 = vrot.slane %v5768_v57, 4  ;;  %v14940_v10 = vrot.slane %v5771_v7, 5  ;;  %v5985_v36 = vrot.slane %v5983_v60, 4  ;;  %v5986_v4 = vshll.u32 %v14933_v44, 16  ;;  %v14958_v57 = vld [vmem:[#allocation2 + $0x48] sm:$0xf] }
 0x3ff   : > { %v4198_v63 = vmax.f32 %v4196_v56, %v4197_v12  ;;  %v4372_v61 = vmax.f32 %v16729_v47, %v4184_v6  ;;  %v4373_v11 = vmax.f32 %v16730_v29, %v4191_v33  ;;  %v4505_v18 = vadd.f32 %v14739_v24, %v4371_v22  ;;  %v14960_v7 = vld [vmem:[#allocation2 + $0x4c] sm:$0x1]  ;;  %v14973_v47 = vld [vmem:[#allocation2 + $0x48] sm:$0xf] }
 0x400   : > { %v5774_v1 = vsel %vm14014_vm9, %v5769_v23, %v14940_v10  ;;  %v5992_v5 = vshll.u32 %v14899_v8, 16  ;;  %v5996_v16 = vshrl.u32 %v14899_v8, 16  ;;  %v5988_v45 = vrot.slane %v5986_v4, 5 }
 0x401   : > { %v4374_v34 = vmax.f32 %v16731_v32, %v4198_v63  ;;  %v4506_v15 = vadd.f32 %v14739_v24, %v4372_v61  ;;  %v4507_v42 = vadd.f32 %v14739_v24, %v4373_v11  ;;  %v4633_v49 = vmax.f32 %v4505_v18, 0.0 }
 0x402   : > { %v11371_v25 = vcombine.low %v5764_v27, %v5774_v1  ;;  %v5994_v30 = vrot.slane %v5992_v5, 5  ;;  %v5998_v14 = vrot.slane %v5996_v16, 4  ;;  %v5989_v20 = vor.u32 %v5988_v45, %v5985_v36 }
 0x403   : > { %v4508_v43 = vadd.f32 %v14739_v24, %v4374_v34  ;;  %v4634_v17 = vmax.f32 %v4506_v15, 0.0  ;;  %v4635_v59 = vmax.f32 %v4507_v42, 0.0  ;;  %v11825_v26 = vpack.c.bf16 %v4633_v49, %v4633_v49  ;;  %v14983_v34 = vld [vmem:[#allocation2 + $0x4c] sm:$0x1] }
 0x404   : > { %7375 = vmatprep.mubr.bf16.mxu1 %v11371_v25  ;;  %v5999_v0 = vor.u32 %v5998_v14, %v5994_v30  ;;  %v6002_v38 = vshll.u32 %v14909_v48, 16  ;;  %v11363_v3 = vcombine.low %v14901_v13, %v14920_v51  ;;  %v5990_v24 = vrot.slane %v5989_v20, 4 }
 0x405   : > { %v4636_v41 = vmax.f32 %v4508_v43, 0.0  ;;  %v11826_v37 = vpack.c.bf16 %v4634_v17, %v4634_v17  ;;  %v11827_v56 = vpack.c.bf16 %v4635_v59, %v4635_v59  ;;  %v5273_v39 = vunpack.c.l.b16 %v11825_v26 }
 0x406   : > { %v6000_v60 = vrot.slane %v5999_v0, 4  ;;  %v14962_v6 = vrot.slane %v6002_v38, 5  ;;  %7376 = vmatmul.mubr.bf16.gmra.mxu1 %v11363_v3  ;;  %v6127_v33 = vrot.slane %v6125_v31, 4  ;;  %v5995_v27 = vsel %vm14014_vm9, %v5990_v24, %v5994_v30  ;;  %v16732_v3 = vld [vmem:[#allocation10_spill] sm:$0xff] }
 0x407   : > { %v11828_v12 = vpack.c.bf16 %v4636_v41, %v4636_v41  ;;  %v5274_v19 = vunpack.c.l.b16 %v11826_v37  ;;  %v5275_v22 = vunpack.c.l.b16 %v11827_v56  ;;  %v5492_v13 = vrot.slane %v5273_v39, 3 }
 0x408   : > { %v6005_v23 = vsel %vm14014_vm9, %v6000_v60, %v14962_v6  ;;  %v6128_v36 = vrot.slane %v14958_v57, 5  ;;  %v6131_v63 = vrot.slane %v14960_v7, 5  ;;  %v5775_v5 = vshrl.u32 %v14931_v55, 16 }
 0x409   : > { %v5276_v61 = vunpack.c.l.b16 %v11828_v12  ;;  %v5493_v31 = vsel %vm5296_vm5, %v5492_v13, %v14914_v54  ;;  %v5494_v29 = vrot.slane %v5274_v19, 2  ;;  %v5496_v11 = vrot.slane %v5275_v22, 1 }
 0x40a   : > { %v11393_v18 = vcombine.low %v5995_v27, %v6005_v23  ;;  %v6129_v1 = vsel %vm14137_vm13, %v6127_v33, %v6128_v36  ;;  %v6130_v4 = vrot.slane %v6128_v36, 4  ;;  %v5781_v15 = vshll.u32 %v14973_v47, 16  ;;  %v5795_v33 = vld [vmem:[#allocation2] sm:$0xe] }
 0x40b   : > { %v5495_v16 = vsel %vm5299_vm6, %v5494_v29, %v5493_v31  ;;  %v5499_v32 = vsel %vm5305_vm8, %v14815_v53, %v5276_v61  ;;  %v5785_v54 = vshrl.u32 %v14973_v47, 16  ;;  %v5777_v45 = vrot.slane %v5775_v5, 4 }
 0x40c   : > { %v5497_v42 = vsel %vm5302_vm7, %v5496_v11, %v5495_v16  ;;  %v5501_v49 = vsel %vm5287_vm2, %v14827_v52, %v5499_v32  ;;  %7554 = vmatmul.mubr.bf16.gmra.mxu0 %v11393_v18  ;;  %v6132_v25 = vsel %vm14137_vm13, %v6130_v4, %v6131_v63  ;;  %v5783_v43 = vrot.slane %v5781_v15, 5  ;;  %v16734_v63 = vld [vmem:[#allocation11_spill] sm:$0xff] }
 0x40d   : > { %v5503_v30 = vsel %vm5290_vm3, %v14832_v28, %v5501_v49  ;;  %v5529_v53 = vpack.c.b16 %v5497_v42, %v5497_v42  ;;  %v11402_v14 = vcombine.low %v6129_v1, %v6132_v25  ;;  %v5778_v59 = vor.u32 %v5777_v45, %v14940_v10  ;;  %v6073_v1 = vld [vmem:[#allocation2 + $0x50] sm:$0xe]  ;;  %v12867_v49 = vld [vmem:[#allocation2 + $0x18] sm:$0xf]  ;;  %v12868_v25 = vld [vmem:[#allocation2 + $0x14] sm:$0xf] }
 0x40e   : > { %v5505_v17 = vsel %vm5293_vm4, %v14842_v9, %v5503_v30  ;;  %v5787_v26 = vrot.slane %v5785_v54, 4  ;;  %v5791_v20 = vshll.u32 %v14983_v34, 16  ;;  %v6006_v0 = vshrl.u32 %v14909_v48, 16  ;;  %v15029_v15 = vld [vmem:[#allocation2 + $0x50] sm:$0xf] }
 0x40f   : > { %v5507_v52 = vsel %vm5296_vm5, %v14903_v50, %v5505_v17  ;;  %5590 = vst [vmem:[#allocation2 + $0x58] sm:$0xf] %v5529_v53  ;;  %7561 = vmatprep.mubr.bf16.mxu0 %v11402_v14  ;;  %v6012_v28 = vshll.u32 %v14958_v57, 16  ;;  %v6016_v38 = vshrl.u32 %v14958_v57, 16  ;;  %v16733_v41 = vrot.slane %v16732_v3, 5 }
 0x410   : > { %v5509_v9 = vsel %vm5299_vm6, %v14905_v35, %v5507_v52  ;;  %v5779_v10 = vrot.slane %v5778_v59, 4  ;;  %v5788_v56 = vor.u32 %v5787_v26, %v5783_v43  ;;  %v6008_v50 = vrot.slane %v6006_v0, 4  ;;  %v15035_v53 = vld [vmem:[#allocation2 + $0x54] sm:$0xf] }
 0x411   : > { %v5826_v37 = vrot.slane %v16733_v41, 4  ;;  %v5511_v39 = vsel %vm5302_vm7, %v14907_v21, %v5509_v9  ;;  %v6014_v24 = vrot.slane %v6012_v28, 5  ;;  %v6018_v60 = vrot.slane %v6016_v38, 4 }
 0x412   : > { %v5530_v12 = vpack.c.b16 %v5511_v39, %v5511_v39  ;;  %v5789_v19 = vrot.slane %v5788_v56, 4  ;;  %v5793_v22 = vrot.slane %v5791_v20, 5  ;;  %v6022_v13 = vshll.u32 %v14960_v7, 16 }
 0x413   : > { %v6009_v27 = vor.u32 %v6008_v50, %v14962_v6  ;;  %v6019_v23 = vor.u32 %v6018_v60, %v6014_v24  ;;  %v5784_v35 = vsel %vm14014_vm9, %v5779_v10, %v5783_v43  ;;  %v11345_v21 = vrot.slane %v5795_v33, 9  ;;  %v15019_v6 = vpop.f32.mrf.mxu1  ;;  %v12869_v43 = vld [vmem:[#allocation2 + $0xc] sm:$0xf] }
 0x414   : > { %5591 = vst [vmem:[#allocation2 + $0x5c] sm:$0xf] %v5530_v12  ;;  %v5794_v36 = vsel %vm14014_vm9, %v5789_v19, %v5793_v22  ;;  %v16735_v61 = vrot.slane %v16734_v63, 5  ;;  %v6024_v7 = vrot.slane %v6022_v13, 5  ;;  %v11364_v4 = vcombine.low %v14931_v55, %v14973_v47  ;;  %v12676_v12 = vld [vmem:[%s16634_s3 + $0x1b8] sm:$0xff]  }
 0x415   : > { %v11372_v29 = vcombine.low %v5784_v35, %v5794_v36  ;;  %v6010_v11 = vrot.slane %v6009_v27, 4  ;;  %v6020_v18 = vrot.slane %v6019_v23, 4  ;;  %v16736_v5 = vmov %v16733_v41  ;;  %v15041_v28 = vpop.f32.mrf.mxu1  ;;  %v12870_v22 = vld [vmem:[#allocation2 + $0x10] sm:$0x1]  ;;  %v15057_v23 = vld [vmem:[#allocation2 + $0x60] sm:$0x1] }
 0x416   : > { %v5828_v31 = vsel %vm14137_vm13, %v5826_v37, %v16735_v61  ;;  %v5825_v16 = vsel %vm14137_vm13, %v11345_v21, %v16736_v5  ;;  %v15027_v32 = vld [vmem:[#allocation2 + $0x58] sm:$0xf]  ;;  %v11381_v45 = vcombine.low %v12868_v25, %v12867_v49  ;;  %v5830_v17 = vrot.slane %v12869_v43, 5  ;;  %v12679_v36 = vld [vmem:[%s16634_s3 + $0x1f0] sm:$0xff]  }
 0x417   : > { %7383 = vmatprep.mubr.bf16.mxu1 %v11372_v29  ;;  %v6015_v54 = vsel %vm14014_vm9, %v6010_v11, %v6014_v24  ;;  %v6025_v42 = vsel %vm14014_vm9, %v6020_v18, %v6024_v7  ;;  %v11373_v30 = vcombine.low %v5825_v16, %v5828_v31  ;;  %v11352_v59 = vrot.slane %v6073_v1, 9  ;;  %v15059_v35 = vpop.f32.mrf.mxu1  ;;  %v12871_v29 = vld [vmem:[#allocation2 + $0x1c] sm:$0xf]  ;;  %v12872_v11 = vld [vmem:[#allocation2 + $0x20] sm:$0xf]  ;;  %v12681_v25 = vld [vmem:[%s16634_s3 + $0x1b0] sm:$0xff]  }
 0x418   : > { %v11394_v14 = vcombine.low %v6015_v54, %v6025_v42  ;;  %7384 = vmatmul.mubr.bf16.gmra.mxu1 %v11364_v4  ;;  %v6135_v26 = vrot.slane %v15035_v53, 5  ;;  %v6138_v20 = vrot.slane %v15027_v32, 5  ;;  %v6027_v52 = vshrl.u32 %v15029_v15, 16 }
 0x419   : > { %7424 = vmatprep.mubr.bf16.mxu1 %v11381_v45  ;;  %v6030_v0 = vshll.u32 %v15029_v15, 16  ;;  %v6036_v38 = vshll.u32 %v15035_v53, 16  ;;  %v6040_v3 = vshrl.u32 %v15035_v53, 16  ;;  %v6046_v41 = vshll.u32 %v15027_v32, 16  ;;  %v15077_v43 = vpop.f32.mrf.mxu1 }
 0x41a   : > { %7562 = vmatmul.mubr.bf16.gmra.mxu0 %v11394_v14  ;;  %v16737_v37 = vmov %v16735_v61  ;;  %v6136_v10 = vsel %vm14137_vm13, %v11352_v59, %v6135_v26  ;;  %v6137_v56 = vrot.slane %v6135_v26, 4  ;;  %v6029_v39 = vrot.slane %v6027_v52, 4  ;;  %v12684_v26 = vld [vmem:[%s16634_s3 + $0x1e8] sm:$0xff]  }
 0x41b   : > { %v5829_v9 = vrot.slane %v16737_v37, 4  ;;  %v6032_v50 = vrot.slane %v6030_v0, 5  ;;  %v6038_v24 = vrot.slane %v6036_v38, 5  ;;  %v6042_v60 = vrot.slane %v6040_v3, 4  ;;  %v15050_v33 = vld [vmem:[#allocation2 + $0x5c] sm:$0xf] }
 0x41c   : > { %v5832_v19 = vrot.slane %v5830_v17, 4  ;;  %v5833_v13 = vrot.slane %v12870_v22, 5  ;;  %v6139_v27 = vsel %vm14137_vm13, %v6137_v56, %v6138_v20  ;;  %v6048_v31 = vrot.slane %v6046_v41, 5  ;;  %v12874_v22 = vld [vmem:[#allocation2 + $0x2c] sm:$0xf] }
 0x41d   : > { %v11403_v21 = vcombine.low %v6136_v10, %v6139_v27  ;;  %v6033_v63 = vor.u32 %v6032_v50, %v6029_v39  ;;  %v6043_v61 = vor.u32 %v6042_v60, %v6038_v24  ;;  %v11382_v18 = vcombine.low %v12871_v29, %v12872_v11  ;;  %v15091_v10 = vld [vmem:[#allocation2 + $0x30] sm:$0xf]  ;;  %v12686_v60 = vld [vmem:[%s16634_s3 + $0x1a8] sm:$0xff]   ;;  %v12876_v29 = vld [vmem:[#allocation2 + $0x1c] sm:$0xf] }
 0x41e   : > { %v5831_v7 = vsel %vm14137_vm13, %v5829_v9, %v5830_v17  ;;  %v6140_v1 = vrot.slane %v6138_v20, 4  ;;  %v6141_v4 = vrot.slane %v15050_v33, 5  ;;  %v6144_v54 = vrot.slane %v15057_v23, 5  ;;  %v12873_v20 = vld [vmem:[#allocation2 + $0x18] sm:$0xf] }
 0x41f   : > { %7569 = vmatprep.mubr.bf16.mxu0 %v11403_v21  ;;  %v6034_v5 = vrot.slane %v6033_v63, 4  ;;  %v6044_v16 = vrot.slane %v6043_v61, 4  ;;  %v6050_v42 = vshrl.u32 %v15027_v32, 16  ;;  %v5834_v49 = vsel %vm14137_vm13, %v5832_v19, %v5833_v13  ;;  %v15089_v9 = vld [vmem:[#allocation2 + $0x2c] sm:$0xf]  ;;  %v15097_v19 = vpop.f32.mrf.mxu1  ;;  %v12689_v21 = vld [vmem:[%s16634_s3 + $0x1e0] sm:$0xff]  }
 0x420   : > { %7425 = vmatmul.mubr.bf16.vlgmr.msra.gmra.mxu1 %v11373_v30  ;;  %v6142_v45 = vsel %vm14137_vm13, %v6140_v1, %v6141_v4  ;;  %v6143_v30 = vrot.slane %v6141_v4, 4  ;;  %v6056_v14 = vshll.u32 %v15050_v33, 16  ;;  %v5837_v52 = vrot.slane %v12873_v20, 5  ;;  %v12875_v13 = vld [vmem:[#allocation2 + $0x28] sm:$0xf] }
 0x421   : > { %12102 = vmatpush3.bf16.msra.mxu1 %v12676_v12  ;;  %7432 = vmatprep.mubr.bf16.mxu1 %v11382_v18  ;;  %v6039_v17 = vsel %vm14014_vm9, %v6034_v5, %v6038_v24  ;;  %v6049_v59 = vsel %vm14014_vm9, %v6044_v16, %v6048_v31  ;;  %v6052_v0 = vrot.slane %v6050_v42, 4  ;;  %v6060_v37 = vshrl.u32 %v15050_v33, 16  ;;  %v15104_v61 = vld [vmem:[#allocation2 + $0x34] sm:$0xf]  ;;  %v6343_v1 = vld [vmem:[#allocation2 + $0x28] sm:$0xe] }
 0x422   : > { %12103 = vmatprep.subr.bf16.mxu1 %v12679_v36  ;;  %v11395_v38 = vcombine.low %v6039_v17, %v6049_v59  ;;  %v6145_v3 = vsel %vm14137_vm13, %v6143_v30, %v6144_v54  ;;  %v6058_v41 = vrot.slane %v6056_v14, 5  ;;  %v11374_v56 = vcombine.low %v5831_v7, %v5834_v49  ;;  %v5796_v4 = vld [vmem:[#allocation2 + $0x14] sm:$0xe]  ;;  %v12691_v42 = vld [vmem:[%s16634_s3 + $0x1a0] sm:$0xff]   ;;  %v12694_v59 = vld [vmem:[%s16634_s3 + $0x1d8] sm:$0xff]  }
 0x423   : > { %v11404_v39 = vcombine.low %v6142_v45, %v6145_v3  ;;  %v6053_v50 = vor.u32 %v6052_v0, %v6048_v31  ;;  %v6066_v24 = vshll.u32 %v15057_v23, 16  ;;  %v6062_v12 = vrot.slane %v6060_v37, 4  ;;  %v12877_v45 = vld [vmem:[#allocation2 + $0x20] sm:$0xf]  ;;  %v15125_v3 = vld [vmem:[#allocation2 + $0x44] sm:$0xf] }
 0x424   : > { %7570 = vmatmul.mubr.bf16.gmra.mxu0 %v11395_v38  ;;  %v11383_v27 = vcombine.low %v12875_v13, %v12874_v22  ;;  %v6369_v23 = vrot.slane %v15089_v9, 5  ;;  %v6372_v63 = vrot.slane %v15091_v10, 5  ;;  %v5839_v31 = vrot.slane %v5837_v52, 4  ;;  %v15137_v22 = vld [vmem:[#allocation2 + $0x48] sm:$0xf] }
 0x425   : > { %12104 = vmatpush3.bf16.msra.mxu1 %v12681_v25  ;;  %7577 = vmatprep.mubr.bf16.mxu0 %v11404_v39  ;;  %v6054_v36 = vrot.slane %v6053_v50, 4  ;;  %v5840_v11 = vrot.slane %v12876_v29, 5  ;;  %v6063_v18 = vor.u32 %v6062_v12, %v6058_v41  ;;  %v6068_v7 = vrot.slane %v6066_v24, 5  ;;  %v15112_v25 = vpop.f32.mrf.mxu1 }
 0x426   : > { %12105 = vmatprep.subr.bf16.mxu1 %v12684_v26  ;;  %v6371_v5 = vrot.slane %v6369_v23, 4  ;;  %v6375_v49 = vrot.slane %v15104_v61, 5  ;;  %v5843_v30 = vrot.slane %v12877_v45, 5  ;;  %v11353_v14 = vrot.slane %v6343_v1, 9  ;;  %v15119_v26 = vld [vmem:[#allocation2 + $0x40] sm:$0xf] }
 0x427   : > { %v6059_v16 = vsel %vm14014_vm9, %v6054_v36, %v6058_v41  ;;  %v6064_v54 = vrot.slane %v6063_v18, 4  ;;  %v11346_v20 = vrot.slane %v5796_v4, 9  ;;  %v5841_v0 = vsel %vm14137_vm13, %v5839_v31, %v5840_v11  ;;  %v15139_v13 = vpop.f32.mrf.mxu1  ;;  %v12879_v31 = vld [vmem:[#allocation2 + $0x34] sm:$0xf]  ;;  %v6344_v4 = vld [vmem:[#allocation2 + $0x3c] sm:$0xe] }
 0x428   : > { %7433 = vmatmul.mubr.bf16.gmra.mxu1 %v11374_v56  ;;  %v6373_v17 = vsel %vm14137_vm13, %v6371_v5, %v6372_v63  ;;  %v6370_v37 = vsel %vm14137_vm13, %v11353_v14, %v6369_v23  ;;  %v15129_v56 = vld [vmem:[#allocation2 + $0x38] sm:$0x1]  ;;  %v6377_v24 = vrot.slane %v6375_v49, 4  ;;  %v6382_v12 = vrot.slane %v15119_v26, 5  ;;  %v12878_v23 = vld [vmem:[#allocation2 + $0x30] sm:$0xf] }
 0x429   : > { %7440 = vmatprep.mubr.bf16.mxu1 %v11383_v27  ;;  %12106 = vmatpush3.bf16.msra.mxu1 %v12686_v60  ;;  %v6069_v38 = vsel %vm14014_vm9, %v6064_v54, %v6068_v7  ;;  %v5838_v39 = vsel %vm14137_vm13, %v11346_v20, %v5837_v52  ;;  %v11421_v50 = vcombine.low %v6370_v37, %v6373_v17  ;;  %v12695_v60 = vld [vmem:[%s16634_s3 + $0x198] sm:$0xff]   ;;  %v5845_v36 = vrot.slane %v5843_v30, 4  ;;  %v12697_v52 = vld [vmem:[%s16634_s3 + $0x1d0] sm:$0xff]   ;;  %v15146_v7 = vld [vmem:[#allocation2 + $0x2c] sm:$0xf] }
 0x42a   : > { %12107 = vmatprep.subr.bf16.mxu1 %v12689_v21  ;;  %v11396_v41 = vcombine.low %v6059_v16, %v6069_v38  ;;  %v11375_v27 = vcombine.low %v5838_v39, %v5841_v0  ;;  %v6385_v21 = vrot.slane %v15125_v3, 5  ;;  %v11384_v29 = vcombine.low %v12878_v23, %v12879_v31  ;;  %v12881_v54 = vld [vmem:[#allocation2 + $0x24] sm:$0x1]  ;;  %v12698_v20 = vld [vmem:[%s16634_s3 + $0x190] sm:$0xff]   ;;  %v15157_v0 = vpop.f32.mrf.mxu1 }
 0x42b   : > { %v6378_v18 = vrot.slane %v15129_v56, 5  ;;  %v16651_v1 = vrot.slane %v15146_v7, 5  ;;  %v6384_v5 = vrot.slane %v6382_v12, 4  ;;  %v5842_v16 = vrot.slane %v5840_v11, 4  ;;  %v15165_v37 = vld [vmem:[#allocation2 + $0x54] sm:$0xf] }
 0x42c   : > { %7578 = vmatmul.mubr.bf16.gmra.mxu0 %v11396_v41  ;;  %v16652_v45 = vrot.slane %v15137_v22, 5  ;;  %v6374_v14 = vrot.slane %v6372_v63, 4  ;;  %v11354_v41 = vrot.slane %v6344_v4, 9  ;;  %v6345_v39 = vld [vmem:[#allocation2 + $0x50] sm:$0xe]  ;;  %v11385_v23 = vcombine.low %v14933_v44, %v14899_v8  ;;  %v12703_v8 = vld [vmem:[%s16634_s3 + $0x1c0] sm:$0xff]   ;;  %v15193_v44 = vpop.f32.mrf.mxu1 }
 0x42d   : > { %12108 = vmatpush3.bf16.msra.mxu1 %v12691_v42  ;;  %12484 = vmatprep.mubr.bf16.mxu0 %v11421_v50  ;;  %v5846_v42 = vrot.slane %v12881_v54, 5  ;;  %v6379_v17 = vsel %vm14137_vm13, %v6377_v24, %v6378_v18  ;;  %v5844_v11 = vsel %vm14137_vm13, %v5842_v16, %v5843_v30  ;;  %v6386_v63 = vsel %vm14137_vm13, %v6384_v5, %v6385_v21  ;;  %v12700_v50 = vld [vmem:[%s16634_s3 + $0x1c8] sm:$0xff]  }
 0x42e   : > { %12109 = vmatprep.subr.bf16.mxu1 %v12694_v59  ;;  %v15152_v59 = vld [vmem:[#allocation2 + $0x4c] sm:$0x1]  ;;  %v6376_v24 = vsel %vm14137_vm13, %v6374_v14, %v6375_v49  ;;  %v5852_v30 = vrot.slane %v16651_v1, 4  ;;  %v6383_v18 = vsel %vm14137_vm13, %v11354_v41, %v6382_v12  ;;  %v6390_v49 = vrot.slane %v16652_v45, 4 }
 0x42f   : > { %v5847_v38 = vsel %vm14137_vm13, %v5845_v36, %v5846_v42  ;;  %v15177_v36 = vld [vmem:[#allocation2 + $0x58] sm:$0xf]  ;;  %v11422_v31 = vcombine.low %v6376_v24, %v6379_v17  ;;  %v11423_v5 = vcombine.low %v6383_v18, %v6386_v63  ;;  %v6391_v16 = vrot.slane %v15152_v59, 5  ;;  %v5798_v42 = vld [vmem:[#allocation2 + $0x3c] sm:$0xe]  ;;  %v12701_v14 = vld [vmem:[%s16634_s3 + $0x188] sm:$0xff]  }
 0x430   : > { %7441 = vmatmul.mubr.bf16.gmra.mxu1 %v11375_v27  ;;  %v11376_v4 = vcombine.low %v5844_v11, %v5847_v38  ;;  %v11355_v54 = vrot.slane %v6345_v39, 9  ;;  %v6398_v17 = vrot.slane %v15177_v36, 5  ;;  %v15196_v11 = vld [vmem:[#allocation2 + $0x5c] sm:$0xf]  ;;  %v5866_v38 = vrot.slane %v14931_v55, 5 }
 0x431   : > { %7448 = vmatprep.mubr.bf16.mxu1 %v11384_v29  ;;  %12110 = vmatpush3.bf16.msra.mxu1 %v12695_v60  ;;  %v15174_v60 = vld [vmem:[#allocation2 + $0x30] sm:$0xf]  ;;  %v5797_v29 = vld [vmem:[#allocation2 + $0x28] sm:$0xe]  ;;  %v6387_v39 = vrot.slane %v6385_v21, 4  ;;  %v5869_v24 = vrot.slane %v14973_v47, 5  ;;  %v15212_v21 = vpop.f32.mrf.mxu1 }
 0x432   : > { %12111 = vmatprep.subr.bf16.mxu1 %v12697_v52  ;;  %v5853_v27 = vrot.slane %v15174_v60, 5  ;;  %v6395_v52 = vrot.slane %v15165_v37, 5  ;;  %v11347_v41 = vrot.slane %v5797_v29, 9  ;;  %v11348_v1 = vrot.slane %v5798_v42, 9  ;;  %v12704_v47 = vld [vmem:[%s16634_s3 + $0x180] sm:$0xff]  }
 0x433   : > { %v6401_v55 = vrot.slane %v15196_v11, 5  ;;  %v5868_v29 = vrot.slane %v5866_v38, 4  ;;  %v5871_v45 = vrot.slane %v5869_v24, 4  ;;  %v6235_v2 = vshrl.u32 %v15125_v3, 16 }
 0x434   : > { %12485 = vmatmul.mubr.bf16.vlgmr.msra.gmra.mxu0 %v11422_v31  ;;  %v6397_v12 = vrot.slane %v6395_v52, 4  ;;  %v5854_v63 = vsel %vm14137_vm13, %v5852_v30, %v5853_v27  ;;  %v12883_v31 = vld [vmem:[#allocation2 + $0x34] sm:$0xf]  ;;  %v5872_v30 = vrot.slane %v14983_v34, 5 }
 0x435   : > { %12112 = vmatpush3.bf16.msra.mxu1 %v12698_v20  ;;  %v5863_v20 = vrot.slane %v14920_v51, 5  ;;  %12488 = vmatprep.mubr.bf16.mxu0 %v11423_v5  ;;  %v5856_v18 = vrot.slane %v12883_v31, 5  ;;  %v6403_v31 = vrot.slane %v6401_v55, 4 }
 0x436   : > { %12113 = vmatprep.subr.bf16.mxu1 %v12700_v50  ;;  %v6392_v50 = vsel %vm14137_vm13, %v6390_v49, %v6391_v16  ;;  %v6396_v49 = vsel %vm14137_vm13, %v11355_v54, %v6395_v52  ;;  %v16738_v16 = vrot.slane %v15137_v22, 5  ;;  %v15230_v52 = vsel %vm14137_vm13, %v5868_v29, %v5869_v24  ;;  %v15243_v24 = vpop.f32.mrf.mxu1 }
 0x437   : > { %v5865_v51 = vrot.slane %v5863_v20, 4  ;;  %v5864_v5 = vsel %vm14137_vm13, %v11348_v1, %v5863_v20  ;;  %v15234_v54 = vsel %vm14137_vm13, %v5871_v45, %v5872_v30  ;;  %v16739_v1 = vrot.slane %v15146_v7, 5 }
 0x438   : > { %7449 = vmatmul.mubr.bf16.gmra.mxu1 %v11376_v4  ;;  %v6399_v4 = vsel %vm14137_vm13, %v6397_v12, %v6398_v17  ;;  %v6389_v42 = vsel %vm14137_vm13, %v6387_v39, %v16738_v16  ;;  %v11380_v20 = vcombine.low %v15230_v52, %v15234_v54  ;;  %v6400_v39 = vrot.slane %v6398_v17, 4 }
 0x439   : > { %7456 = vmatprep.mubr.bf16.mxu1 %v11385_v23  ;;  %12114 = vmatpush3.bf16.msra.mxu1 %v12701_v14  ;;  %v15218_v23 = vld [vmem:[#allocation2 + $0x60] sm:$0x1]  ;;  %v5867_v34 = vsel %vm14137_vm13, %v5865_v51, %v5866_v38  ;;  %v5851_v12 = vsel %vm14137_vm13, %v11347_v41, %v16739_v1  ;;  %v11425_v38 = vcombine.low %v6396_v49, %v6399_v4  ;;  %v5858_v45 = vrot.slane %v5856_v18, 4  ;;  %v12884_v41 = vld [vmem:[#allocation2 + $0x38] sm:$0x1] }
 0x43a   : > { %12115 = vmatprep.subr.bf16.mxu1 %v12703_v8  ;;  %v11379_v14 = vcombine.low %v5864_v5, %v5867_v34  ;;  %v11424_v8 = vcombine.low %v6389_v42, %v6392_v50  ;;  %v6404_v51 = vrot.slane %v15218_v23, 5  ;;  %v11377_v29 = vcombine.low %v5851_v12, %v5854_v63 }
 0x43b   : > { %v11386_v7 = vcombine.low %v14909_v48, %v14958_v57  ;;  %v5859_v50 = vrot.slane %v12884_v41, 5  ;;  %v6402_v17 = vsel %vm14137_vm13, %v6400_v39, %v6401_v55  ;;  %v5855_v63 = vrot.slane %v5853_v27, 4  ;;  %v15257_v57 = vld [vmem:[#allocation2 + $0x28] sm:$0xf] }
 0x43c   : > { %12489 = vmatmul.mubr.bf16.gmra.mxu0 %v11424_v8  ;;  %v6405_v30 = vsel %vm14137_vm13, %v6403_v31, %v6404_v51  ;;  %v6177_v4 = vshll.u32 %v15089_v9, 16  ;;  %v6181_v5 = vshrl.u32 %v15089_v9, 16  ;;  %v6168_v60 = vshrl.u32 %v15257_v57, 16 }
 0x43d   : > { %12116 = vmatpush3.bf16.msra.mxu1 %v12704_v47  ;;  %12492 = vmatprep.mubr.bf16.mxu0 %v11425_v38  ;;  %v15251_v47 = vpop.f32.mrf.mxu1  ;;  %v5860_v48 = vsel %vm14137_vm13, %v5858_v45, %v5859_v50  ;;  %v11426_v49 = vcombine.low %v6402_v17, %v6405_v30  ;;  %v5857_v55 = vsel %vm14137_vm13, %v5855_v63, %v5856_v18  ;;  %v6171_v27 = vshll.u32 %v15257_v57, 16 }
 0x43e   : > { %16740 = vst [vmem:[#allocation23_spill] sm:$0xff] %v15251_v47  ;;  %v11378_v16 = vcombine.low %v5857_v55, %v5860_v48  ;;  %v11387_v42 = vcombine.low %v15029_v15, %v15035_v53  ;;  %v6179_v1 = vrot.slane %v6177_v4, 5  ;;  %v6183_v12 = vrot.slane %v6181_v5, 4  ;;  %v15281_v4 = vld [vmem:[#allocation2 + $0x3c] sm:$0xf] }
 0x43f   : > { %v15263_v34 = vpop.f32.mrf.mxu1  ;;  %v6170_v38 = vrot.slane %v6168_v60, 4  ;;  %v6173_v39 = vrot.slane %v6171_v27, 5  ;;  %v6197_v18 = vshll.u32 %v15104_v61, 16  ;;  %v6201_v31 = vshrl.u32 %v15104_v61, 16  ;;  %v6346_v27 = vld [vmem:[#allocation2 + $0x64] sm:$0xe] }
 0x440   : > { %7457 = vmatmul.mubr.bf16.gmra.mxu1 %v11377_v29  ;;  %v6184_v51 = vor.u32 %v6183_v12, %v6179_v1  ;;  %v6187_v29 = vshll.u32 %v15091_v10, 16  ;;  %v11388_v53 = vcombine.low %v15027_v32, %v15050_v33  ;;  %v6207_v33 = vshll.u32 %v15129_v56, 16 }
 0x441   : > { %7464 = vmatprep.mubr.bf16.mxu1 %v11386_v7  ;;  %v15269_v8 = vpop.f32.mrf.mxu1  ;;  %v6191_v7 = vshrl.u32 %v15091_v10, 16  ;;  %v6174_v15 = vor.u32 %v6173_v39, %v6170_v38  ;;  %v6199_v41 = vrot.slane %v6197_v18, 5  ;;  %v6203_v50 = vrot.slane %v6201_v31, 4  ;;  %v15294_v18 = vld [vmem:[#allocation2 + $0x70] sm:$0xf] }
 0x442   : > { %v6185_v17 = vrot.slane %v6184_v51, 4  ;;  %v6189_v30 = vrot.slane %v6187_v29, 5  ;;  %v6225_v60 = vshrl.u32 %v15119_v26, 16  ;;  %v6212_v12 = vshrl.u32 %v15281_v4, 16  ;;  %v15296_v29 = vld [vmem:[#allocation2 + $0x68] sm:$0xf] }
 0x443   : > { %v15275_v45 = vpop.f32.mrf.mxu1  ;;  %v6193_v63 = vrot.slane %v6191_v7, 4  ;;  %v6204_v55 = vor.u32 %v6203_v50, %v6199_v41  ;;  %v6215_v39 = vshll.u32 %v15281_v4, 16  ;;  %v11356_v56 = vrot.slane %v6346_v27, 9  ;;  %v15298_v7 = vld [vmem:[#allocation2 + $0x74] sm:$0x1] }
 0x444   : > { %12493 = vmatmul.mubr.bf16.gmra.mxu0 %v11426_v49  ;;  %v6175_v49 = vrot.slane %v6174_v15, 4  ;;  %v6190_v32 = vsel %vm14014_vm9, %v6185_v17, %v6189_v30  ;;  %v6227_v17 = vrot.slane %v6225_v60, 4  ;;  %v6417_v54 = vrot.slane %v15298_v7, 5 }
 0x445   : > { %v15279_v48 = vpop.f32.mrf.mxu1  ;;  %v6205_v51 = vrot.slane %v6204_v55, 4  ;;  %v6217_v27 = vrot.slane %v6215_v39, 5  ;;  %v6245_v5 = vshrl.u32 %v15137_v22, 16 }
 0x446   : > { %v6180_v38 = vsel %vm14014_vm9, %v6175_v49, %v6179_v1  ;;  %v15303_v1 = vld [vmem:[#allocation2 + $0x6c] sm:$0xf]  ;;  %v6214_v49 = vrot.slane %v6212_v12, 4 }
 0x447   : > { %v11413_v31 = vcombine.low %v6180_v38, %v6190_v32  ;;  %v6411_v55 = vrot.slane %v15303_v1, 5  ;;  %v6414_v32 = vrot.slane %v15294_v18, 5 }
 0x448   : > { %7465 = vmatmul.mubr.bf16.gmra.mxu1 %v11378_v16  ;;  %v6218_v62 = vor.u32 %v6217_v27, %v6214_v49 }
 0x449   : > { %7472 = vmatprep.mubr.bf16.mxu1 %v11387_v42  ;;  %v6194_v42 = vor.u32 %v6193_v63, %v6189_v30  ;;  %v6408_v30 = vrot.slane %v15296_v29, 5  ;;  %v6416_v60 = vrot.slane %v6414_v32, 4 }
 0x44b   : > { %v11949_v16 = vpop.f32.mrf.mxu1  ;;  %v6195_v63 = vrot.slane %v6194_v42, 4  ;;  %v6409_v38 = vsel %vm14137_vm13, %v11356_v56, %v6408_v30  ;;  %v6410_v52 = vrot.slane %v6408_v30, 4  ;;  %v11405_v56 = vcombine.low %v15257_v57, %v15089_v9 }
 0x44d   : > { %v11950_v15 = vpop.f32.mrf.mxu1  ;;  %v6412_v39 = vsel %vm14137_vm13, %v6410_v52, %v6411_v55 }
 0x44e   : > { %v11427_v30 = vcombine.low %v6409_v38, %v6412_v39  ;;  %v6247_v38 = vrot.slane %v6245_v5, 4  ;;  %v15327_v39 = vld [vmem:[#allocation2 + $0x50] sm:$0xf]  ;;  %v6265_v5 = vshll.u32 %v15165_v37, 16 }
 0x44f   : > { %v11952_v42 = vpop.f32.mrf.mxu1  ;;  %v6259_v49 = vshll.u32 %v15327_v39, 16 }
 0x450   : > { %7473 = vmatmul.mubr.bf16.gmra.mxu1 %v11379_v14  ;;  %v6221_v14 = vshll.u32 %v15119_v26, 16  ;;  %12496 = vmatprep.mubr.bf16.mxu0 %v11427_v30 }
 0x451   : > { %7480 = vmatprep.mubr.bf16.mxu1 %v11388_v53  ;;  %v6209_v53 = vrot.slane %v6207_v33, 5  ;;  %v6231_v33 = vshll.u32 %v15125_v3, 16 }
 0x452   : > { %v6223_v50 = vrot.slane %v6221_v14, 5  ;;  %v6413_v14 = vrot.slane %v6411_v55, 4  ;;  %v11953_v55 = vpop.f32.mrf.mxu1 }
 0x453   : > { %v6233_v9 = vrot.slane %v6231_v33, 5  ;;  %v6269_v33 = vshrl.u32 %v15165_v37, 16 }
 0x454   : > { %v6228_v12 = vor.u32 %v6227_v17, %v6223_v50  ;;  %v6200_v17 = vsel %vm14014_vm9, %v6195_v63, %v6199_v41  ;;  %v15331_v41 = vadd.f32 %v11953_v55, %v11952_v42  ;;  %v6256_v63 = vshrl.u32 %v15327_v39, 16 }
 0x455   : > { %v6289_v55 = vshrl.u32 %v15196_v11, 16 }
 0x456   : > { %v6229_v52 = vrot.slane %v6228_v12, 4  ;;  %v6267_v12 = vrot.slane %v6265_v5, 5 }
 0x458   : > { %7481 = vmatmul.mubr.bf16.gmra.mxu1 %v11380_v20  ;;  %v6210_v20 = vsel %vm14014_vm9, %v6205_v51, %v6209_v53  ;;  %v6415_v51 = vsel %vm14137_vm13, %v6413_v14, %v6414_v32  ;;  %v6418_v53 = vsel %vm14137_vm13, %v6416_v60, %v6417_v54  ;;  %v6219_v32 = vrot.slane %v6218_v62, 4 }
 0x459   : > { %7618 = vmatprep.mubr.bf16.mxu1 %v11413_v31  ;;  %v6241_v31 = vshll.u32 %v15137_v22, 16  ;;  %v11428_v40 = vcombine.low %v6415_v51, %v6418_v53  ;;  %v11414_v47 = vcombine.low %v6200_v17, %v6210_v20  ;;  %v6237_v54 = vrot.slane %v6235_v2, 4 }
 0x45a   : > { %v15329_v14 = vadd.f32 %v11950_v15, %v11949_v16  ;;  %v6234_v27 = vsel %vm14014_vm9, %v6229_v52, %v6233_v9  ;;  %v6224_v2 = vsel %vm14014_vm9, %v6219_v32, %v6223_v50  ;;  %v6258_v15 = vrot.slane %v6256_v63, 4 }
 0x45b   : > { %v6243_v57 = vrot.slane %v6241_v31, 5  ;;  %12497 = vmatmul.mubr.bf16.gmra.mxu0 %v11428_v40  ;;  %v11406_v40 = vcombine.low %v15091_v10, %v15104_v61  ;;  %v6238_v62 = vor.u32 %v6237_v54, %v6233_v9  ;;  %v11415_v16 = vcombine.low %v6224_v2, %v6234_v27  ;;  %v15346_v61 = vpop.f32.mrf.mxu0 }
 0x45c   : > { %v6261_v60 = vrot.slane %v6259_v49, 5  ;;  %v6271_v31 = vrot.slane %v6269_v33, 4  ;;  %v6275_v53 = vshll.u32 %v15177_v36, 16  ;;  %v6279_v10 = vshrl.u32 %v15177_v36, 16 }
 0x45d   : > { %v6248_v20 = vor.u32 %v6247_v38, %v6243_v57  ;;  %v6285_v17 = vshll.u32 %v15196_v11, 16  ;;  %v11407_v52 = vcombine.low %v15281_v4, %v15119_v26  ;;  %v15356_v38 = vld [vmem:[#allocation2 + $0x64] sm:$0xf]  ;;  %v15358_v49 = vpop.f32.mrf.mxu0  ;;  %v6291_v33 = vrot.slane %v6289_v55, 4 }
 0x45e   : > { %v6262_v51 = vor.u32 %v6261_v60, %v6258_v15  ;;  %v6272_v50 = vor.u32 %v6271_v31, %v6267_v12  ;;  %v6277_v54 = vrot.slane %v6275_v53, 5  ;;  %v6281_v63 = vrot.slane %v6279_v10, 4 }
 0x45f   : > { %v6249_v42 = vrot.slane %v6248_v20, 4  ;;  %v6287_v5 = vrot.slane %v6285_v17, 5  ;;  %v6303_v26 = vshll.u32 %v15356_v38, 16  ;;  %v6309_v4 = vshll.u32 %v15296_v29, 16 }
 0x460   : > { %7619 = vmatmul.mubr.bf16.vlgmr.msra.gmra.mxu1 %v11405_v56  ;;  %v6239_v56 = vrot.slane %v6238_v62, 4  ;;  %v6263_v27 = vrot.slane %v6262_v51, 4  ;;  %v6273_v20 = vrot.slane %v6272_v50, 4  ;;  %v6295_v2 = vshll.u32 %v15218_v23, 16  ;;  %v15365_v62 = vpop.f32.mrf.mxu0 }
 0x461   : > { %7626 = vmatprep.mubr.bf16.mxu1 %v11414_v47  ;;  %v6251_v47 = vshll.u32 %v15152_v59, 16  ;;  %v6282_v15 = vor.u32 %v6281_v63, %v6277_v54  ;;  %v6292_v60 = vor.u32 %v6291_v33, %v6287_v5  ;;  %v6305_v31 = vrot.slane %v6303_v26, 5 }
 0x462   : > { %v6244_v9 = vsel %vm14014_vm9, %v6239_v56, %v6243_v57  ;;  %v6313_v57 = vshrl.u32 %v15296_v29, 16  ;;  %v11408_v56 = vcombine.low %v15125_v3, %v15137_v22  ;;  %v15373_v10 = vpop.f32.mrf.mxu0  ;;  %v6297_v50 = vrot.slane %v6295_v2, 5 }
 0x463   : > { %v6253_v30 = vrot.slane %v6251_v47, 5  ;;  %v6268_v47 = vsel %vm14014_vm9, %v6263_v27, %v6267_v12  ;;  %v6283_v23 = vrot.slane %v6282_v15, 4  ;;  %v6319_v17 = vshll.u32 %v15303_v1, 16 }
 0x464   : > { %v6315_v51 = vrot.slane %v6313_v57, 4  ;;  %v6333_v3 = vshrl.u32 %v15294_v18, 16  ;;  %v15379_v22 = vpop.f32.mrf.mxu0  ;;  %v11409_v63 = vcombine.low %v15327_v39, %v15165_v37  ;;  %v6339_v37 = vshll.u32 %v15298_v7, 16 }
 0x465   : > { %v6254_v59 = vsel %vm14014_vm9, %v6249_v42, %v6253_v30  ;;  %v6311_v30 = vrot.slane %v6309_v4, 5 }
 0x466   : > { %v11416_v32 = vcombine.low %v6244_v9, %v6254_v59  ;;  %v6293_v59 = vrot.slane %v6292_v60, 4  ;;  %v6329_v9 = vshll.u32 %v15294_v18, 16  ;;  %v6335_v4 = vrot.slane %v6333_v3, 4  ;;  %v15387_v2 = vpop.f32.mrf.mxu0 }
 0x467   : > { %v6316_v55 = vor.u32 %v6315_v51, %v6311_v30 }
 0x468   : > { %7627 = vmatmul.mubr.bf16.gmra.mxu1 %v11406_v40  ;;  %v6300_v40 = vshrl.u32 %v15356_v38, 16  ;;  %v6331_v26 = vrot.slane %v6329_v9, 5  ;;  %v15394_v39 = vpop.f32.mrf.mxu0 }
 0x469   : > { %7634 = vmatprep.mubr.bf16.mxu1 %v11415_v16  ;;  %v6278_v16 = vsel %vm14014_vm9, %v6273_v20, %v6277_v54  ;;  %v6298_v54 = vsel %vm14014_vm9, %v6293_v59, %v6297_v50  ;;  %v6321_v20 = vrot.slane %v6319_v17, 5  ;;  %v6317_v33 = vrot.slane %v6316_v55, 4 }
 0x46a   : > { %v6302_v42 = vrot.slane %v6300_v40, 4  ;;  %v11417_v53 = vcombine.low %v6268_v47, %v6278_v16  ;;  %v6336_v15 = vor.u32 %v6335_v4, %v6331_v26  ;;  %v15396_v51 = vpop.f32.mrf.mxu0  ;;  %v11411_v59 = vcombine.low %v15356_v38, %v15296_v29 }
 0x46b   : > { %v6322_v47 = vsel %vm14014_vm9, %v6317_v33, %v6321_v20 }
 0x46c   : > { %v6306_v12 = vor.u32 %v6305_v31, %v6302_v42  ;;  %v6337_v31 = vrot.slane %v6336_v15, 4 }
 0x46e   : > { %v6307_v27 = vrot.slane %v6306_v12, 4 }
 0x470   : > { %7635 = vmatmul.mubr.bf16.gmra.mxu1 %v11407_v52  ;;  %v6323_v52 = vshrl.u32 %v15303_v1, 16 }
 0x471   : > { %7642 = vmatprep.mubr.bf16.mxu1 %v11416_v32  ;;  %v6288_v32 = vsel %vm14014_vm9, %v6283_v23, %v6287_v5  ;;  %v6312_v5 = vsel %vm14014_vm9, %v6307_v27, %v6311_v30  ;;  %v15401_v30 = vpop.f32.mrf.mxu0 }
 0x472   : > { %v6325_v40 = vrot.slane %v6323_v52, 4  ;;  %v11418_v57 = vcombine.low %v6288_v32, %v6298_v54  ;;  %v11419_v60 = vcombine.low %v6312_v5, %v6322_v47 }
 0x473   : > { %v15409_v12 = vpop.f32.mrf.mxu0 }
 0x474   : > { %v6326_v16 = vor.u32 %v6325_v40, %v6321_v20 }
 0x475   : > { %v15411_v17 = vpop.f32.mrf.mxu0 }
 0x476   : > { %v6327_v42 = vrot.slane %v6326_v16, 4 }
 0x478   : > { %7643 = vmatmul.mubr.bf16.gmra.mxu1 %v11408_v56  ;;  %v6341_v56 = vrot.slane %v6339_v37, 5  ;;  %v6332_v23 = vsel %vm14014_vm9, %v6327_v42, %v6331_v26 }
 0x479   : > { %7650 = vmatprep.mubr.bf16.mxu1 %v11417_v53  ;;  %v16741_v53 = vcombine.low %v15177_v36, %v15196_v11  ;;  %v11412_v36 = vcombine.low %v15303_v1, %v15294_v18  ;;  %v15415_v11 = vpop.f32.mrf.mxu0  ;;  %v12713_v18 = vld [vmem:[%s16636_s5 + $0x78] sm:$0xff]  }
 0x47a   : > { %v6342_v7 = vsel %vm14014_vm9, %v6337_v31, %v6341_v56  ;;  %v12714_v1 = vld [vmem:[%s16636_s5 + $0x38] sm:$0xff]   ;;  %12181 = vmatprep.subr.bf16.mxu1 %v12713_v18  ;;  %v12715_v31 = vld [vmem:[%s16636_s5 + $0x70] sm:$0xff]  }
 0x47b   : > { %v11420_v50 = vcombine.low %v6332_v23, %v6342_v7  ;;  %12182 = vmatpush3.bf16.msra.mxu1 %v12714_v1  ;;  %v12716_v56 = vld [vmem:[%s16636_s5 + $0x30] sm:$0xff]  }
 0x47c   : > { %12183 = vmatprep.subr.bf16.mxu1 %v12715_v31 }
 0x47f   : > { %12184 = vmatpush3.bf16.msra.mxu1 %v12716_v56 }
 0x480   : > { %7651 = vmatmul.mubr.bf16.gmra.mxu1 %v11409_v63 }
 0x481   : > { %7658 = vmatprep.mubr.bf16.mxu1 %v11418_v57 }
 0x488   : > { %7659 = vmatmul.mubr.bf16.gmra.mxu1 %v16741_v53 }
 0x489   : > { %7666 = vmatprep.mubr.bf16.mxu1 %v11419_v60 }
 0x490   : > { %7667 = vmatmul.mubr.bf16.gmra.mxu1 %v11411_v59 }
 0x491   : > { %7674 = vmatprep.mubr.bf16.mxu1 %v11420_v50 }
 0x497   : > { %v11955_v55 = vpop.f32.mrf.mxu1 }
 0x498   : > { %7675 = vmatmul.mubr.bf16.gmra.mxu1 %v11412_v36 }
 0x499   : > { %v12071_v52 = vpop.f32.mrf.mxu0  ;;  %v11956_v9 = vpop.f32.mrf.mxu1 }
 0x49a   : > { %v15417_v3 = vadd.f32 %v11956_v9, %v11955_v55 }
 0x49b   : > { %v12072_v32 = vpop.f32.mrf.mxu0  ;;  %v11958_v29 = vpop.f32.mrf.mxu1 }
 0x49c   : > { %v15419_v38 = vadd.f32 %v12072_v32, %v12071_v52 }
 0x49d   : > { %v12074_v54 = vpop.f32.mrf.mxu0  ;;  %v11959_v63 = vpop.f32.mrf.mxu1 }
 0x49e   : > { %v15421_v27 = vadd.f32 %v11959_v63, %v11958_v29 }
 0x49f   : > { %v12075_v20 = vpop.f32.mrf.mxu0 }
 0x4a0   : > { %v15423_v33 = vadd.f32 %v12075_v20, %v12074_v54 }
 0x4c6   : > { %v11961_v40 = vpop.f32.mrf.mxu1 }
 0x4c8   : > { %v11962_v26 = vpop.f32.mrf.mxu1 }
 0x4c9   : > { %v15431_v4 = vadd.f32 %v11962_v26, %v11961_v40 }
 0x4ca   : > { %v11964_v57 = vpop.f32.mrf.mxu1 }
 0x4cc   : > { %v12077_v5 = vpop.f32.mrf.mxu0  ;;  %v11965_v47 = vpop.f32.mrf.mxu1 }
 0x4cd   : > { %v15433_v16 = vadd.f32 %v11965_v47, %v11964_v57 }
 0x4ce   : > { %v12078_v15 = vpop.f32.mrf.mxu0 }
 0x4cf   : > { %v15435_v37 = vadd.f32 %v12078_v15, %v12077_v5 }
 0x4d0   : > { %v12080_v60 = vpop.f32.mrf.mxu0 }
 0x4d2   : > { %v12081_v42 = vpop.f32.mrf.mxu0 }
 0x4d3   : > { %v15443_v53 = vadd.f32 %v12081_v42, %v12080_v60 }
 0x4d8   : > { %v11967_v23 = vpop.f32.mrf.mxu1 }
 0x4da   : > { %v12083_v7 = vpop.f32.mrf.mxu0  ;;  %v11968_v59 = vpop.f32.mrf.mxu1 }
 0x4db   : > { %v15445_v50 = vadd.f32 %v11968_v59, %v11967_v23 }
 0x4dc   : > { %v12084_v36 = vpop.f32.mrf.mxu0  ;;  %v11970_v55 = vpop.f32.mrf.mxu1 }
 0x4dd   : > { %v15447_v52 = vadd.f32 %v12084_v36, %v12083_v7 }
 0x4de   : > { %v12086_v9 = vpop.f32.mrf.mxu0  ;;  %v11971_v32 = vpop.f32.mrf.mxu1 }
 0x4df   : > { %v15449_v29 = vadd.f32 %v11971_v32, %v11970_v55 }
 0x4e0   : > { %v12087_v54 = vpop.f32.mrf.mxu0  ;;  %v11989_v63 = vpop.f32.mrf.mxu1 }
 0x4e1   : > { %v15451_v20 = vadd.f32 %v12087_v54, %v12086_v9  ;;  %v11936_v9 = vadd.f32 %v15157_v0, %v15139_v13  ;;  %v12717_v13 = vld [vmem:[%s16636_s5 + $0x68] sm:$0xff]  }
 0x4e2   : > { %v11990_v18 = vpop.f32.mrf.mxu1  ;;  %v12718_v0 = vld [vmem:[%s16636_s5 + $0x28] sm:$0xff]   ;;  %12185 = vmatprep.subr.bf16.mxu1 %v12717_v13 }
 0x4e3   : > { %v15453_v1 = vadd.f32 %v11990_v18, %v11989_v63  ;;  %v12064_v18 = vadd.f32 %v15396_v51, %v15394_v39  ;;  %12186 = vmatpush3.bf16.msra.mxu1 %v12718_v0 }
 0x4e4   : > { %v11992_v40 = vpop.f32.mrf.mxu1  ;;  %v12089_v26 = vpop.f32.mrf.mxu0 }
 0x4e6   : > { %v11993_v57 = vpop.f32.mrf.mxu1  ;;  %v12090_v47 = vpop.f32.mrf.mxu0 }
 0x4e7   : > { %v15455_v5 = vadd.f32 %v11993_v57, %v11992_v40  ;;  %v15457_v60 = vadd.f32 %v12090_v47, %v12089_v26 }
 0x4e8   : > { %v11995_v15 = vpop.f32.mrf.mxu1  ;;  %v12092_v42 = vpop.f32.mrf.mxu0 }
 0x4ea   : > { %v11996_v31 = vpop.f32.mrf.mxu1  ;;  %v12093_v23 = vpop.f32.mrf.mxu0 }
 0x4eb   : > { %v15459_v56 = vadd.f32 %v11996_v31, %v11995_v15  ;;  %v15461_v59 = vadd.f32 %v12093_v23, %v12092_v42 }
 0x4ec   : > { %v11998_v7 = vpop.f32.mrf.mxu1  ;;  %v12095_v55 = vpop.f32.mrf.mxu0 }
 0x4ee   : > { %v11999_v36 = vpop.f32.mrf.mxu1  ;;  %v12096_v63 = vpop.f32.mrf.mxu0 }
 0x4ef   : > { %v12000_v32 = vadd.f32 %v11999_v36, %v11998_v7  ;;  %v15469_v26 = vadd.f32 %v12096_v63, %v12095_v55  ;;  %v11945_v36 = vadd.f32 %v15269_v8, %v15263_v34 }
 0x4f0   : > { %v15465_v54 = vpop.f32.mrf.mxu1  ;;  %v12098_v47 = vpop.f32.mrf.mxu0 }
 0x4f1   : > { %v7438_v40 = vadd.f32 %v12000_v32, %v11936_v9 }
 0x4f2   : > { %v15471_v57 = vpop.f32.mrf.mxu1  ;;  %v12099_v31 = vpop.f32.mrf.mxu0 }
 0x4f3   : > { %v15473_v15 = vadd.f32 %v12064_v18, %v7438_v40  ;;  %v15477_v23 = vadd.f32 %v12099_v31, %v12098_v47  ;;  %v11948_v18 = vadd.f32 %v15279_v48, %v15275_v45 }
 0x4f4   : > { %v15475_v42 = vpop.f32.mrf.mxu1 }
 0x4f5   : > { %16742 = vst [vmem:[#allocation13_spill] sm:$0xff] %v15473_v15 }
 0x4f6   : > { %v15485_v39 = vpop.f32.mrf.mxu1 }
 0x4f8   : > { %v12007_v51 = vpop.f32.mrf.mxu1 }
 0x4fa   : > { %v12008_v7 = vpop.f32.mrf.mxu1 }
 0x4fb   : > { %v12009_v55 = vadd.f32 %v12008_v7, %v12007_v51 }
 0x4fc   : > { %v12010_v9 = vpop.f32.mrf.mxu1 }
 0x4fd   : > { %v7451_v32 = vadd.f32 %v12009_v55, %v11945_v36 }
 0x4fe   : > { %v12011_v63 = vpop.f32.mrf.mxu1 }
 0x4ff   : > { %v12012_v40 = vadd.f32 %v12011_v63, %v12010_v9  ;;  %v15492_v47 = vadd.f32 %v15419_v38, %v7451_v32 }
 0x500   : > { %v12013_v31 = vpop.f32.mrf.mxu1 }
 0x501   : > { %v7454_v46 = vadd.f32 %v12012_v40, %v11948_v18 }
 0x502   : > { %v12014_v13 = vpop.f32.mrf.mxu1 }
 0x503   : > { %v12015_v58 = vadd.f32 %v12014_v13, %v12013_v31  ;;  %v15495_v0 = vadd.f32 %v15423_v33, %v7454_v46 }
 0x504   : > { %v12016_v15 = vpop.f32.mrf.mxu1 }
 0x505   : > { %v7459_v34 = vadd.f32 %v12015_v58, %v15329_v14 }
 0x506   : > { %v12017_v8 = vpop.f32.mrf.mxu1 }
 0x507   : > { %v12018_v51 = vadd.f32 %v12017_v8, %v12016_v15  ;;  %v15499_v7 = vadd.f32 %v15435_v37, %v7459_v34 }
 0x508   : > { %v12019_v45 = vpop.f32.mrf.mxu1 }
 0x509   : > { %v7462_v48 = vadd.f32 %v12018_v51, %v15331_v41 }
 0x50a   : > { %v12020_v38 = vpop.f32.mrf.mxu1 }
 0x50b   : > { %v12021_v36 = vadd.f32 %v12020_v38, %v12019_v45  ;;  %v15503_v55 = vadd.f32 %v15443_v53, %v7462_v48  ;;  %v11927_v45 = vadd.f32 %v15041_v28, %v15019_v6  ;;  %v15530_v38 = vpop.f32.mrf.mxu0 }
 0x50c   : > { %v12022_v9 = vpop.f32.mrf.mxu1 }
 0x50d   : > { %v7467_v46 = vadd.f32 %v12021_v36, %v15417_v3  ;;  %v12719_v3 = vld [vmem:[%s16636_s5 + $0x60] sm:$0xff]   ;;  %v7717_v28 = vpop.f32.mrf.mxu0 }
 0x50e   : > { %v12023_v33 = vpop.f32.mrf.mxu1  ;;  %12187 = vmatprep.subr.bf16.mxu1 %v12719_v3 }
 0x50f   : > { %v12024_v32 = vadd.f32 %v12023_v33, %v12022_v9  ;;  %v15507_v58 = vadd.f32 %v15447_v52, %v7467_v46  ;;  %v12720_v52 = vld [vmem:[%s16636_s5 + $0x20] sm:$0xff]   ;;  %v12055_v33 = vadd.f32 %v15358_v49, %v15346_v61  ;;  %v12058_v49 = vadd.f32 %v15373_v10, %v15365_v62  ;;  %v12722_v62 = vld [vmem:[%s16636_s5 + $0x18] sm:$0xff]  }
 0x510   : > { %v12025_v14 = vpop.f32.mrf.mxu1  ;;  %12188 = vmatpush3.bf16.msra.mxu1 %v12720_v52  ;;  %v12067_v52 = vadd.f32 %v15409_v12, %v15401_v30 }
 0x511   : > { %v7470_v37 = vadd.f32 %v12024_v32, %v15421_v27 }
 0x512   : > { %v12026_v15 = vpop.f32.mrf.mxu1 }
 0x513   : > { %v12027_v63 = vadd.f32 %v12026_v15, %v12025_v14  ;;  %v15511_v41 = vadd.f32 %v15451_v20, %v7470_v37 }
 0x514   : > { %v12028_v18 = vpop.f32.mrf.mxu1 }
 0x515   : > { %v7475_v53 = vadd.f32 %v12027_v63, %v15431_v4 }
 0x516   : > { %v12029_v40 = vpop.f32.mrf.mxu1 }
 0x517   : > { %v12030_v31 = vadd.f32 %v12029_v40, %v12028_v18  ;;  %v15521_v27 = vadd.f32 %v15457_v60, %v7475_v53  ;;  %v7427_v60 = vadd.f32 %v15453_v1, %v11927_v45  ;;  %v16744_v18 = vld [vmem:[#allocation7_spill] sm:$0xff]  ;;  %v12070_v40 = vadd.f32 %v15415_v11, %v15411_v17 }
 0x518   : > { %v12031_v13 = vpop.f32.mrf.mxu1 }
 0x519   : > { %v7478_v20 = vadd.f32 %v12030_v31, %v15433_v16  ;;  %v7524_v14 = vadd.f32 %v12055_v33, %v7427_v60 }
 0x51a   : > { %v12032_v34 = vpop.f32.mrf.mxu1 }
 0x51b   : > { %v12033_v4 = vadd.f32 %v12032_v34, %v12031_v13  ;;  %v15525_v8 = vadd.f32 %v15461_v59, %v7478_v20  ;;  %v11930_v59 = vadd.f32 %v15077_v43, %v15059_v35  ;;  %v12003_v35 = vadd.f32 %v15471_v57, %v15465_v54  ;;  %v12721_v54 = vld [vmem:[%s16636_s5 + $0x58] sm:$0xff]  }
 0x51c   : > { %v12034_v51 = vpop.f32.mrf.mxu1  ;;  %v12006_v43 = vadd.f32 %v15485_v39, %v15475_v42  ;;  %12189 = vmatprep.subr.bf16.mxu1 %v12721_v54 }
 0x51d   : > { %v7483_v48 = vadd.f32 %v12033_v4, %v15445_v50  ;;  %v7430_v32 = vadd.f32 %v15455_v5, %v11930_v59  ;;  %v11939_v5 = vadd.f32 %v15212_v21, %v15193_v44  ;;  %v12061_v44 = vadd.f32 %v15387_v2, %v15379_v22  ;;  %12190 = vmatpush3.bf16.msra.mxu1 %v12722_v62 }
 0x51e   : > { %v12035_v36 = vpop.f32.mrf.mxu1 }
 0x51f   : > { %v12036_v9 = vadd.f32 %v12035_v36, %v12034_v51  ;;  %v15534_v46 = vadd.f32 %v15469_v26, %v7483_v48  ;;  %v11933_v26 = vadd.f32 %v15112_v25, %v15097_v19  ;;  %v15558_v19 = vpop.f32.mrf.mxu0  ;;  %v7527_v57 = vadd.f32 %v12058_v49, %v7430_v32 }
 0x520   : > { %v12117_v16 = vpop.f32.mrf.mxu1  ;;  %v7443_v21 = vadd.f32 %v12003_v35, %v11939_v5 }
 0x521   : > { %v7486_v6 = vadd.f32 %v12036_v9, %v15449_v29  ;;  %v7435_v63 = vadd.f32 %v15459_v56, %v11933_v26  ;;  %v7720_v31 = vpop.f32.mrf.mxu0 }
 0x522   : > { %v12118_v50 = vpop.f32.mrf.mxu1  ;;  %v15575_v36 = vadd.f32 %v12067_v52, %v7443_v21 }
 0x523   : > { %v12119_v37 = vadd.f32 %v12118_v50, %v12117_v16  ;;  %v15543_v1 = vadd.f32 %v15477_v23, %v7486_v6  ;;  %v16743_v23 = vld [vmem:[#allocation23_spill] sm:$0xff]  ;;  %v7532_v13 = vadd.f32 %v12061_v44, %v7435_v63 }
 0x524   : > { %v12120_v61 = vpop.f32.mrf.mxu1  ;;  %v11942_v15 = vadd.f32 %v16743_v23, %v15243_v24 }
 0x525   : > { %v7621_v29 = vadd.f32 %v12119_v37, %v7524_v14 }
 0x526   : > { %v12121_v25 = vpop.f32.mrf.mxu1  ;;  %v7446_v24 = vadd.f32 %v12006_v43, %v11942_v15 }
 0x527   : > { %v7718_v10 = vadd.f32 %v7717_v28, %v7621_v29  ;;  %v12122_v42 = vadd.f32 %v12121_v25, %v12120_v61 }
 0x528   : > { %v12123_v56 = vpop.f32.mrf.mxu1  ;;  %v15577_v60 = vadd.f32 %v12070_v40, %v7446_v24 }
 0x529   : > { %v7796_v39 = vcombine.high %v7718_v10, %v7718_v10  ;;  %v7803_v53 = vrot.slane %v7718_v10, %v16744_v18  ;;  %v7624_v3 = vadd.f32 %v12122_v42, %v7527_v57 }
 0x52a   : > { %v12124_v20 = vpop.f32.mrf.mxu1 }
 0x52b   : > { %v7810_v22 = vrot.slane %v7796_v39, %v16744_v18  ;;  %v7811_v2 = vcombine.high %v7803_v53, %v7803_v53  ;;  %v8132_v34 = vsel %vm2462_vm1, %v7803_v53, -inf  ;;  %v7721_v4 = vadd.f32 %v7720_v31, %v7624_v3  ;;  %v12725_v53 = vld [vmem:[%s16636_s5 + $0xf8] sm:$0xff]  }
 0x52c   : > { %v8133_v51 = vrot.slane %v8132_v34, 4  ;;  %v12125_v45 = vadd.f32 %v12124_v20, %v12123_v56  ;;  %v12126_v48 = vpop.f32.mrf.mxu1  ;;  %v12724_v20 = vld [vmem:[%s16636_s5 + $0x10] sm:$0xff]   ;;  %12209 = vmatprep.subr.bf16.mxu0 %v12725_v53 }
 0x52d   : > { %v7812_v30 = vcombine.high %v7810_v22, %v7810_v22  ;;  %v8139_v12 = vsel %vm2462_vm1, %v7811_v2, -inf  ;;  %v8146_v17 = vsel %vm2462_vm1, %v7810_v22, -inf  ;;  %v7813_v11 = vcombine.high %v7721_v4, %v7721_v4  ;;  %v12726_v22 = vld [vmem:[%s16636_s5 + $0xb8] sm:$0xff]  }
 0x52e   : > { %v8134_v9 = vmax.f32 %v8132_v34, %v8133_v51  ;;  %v8140_v16 = vrot.slane %v8139_v12, 4  ;;  %v8147_v59 = vrot.slane %v8146_v17, 4  ;;  %v7820_v33 = vrot.slane %v7721_v4, %v16744_v18  ;;  %v12127_v6 = vpop.f32.mrf.mxu1  ;;  %12210 = vmatpush3.bf16.msra.mxu0 %v12726_v22 }
 0x52f   : > { %v8153_v28 = vsel %vm2462_vm1, %v7812_v30, -inf  ;;  %v7827_v50 = vrot.slane %v7813_v11, %v16744_v18  ;;  %v7629_v32 = vadd.f32 %v12125_v45, %v7532_v13  ;;  %v12128_v14 = vadd.f32 %v12127_v6, %v12126_v48  ;;  %v12723_v13 = vld [vmem:[%s16636_s5 + $0x50] sm:$0xff]  }
 0x530   : > { %v8135_v37 = vrot.slane %v8134_v9, 2  ;;  %v8141_v26 = vmax.f32 %v8139_v12, %v8140_v16  ;;  %v8148_v35 = vmax.f32 %v8146_v17, %v8147_v59  ;;  %v8154_v43 = vrot.slane %v8153_v28, 4  ;;  %v15584_v61 = vpop.f32.mrf.mxu1  ;;  %12191 = vmatprep.subr.bf16.mxu1 %v12723_v13 }
 0x531   : > { %v7828_v49 = vcombine.high %v7820_v33, %v7820_v33  ;;  %v7829_v29 = vcombine.high %v7827_v50, %v7827_v50  ;;  %v8160_v5 = vsel %vm2462_vm1, %v7820_v33, -inf  ;;  %v8174_v23 = vsel %vm2462_vm1, %v7827_v50, -inf  ;;  %12192 = vmatpush3.bf16.msra.mxu1 %v12724_v20  ;;  %v12727_v33 = vld [vmem:[%s16636_s5 + $0xf0] sm:$0xff]  }
 0x532   : > { %v8136_v15 = vmax.f32 %v8134_v9, %v8135_v37  ;;  %v8142_v63 = vrot.slane %v8141_v26, 2  ;;  %v8149_v25 = vrot.slane %v8148_v35, 2  ;;  %v8155_v54 = vmax.f32 %v8153_v28, %v8154_v43  ;;  %v15588_v62 = vpop.f32.mrf.mxu1  ;;  %12211 = vmatprep.subr.bf16.mxu0 %v12727_v33 }
 0x533   : > { %v8161_v10 = vrot.slane %v8160_v5, 4  ;;  %v8167_v57 = vsel %vm2462_vm1, %v7828_v49, -inf  ;;  %v8175_v42 = vrot.slane %v8174_v23, 4  ;;  %v8181_v44 = vsel %vm2462_vm1, %v7829_v29, -inf  ;;  %v16745_v29 = vld [vmem:[#allocation13_spill] sm:$0xff] }
 0x534   : > { %v8137_v21 = vrot.slane %v8136_v15, 1  ;;  %v8143_v24 = vmax.f32 %v8141_v26, %v8142_v63  ;;  %v8150_v56 = vmax.f32 %v8148_v35, %v8149_v25  ;;  %v8156_v39 = vrot.slane %v8155_v54, 2  ;;  %v15606_v45 = vpop.f32.mrf.mxu1  ;;  %v12729_v26 = vld [vmem:[%s16636_s5 + $0xb0] sm:$0xff]  }
 0x535   : > { %v8162_v3 = vmax.f32 %v8160_v5, %v8161_v10  ;;  %v8168_v52 = vrot.slane %v8167_v57, 4  ;;  %v8176_v40 = vmax.f32 %v8174_v23, %v8175_v42  ;;  %v8182_v31 = vrot.slane %v8181_v44, 4  ;;  %12212 = vmatpush3.bf16.msra.mxu0 %v12729_v26  ;;  %v12728_v42 = vld [vmem:[%s16636_s5 + $0x48] sm:$0xff]  }
 0x536   : > { %v15604_v2 = vmax.f32 %v8136_v15, %v8137_v21  ;;  %v8144_v34 = vrot.slane %v8143_v24, 1  ;;  %v8151_v4 = vrot.slane %v8150_v56, 1  ;;  %v8157_v51 = vmax.f32 %v8155_v54, %v8156_v39  ;;  %v12730_v39 = vld [vmem:[%s16636_s5 + $0x8] sm:$0xff]   ;;  %12193 = vmatprep.subr.bf16.mxu1 %v12728_v42 }
 0x537   : > { %v8163_v48 = vrot.slane %v8162_v3, 2  ;;  %v8169_v30 = vmax.f32 %v8167_v57, %v8168_v52  ;;  %v8177_v12 = vrot.slane %v8176_v40, 2  ;;  %v8183_v17 = vmax.f32 %v8181_v44, %v8182_v31  ;;  %12194 = vmatpush3.bf16.msra.mxu1 %v12730_v39 }
 0x538   : > { %v15608_v11 = vmax.f32 %v8143_v24, %v8144_v34  ;;  %v15610_v9 = vmax.f32 %v8150_v56, %v8151_v4  ;;  %v8158_v16 = vrot.slane %v8157_v51, 1  ;;  %v7726_v59 = vadd.f32 %v15530_v38, %v7629_v32  ;;  %v15623_v32 = vpop.f32.mrf.mxu1 }
 0x539   : > { %v8164_v6 = vmax.f32 %v8162_v3, %v8163_v48  ;;  %v8170_v28 = vrot.slane %v8169_v30, 2  ;;  %v8178_v50 = vmax.f32 %v8176_v40, %v8177_v12  ;;  %v8184_v37 = vrot.slane %v8183_v17, 2 }
 0x53a   : > { %v15619_v35 = vmax.f32 %v8157_v51, %v8158_v16  ;;  %v7830_v43 = vcombine.high %v7726_v59, %v7726_v59  ;;  %v7837_v49 = vrot.slane %v7726_v59, %v16744_v18  ;;  %v7632_v38 = vadd.f32 %v12128_v14, %v16745_v29  ;;  %v12731_v14 = vld [vmem:[%s16636_s5 + $0xe8] sm:$0xff]   ;;  %v15643_v40 = vpop.f32.mrf.mxu1  ;;  %v15653_v59 = vpop.f32.mrf.mxu0 }
 0x53b   : > { %v8165_v5 = vrot.slane %v8164_v6, 1  ;;  %v8171_v23 = vmax.f32 %v8169_v30, %v8170_v28  ;;  %v8179_v15 = vrot.slane %v8178_v50, 1  ;;  %v8185_v63 = vmax.f32 %v8183_v17, %v8184_v37  ;;  %12213 = vmatprep.subr.bf16.mxu0 %v12731_v14 }
 0x53c   : > { %v7844_v25 = vrot.slane %v7830_v43, %v16744_v18  ;;  %v7845_v54 = vcombine.high %v7837_v49, %v7837_v49  ;;  %v8188_v10 = vsel %vm2462_vm1, %v7837_v49, -inf  ;;  %v7729_v57 = vadd.f32 %v15558_v19, %v7632_v38  ;;  %v12136_v37 = vpop.f32.mrf.mxu1 }
 0x53d   : > { %v15634_v44 = vmax.f32 %v8164_v6, %v8165_v5  ;;  %v8172_v21 = vrot.slane %v8171_v23, 1  ;;  %v15636_v24 = vmax.f32 %v8178_v50, %v8179_v15  ;;  %v8186_v56 = vrot.slane %v8185_v63, 1 }
 0x53e   : > { %v7846_v53 = vcombine.high %v7844_v25, %v7844_v25  ;;  %v8189_v19 = vrot.slane %v8188_v10, 4  ;;  %v8195_v3 = vsel %vm2462_vm1, %v7845_v54, -inf  ;;  %v8202_v52 = vsel %vm2462_vm1, %v7844_v25, -inf }
 0x53f   : > { %v15645_v31 = vmax.f32 %v8171_v23, %v8172_v21  ;;  %v15647_v13 = vmax.f32 %v8185_v63, %v8186_v56  ;;  %v8196_v20 = vrot.slane %v8195_v3, 4  ;;  %v8203_v22 = vrot.slane %v8202_v52, 4  ;;  %v12138_v56 = vpop.f32.mrf.mxu1 }
 0x540   : > { %v8190_v34 = vmax.f32 %v8188_v10, %v8189_v19  ;;  %v8209_v4 = vsel %vm2462_vm1, %v7846_v53, -inf  ;;  %v7847_v51 = vcombine.high %v7729_v57, %v7729_v57  ;;  %v7854_v48 = vrot.slane %v7729_v57, %v16744_v18  ;;  %v7733_v10 = vpop.f32.mrf.mxu0 }
 0x541   : > { %v8197_v30 = vmax.f32 %v8195_v3, %v8196_v20  ;;  %v8204_v12 = vmax.f32 %v8202_v52, %v8203_v22  ;;  %v8210_v17 = vrot.slane %v8209_v4, 4  ;;  %v12131_v16 = vadd.f32 %v15588_v62, %v15584_v61  ;;  %v12732_v61 = vld [vmem:[%s16636_s5 + $0xa8] sm:$0xff]   ;;  %v12733_v52 = vld [vmem:[%s16636_s5 + $0x40] sm:$0xff]  }
 0x542   : > { %v8191_v33 = vrot.slane %v8190_v34, 2  ;;  %v7861_v6 = vrot.slane %v7847_v51, %v16744_v18  ;;  %v7862_v28 = vcombine.high %v7854_v48, %v7854_v48  ;;  %v8216_v50 = vsel %vm2462_vm1, %v7854_v48, -inf  ;;  %12214 = vmatpush3.bf16.msra.mxu0 %v12732_v61  ;;  %v12734_v20 = vld [vmem:[%s16636_s5 + $0xe0] sm:$0xff]   ;;  %12195 = vmatprep.subr.bf16.mxu1 %v12733_v52 }
 0x543   : > { %v8198_v26 = vrot.slane %v8197_v30, 2  ;;  %v8205_v43 = vrot.slane %v8204_v12, 2  ;;  %v8211_v49 = vmax.f32 %v8209_v4, %v8210_v17  ;;  %v8217_v29 = vrot.slane %v8216_v50, 4  ;;  %12215 = vmatprep.subr.bf16.mxu0 %v12734_v20 }
 0x544   : > { %v8192_v38 = vmax.f32 %v8190_v34, %v8191_v33  ;;  %v7863_v5 = vcombine.high %v7861_v6, %v7861_v6  ;;  %v8223_v23 = vsel %vm2462_vm1, %v7862_v28, -inf  ;;  %v8230_v15 = vsel %vm2462_vm1, %v7861_v6, -inf  ;;  %v15675_v33 = vpop.f32.mrf.mxu0 }
 0x545   : > { %v8199_v62 = vmax.f32 %v8197_v30, %v8198_v26  ;;  %v8206_v63 = vmax.f32 %v8204_v12, %v8205_v43  ;;  %v8212_v25 = vrot.slane %v8211_v49, 2  ;;  %v8218_v54 = vmax.f32 %v8216_v50, %v8217_v29  ;;  %v12139_v43 = vpop.f32.mrf.mxu1 }
 0x546   : > { %v8193_v57 = vrot.slane %v8192_v38, 1  ;;  %v8224_v42 = vrot.slane %v8223_v23, 4  ;;  %v8231_v14 = vrot.slane %v8230_v15, 4  ;;  %v8237_v21 = vsel %vm2462_vm1, %v7863_v5, -inf }
 0x547   : > { %v8200_v39 = vrot.slane %v8199_v62, 1  ;;  %v8207_v53 = vrot.slane %v8206_v63, 1  ;;  %v8213_v19 = vmax.f32 %v8211_v49, %v8212_v25  ;;  %v8219_v3 = vrot.slane %v8218_v54, 2 }
 0x548   : > { %v15669_v22 = vmax.f32 %v8192_v38, %v8193_v57  ;;  %v8225_v34 = vmax.f32 %v8223_v23, %v8224_v42  ;;  %v8232_v4 = vmax.f32 %v8230_v15, %v8231_v14  ;;  %v8238_v51 = vrot.slane %v8237_v21, 4 }
 0x549   : > { %v15671_v48 = vmax.f32 %v8199_v62, %v8200_v39  ;;  %v15673_v30 = vmax.f32 %v8206_v63, %v8207_v53  ;;  %v8214_v12 = vrot.slane %v8213_v19, 1  ;;  %v8220_v17 = vmax.f32 %v8218_v54, %v8219_v3 }
 0x54a   : > { %v8226_v6 = vrot.slane %v8225_v34, 2  ;;  %v8233_v28 = vrot.slane %v8232_v4, 2  ;;  %v8239_v50 = vmax.f32 %v8237_v21, %v8238_v51  ;;  %v7637_v26 = vadd.f32 %v12131_v16, %v15575_v36  ;;  %v7736_v16 = vpop.f32.mrf.mxu0 }
 0x54b   : > { %v15678_v49 = vmax.f32 %v8213_v19, %v8214_v12  ;;  %v8221_v29 = vrot.slane %v8220_v17, 1  ;;  %v12134_v38 = vadd.f32 %v15623_v32, %v15606_v45  ;;  %v12137_v5 = vadd.f32 %v12136_v37, %v15643_v40 }
 0x54c   : > { %v8227_v23 = vmax.f32 %v8225_v34, %v8226_v6  ;;  %v8234_v15 = vmax.f32 %v8232_v4, %v8233_v28  ;;  %v8240_v61 = vrot.slane %v8239_v50, 2  ;;  %v7734_v62 = vadd.f32 %v7733_v10, %v7637_v26  ;;  %v12736_v6 = vld [vmem:[%s16636_s5 + $0xa0] sm:$0xff]  }
 0x54d   : > { %v15683_v63 = vmax.f32 %v8220_v17, %v8221_v29  ;;  %v7640_v25 = vadd.f32 %v12134_v38, %v15577_v60  ;;  %v7645_v54 = vadd.f32 %v12137_v5, %v15492_v47  ;;  %v12140_v36 = vadd.f32 %v12139_v43, %v12138_v56  ;;  %v12735_v17 = vld [vmem:[%s16636_s5] sm:$0xff]   ;;  %12216 = vmatpush3.bf16.msra.mxu0 %v12736_v6 }
 0x54e   : > { %v8228_v57 = vrot.slane %v8227_v23, 1  ;;  %v8235_v42 = vrot.slane %v8234_v15, 1  ;;  %v8241_v14 = vmax.f32 %v8239_v50, %v8240_v61  ;;  %v7864_v21 = vcombine.high %v7734_v62, %v7734_v62  ;;  %12196 = vmatpush3.bf16.msra.mxu1 %v12735_v17 }
 0x54f   : > { %v7871_v45 = vrot.slane %v7734_v62, %v16744_v18  ;;  %v7737_v32 = vadd.f32 %v7736_v16, %v7640_v25  ;;  %v15689_v40 = vadd.f32 %v15653_v59, %v7645_v54  ;;  %v15692_v37 = vadd.f32 %v12140_v36, %v15495_v0 }
 0x550   : > { %v15694_v10 = vmax.f32 %v8227_v23, %v8228_v57  ;;  %v15696_v60 = vmax.f32 %v8234_v15, %v8235_v42  ;;  %v8242_v47 = vrot.slane %v8241_v14, 1  ;;  %v7878_v56 = vrot.slane %v7864_v21, %v16744_v18 }
 0x551   : > { %v7879_v39 = vcombine.high %v7871_v45, %v7871_v45  ;;  %v8244_v53 = vsel %vm2462_vm1, %v7871_v45, -inf  ;;  %v7881_v19 = vcombine.high %v7737_v32, %v7737_v32  ;;  %v7888_v3 = vrot.slane %v7737_v32, %v16744_v18 }
 0x552   : > { %v15701_v52 = vmax.f32 %v8241_v14, %v8242_v47  ;;  %v7880_v59 = vcombine.high %v7878_v56, %v7878_v56  ;;  %v8245_v20 = vrot.slane %v8244_v53, 4  ;;  %v8258_v0 = vsel %vm2462_vm1, %v7878_v56, -inf }
 0x553   : > { %v8251_v34 = vsel %vm2462_vm1, %v7879_v39, -inf  ;;  %v8259_v4 = vrot.slane %v8258_v0, 4  ;;  %v7895_v51 = vrot.slane %v7881_v19, %v16744_v18  ;;  %v7896_v12 = vcombine.high %v7888_v3, %v7888_v3 }
 0x554   : > { %v8246_v28 = vmax.f32 %v8244_v53, %v8245_v20  ;;  %v8252_v50 = vrot.slane %v8251_v34, 4  ;;  %v8265_v26 = vsel %vm2462_vm1, %v7880_v59, -inf  ;;  %v8272_v43 = vsel %vm2462_vm1, %v7888_v3, -inf }
 0x555   : > { %v8260_v29 = vmax.f32 %v8258_v0, %v8259_v4  ;;  %v8266_v38 = vrot.slane %v8265_v26, 4  ;;  %v7897_v5 = vcombine.high %v7895_v51, %v7895_v51  ;;  %v8273_v23 = vrot.slane %v8272_v43, 4 }
 0x556   : > { %v8247_v15 = vrot.slane %v8246_v28, 2  ;;  %v8253_v61 = vmax.f32 %v8251_v34, %v8252_v50  ;;  %v8279_v62 = vsel %vm2462_vm1, %v7896_v12, -inf  ;;  %v8286_v25 = vsel %vm2462_vm1, %v7895_v51, -inf }
 0x557   : > { %v8261_v54 = vrot.slane %v8260_v29, 2  ;;  %v8267_v36 = vmax.f32 %v8265_v26, %v8266_v38  ;;  %v8274_v16 = vmax.f32 %v8272_v43, %v8273_v23  ;;  %v8280_v57 = vrot.slane %v8279_v62, 4 }
 0x558   : > { %v8248_v42 = vmax.f32 %v8246_v28, %v8247_v15  ;;  %v8254_v14 = vrot.slane %v8253_v61, 2  ;;  %v8287_v21 = vrot.slane %v8286_v25, 4  ;;  %v8293_v45 = vsel %vm2462_vm1, %v7897_v5, -inf  ;;  %v15720_v28 = vld [vmem:[%s16635_s4] ss:$0 sm:$0xff] }
 0x559   : > { %v8262_v32 = vmax.f32 %v8260_v29, %v8261_v54  ;;  %v8268_v47 = vrot.slane %v8267_v36, 2  ;;  %v8275_v56 = vrot.slane %v8274_v16, 2  ;;  %v8281_v39 = vmax.f32 %v8279_v62, %v8280_v57 }
 0x55a   : > { %v8249_v53 = vrot.slane %v8248_v42, 1  ;;  %v8255_v19 = vmax.f32 %v8253_v61, %v8254_v14  ;;  %v8288_v3 = vmax.f32 %v8286_v25, %v8287_v21  ;;  %v8294_v59 = vrot.slane %v8293_v45, 4 }
 0x55b   : > { %v8263_v20 = vrot.slane %v8262_v32, 1  ;;  %v8269_v0 = vmax.f32 %v8267_v36, %v8268_v47  ;;  %v8276_v34 = vmax.f32 %v8274_v16, %v8275_v56  ;;  %v8282_v4 = vrot.slane %v8281_v39, 2 }
 0x55c   : > { %v8250_v51 = vmax.f32 %v8248_v42, %v8249_v53  ;;  %v8256_v12 = vrot.slane %v8255_v19, 1  ;;  %v8289_v17 = vrot.slane %v8288_v3, 2  ;;  %v8295_v6 = vmax.f32 %v8293_v45, %v8294_v59 }
 0x55d   : > { %v8264_v50 = vmax.f32 %v8262_v32, %v8263_v20  ;;  %v8270_v26 = vrot.slane %v8269_v0, 1  ;;  %v8277_v43 = vrot.slane %v8276_v34, 1  ;;  %v8283_v29 = vmax.f32 %v8281_v39, %v8282_v4 }
 0x55e   : > { %v8257_v38 = vmax.f32 %v8255_v19, %v8256_v12  ;;  %v8580_v5 = vmax.f32 %v15604_v2, %v8250_v51  ;;  %v8290_v23 = vmax.f32 %v8288_v3, %v8289_v17  ;;  %v8296_v15 = vrot.slane %v8295_v6, 2 }
 0x55f   : > { %v8271_v61 = vmax.f32 %v8269_v0, %v8270_v26  ;;  %v8582_v62 = vmax.f32 %v15610_v9, %v8264_v50  ;;  %v8278_v25 = vmax.f32 %v8276_v34, %v8277_v43  ;;  %v8284_v54 = vrot.slane %v8283_v29, 1 }
 0x560   : > { %v8581_v36 = vmax.f32 %v15608_v11, %v8257_v38  ;;  %v8618_v16 = vadd.f32 %v15720_v28, %v8580_v5  ;;  %v8291_v57 = vrot.slane %v8290_v23, 1  ;;  %v8297_v42 = vmax.f32 %v8295_v6, %v8296_v15 }
 0x561   : > { %v8583_v14 = vmax.f32 %v15619_v35, %v8271_v61  ;;  %v8620_v21 = vadd.f32 %v15720_v28, %v8582_v62  ;;  %v8285_v45 = vmax.f32 %v8283_v29, %v8284_v54  ;;  %v8584_v2 = vmax.f32 %v15634_v44, %v8278_v25 }
 0x562   : > { %v8619_v32 = vadd.f32 %v15720_v28, %v8581_v36  ;;  %v8650_v47 = vmax.f32 %v8618_v16, 0.0  ;;  %v8292_v56 = vmax.f32 %v8290_v23, %v8291_v57  ;;  %v8298_v9 = vrot.slane %v8297_v42, 1 }
 0x563   : > { %v8621_v39 = vadd.f32 %v15720_v28, %v8583_v14  ;;  %v8652_v53 = vmax.f32 %v8620_v21, 0.0  ;;  %v8585_v11 = vmax.f32 %v15645_v31, %v8285_v45  ;;  %v8622_v19 = vadd.f32 %v15720_v28, %v8584_v2  ;;  %v12141_v21 = vpop.f32.mrf.mxu1 }
 0x564   : > { %v8651_v3 = vmax.f32 %v8619_v32, 0.0  ;;  %v11841_v59 = vpack.c.bf16 %v8650_v47, %v8650_v47  ;;  %v8299_v35 = vmax.f32 %v8297_v42, %v8298_v9  ;;  %v8586_v20 = vmax.f32 %v15636_v24, %v8292_v56 }
 0x565   : > { %v8653_v0 = vmax.f32 %v8621_v39, 0.0  ;;  %v11843_v34 = vpack.c.bf16 %v8652_v53, %v8652_v53  ;;  %v8623_v44 = vadd.f32 %v15720_v28, %v8585_v11  ;;  %v8654_v4 = vmax.f32 %v8622_v19, 0.0 }
 0x566   : > { %v11842_v51 = vpack.c.bf16 %v8651_v3, %v8651_v3  ;;  %v8810_v12 = vunpack.c.l.b16 %v11841_v59  ;;  %v8587_v17 = vmax.f32 %v15647_v13, %v8299_v35  ;;  %v8624_v6 = vadd.f32 %v15720_v28, %v8586_v20 }
 0x567   : > { %v11844_v50 = vpack.c.bf16 %v8653_v0, %v8653_v0  ;;  %v8812_v31 = vunpack.c.l.b16 %v11843_v34  ;;  %v8655_v26 = vmax.f32 %v8623_v44, 0.0  ;;  %v11845_v43 = vpack.c.bf16 %v8654_v4, %v8654_v4  ;;  %v12142_v34 = vpop.f32.mrf.mxu1 }
 0x568   : > { %v8811_v29 = vunpack.c.l.b16 %v11842_v51  ;;  %v8842_v38 = vrot.slane %v8810_v12, 7  ;;  %v8625_v5 = vadd.f32 %v15720_v28, %v8587_v17  ;;  %v8656_v24 = vmax.f32 %v8624_v6, 0.0  ;;  %v15755_v17 = vpop.f32.mrf.mxu0 }
 0x569   : > { %v8813_v23 = vunpack.c.l.b16 %v11844_v50  ;;  %v8845_v15 = vrot.slane %v8812_v31, 5  ;;  %v11846_v61 = vpack.c.bf16 %v8655_v26, %v8655_v26  ;;  %v8814_v62 = vunpack.c.l.b16 %v11845_v43  ;;  %v8909_v50 = vld [vmem:[#allocation3 + $0xc] sm:$0xf] }
 0x56a   : > { %v8843_v25 = vrot.slane %v8811_v29, 6  ;;  %v8657_v54 = vmax.f32 %v8625_v5, 0.0  ;;  %v11847_v36 = vpack.c.bf16 %v8656_v24, %v8656_v24  ;;  %v7898_v13 = vcombine.high %v15689_v40, %v15689_v40 }
 0x56b   : > { %v8847_v16 = vrot.slane %v8813_v23, 4  ;;  %v8815_v57 = vunpack.c.l.b16 %v11846_v61  ;;  %v8849_v42 = vrot.slane %v8814_v62, 3  ;;  %v7905_v14 = vrot.slane %v15689_v40, %v16744_v18 }
 0x56c   : > { %v8844_v45 = vsel %vm5287_vm2, %v8843_v25, %v8842_v38  ;;  %v15743_v2 = vpack.c.bf16 %v8657_v54, %v8657_v54  ;;  %v8816_v32 = vunpack.c.l.b16 %v11847_v36  ;;  %v7912_v47 = vrot.slane %v7898_v13, %v16744_v18 }
 0x56d   : > { %v8846_v56 = vsel %vm5290_vm3, %v8845_v15, %v8844_v45  ;;  %v8851_v9 = vrot.slane %v8815_v57, 2  ;;  %v7913_v39 = vcombine.high %v7905_v14, %v7905_v14  ;;  %v8300_v53 = vsel %vm2462_vm1, %v7905_v14, -inf  ;;  %v7749_v57 = vpop.f32.mrf.mxu0  ;;  %v12739_v45 = vld [vmem:[%s16636_s5 + $0x178] sm:$0xff]  }
 0x56e   : > { %v8817_v11 = vunpack.c.l.b16 %v15743_v2  ;;  %v8848_v19 = vsel %vm5293_vm4, %v8847_v16, %v8846_v56  ;;  %v8853_v3 = vrot.slane %v8816_v32, 1  ;;  %v7914_v40 = vcombine.high %v7912_v47, %v7912_v47  ;;  %12237 = vmatprep.subr.bf16.mxu1 %v12739_v45 }
 0x56f   : > { %v8850_v59 = vsel %vm5296_vm5, %v8849_v42, %v8848_v19  ;;  %v8301_v35 = vrot.slane %v8300_v53, 4  ;;  %v8307_v20 = vsel %vm2462_vm1, %v7913_v39, -inf  ;;  %v8314_v0 = vsel %vm2462_vm1, %v7912_v47, -inf  ;;  %v12740_v39 = vld [vmem:[%s16636_s5 + $0x98] sm:$0xff]  }
 0x570   : > { %v8852_v44 = vsel %vm5299_vm6, %v8851_v9, %v8850_v59  ;;  %v8308_v4 = vrot.slane %v8307_v20, 4  ;;  %v8315_v51 = vrot.slane %v8314_v0, 4  ;;  %v8321_v12 = vsel %vm2462_vm1, %v7914_v40, -inf  ;;  %v15774_v9 = vpop.f32.mrf.mxu1 }
 0x571   : > { %v8854_v6 = vsel %vm5302_vm7, %v8853_v3, %v8852_v44  ;;  %v8302_v31 = vmax.f32 %v8300_v53, %v8301_v35  ;;  %v8322_v26 = vrot.slane %v8321_v12, 4  ;;  %v7745_v43 = vadd.f32 %v15675_v33, %v15692_v37 }
 0x572   : > { %v8896_v29 = vpack.c.b16 %v8854_v6, %v8854_v6  ;;  %v8309_v38 = vmax.f32 %v8307_v20, %v8308_v4  ;;  %v8316_v5 = vmax.f32 %v8314_v0, %v8315_v51  ;;  %v12143_v24 = vadd.f32 %v12142_v34, %v12141_v21  ;;  %v12738_v21 = vld [vmem:[%s16636_s5 + $0xd8] sm:$0xff]  }
 0x573   : > { %v8303_v23 = vrot.slane %v8302_v31, 2  ;;  %v8323_v15 = vmax.f32 %v8321_v12, %v8322_v26  ;;  %v7915_v61 = vcombine.high %v7745_v43, %v7745_v43  ;;  %v7922_v62 = vrot.slane %v7745_v43, %v16744_v18  ;;  %12217 = vmatprep.subr.bf16.mxu0 %v12738_v21  ;;  %v12742_v12 = vld [vmem:[%s16636_s5 + $0xd0] sm:$0xff]   ;;  %v15785_v43 = vpop.f32.mrf.mxu1 }
 0x574   : > { %v8910_v54 = vsel %vm13427_vm11, %v8896_v29, %v8909_v50  ;;  %v8310_v36 = vrot.slane %v8309_v38, 2  ;;  %v8317_v13 = vrot.slane %v8316_v5, 2  ;;  %v7653_v16 = vadd.f32 %v12143_v24, %v15499_v7  ;;  %12218 = vmatpush3.bf16.msra.mxu0 %v12740_v39  ;;  %v12744_v29 = vld [vmem:[%s16636_s5 + $0x90] sm:$0xff]  }
 0x575   : > { %8911 = vst [vmem:[#allocation3 + $0xc] sm:$0xf] %v8910_v54  ;;  %v8304_v42 = vmax.f32 %v8302_v31, %v8303_v23  ;;  %v8324_v33 = vrot.slane %v8323_v15, 2  ;;  %v7929_v37 = vrot.slane %v7915_v61, %v16744_v18  ;;  %v7930_v14 = vcombine.high %v7922_v62, %v7922_v62  ;;  %12219 = vmatprep.subr.bf16.mxu0 %v12742_v12 }
 0x576   : > { %v8311_v32 = vmax.f32 %v8309_v38, %v8310_v36  ;;  %v8318_v47 = vmax.f32 %v8316_v5, %v8317_v13  ;;  %v8328_v56 = vsel %vm2462_vm1, %v7922_v62, -inf  ;;  %v15772_v7 = vadd.f32 %v7749_v57, %v7653_v16  ;;  %v12746_v36 = vld [vmem:[%s16636_s5 + $0xc8] sm:$0xff]  }
 0x577   : > { %v8305_v53 = vrot.slane %v8304_v42, 1  ;;  %v8325_v19 = vmax.f32 %v8323_v15, %v8324_v33  ;;  %v7931_v3 = vcombine.high %v7929_v37, %v7929_v37  ;;  %v8329_v40 = vrot.slane %v8328_v56, 4 }
 0x578   : > { %v8312_v59 = vrot.slane %v8311_v32, 1  ;;  %v8319_v35 = vrot.slane %v8318_v47, 1  ;;  %v8335_v20 = vsel %vm2462_vm1, %v7930_v14, -inf  ;;  %v8342_v0 = vsel %vm2462_vm1, %v7929_v37, -inf  ;;  %12220 = vmatpush3.bf16.msra.mxu0 %v12744_v29  ;;  %v15803_v14 = vpop.f32.mrf.mxu1 }
 0x579   : > { %v8306_v34 = vmax.f32 %v8304_v42, %v8305_v53  ;;  %v8326_v44 = vrot.slane %v8325_v19, 1  ;;  %v8330_v4 = vmax.f32 %v8328_v56, %v8329_v40  ;;  %v8336_v51 = vrot.slane %v8335_v20, 4  ;;  %v12748_v42 = vld [vmem:[%s16636_s5 + $0x88] sm:$0xff]   ;;  %12221 = vmatprep.subr.bf16.mxu0 %v12746_v36 }
 0x57a   : > { %v8313_v6 = vmax.f32 %v8311_v32, %v8312_v59  ;;  %v8320_v50 = vmax.f32 %v8318_v47, %v8319_v35  ;;  %v8343_v31 = vrot.slane %v8342_v0, 4  ;;  %v8349_v26 = vsel %vm2462_vm1, %v7931_v3, -inf }
 0x57b   : > { %v8327_v38 = vmax.f32 %v8325_v19, %v8326_v44  ;;  %v8588_v5 = vmax.f32 %v15669_v22, %v8306_v34  ;;  %v8331_v24 = vrot.slane %v8330_v4, 2  ;;  %v8337_v23 = vmax.f32 %v8335_v20, %v8336_v51  ;;  %v12750_v19 = vld [vmem:[%s16636_s5 + $0xc0] sm:$0xff]   ;;  %v15812_v51 = vpop.f32.mrf.mxu1 }
 0x57c   : > { %v8589_v15 = vmax.f32 %v15671_v48, %v8313_v6  ;;  %v8590_v61 = vmax.f32 %v15673_v30, %v8320_v50  ;;  %v8344_v62 = vmax.f32 %v8342_v0, %v8343_v31  ;;  %v8350_v54 = vrot.slane %v8349_v26, 4  ;;  %12222 = vmatpush3.bf16.msra.mxu0 %v12748_v42  ;;  %v12752_v20 = vld [vmem:[%s16636_s5 + $0x80] sm:$0xff]  }
 0x57d   : > { %v8591_v13 = vmax.f32 %v15678_v49, %v8327_v38  ;;  %v8626_v16 = vadd.f32 %v15720_v28, %v8588_v5  ;;  %v8332_v57 = vmax.f32 %v8330_v4, %v8331_v24  ;;  %v8338_v22 = vrot.slane %v8337_v23, 2  ;;  %12223 = vmatprep.subr.bf16.mxu0 %v12750_v19 }
 0x57e   : > { %v8627_v48 = vadd.f32 %v15720_v28, %v8589_v15  ;;  %v8628_v30 = vadd.f32 %v15720_v28, %v8590_v61  ;;  %v8345_v33 = vrot.slane %v8344_v62, 2  ;;  %v8351_v37 = vmax.f32 %v8349_v26, %v8350_v54 }
 0x57f   : > { %v8629_v21 = vadd.f32 %v15720_v28, %v8591_v13  ;;  %v8658_v49 = vmax.f32 %v8626_v16, 0.0  ;;  %v8333_v45 = vrot.slane %v8332_v57, 1  ;;  %v8339_v32 = vmax.f32 %v8337_v23, %v8338_v22  ;;  %v15818_v16 = vpop.f32.mrf.mxu1 }
 0x580   : > { %v8659_v47 = vmax.f32 %v8627_v48, 0.0  ;;  %v8660_v56 = vmax.f32 %v8628_v30, 0.0  ;;  %v8346_v39 = vmax.f32 %v8344_v62, %v8345_v33  ;;  %v8352_v53 = vrot.slane %v8351_v37, 2  ;;  %12224 = vmatpush3.bf16.msra.mxu0 %v12752_v20 }
 0x581   : > { %v8661_v3 = vmax.f32 %v8629_v21, 0.0  ;;  %v11849_v40 = vpack.c.bf16 %v8658_v49, %v8658_v49  ;;  %v8334_v59 = vmax.f32 %v8332_v57, %v8333_v45  ;;  %v8340_v35 = vrot.slane %v8339_v32, 1 }
 0x582   : > { %v11850_v0 = vpack.c.bf16 %v8659_v47, %v8659_v47  ;;  %v11851_v34 = vpack.c.bf16 %v8660_v56, %v8660_v56  ;;  %v8347_v44 = vrot.slane %v8346_v39, 1  ;;  %v8353_v4 = vmax.f32 %v8351_v37, %v8352_v53 }
 0x583   : > { %v11852_v12 = vpack.c.bf16 %v8661_v3, %v8661_v3  ;;  %v8818_v6 = vunpack.c.l.b16 %v11849_v40  ;;  %v8341_v50 = vmax.f32 %v8339_v32, %v8340_v35  ;;  %v8592_v31 = vmax.f32 %v15683_v63, %v8334_v59 }
 0x584   : > { %v8819_v26 = vunpack.c.l.b16 %v11850_v0  ;;  %v8820_v29 = vunpack.c.l.b16 %v11851_v34  ;;  %v8348_v38 = vmax.f32 %v8346_v39, %v8347_v44  ;;  %v8354_v5 = vrot.slane %v8353_v4, 1 }
 0x585   : > { %v8821_v24 = vunpack.c.l.b16 %v11852_v12  ;;  %v8855_v23 = vrot.slane %v8818_v6, 7  ;;  %v8593_v15 = vmax.f32 %v15694_v10, %v8341_v50  ;;  %v8630_v61 = vadd.f32 %v15720_v28, %v8592_v31  ;;  %v12762_v31 = vld [vmem:[%s16636_s5 + $0x1f8] sm:$0xff]  }
 0x586   : > { %v8857_v62 = vrot.slane %v8819_v26, 6  ;;  %v8859_v54 = vrot.slane %v8820_v29, 5  ;;  %v8355_v36 = vmax.f32 %v8353_v4, %v8354_v5  ;;  %v8594_v13 = vmax.f32 %v15696_v60, %v8348_v38  ;;  %12265 = vmatprep.subr.bf16.mxu0 %v12762_v31 }
 0x587   : > { %v8856_v63 = vsel %vm5305_vm8, %v8855_v23, %v8817_v11  ;;  %v8861_v57 = vrot.slane %v8821_v24, 4  ;;  %v8631_v22 = vadd.f32 %v15720_v28, %v8593_v15  ;;  %v8662_v42 = vmax.f32 %v8630_v61, 0.0  ;;  %v12495_v24 = vpop.f32.mrf.mxu0 }
 0x588   : > { %v8858_v48 = vsel %vm5287_vm2, %v8857_v62, %v8856_v63  ;;  %v8595_v10 = vmax.f32 %v15701_v52, %v8355_v36  ;;  %v8632_v30 = vadd.f32 %v15720_v28, %v8594_v13  ;;  %v7932_v33 = vcombine.high %v15772_v7, %v15772_v7  ;;  %v12151_v52 = vpop.f32.mrf.mxu1 }
 0x589   : > { %v8860_v60 = vsel %vm5290_vm3, %v8859_v54, %v8858_v48  ;;  %v8663_v37 = vmax.f32 %v8631_v22, 0.0  ;;  %v11853_v21 = vpack.c.bf16 %v8662_v42, %v8662_v42  ;;  %v7939_v2 = vrot.slane %v15772_v7, %v16744_v18  ;;  %v8913_v7 = vld [vmem:[#allocation3 + $0x14] sm:$0x1] }
 0x58a   : > { %v8633_v11 = vadd.f32 %v15720_v28, %v8595_v10  ;;  %v8664_v49 = vmax.f32 %v8632_v30, 0.0  ;;  %v8862_v45 = vsel %vm5293_vm4, %v8861_v57, %v8860_v60  ;;  %v7946_v32 = vrot.slane %v7932_v33, %v16744_v18  ;;  %v12153_v50 = vpop.f32.mrf.mxu1 }
 0x58b   : > { %v11854_v47 = vpack.c.bf16 %v8663_v37, %v8663_v37  ;;  %v8822_v56 = vunpack.c.l.b16 %v11853_v21  ;;  %v7947_v39 = vcombine.high %v7939_v2, %v7939_v2  ;;  %v8356_v53 = vsel %vm2462_vm1, %v7939_v2, -inf  ;;  %v7752_v2 = vpop.f32.mrf.mxu0 }
 0x58c   : > { %v8665_v19 = vmax.f32 %v8633_v11, 0.0  ;;  %v11855_v3 = vpack.c.bf16 %v8664_v49, %v8664_v49  ;;  %v7948_v40 = vcombine.high %v7946_v32, %v7946_v32  ;;  %v8357_v59 = vrot.slane %v8356_v53, 4  ;;  %v12154_v30 = vpop.f32.mrf.mxu1 }
 0x58d   : > { %v8823_v35 = vunpack.c.l.b16 %v11854_v47  ;;  %v8863_v20 = vrot.slane %v8822_v56, 3  ;;  %v8363_v0 = vsel %vm2462_vm1, %v7947_v39, -inf  ;;  %v8370_v34 = vsel %vm2462_vm1, %v7946_v32, -inf }
 0x58e   : > { %v8824_v44 = vunpack.c.l.b16 %v11855_v3  ;;  %v11873_v4 = vpack.c.bf16 %v8665_v19, %v8665_v19  ;;  %v8358_v12 = vmax.f32 %v8356_v53, %v8357_v59  ;;  %v8364_v6 = vrot.slane %v8363_v0, 4 }
 0x58f   : > { %v8864_v26 = vsel %vm5296_vm5, %v8863_v20, %v8862_v45  ;;  %v8865_v29 = vrot.slane %v8823_v35, 2  ;;  %v8371_v38 = vrot.slane %v8370_v34, 4  ;;  %v8377_v5 = vsel %vm2462_vm1, %v7948_v40, -inf }
 0x590   : > { %v8867_v23 = vrot.slane %v8824_v44, 1  ;;  %v8914_v61 = vsel %vm13535_vm14, %v11873_v4, %v8913_v7  ;;  %v8359_v62 = vrot.slane %v8358_v12, 2  ;;  %v8365_v54 = vmax.f32 %v8363_v0, %v8364_v6 }
 0x591   : > { %v8866_v36 = vsel %vm5299_vm6, %v8865_v29, %v8864_v26  ;;  %8915 = vst [vmem:[#allocation3 + $0x14] sm:$0x1] %v8914_v61  ;;  %v8372_v13 = vmax.f32 %v8370_v34, %v8371_v38  ;;  %v8378_v63 = vrot.slane %v8377_v5, 4  ;;  %v12146_v57 = vadd.f32 %v15785_v43, %v15774_v9 }
 0x592   : > { %v8868_v22 = vsel %vm5302_vm7, %v8867_v23, %v8866_v36  ;;  %v8360_v42 = vmax.f32 %v8358_v12, %v8359_v62  ;;  %v8366_v48 = vrot.slane %v8365_v54, 2  ;;  %v12149_v10 = vadd.f32 %v15812_v51, %v15803_v14 }
 0x593   : > { %v8897_v33 = vpack.c.b16 %v8868_v22, %v8868_v22  ;;  %v8373_v60 = vrot.slane %v8372_v13, 2  ;;  %v8379_v37 = vmax.f32 %v8377_v5, %v8378_v63  ;;  %v7656_v21 = vadd.f32 %v12146_v57, %v15503_v55 }
 0x594   : > { %v8361_v11 = vrot.slane %v8360_v42, 1  ;;  %v15852_v49 = vmax.f32 %v8365_v54, %v8366_v48  ;;  %v7661_v45 = vadd.f32 %v12149_v10, %v15507_v58  ;;  %v12152_v9 = vadd.f32 %v12151_v52, %v15818_v16 }
 0x595   : > { %8912 = vst [vmem:[#allocation3 + $0x10] sm:$0xf] %v8897_v33  ;;  %v15856_v43 = vmax.f32 %v8372_v13, %v8373_v60  ;;  %v8380_v32 = vrot.slane %v8379_v37, 2  ;;  %v7753_v47 = vadd.f32 %v7752_v2, %v7656_v21  ;;  %v12155_v14 = vadd.f32 %v12154_v30, %v12153_v50  ;;  %v15882_v2 = vpop.f32.mrf.mxu0 }
 0x596   : > { %v8368_v51 = vrot.slane %v15852_v49, 1  ;;  %v7758_v56 = vadd.f32 %v15755_v17, %v7661_v45  ;;  %v7664_v55 = vadd.f32 %v12152_v9, %v15511_v41  ;;  %v15861_v39 = vmax.f32 %v8360_v42, %v8361_v11 }
 0x597   : > { %v8375_v53 = vrot.slane %v15856_v43, 1  ;;  %v15864_v19 = vmax.f32 %v8379_v37, %v8380_v32  ;;  %v7949_v58 = vcombine.high %v7753_v47, %v7753_v47  ;;  %v7956_v16 = vrot.slane %v7753_v47, %v16744_v18  ;;  %v15889_v47 = vpop.f32.mrf.mxu1 }
 0x598   : > { %v7966_v52 = vcombine.high %v7758_v56, %v7758_v56  ;;  %v7973_v3 = vrot.slane %v7758_v56, %v16744_v18  ;;  %v7761_v40 = vadd.f32 %v12495_v24, %v7664_v55  ;;  %v7669_v59 = vadd.f32 %v12155_v14, %v15521_v27 }
 0x599   : > { %v8382_v35 = vrot.slane %v15864_v19, 1  ;;  %v7963_v17 = vrot.slane %v7949_v58, %v16744_v18  ;;  %v7964_v41 = vcombine.high %v7956_v16, %v7956_v16  ;;  %v8384_v20 = vsel %vm2462_vm1, %v7956_v16, -inf }
 0x59a   : > { %v8385_v7 = vrot.slane %v8384_v20, 4  ;;  %v7980_v0 = vrot.slane %v7966_v52, %v16744_v18  ;;  %v7981_v34 = vcombine.high %v7973_v3, %v7973_v3  ;;  %v8412_v44 = vsel %vm2462_vm1, %v7973_v3, -inf }
 0x59b   : > { %v7965_v4 = vcombine.high %v7963_v17, %v7963_v17  ;;  %v8391_v12 = vsel %vm2462_vm1, %v7964_v41, -inf  ;;  %v8398_v6 = vsel %vm2462_vm1, %v7963_v17, -inf  ;;  %v8413_v50 = vrot.slane %v8412_v44, 4 }
 0x59c   : > { %v8386_v27 = vmax.f32 %v8384_v20, %v8385_v7  ;;  %v8392_v31 = vrot.slane %v8391_v12, 4  ;;  %v8399_v26 = vrot.slane %v8398_v6, 4  ;;  %v7982_v29 = vcombine.high %v7980_v0, %v7980_v0 }
 0x59d   : > { %v8405_v38 = vsel %vm2462_vm1, %v7965_v4, -inf  ;;  %v8414_v5 = vmax.f32 %v8412_v44, %v8413_v50  ;;  %v8419_v24 = vsel %vm2462_vm1, %v7981_v34, -inf  ;;  %v8426_v23 = vsel %vm2462_vm1, %v7980_v0, -inf  ;;  %v7765_v34 = vpop.f32.mrf.mxu0  ;;  %v15900_v50 = vpop.f32.mrf.mxu1 }
 0x59e   : > { %v8387_v61 = vrot.slane %v8386_v27, 2  ;;  %v8393_v62 = vmax.f32 %v8391_v12, %v8392_v31  ;;  %v8400_v54 = vmax.f32 %v8398_v6, %v8399_v26  ;;  %v8406_v36 = vrot.slane %v8405_v38, 4 }
 0x59f   : > { %v8415_v13 = vrot.slane %v8414_v5, 2  ;;  %v8420_v63 = vrot.slane %v8419_v24, 4  ;;  %v8427_v57 = vrot.slane %v8426_v23, 4  ;;  %v8433_v22 = vsel %vm2462_vm1, %v7982_v29, -inf }
 0x5a0   : > { %v15880_v42 = vmax.f32 %v8386_v27, %v8387_v61  ;;  %v8394_v48 = vrot.slane %v8393_v62, 2  ;;  %v8401_v10 = vrot.slane %v8400_v54, 2  ;;  %v8407_v30 = vmax.f32 %v8405_v38, %v8406_v36 }
 0x5a1   : > { %v8416_v33 = vmax.f32 %v8414_v5, %v8415_v13  ;;  %v8421_v60 = vmax.f32 %v8419_v24, %v8420_v63  ;;  %v8428_v37 = vmax.f32 %v8426_v23, %v8427_v57  ;;  %v8434_v21 = vrot.slane %v8433_v22, 4 }
 0x5a2   : > { %v8389_v11 = vrot.slane %v15880_v42, 1  ;;  %v15885_v45 = vmax.f32 %v8393_v62, %v8394_v48  ;;  %v15887_v9 = vmax.f32 %v8400_v54, %v8401_v10  ;;  %v8408_v32 = vrot.slane %v8407_v30, 2 }
 0x5a3   : > { %v8417_v14 = vrot.slane %v8416_v33, 1  ;;  %v8422_v56 = vrot.slane %v8421_v60, 2  ;;  %v8429_v55 = vrot.slane %v8428_v37, 2  ;;  %v8435_v58 = vmax.f32 %v8433_v22, %v8434_v21 }
 0x5a4   : > { %v8396_v16 = vrot.slane %v15885_v45, 1  ;;  %v8403_v52 = vrot.slane %v15887_v9, 1  ;;  %v15893_v3 = vmax.f32 %v8407_v30, %v8408_v32  ;;  %v7983_v17 = vcombine.high %v7761_v40, %v7761_v40 }
 0x5a5   : > { %v15895_v41 = vmax.f32 %v8416_v33, %v8417_v14  ;;  %v8423_v20 = vmax.f32 %v8421_v60, %v8422_v56  ;;  %v8430_v7 = vmax.f32 %v8428_v37, %v8429_v55  ;;  %v8436_v0 = vrot.slane %v8435_v58, 2 }
 0x5a6   : > { %v8410_v44 = vrot.slane %v15893_v3, 1  ;;  %v7990_v4 = vrot.slane %v7761_v40, %v16744_v18  ;;  %v7997_v12 = vrot.slane %v7983_v17, %v16744_v18  ;;  %v7766_v6 = vadd.f32 %v7765_v34, %v7669_v59 }
 0x5a7   : > { %v8424_v27 = vrot.slane %v8423_v20, 1  ;;  %v8431_v31 = vrot.slane %v8430_v7, 1  ;;  %v8437_v26 = vmax.f32 %v8435_v58, %v8436_v0  ;;  %v15905_v29 = vmax.f32 %v15852_v49, %v8368_v51  ;;  %v15915_v49 = vpop.f32.mrf.mxu1 }
 0x5a8   : > { %v7998_v38 = vcombine.high %v7990_v4, %v7990_v4  ;;  %v7999_v5 = vcombine.high %v7997_v12, %v7997_v12  ;;  %v8440_v24 = vsel %vm2462_vm1, %v7990_v4, -inf  ;;  %v8454_v23 = vsel %vm2462_vm1, %v7997_v12, -inf }
 0x5a9   : > { %v15909_v40 = vmax.f32 %v8423_v20, %v8424_v27  ;;  %v15911_v61 = vmax.f32 %v8430_v7, %v8431_v31  ;;  %v8438_v59 = vrot.slane %v8437_v26, 1  ;;  %v8441_v62 = vrot.slane %v8440_v24, 4  ;;  %v12160_v20 = vpop.f32.mrf.mxu1 }
 0x5aa   : > { %v8447_v54 = vsel %vm2462_vm1, %v7998_v38, -inf  ;;  %v8455_v36 = vrot.slane %v8454_v23, 4  ;;  %v8461_v13 = vsel %vm2462_vm1, %v7999_v5, -inf  ;;  %v8000_v63 = vcombine.high %v7766_v6, %v7766_v6 }
 0x5ab   : > { %v15917_v51 = vmax.f32 %v8437_v26, %v8438_v59  ;;  %v8442_v57 = vmax.f32 %v8440_v24, %v8441_v62  ;;  %v8448_v22 = vrot.slane %v8447_v54, 4  ;;  %v8462_v48 = vrot.slane %v8461_v13, 4 }
 0x5ac   : > { %v8456_v10 = vmax.f32 %v8454_v23, %v8455_v36  ;;  %v8007_v30 = vrot.slane %v7766_v6, %v16744_v18  ;;  %v8014_v33 = vrot.slane %v8000_v63, %v16744_v18  ;;  %v15924_v60 = vmax.f32 %v15856_v43, %v8375_v53  ;;  %v12162_v23 = vpop.f32.mrf.mxu1 }
 0x5ad   : > { %v8443_v37 = vrot.slane %v8442_v57, 2  ;;  %v8449_v21 = vmax.f32 %v8447_v54, %v8448_v22  ;;  %v8463_v32 = vmax.f32 %v8461_v13, %v8462_v48  ;;  %v15929_v14 = vmax.f32 %v15864_v19, %v8382_v35  ;;  %v15939_v48 = vpop.f32.mrf.mxu0 }
 0x5ae   : > { %v8457_v56 = vrot.slane %v8456_v10, 2  ;;  %v8015_v55 = vcombine.high %v8007_v30, %v8007_v30  ;;  %v8016_v58 = vcombine.high %v8014_v33, %v8014_v33  ;;  %v8468_v17 = vsel %vm2462_vm1, %v8007_v30, -inf }
 0x5af   : > { %v8444_v7 = vmax.f32 %v8442_v57, %v8443_v37  ;;  %v8450_v0 = vrot.slane %v8449_v21, 2  ;;  %v8464_v34 = vrot.slane %v8463_v32, 2  ;;  %v8469_v4 = vrot.slane %v8468_v17, 4 }
 0x5b0   : > { %v8458_v43 = vmax.f32 %v8456_v10, %v8457_v56  ;;  %v8475_v53 = vsel %vm2462_vm1, %v8015_v55, -inf  ;;  %v8482_v12 = vsel %vm2462_vm1, %v8014_v33, -inf  ;;  %v8489_v6 = vsel %vm2462_vm1, %v8016_v58, -inf  ;;  %v12163_v58 = vpop.f32.mrf.mxu1 }
 0x5b1   : > { %v8445_v27 = vrot.slane %v8444_v7, 1  ;;  %v8451_v19 = vmax.f32 %v8449_v21, %v8450_v0  ;;  %v8465_v35 = vmax.f32 %v8463_v32, %v8464_v34  ;;  %v8470_v31 = vmax.f32 %v8468_v17, %v8469_v4 }
 0x5b2   : > { %v8459_v26 = vrot.slane %v8458_v43, 1  ;;  %v8476_v38 = vrot.slane %v8475_v53, 4  ;;  %v8483_v5 = vrot.slane %v8482_v12, 4  ;;  %v8490_v24 = vrot.slane %v8489_v6, 4 }
 0x5b3   : > { %v15935_v59 = vmax.f32 %v8444_v7, %v8445_v27  ;;  %v8452_v62 = vrot.slane %v8451_v19, 1  ;;  %v8466_v54 = vrot.slane %v8465_v35, 1  ;;  %v8471_v36 = vrot.slane %v8470_v31, 2 }
 0x5b4   : > { %v15937_v13 = vmax.f32 %v8458_v43, %v8459_v26  ;;  %v8477_v63 = vmax.f32 %v8475_v53, %v8476_v38  ;;  %v8484_v57 = vmax.f32 %v8482_v12, %v8483_v5  ;;  %v8491_v22 = vmax.f32 %v8489_v6, %v8490_v24 }
 0x5b5   : > { %v15941_v10 = vmax.f32 %v8451_v19, %v8452_v62  ;;  %v15943_v30 = vmax.f32 %v8465_v35, %v8466_v54  ;;  %v8472_v33 = vmax.f32 %v8470_v31, %v8471_v36  ;;  %v12158_v37 = vadd.f32 %v15900_v50, %v15889_v47  ;;  %v15963_v50 = vld [vmem:[#allocation3] sm:$0xf] }
 0x5b6   : > { %v8478_v21 = vrot.slane %v8477_v63, 2  ;;  %v8485_v32 = vrot.slane %v8484_v57, 2  ;;  %v8492_v56 = vrot.slane %v8491_v22, 2  ;;  %v15950_v55 = vmax.f32 %v15880_v42, %v8389_v11  ;;  %v7768_v11 = vpop.f32.mrf.mxu0 }
 0x5b7   : > { %v8473_v17 = vrot.slane %v8472_v33, 1  ;;  %v7672_v7 = vadd.f32 %v12158_v37, %v15525_v8  ;;  %v15956_v0 = vmax.f32 %v15885_v45, %v8396_v16  ;;  %v15961_v47 = vmax.f32 %v15887_v9, %v8403_v52 }
 0x5b8   : > { %v8479_v34 = vmax.f32 %v8477_v63, %v8478_v21  ;;  %v8486_v4 = vmax.f32 %v8484_v57, %v8485_v32  ;;  %v8493_v42 = vmax.f32 %v8491_v22, %v8492_v56  ;;  %v15968_v8 = vmax.f32 %v15893_v3, %v8410_v44 }
 0x5b9   : > { %v8474_v43 = vmax.f32 %v8472_v33, %v8473_v17  ;;  %v7769_v53 = vadd.f32 %v7768_v11, %v7672_v7  ;;  %v12161_v45 = vadd.f32 %v12160_v20, %v15915_v49  ;;  %v12164_v16 = vadd.f32 %v12163_v58, %v12162_v23 }
 0x5ba   : > { %v8480_v12 = vrot.slane %v8479_v34, 1  ;;  %v8487_v6 = vrot.slane %v8486_v4, 1  ;;  %v8494_v9 = vrot.slane %v8493_v42, 1  ;;  %v8931_v52 = vshrl.u32 %v15963_v50, 16 }
 0x5bb   : > { %v8596_v27 = vmax.f32 %v15861_v39, %v8474_v43  ;;  %v8017_v19 = vcombine.high %v7769_v53, %v7769_v53  ;;  %v8024_v35 = vrot.slane %v7769_v53, %v16744_v18  ;;  %v7677_v31 = vadd.f32 %v12161_v45, %v15534_v46 }
 0x5bc   : > { %v8481_v26 = vmax.f32 %v8479_v34, %v8480_v12  ;;  %v8488_v3 = vmax.f32 %v8486_v4, %v8487_v6  ;;  %v8495_v44 = vmax.f32 %v8493_v42, %v8494_v9  ;;  %v7680_v38 = vadd.f32 %v12164_v16, %v15543_v1 }
 0x5bd   : > { %v8634_v49 = vadd.f32 %v15720_v28, %v8596_v27  ;;  %v8031_v20 = vrot.slane %v8017_v19, %v16744_v18  ;;  %v8032_v5 = vcombine.high %v8024_v35, %v8024_v35  ;;  %v8496_v24 = vsel %vm2462_vm1, %v8024_v35, -inf }
 0x5be   : > { %v8597_v23 = vmax.f32 %v15905_v29, %v8481_v26  ;;  %v8598_v39 = vmax.f32 %v15924_v60, %v8488_v3  ;;  %v8599_v62 = vmax.f32 %v15929_v14, %v8495_v44  ;;  %v8497_v54 = vrot.slane %v8496_v24, 4 }
 0x5bf   : > { %v8666_v46 = vmax.f32 %v8634_v49, 0.0  ;;  %v8033_v36 = vcombine.high %v8031_v20, %v8031_v20  ;;  %v8503_v63 = vsel %vm2462_vm1, %v8032_v5, -inf  ;;  %v8510_v1 = vsel %vm2462_vm1, %v8031_v20, -inf }
 0x5c0   : > { %v8635_v57 = vadd.f32 %v15720_v28, %v8597_v23  ;;  %v8636_v22 = vadd.f32 %v15720_v28, %v8598_v39  ;;  %v8637_v33 = vadd.f32 %v15720_v28, %v8599_v62  ;;  %v8498_v37 = vmax.f32 %v8496_v24, %v8497_v54 }
 0x5c1   : > { %v11857_v21 = vpack.c.bf16 %v8666_v46, %v8666_v46  ;;  %v8504_v29 = vrot.slane %v8503_v63, 4  ;;  %v8511_v32 = vrot.slane %v8510_v1, 4  ;;  %v8517_v60 = vsel %vm2462_vm1, %v8033_v36, -inf }
 0x5c2   : > { %v8667_v14 = vmax.f32 %v8635_v57, 0.0  ;;  %v8668_v56 = vmax.f32 %v8636_v22, 0.0  ;;  %v8669_v58 = vmax.f32 %v8637_v33, 0.0  ;;  %v8499_v17 = vrot.slane %v8498_v37, 2 }
 0x5c3   : > { %v8826_v7 = vunpack.c.l.b16 %v11857_v21  ;;  %v8505_v34 = vmax.f32 %v8503_v63, %v8504_v29  ;;  %v8512_v4 = vmax.f32 %v8510_v1, %v8511_v32  ;;  %v8518_v42 = vrot.slane %v8517_v60, 4 }
 0x5c4   : > { %v11858_v11 = vpack.c.bf16 %v8667_v14, %v8667_v14  ;;  %v11859_v43 = vpack.c.bf16 %v8668_v56, %v8668_v56  ;;  %v11860_v53 = vpack.c.bf16 %v8669_v58, %v8669_v58  ;;  %v8500_v45 = vmax.f32 %v8498_v37, %v8499_v17 }
 0x5c5   : > { %v8869_v16 = vrot.slane %v8826_v7, 7  ;;  %v8506_v12 = vrot.slane %v8505_v34, 2  ;;  %v8513_v6 = vrot.slane %v8512_v4, 2  ;;  %v8519_v9 = vmax.f32 %v8517_v60, %v8518_v42 }
 0x5c6   : > { %v8827_v27 = vunpack.c.l.b16 %v11858_v11  ;;  %v8828_v19 = vunpack.c.l.b16 %v11859_v43  ;;  %v8829_v35 = vunpack.c.l.b16 %v11860_v53  ;;  %v8501_v26 = vrot.slane %v8500_v45, 1 }
 0x5c7   : > { %v8507_v3 = vmax.f32 %v8505_v34, %v8506_v12  ;;  %v8514_v44 = vmax.f32 %v8512_v4, %v8513_v6  ;;  %v8520_v49 = vrot.slane %v8519_v9, 2  ;;  %v7774_v20 = vadd.f32 %v15882_v2, %v7677_v31 }
 0x5c8   : > { %v8870_v5 = vrot.slane %v8827_v27, 6  ;;  %v8872_v24 = vrot.slane %v8828_v19, 5  ;;  %v8874_v23 = vrot.slane %v8829_v35, 4  ;;  %v8502_v39 = vmax.f32 %v8500_v45, %v8501_v26  ;;  %v16011_v45 = vld [vmem:[%s16635_s4] ss:$0 sm:$0xff] }
 0x5c9   : > { %v8508_v62 = vrot.slane %v8507_v3, 1  ;;  %v8515_v54 = vrot.slane %v8514_v44, 1  ;;  %v8521_v46 = vmax.f32 %v8519_v9, %v8520_v49  ;;  %v8034_v36 = vcombine.high %v7774_v20, %v7774_v20 }
 0x5ca   : > { %v8871_v63 = vsel %vm5287_vm2, %v8870_v5, %v8869_v16  ;;  %v8600_v1 = vmax.f32 %v15950_v55, %v8502_v39  ;;  %v8041_v57 = vrot.slane %v7774_v20, %v16744_v18  ;;  %v15993_v22 = vadd.f32 %v15939_v48, %v7680_v38 }
 0x5cb   : > { %v8873_v33 = vsel %vm5290_vm3, %v8872_v24, %v8871_v63  ;;  %v8509_v2 = vmax.f32 %v8507_v3, %v8508_v62  ;;  %v8516_v31 = vmax.f32 %v8514_v44, %v8515_v54  ;;  %v8522_v37 = vrot.slane %v8521_v46, 1 }
 0x5cc   : > { %v8638_v21 = vadd.f32 %v15720_v28, %v8600_v1  ;;  %v8875_v29 = vsel %vm5293_vm4, %v8874_v23, %v8873_v33  ;;  %v8048_v32 = vrot.slane %v8034_v36, %v16744_v18  ;;  %v8049_v60 = vcombine.high %v8041_v57, %v8041_v57 }
 0x5cd   : > { %v8523_v14 = vmax.f32 %v8521_v46, %v8522_v37  ;;  %v8601_v55 = vmax.f32 %v15956_v0, %v8509_v2  ;;  %v8602_v56 = vmax.f32 %v15961_v47, %v8516_v31  ;;  %v8524_v48 = vsel %vm2462_vm1, %v8041_v57, -inf }
 0x5ce   : > { %v8670_v38 = vmax.f32 %v8638_v21, 0.0  ;;  %v8050_v58 = vcombine.high %v8048_v32, %v8048_v32  ;;  %v8525_v17 = vrot.slane %v8524_v48, 4  ;;  %v8531_v7 = vsel %vm2462_vm1, %v8049_v60, -inf }
 0x5cf   : > { %v8603_v34 = vmax.f32 %v15968_v8, %v8523_v14  ;;  %v8639_v4 = vadd.f32 %v15720_v28, %v8601_v55  ;;  %v8640_v42 = vadd.f32 %v15720_v28, %v8602_v56  ;;  %v8532_v11 = vrot.slane %v8531_v7, 4 }
 0x5d0   : > { %v11861_v43 = vpack.c.bf16 %v8670_v38, %v8670_v38  ;;  %v8526_v53 = vmax.f32 %v8524_v48, %v8525_v17  ;;  %v8538_v0 = vsel %vm2462_vm1, %v8048_v32, -inf  ;;  %v8545_v47 = vsel %vm2462_vm1, %v8050_v58, -inf  ;;  %v8916_v38 = vld [vmem:[#allocation3 + $0x18] sm:$0xf] }
 0x5d1   : > { %v8641_v16 = vadd.f32 %v16011_v45, %v8603_v34  ;;  %v8671_v12 = vmax.f32 %v8639_v4, 0.0  ;;  %v8672_v8 = vmax.f32 %v8640_v42, 0.0  ;;  %v8533_v6 = vmax.f32 %v8531_v7, %v8532_v11 }
 0x5d2   : > { %v8830_v9 = vunpack.c.l.b16 %v11861_v43  ;;  %v8527_v27 = vrot.slane %v8526_v53, 2  ;;  %v8539_v28 = vrot.slane %v8538_v0, 4  ;;  %v8546_v19 = vrot.slane %v8545_v47, 4 }
 0x5d3   : > { %v8673_v35 = vmax.f32 %v8641_v16, 0.0  ;;  %v11862_v26 = vpack.c.bf16 %v8671_v12, %v8671_v12  ;;  %v11863_v3 = vpack.c.bf16 %v8672_v8, %v8672_v8  ;;  %v8534_v44 = vrot.slane %v8533_v6, 2 }
 0x5d4   : > { %v8876_v49 = vrot.slane %v8830_v9, 3  ;;  %v8528_v20 = vmax.f32 %v8526_v53, %v8527_v27  ;;  %v8540_v5 = vmax.f32 %v8538_v0, %v8539_v28  ;;  %v8547_v24 = vmax.f32 %v8545_v47, %v8546_v19 }
 0x5d5   : > { %v16014_v23 = vpack.c.bf16 %v8673_v35, %v8673_v35  ;;  %v8831_v39 = vunpack.c.l.b16 %v11862_v26  ;;  %v8832_v62 = vunpack.c.l.b16 %v11863_v3  ;;  %v8535_v54 = vmax.f32 %v8533_v6, %v8534_v44 }
 0x5d6   : > { %v8877_v46 = vsel %vm5296_vm5, %v8876_v49, %v8875_v29  ;;  %v8529_v36 = vrot.slane %v8528_v20, 1  ;;  %v8541_v63 = vrot.slane %v8540_v5, 2  ;;  %v8548_v1 = vrot.slane %v8547_v24, 2 }
 0x5d7   : > { %v8833_v57 = vunpack.c.l.b16 %v16014_v23  ;;  %v8878_v33 = vrot.slane %v8831_v39, 2  ;;  %v8880_v2 = vrot.slane %v8832_v62, 1  ;;  %v8536_v31 = vrot.slane %v8535_v54, 1 }
 0x5d8   : > { %v8530_v37 = vmax.f32 %v8528_v20, %v8529_v36  ;;  %v8542_v21 = vmax.f32 %v8540_v5, %v8541_v63  ;;  %v8549_v32 = vmax.f32 %v8547_v24, %v8548_v1  ;;  %v8051_v60 = vcombine.high %v15993_v22, %v15993_v22 }
 0x5d9   : > { %v8879_v14 = vsel %vm5299_vm6, %v8878_v33, %v8877_v46  ;;  %v8537_v55 = vmax.f32 %v8535_v54, %v8536_v31  ;;  %v8058_v29 = vrot.slane %v15993_v22, %v16744_v18  ;;  %v16025_v56 = vrot.slane %v8931_v52, 4 }
 0x5da   : > { %v8881_v48 = vsel %vm5302_vm7, %v8880_v2, %v8879_v14  ;;  %v8543_v58 = vrot.slane %v8542_v21, 1  ;;  %v8550_v17 = vrot.slane %v8549_v32, 1  ;;  %v8604_v7 = vmax.f32 %v15895_v41, %v8530_v37 }
 0x5db   : > { %v8899_v34 = vpack.c.b16 %v8881_v48, %v8881_v48  ;;  %v8605_v4 = vmax.f32 %v15909_v40, %v8537_v55  ;;  %v8065_v42 = vrot.slane %v8051_v60, %v16744_v18  ;;  %v8066_v11 = vcombine.high %v8058_v29, %v8058_v29  ;;  %v16046_v48 = vld [vmem:[#allocation3 + $0x4] sm:$0xf] }
 0x5dc   : > { %v8544_v43 = vmax.f32 %v8542_v21, %v8543_v58  ;;  %v8551_v53 = vmax.f32 %v8549_v32, %v8550_v17  ;;  %v8642_v22 = vadd.f32 %v16011_v45, %v8604_v7  ;;  %v8552_v52 = vsel %vm2462_vm1, %v8058_v29, -inf }
 0x5dd   : > { %v8917_v0 = vsel %vm13427_vm11, %v8899_v34, %v8916_v38  ;;  %v8643_v47 = vadd.f32 %v16011_v45, %v8605_v4  ;;  %v8067_v16 = vcombine.high %v8065_v42, %v8065_v42  ;;  %v8553_v12 = vrot.slane %v8552_v52, 4 }
 0x5de   : > { %8918 = vst [vmem:[#allocation3 + $0x18] sm:$0xf] %v8917_v0  ;;  %v8606_v41 = vmax.f32 %v15911_v61, %v8544_v43  ;;  %v8607_v40 = vmax.f32 %v15917_v51, %v8551_v53  ;;  %v8674_v8 = vmax.f32 %v8642_v22, 0.0  ;;  %v8559_v6 = vsel %vm2462_vm1, %v8066_v11, -inf  ;;  %v8928_v0 = vld [vmem:[#allocation3 + $0x8] sm:$0x1] }
 0x5df   : > { %v8675_v9 = vmax.f32 %v8643_v47, 0.0  ;;  %v8554_v27 = vmax.f32 %v8552_v52, %v8553_v12  ;;  %v8560_v28 = vrot.slane %v8559_v6, 4  ;;  %v8566_v19 = vsel %vm2462_vm1, %v8065_v42, -inf }
 0x5e0   : > { %v8644_v25 = vadd.f32 %v16011_v45, %v8606_v41  ;;  %v8645_v35 = vadd.f32 %v16011_v45, %v8607_v40  ;;  %v11865_v26 = vpack.c.bf16 %v8674_v8, %v8674_v8  ;;  %v8567_v3 = vrot.slane %v8566_v19, 4 }
 0x5e1   : > { %v11866_v44 = vpack.c.bf16 %v8675_v9, %v8675_v9  ;;  %v8555_v49 = vrot.slane %v8554_v27, 2  ;;  %v8561_v20 = vmax.f32 %v8559_v6, %v8560_v28  ;;  %v8573_v61 = vsel %vm2462_vm1, %v8067_v16, -inf }
 0x5e2   : > { %v8676_v51 = vmax.f32 %v8644_v25, 0.0  ;;  %v8677_v5 = vmax.f32 %v8645_v35, 0.0  ;;  %v8834_v24 = vunpack.c.l.b16 %v11865_v26  ;;  %v8568_v39 = vmax.f32 %v8566_v19, %v8567_v3 }
 0x5e3   : > { %v8835_v62 = vunpack.c.l.b16 %v11866_v44  ;;  %v8556_v54 = vmax.f32 %v8554_v27, %v8555_v49  ;;  %v8562_v46 = vrot.slane %v8561_v20, 2  ;;  %v8574_v36 = vrot.slane %v8573_v61, 4 }
 0x5e4   : > { %v11867_v63 = vpack.c.bf16 %v8676_v51, %v8676_v51  ;;  %v11868_v1 = vpack.c.bf16 %v8677_v5, %v8677_v5  ;;  %v8882_v33 = vrot.slane %v8834_v24, 7  ;;  %v8569_v2 = vrot.slane %v8568_v39, 2 }
 0x5e5   : > { %v8884_v31 = vrot.slane %v8835_v62, 6  ;;  %v8557_v37 = vrot.slane %v8556_v54, 1  ;;  %v8563_v21 = vmax.f32 %v8561_v20, %v8562_v46  ;;  %v8575_v32 = vmax.f32 %v8573_v61, %v8574_v36 }
 0x5e6   : > { %v8836_v60 = vunpack.c.l.b16 %v11867_v63  ;;  %v8837_v14 = vunpack.c.l.b16 %v11868_v1  ;;  %v8883_v55 = vsel %vm5305_vm8, %v8882_v33, %v8833_v57  ;;  %v8570_v29 = vmax.f32 %v8568_v39, %v8569_v2 }
 0x5e7   : > { %v8885_v38 = vsel %vm5287_vm2, %v8884_v31, %v8883_v55  ;;  %v8558_v58 = vmax.f32 %v8556_v54, %v8557_v37  ;;  %v8564_v17 = vrot.slane %v8563_v21, 1  ;;  %v8576_v7 = vrot.slane %v8575_v32, 2  ;;  %v16070_v37 = vld [vmem:[#allocation3 + $0x10] sm:$0xf] }
 0x5e8   : > { %v8886_v34 = vrot.slane %v8836_v60, 5  ;;  %v8888_v4 = vrot.slane %v8837_v14, 4  ;;  %v8571_v42 = vrot.slane %v8570_v29, 1  ;;  %v8934_v11 = vshll.u32 %v15963_v50, 16  ;;  %v12741_v60 = vld [vmem:[%s16636_s5 + $0x138] sm:$0xff]  }
 0x5e9   : > { %v8565_v43 = vmax.f32 %v8563_v21, %v8564_v17  ;;  %v8577_v53 = vmax.f32 %v8575_v32, %v8576_v7  ;;  %v8608_v22 = vmax.f32 %v15935_v59, %v8558_v58  ;;  %v8940_v23 = vshll.u32 %v16046_v48, 16  ;;  %v8920_v21 = vld [vmem:[#allocation3 + $0x20] sm:$0x1]  ;;  %v8978_v14 = vld [vmem:[#allocation3] sm:$0xe]  ;;  %v12743_v58 = vld [vmem:[%s16636_s5 + $0x170] sm:$0xff]  }
 0x5ea   : > { %v8887_v57 = vsel %vm5290_vm3, %v8886_v34, %v8885_v38  ;;  %v8572_v52 = vmax.f32 %v8570_v29, %v8571_v42  ;;  %v8936_v47 = vrot.slane %v8934_v11, 5  ;;  %v8944_v16 = vshrl.u32 %v16046_v48, 16  ;;  %v9000_v17 = vld [vmem:[#allocation3 + $0xc] sm:$0xf]  ;;  %v16082_v34 = vld [vmem:[#allocation3 + $0x10] sm:$0xf] }
 0x5eb   : > { %v8578_v12 = vrot.slane %v8577_v53, 1  ;;  %v8609_v41 = vmax.f32 %v15941_v10, %v8565_v43  ;;  %v8646_v40 = vadd.f32 %v16011_v45, %v8608_v22  ;;  %v8889_v8 = vsel %vm5293_vm4, %v8888_v4, %v8887_v57  ;;  %v12794_v11 = vld [vmem:[%s16638_s7 + $0xb8] sm:$0xff]  }
 0x5ec   : > { %v8610_v6 = vmax.f32 %v15937_v13, %v8572_v52  ;;  %v8937_v59 = vor.u32 %v8936_v47, %v16025_v56  ;;  %v8942_v9 = vrot.slane %v8940_v23, 5  ;;  %v8946_v27 = vrot.slane %v8944_v16, 4  ;;  %v12745_v23 = vld [vmem:[%s16636_s5 + $0x130] sm:$0xff]   ;;  %v12747_v47 = vld [vmem:[%s16636_s5 + $0x168] sm:$0xff]  }
 0x5ed   : > { %v8579_v28 = vmax.f32 %v8577_v53, %v8578_v12  ;;  %v8647_v19 = vadd.f32 %v16011_v45, %v8609_v41  ;;  %v8678_v25 = vmax.f32 %v8646_v40, 0.0  ;;  %v8950_v35 = vshll.u32 %v8928_v0, 16  ;;  %v12763_v40 = vld [vmem:[%s16636_s5 + $0x1b8] sm:$0xff]  }
 0x5ee   : > { %v8648_v26 = vadd.f32 %v16011_v45, %v8610_v6  ;;  %v8938_v3 = vrot.slane %v8937_v59, 4  ;;  %v8947_v44 = vor.u32 %v8946_v27, %v8942_v9  ;;  %v8988_v10 = vrot.slane %v16046_v48, 5 }
 0x5ef   : > { %v8611_v49 = vmax.f32 %v15943_v30, %v8579_v28  ;;  %v8679_v20 = vmax.f32 %v8647_v19, 0.0  ;;  %v11869_v61 = vpack.c.bf16 %v8678_v25, %v8678_v25  ;;  %v8952_v13 = vrot.slane %v8950_v35, 5  ;;  %v12766_v28 = vld [vmem:[%s16636_s5 + $0x1f0] sm:$0xff]  }
 0x5f0   : > { %v8680_v51 = vmax.f32 %v8648_v26, 0.0  ;;  %v8948_v56 = vrot.slane %v8947_v44, 4  ;;  %v8943_v54 = vsel %vm14014_vm9, %v8938_v3, %v8942_v9  ;;  %v8990_v63 = vrot.slane %v8988_v10, 4  ;;  %v16106_v9 = vld [vmem:[#allocation3 + $0x14] sm:$0x1]  ;;  %v12751_v3 = vld [vmem:[%s16636_s5 + $0x160] sm:$0xff]  }
 0x5f1   : > { %v8649_v5 = vadd.f32 %v16011_v45, %v8611_v49  ;;  %v11870_v24 = vpack.c.bf16 %v8679_v20, %v8679_v20  ;;  %v8838_v39 = vunpack.c.l.b16 %v11869_v61  ;;  %v8991_v1 = vrot.slane %v8928_v0, 5  ;;  %v12749_v26 = vld [vmem:[%s16636_s5 + $0x128] sm:$0xff]   ;;  %v12767_v61 = vld [vmem:[%s16636_s5 + $0x1b0] sm:$0xff]  }
 0x5f2   : > { %v11871_v46 = vpack.c.bf16 %v8680_v51, %v8680_v51  ;;  %v8953_v36 = vsel %vm14014_vm9, %v8948_v56, %v8952_v13  ;;  %v11542_v31 = vcombine.low %v15963_v50, %v16046_v48  ;;  %v16079_v50 = vld [vmem:[#allocation3 + $0xc] sm:$0xf]  ;;  %v11548_v7 = vcombine.low %v9000_v17, %v16070_v37  ;;  %v12769_v13 = vld [vmem:[%s16636_s5 + $0x1e8] sm:$0xff]  }
 0x5f3   : > { %v8681_v33 = vmax.f32 %v8649_v5, 0.0  ;;  %v8839_v30 = vunpack.c.l.b16 %v11870_v24  ;;  %v8890_v2 = vrot.slane %v8838_v39, 3  ;;  %v11544_v32 = vcombine.low %v8943_v54, %v8953_v36  ;;  %v9004_v24 = vld [vmem:[#allocation3 + $0x14] sm:$0x1]  ;;  %v12753_v36 = vld [vmem:[%s16636_s5 + $0x120] sm:$0xff]  }
 0x5f4   : > { %v8840_v45 = vunpack.c.l.b16 %v11871_v46  ;;  %v8992_v43 = vsel %vm14137_vm13, %v8990_v63, %v8991_v1  ;;  %v11536_v53 = vrot.slane %v8978_v14, 9  ;;  %v9007_v57 = vshrl.u32 %v9000_v17, 16  ;;  %9888 = vmatprep.mubr.bf16.mxu0 %v11548_v7  ;;  %v9054_v46 = vld [vmem:[#allocation3 + $0xc] sm:$0xe]  ;;  %v12755_v63 = vld [vmem:[%s16636_s5 + $0x158] sm:$0xff]  }
 0x5f5   : > { %v8891_v55 = vsel %vm5296_vm5, %v8890_v2, %v8889_v8  ;;  %v8892_v29 = vrot.slane %v8839_v30, 2  ;;  %v11874_v38 = vpack.c.bf16 %v8681_v33, %v8681_v33  ;;  %9839 = vmatprep.mubr.bf16.mxu1 %v11544_v32  ;;  %v9010_v52 = vshll.u32 %v9000_v17, 16  ;;  %v8979_v33 = vld [vmem:[#allocation3 + $0xc] sm:$0xe] }
 0x5f6   : > { %v8894_v48 = vrot.slane %v8840_v45, 1  ;;  %9840 = vmatmul.mubr.bf16.vlgmr.msra.gmra.mxu1 %v11542_v31  ;;  %v8955_v0 = vshrl.u32 %v16079_v50, 16  ;;  %v8989_v16 = vsel %vm14137_vm13, %v11536_v53, %v8988_v10  ;;  %v8958_v12 = vshll.u32 %v16079_v50, 16 }
 0x5f7   : > { %v8893_v4 = vsel %vm5299_vm6, %v8892_v29, %v8891_v55  ;;  %v8921_v42 = vsel %vm13535_vm14, %v11874_v38, %v8920_v21  ;;  %12238 = vmatpush3.bf16.msra.mxu1 %v12741_v60  ;;  %v8964_v41 = vshll.u32 %v16082_v34, 16  ;;  %v9016_v8 = vshll.u32 %v16070_v37, 16  ;;  %v12772_v21 = vld [vmem:[%s16636_s5 + $0x1e0] sm:$0xff]   ;;  %v16141_v55 = vld [vmem:[#allocation3 + $0x18] sm:$0xf] }
 0x5f8   : > { %v8895_v22 = vsel %vm5302_vm7, %v8894_v48, %v8893_v4  ;;  %8922 = vst [vmem:[#allocation3 + $0x20] sm:$0x1] %v8921_v42  ;;  %12239 = vmatprep.subr.bf16.mxu1 %v12743_v58  ;;  %v9020_v6 = vshrl.u32 %v16070_v37, 16  ;;  %v11546_v59 = vcombine.low %v8989_v16, %v8992_v43  ;;  %v8957_v27 = vrot.slane %v8955_v0, 4  ;;  %v12756_v4 = vld [vmem:[%s16636_s5 + $0x118] sm:$0xff]  }
 0x5f9   : > { %v8900_v15 = vpack.c.b16 %v8895_v22, %v8895_v22  ;;  %v8960_v19 = vrot.slane %v8958_v12, 5  ;;  %v8966_v25 = vrot.slane %v8964_v41, 5  ;;  %v8968_v35 = vshrl.u32 %v16082_v34, 16 }
 0x5fa   : > { %9889 = vmatmul.mubr.bf16.vlgmr.msra.gmra.mxu0 %v11546_v59  ;;  %v9009_v44 = vrot.slane %v9007_v57, 4  ;;  %v8974_v20 = vshll.u32 %v16106_v9, 16  ;;  %v9012_v51 = vrot.slane %v9010_v52, 5  ;;  %v16125_v56 = vrot.slane %v9016_v8, 5  ;;  %v12757_v57 = vld [vmem:[%s16636_s5 + $0x150] sm:$0xff]  }
 0x5fb   : > { %8919 = vst [vmem:[#allocation3 + $0x1c] sm:$0xf] %v8900_v15  ;;  %12240 = vmatpush3.bf16.msra.mxu1 %v12745_v23  ;;  %v8961_v10 = vor.u32 %v8960_v19, %v8957_v27  ;;  %v8970_v49 = vrot.slane %v8968_v35, 4  ;;  %12266 = vmatpush3.bf16.msra.mxu0 %v12763_v40  ;;  %v9022_v5 = vrot.slane %v9020_v6, 4  ;;  %v9064_v39 = vrot.slane %v16070_v37, 5  ;;  %v12770_v37 = vld [vmem:[%s16636_s5 + $0x1a8] sm:$0xff]  }
 0x5fc   : > { %12241 = vmatprep.subr.bf16.mxu1 %v12747_v47  ;;  %12267 = vmatprep.subr.bf16.mxu0 %v12766_v28  ;;  %v8976_v31 = vrot.slane %v8974_v20, 5  ;;  %v9067_v45 = vrot.slane %v9004_v24, 5  ;;  %v9013_v32 = vor.u32 %v9012_v51, %v9009_v44  ;;  %v11538_v14 = vrot.slane %v9054_v46, 9  ;;  %v16158_v23 = vld [vmem:[#allocation3 + $0x18] sm:$0xf]  ;;  %v12773_v15 = vld [vmem:[%s16636_s5 + $0x1a0] sm:$0xff]  }
 0x5fd   : > { %v8971_v54 = vor.u32 %v8970_v49, %v8966_v25  ;;  %v9066_v1 = vrot.slane %v9064_v39, 4  ;;  %v8962_v30 = vrot.slane %v8961_v10, 4  ;;  %v9023_v60 = vor.u32 %v9022_v5, %v16125_v56  ;;  %v12758_v8 = vld [vmem:[%s16636_s5 + $0x110] sm:$0xff]   ;;  %v12759_v6 = vld [vmem:[%s16636_s5 + $0x148] sm:$0xff]  }
 0x5fe   : > { %v8995_v38 = vrot.slane %v16082_v34, 5  ;;  %v8998_v42 = vrot.slane %v16106_v9, 5  ;;  %v9026_v53 = vshll.u32 %v9004_v24, 16  ;;  %v11543_v52 = vcombine.low %v16079_v50, %v16082_v34  ;;  %v12775_v50 = vld [vmem:[%s16636_s5 + $0x1d8] sm:$0xff]   ;;  %v12778_v51 = vld [vmem:[%s16636_s5 + $0x1d0] sm:$0xff]  }
 0x5ff   : > { %12242 = vmatpush3.bf16.msra.mxu1 %v12749_v26  ;;  %v8972_v2 = vrot.slane %v8971_v54, 4  ;;  %12268 = vmatpush3.bf16.msra.mxu0 %v12767_v61  ;;  %v8967_v58 = vsel %vm14014_vm9, %v8962_v30, %v8966_v25  ;;  %v9068_v48 = vsel %vm14137_vm13, %v9066_v1, %v9067_v45  ;;  %v9065_v0 = vsel %vm14137_vm13, %v11538_v14, %v9064_v39  ;;  %v12776_v25 = vld [vmem:[%s16636_s5 + $0x198] sm:$0xff]   ;;  %v9055_v26 = vld [vmem:[#allocation3 + $0x18] sm:$0xe]  ;;  %v12761_v30 = vld [vmem:[%s16636_s5 + $0x108] sm:$0xff]  }
 0x600   : > { %12243 = vmatprep.subr.bf16.mxu1 %v12751_v3  ;;  %12269 = vmatprep.subr.bf16.mxu0 %v12769_v13  ;;  %v8997_v22 = vrot.slane %v8995_v38, 4  ;;  %v11537_v47 = vrot.slane %v8979_v33, 9  ;;  %v16172_v12 = vrot.slane %v9013_v32, 4  ;;  %v16174_v41 = vrot.slane %v9023_v60, 4  ;;  %v16202_v61 = vld [vmem:[#allocation3 + $0x20] sm:$0x1] }
 0x601   : > { %v8977_v17 = vsel %vm14014_vm9, %v8972_v2, %v8976_v31  ;;  %v11552_v40 = vcombine.low %v9065_v0, %v9068_v48  ;;  %v9084_v28 = vshrl.u32 %v16158_v23, 16  ;;  %v16192_v19 = vrot.slane %v9026_v53, 5  ;;  %v16208_v54 = vld [vmem:[#allocation3 + $0x24] sm:$0xf]  ;;  %v12779_v32 = vld [vmem:[%s16636_s5 + $0x190] sm:$0xff]  }
 0x602   : > { %v16143_v29 = vld [vmem:[#allocation3 + $0x1c] sm:$0xf]  ;;  %v11545_v43 = vcombine.low %v8967_v58, %v8977_v17  ;;  %v8999_v34 = vsel %vm14137_vm13, %v8997_v22, %v8998_v42  ;;  %v8996_v9 = vsel %vm14137_vm13, %v11537_v47, %v8995_v38  ;;  %v9087_v3 = vshll.u32 %v16158_v23, 16  ;;  %v12782_v38 = vld [vmem:[%s16636_s5 + $0x1c8] sm:$0xff]  }
 0x603   : > { %v11549_v7 = vcombine.low %v16141_v55, %v16143_v29  ;;  %12244 = vmatpush3.bf16.msra.mxu1 %v12753_v36  ;;  %12270 = vmatpush3.bf16.msra.mxu0 %v12770_v37  ;;  %v16170_v16 = vld [vmem:[#allocation3 + $0x1c] sm:$0xf]  ;;  %v9044_v59 = vshrl.u32 %v16143_v29, 16  ;;  %v9040_v27 = vshll.u32 %v16143_v29, 16  ;;  %v11547_v35 = vcombine.low %v8996_v9, %v8999_v34  ;;  %v16226_v37 = vld [vmem:[#allocation3 + $0x28] sm:$0xf] }
 0x604   : > { %12245 = vmatprep.subr.bf16.mxu1 %v12755_v63  ;;  %9847 = vmatprep.mubr.bf16.mxu1 %v11545_v43  ;;  %v9093_v44 = vshll.u32 %v16170_v16, 16  ;;  %v9031_v10 = vshrl.u32 %v16141_v55, 16  ;;  %v9034_v49 = vshll.u32 %v16141_v55, 16  ;;  %v9071_v20 = vrot.slane %v16143_v29, 5  ;;  %v16218_v63 = vld [vmem:[#allocation3 + $0x20] sm:$0x1] }
 0x605   : > { %12271 = vmatprep.subr.bf16.mxu0 %v12772_v21  ;;  %9848 = vmatmul.mubr.bf16.gmra.mxu1 %v11543_v52  ;;  %v9086_v13 = vrot.slane %v9084_v28, 4  ;;  %v9089_v5 = vrot.slane %v9087_v3, 5  ;;  %v9097_v39 = vshrl.u32 %v16170_v16, 16  ;;  %v9019_v46 = vsel %vm14014_vm9, %v16172_v12, %v16125_v56  ;;  %v12764_v21 = vld [vmem:[%s16636_s5 + $0x140] sm:$0xff]   ;;  %v12768_v12 = vld [vmem:[%s16636_s5 + $0x238] sm:$0xff]  }
 0x606   : > { %9896 = vmatprep.mubr.bf16.mxu0 %v11549_v7  ;;  %9937 = vmatprep.mubr.bf16.mxu1 %v11552_v40  ;;  %v9095_v24 = vrot.slane %v9093_v44, 5  ;;  %v9029_v36 = vsel %vm14014_vm9, %v16174_v41, %v16192_v19  ;;  %v16220_v1 = vrot.slane %v9040_v27, 5  ;;  %v9046_v33 = vrot.slane %v9044_v59, 4  ;;  %v16241_v7 = vld [vmem:[#allocation3 + $0x2c] sm:$0x1]  ;;  %v12783_v41 = vld [vmem:[%s16636_s5 + $0x188] sm:$0xff]  }
 0x607   : > { %12246 = vmatpush3.bf16.msra.mxu1 %v12756_v4  ;;  %12272 = vmatpush3.bf16.msra.mxu0 %v12773_v15  ;;  %v11539_v2 = vrot.slane %v9055_v26, 9  ;;  %v9090_v31 = vor.u32 %v9089_v5, %v9086_v13  ;;  %v9099_v45 = vrot.slane %v9097_v39, 4  ;;  %v9103_v56 = vshll.u32 %v16202_v61, 16  ;;  %v12771_v13 = vld [vmem:[%s16636_s5 + $0x230] sm:$0xff]  }
 0x608   : > { %12247 = vmatprep.subr.bf16.mxu1 %v12757_v57  ;;  %12273 = vmatprep.subr.bf16.mxu0 %v12775_v50  ;;  %v9033_v60 = vrot.slane %v9031_v10, 4  ;;  %v9036_v14 = vrot.slane %v9034_v49, 5  ;;  %v9073_v55 = vrot.slane %v9071_v20, 4  ;;  %v9108_v29 = vshrl.u32 %v16208_v54, 16  ;;  %v12765_v57 = vld [vmem:[%s16636_s5 + $0x100] sm:$0xff]  }
 0x609   : > { %9897 = vmatmul.mubr.bf16.gmra.mxu0 %v11547_v35  ;;  %v9072_v58 = vsel %vm14137_vm13, %v11539_v2, %v9071_v20  ;;  %v9074_v17 = vrot.slane %v16218_v63, 5  ;;  %v9100_v48 = vor.u32 %v9099_v45, %v9095_v24  ;;  %v9111_v4 = vshll.u32 %v16208_v54, 16  ;;  %v12774_v2 = vld [vmem:[%s16636_s5 + $0x228] sm:$0xff]  }
 0x60a   : > { %v9047_v42 = vor.u32 %v9046_v33, %v16220_v1  ;;  %v9110_v43 = vrot.slane %v9108_v29, 4  ;;  %v9117_v53 = vshll.u32 %v16226_v37, 16  ;;  %v9121_v22 = vshrl.u32 %v16226_v37, 16 }
 0x60b   : > { %12248 = vmatpush3.bf16.msra.mxu1 %v12758_v8  ;;  %12274 = vmatpush3.bf16.msra.mxu0 %v12776_v25  ;;  %v9091_v52 = vrot.slane %v9090_v31, 4  ;;  %v9101_v0 = vrot.slane %v9100_v48, 4  ;;  %v9105_v15 = vrot.slane %v9103_v56, 5  ;;  %v9113_v47 = vrot.slane %v9111_v4, 5  ;;  %v12789_v4 = vld [vmem:[%s16636_s5 + $0x200] sm:$0xff]  }
 0x60c   : > { %12249 = vmatprep.subr.bf16.mxu1 %v12759_v6  ;;  %12275 = vmatprep.subr.bf16.mxu0 %v12778_v51  ;;  %v9075_v40 = vsel %vm14137_vm13, %v9073_v55, %v9074_v17  ;;  %v9119_v50 = vrot.slane %v9117_v53, 5  ;;  %v9123_v34 = vrot.slane %v9121_v22, 4  ;;  %v9127_v8 = vshll.u32 %v16241_v7, 16  ;;  %v12785_v6 = vld [vmem:[%s16636_s5 + $0x1c0] sm:$0xff]   ;;  %v12792_v53 = vld [vmem:[%s16638_s7 + $0x38] sm:$0xff]  }
 0x60d   : > { %v9050_v59 = vshll.u32 %v16218_v63, 16  ;;  %v9096_v9 = vsel %vm14014_vm9, %v9091_v52, %v9095_v24  ;;  %v9106_v27 = vsel %vm14014_vm9, %v9101_v0, %v9105_v15  ;;  %v9114_v28 = vor.u32 %v9113_v47, %v9110_v43  ;;  %v12786_v51 = vld [vmem:[%s16636_s5 + $0x180] sm:$0xff]   ;;  %v12793_v22 = vld [vmem:[%s16638_s7 + $0xf8] sm:$0xff]   ;;  %v12796_v52 = vld [vmem:[%s16638_s7 + $0x30] sm:$0xff]  }
 0x60e   : > { %v11556_v19 = vcombine.low %v9096_v9, %v9106_v27  ;;  %v9141_v25 = vrot.slane %v16170_v16, 5  ;;  %v9124_v35 = vor.u32 %v9123_v34, %v9119_v50  ;;  %v9129_v26 = vrot.slane %v9127_v8, 5  ;;  %v12797_v0 = vld [vmem:[%s16638_s7 + $0xf0] sm:$0xff]   ;;  %v12799_v47 = vld [vmem:[%s16638_s7 + $0x68] sm:$0xff]   ;;  %v12804_v34 = vld [vmem:[%s16638_s7 + $0x20] sm:$0xff]  }
 0x60f   : > { %12250 = vmatpush3.bf16.msra.mxu1 %v12761_v30  ;;  %12276 = vmatpush3.bf16.msra.mxu0 %v12779_v32  ;;  %v11553_v3 = vcombine.low %v9072_v58, %v9075_v40  ;;  %v9037_v44 = vor.u32 %v9036_v14, %v9033_v60  ;;  %v9048_v10 = vrot.slane %v9047_v42, 4  ;;  %v9115_v49 = vrot.slane %v9114_v28, 4  ;;  %v9131_v30 = vld [vmem:[#allocation3 + $0x18] sm:$0xe]  ;;  %v12802_v40 = vld [vmem:[%s16638_s7 + $0xa8] sm:$0xff]   ;;  %v12805_v8 = vld [vmem:[%s16638_s7 + $0xe0] sm:$0xff]  }
 0x610   : > { %12251 = vmatprep.subr.bf16.mxu1 %v12764_v21  ;;  %12277 = vmatprep.subr.bf16.mxu0 %v12782_v38  ;;  %v11550_v20 = vcombine.low %v9019_v46, %v9029_v36  ;;  %v9125_v5 = vrot.slane %v9124_v35, 4  ;;  %v9052_v24 = vrot.slane %v9050_v59, 5  ;;  %v9143_v63 = vrot.slane %v9141_v25, 4  ;;  %v9132_v38 = vld [vmem:[#allocation3 + $0x24] sm:$0xe]  ;;  %v12798_v15 = vld [vmem:[%s16638_s7 + $0xb0] sm:$0xff]  }
 0x611   : > { %9986 = vmatprep.mubr.bf16.mxu0 %v11556_v19  ;;  %v9120_v39 = vsel %vm14014_vm9, %v9115_v49, %v9119_v50  ;;  %v9038_v36 = vrot.slane %v9037_v44, 4  ;;  %v9144_v31 = vrot.slane %v16202_v61, 5  ;;  %v11554_v21 = vcombine.low %v16158_v23, %v16170_v16  ;;  %v12777_v61 = vld [vmem:[%s16636_s5 + $0x220] sm:$0xff]   ;;  %v12781_v16 = vld [vmem:[%s16636_s5 + $0x218] sm:$0xff]   ;;  %v12811_v19 = vld [vmem:[%s16638_s7 + $0x50] sm:$0xff]  }
 0x612   : > { %v9130_v46 = vsel %vm14014_vm9, %v9125_v5, %v9129_v26  ;;  %v9053_v33 = vsel %vm14014_vm9, %v9048_v10, %v9052_v24  ;;  %v11540_v60 = vrot.slane %v9131_v30, 9  ;;  %v11555_v23 = vcombine.low %v16208_v54, %v16226_v37  ;;  %v12788_v54 = vld [vmem:[%s16636_s5 + $0x208] sm:$0xff]   ;;  %v12803_v50 = vld [vmem:[%s16638_s7 + $0x60] sm:$0xff]   ;;  %v12807_v59 = vld [vmem:[%s16638_s7 + $0x58] sm:$0xff]  }
 0x613   : > { %12252 = vmatpush3.bf16.msra.mxu1 %v12765_v57  ;;  %12278 = vmatpush3.bf16.msra.mxu0 %v12783_v41  ;;  %v11557_v45 = vcombine.low %v9120_v39, %v9130_v46  ;;  %v9043_v56 = vsel %vm14014_vm9, %v9038_v36, %v16220_v1  ;;  %v9145_v14 = vsel %vm14137_vm13, %v9143_v63, %v9144_v31  ;;  %v12784_v1 = vld [vmem:[%s16636_s5 + $0x210] sm:$0xff]   ;;  %v9148_v29 = vrot.slane %v16226_v37, 5  ;;  %v12801_v41 = vld [vmem:[%s16638_s7 + $0xe8] sm:$0xff]   ;;  %v12808_v9 = vld [vmem:[%s16638_s7 + $0x18] sm:$0xff]  }
 0x614   : > { %12500 = vmatprep.subr.bf16.mxu1 %v12768_v12  ;;  %12279 = vmatprep.subr.bf16.mxu0 %v12785_v6  ;;  %v11551_v32 = vcombine.low %v9043_v56, %v9053_v33  ;;  %v9142_v55 = vsel %vm14137_vm13, %v11540_v60, %v9141_v25  ;;  %v9151_v17 = vrot.slane %v16241_v7, 5  ;;  %v11541_v48 = vrot.slane %v9132_v38, 9  ;;  %v12791_v7 = vld [vmem:[%s16638_s7 + $0x78] sm:$0xff]   ;;  %v12795_v57 = vld [vmem:[%s16638_s7 + $0x70] sm:$0xff]   ;;  %v12806_v6 = vld [vmem:[%s16638_s7 + $0xa0] sm:$0xff]  }
 0x615   : > { %v11558_v62 = vcombine.low %v9142_v55, %v9145_v14  ;;  %v9150_v58 = vrot.slane %v9148_v29, 4  ;;  %v12809_v27 = vld [vmem:[%s16638_s7 + $0xd8] sm:$0xff]   ;;  %v12812_v25 = vld [vmem:[%s16638_s7 + $0x10] sm:$0xff]   ;;  %v12816_v44 = vld [vmem:[%s16638_s7 + $0x8] sm:$0xff]  }
 0x616   : > { %9938 = vmatmul.mubr.bf16.vlgmr.msra.gmra.mxu1 %v11550_v20  ;;  %v9149_v42 = vsel %vm14137_vm13, %v11541_v48, %v9148_v29  ;;  %v12810_v28 = vld [vmem:[%s16638_s7 + $0x98] sm:$0xff]   ;;  %v12813_v35 = vld [vmem:[%s16638_s7 + $0xd0] sm:$0xff]   ;;  %v12817_v10 = vld [vmem:[%s16638_s7 + $0xc8] sm:$0xff]  }
 0x617   : > { %12501 = vmatpush3.bf16.msra.mxu1 %v12768_v12  ;;  %9945 = vmatprep.mubr.bf16.mxu1 %v11553_v3  ;;  %v9152_v37 = vsel %vm14137_vm13, %v9150_v58, %v9151_v17  ;;  %v12800_v12 = vld [vmem:[%s16638_s7 + $0x28] sm:$0xff]   ;;  %v12814_v26 = vld [vmem:[%s16638_s7 + $0x90] sm:$0xff]   ;;  %v12819_v20 = vld [vmem:[%s16638_s7 + $0x40] sm:$0xff]  }
 0x618   : > { %12502 = vmatprep.subr.bf16.mxu1 %v12771_v13  ;;  %12280 = vmatpush3.bf16.msra.mxu0 %v12786_v51  ;;  %v11559_v43 = vcombine.low %v9149_v42, %v9152_v37  ;;  %v12815_v3 = vld [vmem:[%s16638_s7 + $0x48] sm:$0xff]   ;;  %v12821_v51 = vld [vmem:[%s16638_s7 + $0xc0] sm:$0xff]   ;;  %v12823_v24 = vld [vmem:[%s16638_s7 + $0x178] sm:$0xff]  }
 0x619   : > { %12303 = vmatprep.subr.bf16.mxu0 %v12791_v7  ;;  %v12818_v49 = vld [vmem:[%s16638_s7 + $0x88] sm:$0xff]   ;;  %v12822_v5 = vld [vmem:[%s16638_s7 + $0x80] sm:$0xff]   ;;  %v12825_v39 = vld [vmem:[%s16638_s7 + $0x1f8] sm:$0xff]  }
 0x61b   : > { %12503 = vmatpush3.bf16.msra.mxu1 %v12771_v13  ;;  %9987 = vmatmul.mubr.bf16.vlgmr.msra.gmra.mxu0 %v11554_v21  ;;  %v12820_v13 = vld [vmem:[%s16638_s7] sm:$0xff]  }
 0x61c   : > { %12504 = vmatprep.subr.bf16.mxu1 %v12774_v2  ;;  %9994 = vmatprep.mubr.bf16.mxu0 %v11557_v45 }
 0x61d   : > { %12304 = vmatpush3.bf16.msra.mxu0 %v12792_v53 }
 0x61e   : > { %9946 = vmatmul.mubr.bf16.gmra.mxu1 %v11551_v32  ;;  %12305 = vmatprep.subr.bf16.mxu0 %v12795_v57 }
 0x61f   : > { %12505 = vmatpush3.bf16.msra.mxu1 %v12774_v2  ;;  %12516 = vmatprep.mubr.bf16.mxu1 %v11558_v62 }
 0x620   : > { %12506 = vmatprep.subr.bf16.mxu1 %v12777_v61 }
 0x621   : > { %12306 = vmatpush3.bf16.msra.mxu0 %v12796_v52 }
 0x622   : > { %12307 = vmatprep.subr.bf16.mxu0 %v12799_v47 }
 0x623   : > { %12507 = vmatpush3.bf16.msra.mxu1 %v12777_v61  ;;  %9995 = vmatmul.mubr.bf16.gmra.mxu0 %v11555_v23 }
 0x624   : > { %12508 = vmatprep.subr.bf16.mxu1 %v12781_v16 }
 0x625   : > { %12308 = vmatpush3.bf16.msra.mxu0 %v12800_v12 }
 0x626   : > { %12309 = vmatprep.subr.bf16.mxu0 %v12803_v50 }
 0x627   : > { %12509 = vmatpush3.bf16.msra.mxu1 %v12781_v16 }
 0x628   : > { %12510 = vmatprep.subr.bf16.mxu1 %v12784_v1 }
 0x629   : > { %12310 = vmatpush3.bf16.msra.mxu0 %v12804_v34 }
 0x62a   : > { %12311 = vmatprep.subr.bf16.mxu0 %v12807_v59 }
 0x62b   : > { %12511 = vmatpush3.bf16.msra.mxu1 %v12784_v1 }
 0x62c   : > { %12512 = vmatprep.subr.bf16.mxu1 %v12788_v54 }
 0x62d   : > { %12312 = vmatpush3.bf16.msra.mxu0 %v12808_v9 }
 0x62e   : > { %12313 = vmatprep.subr.bf16.mxu0 %v12811_v19 }
 0x62f   : > { %12513 = vmatpush3.bf16.msra.mxu1 %v12788_v54 }
 0x630   : > { %12514 = vmatprep.subr.bf16.mxu1 %v12789_v4 }
 0x631   : > { %12314 = vmatpush3.bf16.msra.mxu0 %v12812_v25 }
 0x632   : > { %12315 = vmatprep.subr.bf16.mxu0 %v12815_v3 }
 0x633   : > { %12515 = vmatpush3.bf16.msra.mxu1 %v12789_v4 }
 0x634   : > { %12325 = vmatprep.subr.bf16.mxu1 %v12793_v22 }
 0x635   : > { %12316 = vmatpush3.bf16.msra.mxu0 %v12816_v44 }
 0x636   : > { %12517 = vmatmul.mubr.bf16.vlgmr.msra.gmra.mxu1 %v11559_v43  ;;  %12317 = vmatprep.subr.bf16.mxu0 %v12819_v20 }
 0x637   : > { %12326 = vmatpush3.bf16.msra.mxu1 %v12794_v11 }
 0x638   : > { %12327 = vmatprep.subr.bf16.mxu1 %v12797_v0 }
 0x639   : > { %12318 = vmatpush3.bf16.msra.mxu0 %v12820_v13 }
 0x63a   : > { %12347 = vmatprep.subr.bf16.mxu0 %v12823_v24 }
 0x63b   : > { %12328 = vmatpush3.bf16.msra.mxu1 %v12798_v15 }
 0x63c   : > { %12329 = vmatprep.subr.bf16.mxu1 %v12801_v41 }
 0x63f   : > { %12330 = vmatpush3.bf16.msra.mxu1 %v12802_v40 }
 0x640   : > { %12331 = vmatprep.subr.bf16.mxu1 %v12805_v8 }
 0x643   : > { %12332 = vmatpush3.bf16.msra.mxu1 %v12806_v6 }
 0x644   : > { %12333 = vmatprep.subr.bf16.mxu1 %v12809_v27 }
 0x647   : > { %12334 = vmatpush3.bf16.msra.mxu1 %v12810_v28 }
 0x648   : > { %12335 = vmatprep.subr.bf16.mxu1 %v12813_v35 }
 0x64b   : > { %12336 = vmatpush3.bf16.msra.mxu1 %v12814_v26 }
 0x64c   : > { %12337 = vmatprep.subr.bf16.mxu1 %v12817_v10 }
 0x64f   : > { %12338 = vmatpush3.bf16.msra.mxu1 %v12818_v49 }
 0x650   : > { %12339 = vmatprep.subr.bf16.mxu1 %v12821_v51 }
 0x653   : > { %12340 = vmatpush3.bf16.msra.mxu1 %v12822_v5 }
 0x654   : > { %12369 = vmatprep.subr.bf16.mxu1 %v12825_v39 }
 0x6b6   : > { %v12197_v63 = vpop.f32.mrf.mxu1 }
 0x6b8   : > { %v12198_v36 = vpop.f32.mrf.mxu1 }
 0x6b9   : > { %v12199_v0 = vadd.f32 %v12198_v36, %v12197_v63 }
 0x6ba   : > { %v12225_v46 = vpop.f32.mrf.mxu0  ;;  %v12200_v30 = vpop.f32.mrf.mxu1 }
 0x6bc   : > { %v12226_v33 = vpop.f32.mrf.mxu0  ;;  %v12201_v31 = vpop.f32.mrf.mxu1 }
 0x6bd   : > { %v12227_v11 = vadd.f32 %v12226_v33, %v12225_v46  ;;  %v12202_v44 = vadd.f32 %v12201_v31, %v12200_v30 }
 0x6be   : > { %v12228_v2 = vpop.f32.mrf.mxu0 }
 0x6bf   : > { %v9891_v41 = vadd.f32 %v12227_v11, %v12199_v0 }
 0x6c0   : > { %v12229_v56 = vpop.f32.mrf.mxu0 }
 0x6c1   : > { %v12230_v19 = vadd.f32 %v12229_v56, %v12228_v2 }
 0x6c3   : > { %v9894_v36 = vadd.f32 %v12230_v19, %v12202_v44 }
 0x6c5   : > { %v12203_v45 = vpop.f32.mrf.mxu1 }
 0x6c7   : > { %v12204_v32 = vpop.f32.mrf.mxu1 }
 0x6c8   : > { %v12205_v7 = vadd.f32 %v12204_v32, %v12203_v45 }
 0x6c9   : > { %v12231_v21 = vpop.f32.mrf.mxu0  ;;  %v12206_v14 = vpop.f32.mrf.mxu1 }
 0x6cb   : > { %v12232_v60 = vpop.f32.mrf.mxu0  ;;  %v12207_v55 = vpop.f32.mrf.mxu1 }
 0x6cc   : > { %v12233_v42 = vadd.f32 %v12232_v60, %v12231_v21  ;;  %v12208_v10 = vadd.f32 %v12207_v55, %v12206_v14 }
 0x6cd   : > { %v12234_v61 = vpop.f32.mrf.mxu0 }
 0x6ce   : > { %v9899_v57 = vadd.f32 %v12233_v42, %v12205_v7 }
 0x6cf   : > { %v12235_v62 = vpop.f32.mrf.mxu0 }
 0x6d0   : > { %v12236_v27 = vadd.f32 %v12235_v62, %v12234_v61 }
 0x6d2   : > { %v9902_v24 = vadd.f32 %v12236_v27, %v12208_v10 }
 0x6d6   : > { %v12253_v23 = vpop.f32.mrf.mxu1 }
 0x6d8   : > { %v12254_v1 = vpop.f32.mrf.mxu1 }
 0x6d9   : > { %v12255_v15 = vadd.f32 %v12254_v1, %v12253_v23 }
 0x6da   : > { %v12256_v54 = vpop.f32.mrf.mxu1 }
 0x6db   : > { %v12281_v16 = vpop.f32.mrf.mxu0  ;;  %v9940_v34 = vadd.f32 %v12255_v15, %v9891_v41 }
 0x6dc   : > { %v12257_v58 = vpop.f32.mrf.mxu1 }
 0x6dd   : > { %v12282_v29 = vpop.f32.mrf.mxu0  ;;  %v12258_v20 = vadd.f32 %v12257_v58, %v12256_v54 }
 0x6de   : > { %v12259_v48 = vpop.f32.mrf.mxu1  ;;  %v12283_v40 = vadd.f32 %v12282_v29, %v12281_v16 }
 0x6df   : > { %v12284_v38 = vpop.f32.mrf.mxu0  ;;  %v9943_v21 = vadd.f32 %v12258_v20, %v9894_v36 }
 0x6e0   : > { %v12260_v37 = vpop.f32.mrf.mxu1  ;;  %v9989_v59 = vadd.f32 %v12283_v40, %v9940_v34 }
 0x6e1   : > { %v12285_v17 = vpop.f32.mrf.mxu0  ;;  %v12261_v53 = vadd.f32 %v12260_v37, %v12259_v48 }
 0x6e2   : > { %v12262_v22 = vpop.f32.mrf.mxu1  ;;  %v12286_v33 = vadd.f32 %v12285_v17, %v12284_v38 }
 0x6e3   : > { %v12287_v4 = vpop.f32.mrf.mxu0  ;;  %v9948_v47 = vadd.f32 %v12261_v53, %v9899_v57 }
 0x6e4   : > { %v12263_v12 = vpop.f32.mrf.mxu1  ;;  %v9992_v62 = vadd.f32 %v12286_v33, %v9943_v21 }
 0x6e5   : > { %v12288_v43 = vpop.f32.mrf.mxu0  ;;  %v12264_v49 = vadd.f32 %v12263_v12, %v12262_v22 }
 0x6e6   : > { %v12289_v52 = vadd.f32 %v12288_v43, %v12287_v4 }
 0x6e7   : > { %v12290_v8 = vpop.f32.mrf.mxu0  ;;  %v9951_v30 = vadd.f32 %v12264_v49, %v9902_v24 }
 0x6e8   : > { %v9997_v50 = vadd.f32 %v12289_v52, %v9948_v47 }
 0x6e9   : > { %v12291_v3 = vpop.f32.mrf.mxu0 }
 0x6ea   : > { %v12292_v46 = vadd.f32 %v12291_v3, %v12290_v8 }
 0x6ec   : > { %v10000_v61 = vadd.f32 %v12292_v46, %v9951_v30 }
 0x6f6   : > { %v12518_v6 = vpop.f32.mrf.mxu1 }
 0x6f7   : > { %v10046_v9 = vadd.f32 %v12518_v6, %v9997_v50 }
 0x6f8   : > { %v10037_v28 = vpop.f32.mrf.mxu1 }
 0x6f9   : > { %v10038_v25 = vadd.f32 %v10037_v28, %v9989_v59  ;;  %v10090_v35 = vcombine.high %v10046_v9, %v10046_v9  ;;  %v10097_v26 = vrot.slane %v10046_v9, %v16744_v18 }
 0x6fa   : > { %v12519_v63 = vpop.f32.mrf.mxu1 }
 0x6fb   : > { %v10056_v13 = vcombine.high %v10038_v25, %v10038_v25  ;;  %v10063_v51 = vrot.slane %v10038_v25, %v16744_v18  ;;  %v10104_v5 = vrot.slane %v10090_v35, %v16744_v18  ;;  %v10196_v39 = vsel %vm2462_vm1, %v10097_v26, -inf }
 0x6fc   : > { %v10197_v56 = vrot.slane %v10196_v39, 4  ;;  %v10040_v14 = vpop.f32.mrf.mxu1  ;;  %v10105_v17 = vcombine.high %v10097_v26, %v10097_v26  ;;  %v10049_v48 = vadd.f32 %v12519_v63, %v10000_v61 }
 0x6fd   : > { %v10070_v2 = vrot.slane %v10056_v13, %v16744_v18  ;;  %v10140_v45 = vsel %vm2462_vm1, %v10063_v51, -inf  ;;  %v10071_v31 = vcombine.high %v10063_v51, %v10063_v51  ;;  %v10210_v60 = vsel %vm2462_vm1, %v10104_v5, -inf }
 0x6fe   : > { %v10141_v32 = vrot.slane %v10140_v45, 4  ;;  %v10198_v1 = vmax.f32 %v10196_v39, %v10197_v56  ;;  %v10211_v29 = vrot.slane %v10210_v60, 4  ;;  %v10041_v38 = vadd.f32 %v10040_v14, %v9992_v62 }
 0x6ff   : > { %v10154_v55 = vsel %vm2462_vm1, %v10070_v2, -inf  ;;  %v10072_v23 = vcombine.high %v10070_v2, %v10070_v2  ;;  %v10147_v16 = vsel %vm2462_vm1, %v10071_v31, -inf  ;;  %v10203_v0 = vsel %vm2462_vm1, %v10105_v17, -inf }
 0x700   : > { %v10142_v54 = vmax.f32 %v10140_v45, %v10141_v32  ;;  %v10155_v58 = vrot.slane %v10154_v55, 4  ;;  %v10148_v4 = vrot.slane %v10147_v16, 4  ;;  %v10073_v37 = vcombine.high %v10041_v38, %v10041_v38 }
 0x701   : > { %v16428_v42 = vrot.slane %v10041_v38, %v16744_v18  ;;  %v10161_v43 = vsel %vm2462_vm1, %v10072_v23, -inf  ;;  %v10199_v7 = vrot.slane %v10198_v1, 2  ;;  %v10212_v53 = vmax.f32 %v10210_v60, %v10211_v29 }
 0x702   : > { %v10143_v22 = vrot.slane %v10142_v54, 2  ;;  %v16432_v11 = vrot.slane %v10073_v37, %v16744_v18  ;;  %v10156_v52 = vmax.f32 %v10154_v55, %v10155_v58  ;;  %v10107_v15 = vcombine.high %v10049_v48, %v10049_v48 }
 0x703   : > { %v10088_v57 = vcombine.high %v16428_v42, %v16428_v42  ;;  %v10149_v47 = vmax.f32 %v10147_v16, %v10148_v4  ;;  %v10162_v12 = vrot.slane %v10161_v43, 4  ;;  %v10106_v41 = vcombine.high %v10104_v5, %v10104_v5 }
 0x704   : > { %v10089_v40 = vcombine.high %v16432_v11, %v16432_v11  ;;  %v10200_v50 = vmax.f32 %v10198_v1, %v10199_v7  ;;  %v10213_v34 = vrot.slane %v10212_v53, 2  ;;  %v10114_v6 = vrot.slane %v10049_v48, %v16744_v18 }
 0x705   : > { %v10175_v8 = vsel %vm2462_vm1, %v10088_v57, -inf  ;;  %v10144_v59 = vmax.f32 %v10142_v54, %v10143_v22  ;;  %v10204_v9 = vrot.slane %v10203_v0, 4  ;;  %v10157_v28 = vrot.slane %v10156_v52, 2  ;;  %v16449_v54 = vld [vmem:[%s16637_s6] ss:$0 sm:$0xff] }
 0x706   : > { %v10176_v27 = vrot.slane %v10175_v8, 4  ;;  %v10189_v19 = vsel %vm2462_vm1, %v10089_v40, -inf  ;;  %v10121_v25 = vrot.slane %v10107_v15, %v16744_v18  ;;  %v10122_v35 = vcombine.high %v10114_v6, %v10114_v6 }
 0x707   : > { %v10150_v26 = vrot.slane %v10149_v47, 2  ;;  %v10163_v3 = vmax.f32 %v10161_v43, %v10162_v12  ;;  %v10217_v44 = vsel %vm2462_vm1, %v10106_v41, -inf  ;;  %v10201_v10 = vrot.slane %v10200_v50, 1 }
 0x708   : > { %v10214_v49 = vmax.f32 %v10212_v53, %v10213_v34  ;;  %v10177_v20 = vmax.f32 %v10175_v8, %v10176_v27  ;;  %v10231_v13 = vsel %vm2462_vm1, %v10122_v35, -inf  ;;  %v10205_v51 = vmax.f32 %v10203_v0, %v10204_v9 }
 0x709   : > { %v10190_v5 = vrot.slane %v10189_v19, 4  ;;  %v10145_v24 = vrot.slane %v10144_v59, 1  ;;  %v10158_v39 = vmax.f32 %v10156_v52, %v10157_v28  ;;  %v10123_v63 = vcombine.high %v10121_v25, %v10121_v25 }
 0x70a   : > { %v10232_v46 = vrot.slane %v10231_v13, 4  ;;  %v10151_v36 = vmax.f32 %v10149_v47, %v10150_v26  ;;  %v10164_v33 = vrot.slane %v10163_v3, 2  ;;  %v10218_v2 = vrot.slane %v10217_v44, 4 }
 0x70b   : > { %v10202_v18 = vmax.f32 %v10200_v50, %v10201_v10  ;;  %v10215_v45 = vrot.slane %v10214_v49, 1  ;;  %v10178_v30 = vrot.slane %v10177_v20, 2  ;;  %v10191_v31 = vmax.f32 %v10189_v19, %v10190_v5 }
 0x70c   : > { %v10206_v56 = vrot.slane %v10205_v51, 2  ;;  %v10146_v21 = vmax.f32 %v10144_v59, %v10145_v24  ;;  %v10159_v32 = vrot.slane %v10158_v39, 1  ;;  %v10233_v60 = vmax.f32 %v10231_v13, %v10232_v46  ;;  %v12824_v24 = vld [vmem:[%s16638_s7 + $0x138] sm:$0xff]  }
 0x70d   : > { %v10245_v14 = vsel %vm2462_vm1, %v10123_v63, -inf  ;;  %v10152_v61 = vrot.slane %v10151_v36, 1  ;;  %v10165_v62 = vmax.f32 %v10163_v3, %v10164_v33  ;;  %v10219_v23 = vmax.f32 %v10217_v44, %v10218_v2  ;;  %v12827_v2 = vld [vmem:[%s16638_s7 + $0x170] sm:$0xff]  }
 0x70e   : > { %v10207_v55 = vmax.f32 %v10205_v51, %v10206_v56  ;;  %v10216_v16 = vmax.f32 %v10214_v49, %v10215_v45  ;;  %v10252_v1 = vmax.f32 %v10146_v21, %v10202_v18  ;;  %v10179_v29 = vmax.f32 %v10177_v20, %v10178_v30 }
 0x70f   : > { %v10192_v38 = vrot.slane %v10191_v31, 2  ;;  %v10246_v58 = vrot.slane %v10245_v14, 4  ;;  %v10220_v48 = vrot.slane %v10219_v23, 2  ;;  %v10160_v4 = vmax.f32 %v10158_v39, %v10159_v32 }
 0x710   : > { %v10208_v17 = vrot.slane %v10207_v55, 1  ;;  %v10224_v37 = vsel %vm2462_vm1, %v10114_v6, -inf  ;;  %v10234_v43 = vrot.slane %v10233_v60, 2  ;;  %v10153_v7 = vmax.f32 %v10151_v36, %v10152_v61  ;;  %v12828_v61 = vld [vmem:[%s16638_s7 + $0x130] sm:$0xff]  }
 0x711   : > { %v10166_v22 = vrot.slane %v10165_v62, 1  ;;  %v10221_v57 = vmax.f32 %v10219_v23, %v10220_v48  ;;  %v10266_v52 = vadd.f32 %v16449_v54, %v10252_v1  ;;  %v10254_v0 = vmax.f32 %v10160_v4, %v10216_v16  ;;  %v12829_v1 = vld [vmem:[%s16638_s7 + $0x1f0] sm:$0xff]  }
 0x712   : > { %v10209_v53 = vmax.f32 %v10207_v55, %v10208_v17  ;;  %v10180_v15 = vrot.slane %v10179_v29, 1  ;;  %v10235_v47 = vmax.f32 %v10233_v60, %v10234_v43  ;;  %v10193_v40 = vmax.f32 %v10191_v31, %v10192_v38 }
 0x713   : > { %v10222_v41 = vrot.slane %v10221_v57, 1  ;;  %v10247_v50 = vmax.f32 %v10245_v14, %v10246_v58  ;;  %v10168_v34 = vsel %vm2462_vm1, %v16428_v42, -inf  ;;  %v10225_v8 = vrot.slane %v10224_v37, 4  ;;  %v12826_v14 = vld [vmem:[%s16638_s7 + $0x1b8] sm:$0xff]  }
 0x714   : > { %v10253_v12 = vmax.f32 %v10153_v7, %v10209_v53  ;;  %v10238_v6 = vsel %vm2462_vm1, %v10121_v25, -inf  ;;  %v10236_v59 = vrot.slane %v10235_v47, 1  ;;  %v10167_v27 = vmax.f32 %v10165_v62, %v10166_v22  ;;  %v12832_v7 = vld [vmem:[%s16638_s7 + $0x128] sm:$0xff]  }
 0x715   : > { %v10223_v28 = vmax.f32 %v10221_v57, %v10222_v41  ;;  %v10248_v19 = vrot.slane %v10247_v50, 2  ;;  %v10274_v35 = vmax.f32 %v10266_v52, 0.0  ;;  %v10268_v26 = vadd.f32 %v16449_v54, %v10254_v0  ;;  %v12833_v53 = vld [vmem:[%s16638_s7 + $0x1e8] sm:$0xff]   ;;  %v12835_v52 = vld [vmem:[%s16638_s7 + $0x160] sm:$0xff]  }
 0x716   : > { %v10267_v9 = vadd.f32 %v16449_v54, %v10253_v12  ;;  %v10181_v3 = vmax.f32 %v10179_v29, %v10180_v15  ;;  %v10237_v44 = vmax.f32 %v10235_v47, %v10236_v59  ;;  %v10194_v20 = vrot.slane %v10193_v40, 1  ;;  %v12831_v29 = vld [vmem:[%s16638_s7 + $0x168] sm:$0xff]   ;;  %v12836_v41 = vld [vmem:[%s16638_s7 + $0x120] sm:$0xff]  }
 0x717   : > { %v10255_v49 = vmax.f32 %v10167_v27, %v10223_v28  ;;  %v10249_v13 = vmax.f32 %v10247_v50, %v10248_v19  ;;  %v10169_v51 = vrot.slane %v10168_v34, 4  ;;  %v10182_v25 = vsel %vm2462_vm1, %v16432_v11, -inf  ;;  %v12834_v47 = vld [vmem:[%s16638_s7 + $0x1a8] sm:$0xff]   ;;  %v12838_v59 = vld [vmem:[%s16638_s7 + $0x1a0] sm:$0xff]   ;;  %v12840_v27 = vld [vmem:[%s16638_s7 + $0x118] sm:$0xff]  }
 0x718   : > { %v10275_v10 = vmax.f32 %v10267_v9, 0.0  ;;  %v10257_v42 = vmax.f32 %v10181_v3, %v10237_v44  ;;  %v10239_v46 = vrot.slane %v10238_v6, 4  ;;  %v10282_v36 = vpack.c.bf16 %v10274_v35, %v10274_v35  ;;  %v12841_v28 = vld [vmem:[%s16638_s7 + $0x1d8] sm:$0xff]   ;;  %v12843_v35 = vld [vmem:[%s16638_s7 + $0x150] sm:$0xff]  }
 0x719   : > { %v10269_v39 = vadd.f32 %v16449_v54, %v10255_v49  ;;  %v10250_v63 = vrot.slane %v10249_v13, 1  ;;  %v10276_v33 = vmax.f32 %v10268_v26, 0.0  ;;  %v10226_v45 = vmax.f32 %v10224_v37, %v10225_v8  ;;  %v12830_v37 = vld [vmem:[%s16638_s7 + $0x1b0] sm:$0xff]   ;;  %v12842_v44 = vld [vmem:[%s16638_s7 + $0x198] sm:$0xff]  }
 0x71a   : > { %v10283_v5 = vpack.c.bf16 %v10275_v10, %v10275_v10  ;;  %v10271_v18 = vadd.f32 %v16449_v54, %v10257_v42  ;;  %v10195_v30 = vmax.f32 %v10193_v40, %v10194_v20  ;;  %v10183_v56 = vrot.slane %v10182_v25, 4  ;;  %v12837_v40 = vld [vmem:[%s16638_s7 + $0x1e0] sm:$0xff]   ;;  %v12844_v49 = vld [vmem:[%s16638_s7 + $0x110] sm:$0xff]  }
 0x71b   : > { %v10277_v11 = vmax.f32 %v10269_v39, 0.0  ;;  %v10251_v31 = vmax.f32 %v10249_v13, %v10250_v63  ;;  %v10170_v32 = vmax.f32 %v10168_v34, %v10169_v51  ;;  %v10240_v62 = vmax.f32 %v10238_v6, %v10239_v46  ;;  %v12839_v34 = vld [vmem:[%s16638_s7 + $0x158] sm:$0xff]   ;;  %v12845_v20 = vld [vmem:[%s16638_s7 + $0x1d0] sm:$0xff]   ;;  %v12847_v13 = vld [vmem:[%s16638_s7 + $0x148] sm:$0xff]  }
 0x71c   : > { %10835 = vmatprep.mubr.bf16.mxu0 %v10283_v5  ;;  %v10279_v21 = vmax.f32 %v10271_v18, 0.0  ;;  %v10284_v23 = vpack.c.bf16 %v10276_v33, %v10276_v33  ;;  %v10227_v38 = vrot.slane %v10226_v45, 2  ;;  %v10184_v17 = vmax.f32 %v10182_v25, %v10183_v56  ;;  %v12846_v25 = vld [vmem:[%s16638_s7 + $0x190] sm:$0xff]   ;;  %v12848_v5 = vld [vmem:[%s16638_s7 + $0x108] sm:$0xff]   ;;  %v12851_v63 = vld [vmem:[%s16638_s7 + $0x140] sm:$0xff]  }
 0x71d   : > { %10836 = vmatmul.mubr.bf16.vlgmr.msra.gmra.mxu0 %v10282_v36  ;;  %v10285_v60 = vpack.c.bf16 %v10277_v11, %v10277_v11  ;;  %v10259_v55 = vmax.f32 %v10195_v30, %v10251_v31  ;;  %v10171_v48 = vrot.slane %v10170_v32, 2  ;;  %v10241_v43 = vrot.slane %v10240_v62, 2  ;;  %v12850_v36 = vld [vmem:[%s16638_s7 + $0x188] sm:$0xff]   ;;  %v12852_v33 = vld [vmem:[%s16638_s7 + $0x100] sm:$0xff]  }
 0x71e   : > { %12348 = vmatpush3.bf16.msra.mxu0 %v12824_v24  ;;  %v10287_v16 = vpack.c.bf16 %v10279_v21, %v10279_v21  ;;  %v10228_v22 = vmax.f32 %v10226_v45, %v10227_v38  ;;  %v10185_v0 = vrot.slane %v10184_v17, 2  ;;  %v12849_v24 = vld [vmem:[%s16638_s7 + $0x1c8] sm:$0xff]   ;;  %v12854_v11 = vld [vmem:[%s16638_s7 + $0x180] sm:$0xff]   ;;  %v12855_v21 = vld [vmem:[%s16640_s9 + $0x38] sm:$0xff]   ;;  %vm12951_vm1 = vmmov 0  }
 0x71f   : > { %12349 = vmatprep.subr.bf16.mxu0 %v12827_v2  ;;  %10875 = vmatprep.mubr.bf16.mxu1 %v10285_v60  ;;  %v10273_v58 = vadd.f32 %v16449_v54, %v10259_v55  ;;  %v10172_v15 = vmax.f32 %v10170_v32, %v10171_v48  ;;  %v10242_v12 = vmax.f32 %v10240_v62, %v10241_v43  ;;  %v12853_v2 = vld [vmem:[%s16638_s7 + $0x1c0] sm:$0xff]   ;;  %v12856_v32 = vld [vmem:[%s16640_s9 + $0x30] sm:$0xff]   ;;  %v12857_v60 = vld [vmem:[%s16640_s9 + $0x28] sm:$0xff]  }
 0x720   : > { %10876 = vmatmul.mubr.bf16.vlgmr.msra.gmra.mxu1 %v10284_v23  ;;  %10915 = vmatprep.mubr.bf16.mxu0 %v10287_v16  ;;  %v10229_v50 = vrot.slane %v10228_v22, 1  ;;  %v10186_v8 = vmax.f32 %v10184_v17, %v10185_v0  ;;  %v12860_v55 = vld [vmem:[%s16640_s9 + $0x10] sm:$0xff]   ;;  %v12861_v62 = vld [vmem:[%s16640_s9 + $0x8] sm:$0xff]   ;;  %v12862_v23 = vld [vmem:[%s16640_s9] sm:$0xff]  }
 0x721   : > { %12370 = vmatpush3.bf16.msra.mxu1 %v12826_v14  ;;  %v10281_v4 = vmax.f32 %v10273_v58, 0.0  ;;  %v10173_v6 = vrot.slane %v10172_v15, 1  ;;  %v10243_v9 = vrot.slane %v10242_v12, 1  ;;  %v12858_v14 = vld [vmem:[%s16640_s9 + $0x20] sm:$0xff]  }
 0x722   : > { %12350 = vmatpush3.bf16.msra.mxu0 %v12828_v61  ;;  %12371 = vmatprep.subr.bf16.mxu1 %v12829_v1  ;;  %v10230_v19 = vmax.f32 %v10228_v22, %v10229_v50  ;;  %v10187_v26 = vrot.slane %v10186_v8, 1  ;;  %v12859_v61 = vld [vmem:[%s16640_s9 + $0x18] sm:$0xff]   ;;  %v10418_v43 = vld [vmem:[%s16639_s8] sm:$0x1] }
 0x723   : > { %12351 = vmatprep.subr.bf16.mxu0 %v12831_v29  ;;  %v10289_v57 = vpack.c.bf16 %v10281_v4, %v10281_v4  ;;  %v10174_v3 = vmax.f32 %v10172_v15, %v10173_v6  ;;  %v10244_v10 = vmax.f32 %v10242_v12, %v10243_v9 }
 0x724   : > { %v10188_v42 = vmax.f32 %v10186_v8, %v10187_v26 }
 0x725   : > { %10955 = vmatprep.mubr.bf16.mxu1 %v10289_v57  ;;  %12372 = vmatpush3.bf16.msra.mxu1 %v12830_v37  ;;  %v10256_v51 = vmax.f32 %v10174_v3, %v10230_v19 }
 0x726   : > { %12352 = vmatpush3.bf16.msra.mxu0 %v12832_v7  ;;  %12373 = vmatprep.subr.bf16.mxu1 %v12833_v53  ;;  %v10258_v39 = vmax.f32 %v10188_v42, %v10244_v10 }
 0x727   : > { %12353 = vmatprep.subr.bf16.mxu0 %v12835_v52  ;;  %v10270_v46 = vadd.f32 %v16449_v54, %v10256_v51 }
 0x728   : > { %v10272_v18 = vadd.f32 %v16449_v54, %v10258_v39  ;;  %v12950_v54 = vmov 0.0  }
 0x729   : > { %12374 = vmatpush3.bf16.msra.mxu1 %v12834_v47  ;;  %v10278_v45 = vmax.f32 %v10270_v46, 0.0 }
 0x72a   : > { %12354 = vmatpush3.bf16.msra.mxu0 %v12836_v41  ;;  %12375 = vmatprep.subr.bf16.mxu1 %v12837_v40  ;;  %v10280_v30 = vmax.f32 %v10272_v18, 0.0 }
 0x72b   : > { %12355 = vmatprep.subr.bf16.mxu0 %v12839_v34  ;;  %v10286_v31 = vpack.c.bf16 %v10278_v45, %v10278_v45 }
 0x72c   : > { %v10288_v56 = vpack.c.bf16 %v10280_v30, %v10280_v30 }
 0x72d   : > { %12376 = vmatpush3.bf16.msra.mxu1 %v12838_v59 }
 0x72e   : > { %12356 = vmatpush3.bf16.msra.mxu0 %v12840_v27  ;;  %12377 = vmatprep.subr.bf16.mxu1 %v12841_v28  ;;  %v10981_v27 = vld [vmem:[%s16641_s10] sm:$0x1] }
 0x72f   : > { %12357 = vmatprep.subr.bf16.mxu0 %v12843_v35 }
 0x731   : > { %12378 = vmatpush3.bf16.msra.mxu1 %v12842_v44 }
 0x732   : > { %12358 = vmatpush3.bf16.msra.mxu0 %v12844_v49  ;;  %12379 = vmatprep.subr.bf16.mxu1 %v12845_v20 }
 0x733   : > { %12359 = vmatprep.subr.bf16.mxu0 %v12847_v13 }
 0x735   : > { %12380 = vmatpush3.bf16.msra.mxu1 %v12846_v25 }
 0x736   : > { %12360 = vmatpush3.bf16.msra.mxu0 %v12848_v5  ;;  %12381 = vmatprep.subr.bf16.mxu1 %v12849_v24 }
 0x737   : > { %12361 = vmatprep.subr.bf16.mxu0 %v12851_v63 }
 0x739   : > { %12382 = vmatpush3.bf16.msra.mxu1 %v12850_v36 }
 0x73a   : > { %12362 = vmatpush3.bf16.msra.mxu0 %v12852_v33  ;;  %12383 = vmatprep.subr.bf16.mxu1 %v12853_v2 }
 0x73b   : > { %12520 = vmatprep.subr.bf16.mxu0 %v12950_v54 }
 0x73d   : > { %12384 = vmatpush3.bf16.msra.mxu1 %v12854_v11  ;;  %10916 = vmatmul.mubr.bf16.vlgmr.msra.gmra.mxu0 %v10286_v31 }
 0x73e   : > { %12521 = vmatpush3.bf16.msra.mxu0 %v12855_v21  ;;  %12536 = vmatprep.mubr.msk.bf16.mxu0 %vm12951_vm1, %v12950_v54 }
 0x73f   : > { %12522 = vmatprep.subr.bf16.mxu0 %v12950_v54 }
 0x740   : > { %10956 = vmatmul.mubr.bf16.vlgmr.msra.gmra.mxu1 %v10288_v56 }
 0x742   : > { %12523 = vmatpush3.bf16.msra.mxu0 %v12856_v32 }
 0x743   : > { %12524 = vmatprep.subr.bf16.mxu0 %v12950_v54 }
 0x746   : > { %12525 = vmatpush3.bf16.msra.mxu0 %v12857_v60 }
 0x747   : > { %12526 = vmatprep.subr.bf16.mxu0 %v12950_v54 }
 0x74a   : > { %12527 = vmatpush3.bf16.msra.mxu0 %v12858_v14 }
 0x74b   : > { %12528 = vmatprep.subr.bf16.mxu0 %v12950_v54 }
 0x74e   : > { %12529 = vmatpush3.bf16.msra.mxu0 %v12859_v61 }
 0x74f   : > { %12530 = vmatprep.subr.bf16.mxu0 %v12950_v54 }
 0x752   : > { %12531 = vmatpush3.bf16.msra.mxu0 %v12860_v55 }
 0x753   : > { %12532 = vmatprep.subr.bf16.mxu0 %v12950_v54 }
 0x756   : > { %12533 = vmatpush3.bf16.msra.mxu0 %v12861_v62 }
 0x757   : > { %12534 = vmatprep.subr.bf16.mxu0 %v12950_v54 }
 0x75a   : > { %12535 = vmatpush3.bf16.msra.mxu0 %v12862_v23 }
 0x7dd   : > { %v12319_v16 = vpop.f32.mrf.mxu0 }
 0x7df   : > { %v12320_v1 = vpop.f32.mrf.mxu0 }
 0x7e0   : > { %v12341_v29 = vpop.f32.mrf.mxu1  ;;  %v12321_v37 = vadd.f32 %v12320_v1, %v12319_v16 }
 0x7e1   : > { %v12322_v38 = vpop.f32.mrf.mxu0 }
 0x7e2   : > { %v12342_v58 = vpop.f32.mrf.mxu1  ;;  %v10838_v7 = vadd.f32 %v12321_v37, %v10418_v43 }
 0x7e3   : > { %v12323_v17 = vpop.f32.mrf.mxu0  ;;  %v12343_v53 = vadd.f32 %v12342_v58, %v12341_v29 }
 0x7e4   : > { %v12344_v48 = vpop.f32.mrf.mxu1 }
 0x7e5   : > { %v10878_v52 = vadd.f32 %v12343_v53, %v10838_v7 }
 0x7e6   : > { %v12345_v4 = vpop.f32.mrf.mxu1 }
 0x7fd   : > { %v12363_v22 = vpop.f32.mrf.mxu0 }
 0x7ff   : > { %v12364_v57 = vpop.f32.mrf.mxu0 }
 0x800   : > { %v12365_v0 = vadd.f32 %v12364_v57, %v12363_v22  ;;  %v12385_v15 = vpop.f32.mrf.mxu1 }
 0x801   : > { %v12366_v47 = vpop.f32.mrf.mxu0 }
 0x802   : > { %v10918_v12 = vadd.f32 %v12365_v0, %v10878_v52  ;;  %v12386_v41 = vpop.f32.mrf.mxu1 }
 0x803   : > { %v12387_v40 = vadd.f32 %v12386_v41, %v12385_v15  ;;  %v12367_v50 = vpop.f32.mrf.mxu0 }
 0x804   : > { %v12388_v34 = vpop.f32.mrf.mxu1 }
 0x805   : > { %v10958_v8 = vadd.f32 %v12387_v40, %v10918_v12 }
 0x806   : > { %v12389_v6 = vpop.f32.mrf.mxu1 }
 0x807   : > { %v10963_v59 = vmax.f32 %v10958_v8, 0.0 }
 0x809   : > { %v10964_v9 = vpack.c.bf16 %v10963_v59, %v10963_v59 }
 0x80b   : > { %12537 = vmatmul.mubr.bf16.vlgmr.msra.gmra.mxu0 %v10964_v9 }
 0x8cb   : > { %v11064_v28 = vpop.f32.mrf.mxu0 }
 0x8cc   : > { %v11065_v19 = vadd.f32 %v11064_v28, %v10981_v27 }
 0x8cd   : > { %v12538_v35 = vpop.f32.mrf.mxu0 }
 0x8ce   : > { %v11070_v26 = vmax.f32 %v11065_v19, 0.0 }
 0x8cf   : > { %v11067_v3 = vpop.f32.mrf.mxu0 }
 0x8d0   : > { %11071 = vst [vmem:[%s378_s13] sm:$0x1] %v11070_v26 }
 0x8d1   : > { %v12539_v44 = vpop.f32.mrf.mxu0 }
 0x8d2   : > { %12899 = shalt.err (!%p12896_p3)
}
 0x8d3   : > { %s12900_s12 = scalar_lea.hbm %s16590_s22, 16  ;;  %s12904_s16 = scalar_lea.hbm %s16642_s11, 32 }
 0x8d4   : > { %p12901_p4 = scmp.ne.s32.totalorder %s16590_s22, %s12900_s12  ;;  %p12905_p9 = scmp.lt.s32.totalorder %s16590_s22, %s16642_s11 }
 0x8d5   : > { %p12906_p10 = scmp.lt.s32.totalorder %s12904_s16, %s12900_s12 }
 0x8d6   : > { %p12902_p7 = pnand %p12901_p4, %p13051_p5 }
 0x8d7   : > { %p12907_p11 = por %p12906_p10, %p12905_p9 }
 0x8d8   : > { %p12903_p8 = pneg %p12902_p7 }
 0x8da   : > { %p12908_p12 = pnand %p12907_p11, %p12903_p8 }
 0x8dc   : > { %12911 = shalt.err (!%p12908_p12)
}
 0x8dd   : > { %12540 = dma.vmem_to_hbm [thread:$0]  (%p13051_p5), %s16592_s14, 16, %s16590_s22, %s11073_s24  }
 0x8de PF: > { %p12546_p13 = scmp.ge.s32.totalorder %s12946_s20, 2  ;;  %s11097_s21 = sand.u32 1, %s12934_s17  }
 0x8df   : > { %s11098_s0 = scalar_lea.sflag [#allocation5], %s11097_s21 }
 0x8e0   : > { %p12543_p0 = pnand %p12546_p13, %p13055_p6 }
 0x8e2   : > { %p12544_p1 = pneg %p12543_p0 }
 0x8e4   : > { %12929 = dma.done.wait (%p12544_p1), %s11098_s0, 16  }
 0x8e5   : > { %12931 = vsyncadd (%p12544_p1), %s11098_s0, 4294967280  ;;  %p21_p2 = scmp.ge.s32.totalorder %s13038_s23, 4   ;;  %s16750_s17 = smov %s12938_s18 }
 0x8e6   : > { %s16751_s18 = smov %s12942_s19  ;;  %s16752_s19 = smov %s13049_s26 }
 0x8e7   : > { %s16753_s20 = smov %s13038_s23  ;;  %23 = sbr.rel (!%p21_p2) target bundleno = 5 (0x5), region = 103 }
 0x8ec   :  { %11102 = vsyncpa [#allocation5], 1 }
 0x8ed   :  { %11104 = vsyncpa [#allocation5 + $0x1], 1 }

</bundles_post_ra>
